<compile_context>
chip_gen: v5e
topology: v5e:2x2
jax: 0.10.0
libtpu: 0.0.40
codegen_flags: <defaults>
</compile_context>

<pallas_src>
import jax
import jax.numpy as jnp
from jax.experimental import pallas as pl
from jax.experimental.pallas import tpu as pltpu

LRELU_SLOPE = 0.2
BN_EPS = 1e-5


# ------------------------------ Pallas kernel ------------------------------ #

def _make_layer_kernel(ow, m, count):
    """Fused Conv2d(4,2,1) + BatchNorm(batch stats) + LeakyReLU kernel factory.

    Grid = (2, N): phase 0 accumulates BN statistics, phase 1 applies them.
    Per grid step the kernel handles one full sample:
      y_ref : ((OH+1)*OW, 8*Cin) bf16  packed activation slab for sample b
      w_ref : (2, 8*Cin, Cout)   bf16  packed conv weights (row shift di=0,1)
      g_ref : (1, Cout) f32            BN gamma
      b_ref : (1, Cout) f32            BN beta
      o_ref : (M, Cout) bf16           layer output for sample b (phase 1 only)
      st_ref: (8, Cout) f32 scratch    rows 0/1 = sum/sumsq, rows 2/3 = scale/bias
    """
    inv_count = 1.0 / float(count)

    def kernel(y_ref, w_ref, g_ref, b_ref, o_ref, st_ref):
        phase = pl.program_id(0)
        b = pl.program_id(1)
        last_b = pl.num_programs(1) - 1

        @pl.when(jnp.logical_and(phase == 0, b == 0))
        def _init_stats():
            st_ref[...] = jnp.zeros_like(st_ref)

        # In-kernel "im2col": the 4x4 stride-2 conv collapses to two shifted,
        # contiguous matmuls over the pre-packed slab (see _pack_input).
        acc = jnp.dot(y_ref[pl.ds(0, m), :], w_ref[0],
                      preferred_element_type=jnp.float32)
        acc = acc + jnp.dot(y_ref[pl.ds(ow, m), :], w_ref[1],
                            preferred_element_type=jnp.float32)

        @pl.when(phase == 0)
        def _accumulate():
            st_ref[0:1, :] = st_ref[0:1, :] + jnp.sum(acc, axis=0, keepdims=True)
            st_ref[1:2, :] = st_ref[1:2, :] + jnp.sum(acc * acc, axis=0,
                                                      keepdims=True)

        @pl.when(jnp.logical_and(phase == 0, b == last_b))
        def _fold_bn():
            mean = st_ref[0:1, :] * inv_count
            # TODO(synk): E[x^2]-E[x]^2 is cancellation-prone; switch to a
            # shifted pivot if tighter f32 agreement is ever required.
            var = jnp.maximum(st_ref[1:2, :] * inv_count - mean * mean, 0.0)
            scale = g_ref[...] * jax.lax.rsqrt(var + BN_EPS)
            st_ref[2:3, :] = scale
            st_ref[3:4, :] = b_ref[...] - mean * scale

        @pl.when(phase == 1)
        def _apply():
            y = acc * st_ref[2:3, :] + st_ref[3:4, :]
            o_ref[...] = jnp.where(y > 0, y, LRELU_SLOPE * y).astype(o_ref.dtype)

    return kernel


# ---------------------------- wrapper-side packing -------------------------- #

def _pack_input(h):
    """NHWC (N,H,W,C) -> ((N, (OH+1)*OW, 8C) bf16, OH, OW).

    Row-pair/col-pair repack so that
        slab[n, rh*OW + ow, (dj,a,b,c)] = x_pad[n, 2*rh + a, 2*(ow+dj) + b, c]
    and conv output row m = oh*OW + ow only needs slab rows m and m + OW.
    """
    n, hh, ww, c = h.shape
    oh, ow = hh // 2, ww // 2
    rh, rw = oh + 1, ow + 1
    xp = jnp.pad(h, ((0, 0), (1, 1), (1, 1), (0, 0)))
    y = xp.reshape(n, rh, 2, rw, 2, c).transpose(0, 1, 3, 2, 4, 5)
    y = y.reshape(n, rh, rw, 4 * c)
    slab = jnp.concatenate([y[:, :, :ow, :], y[:, :, 1:, :]], axis=-1)
    return slab.reshape(n, rh * ow, 8 * c).astype(jnp.bfloat16), oh, ow


def _pack_weight(w):
    """PyTorch (Cout,Cin,4,4) -> (2, 8*Cin, Cout), matching _pack_input order."""
    cout, cin = w.shape[0], w.shape[1]
    wr = w.reshape(cout, cin, 2, 2, 2, 2)            # (co, ci, di, a, dj, b)
    wr = wr.transpose(2, 4, 3, 5, 1, 0)              # (di, dj, a, b, ci, co)
    return wr.reshape(2, 8 * cin, cout).astype(jnp.bfloat16)


def conv_bn_lrelu_layer(h_nhwc, w, gamma, beta):
    """Conv2d(4,2,1,bias=False) + BatchNorm2d(train stats) + LeakyReLU(0.2)."""
    n = h_nhwc.shape[0]
    cout = w.shape[0]
    slab, oh, ow = _pack_input(h_nhwc)
    m = oh * ow
    k = slab.shape[-1]
    wmat = _pack_weight(w)

    out = pl.pallas_call(
        _make_layer_kernel(ow, m, n * m),
        out_shape=jax.ShapeDtypeStruct((n, m, cout), jnp.bfloat16),
        grid=(2, n),
        in_specs=[
            pl.BlockSpec((None, (oh + 1) * ow, k), lambda p, b: (b, 0, 0)),
            pl.BlockSpec((2, k, cout), lambda p, b: (0, 0, 0)),
            pl.BlockSpec((1, cout), lambda p, b: (0, 0)),
            pl.BlockSpec((1, cout), lambda p, b: (0, 0)),
        ],
        # Phase 0 never writes the output; parking its block index at 0 avoids
        # any spurious HBM write-back until phase 1 produces real data.
        out_specs=pl.BlockSpec((None, m, cout), lambda p, b: (p * b, 0, 0)),
        scratch_shapes=[pltpu.VMEM((8, cout), jnp.float32)],
        compiler_params=pltpu.CompilerParams(
            dimension_semantics=("arbitrary", "arbitrary")),
    )(slab, wmat,
      gamma.reshape(1, cout).astype(jnp.float32),
      beta.reshape(1, cout).astype(jnp.float32))

    return out.reshape(n, oh, ow, cout)      # NHWC bf16


# ------------------------------ full forward -------------------------------- #

def discriminator_forward(x, params):
    n = x.shape[0]
    h = jnp.transpose(x, (0, 2, 3, 1))                     # NCHW -> NHWC once
    for (w, gamma, beta) in params["hidden"]:
        h = conv_bn_lrelu_layer(h, w, gamma, beta)
    # Final Conv2d(4,1,0,bias=False) + Sigmoid on a 4x4 plane: one dot product
    # per sample -> plain JAX (a Cout=1 Pallas output is pure launch overhead).
    hh, ww, c = h.shape[1], h.shape[2], h.shape[3]
    assert (hh, ww) == (4, 4), "final conv expects the DCGAN 64x64 geometry"
    w = params["final_w"]                                  # (1, C, 4, 4)
    patches = h.reshape(n, 4 * 4 * c).astype(jnp.float32)  # (kh, kw, ci) order
    wmat = w.transpose(2, 3, 1, 0).reshape(4 * 4 * c, 1).astype(jnp.float32)
    logits = patches @ wmat
    return jax.nn.sigmoid(logits).reshape(n, 1, 1, 1)      # (N, 1, 1, 1)


# ------------------------------ params & reference -------------------------- #

def init_params(key, nc, ndf):
    chans = [nc, ndf, ndf * 2, ndf * 4, ndf * 8]
    hidden = []
    for i in range(4):
        key, kw, kg, kb = jax.random.split(key, 4)
        fan_in = chans[i] * 16
        w = jax.random.normal(kw, (chans[i + 1], chans[i], 4, 4), jnp.float32)
        w = w / jnp.sqrt(fan_in)
        gamma = 1.0 + 0.1 * jax.random.normal(kg, (chans[i + 1],), jnp.float32)
        beta = 0.1 * jax.random.normal(kb, (chans[i + 1],), jnp.float32)
        hidden.append((w, gamma, beta))
    key, kw = jax.random.split(key)
    final_w = jax.random.normal(kw, (1, chans[4], 4, 4), jnp.float32)
    final_w = final_w / jnp.sqrt(chans[4] * 16.0)
    return {"hidden": hidden, "final_w": final_w}


def reference_forward(x, params):
    """Pure-JAX f32 reference (PyTorch-equivalent, training-mode BatchNorm)."""
    h = x
    for (w, gamma, beta) in params["hidden"]:
        h = jax.lax.conv_general_dilated(
            h, w, window_strides=(2, 2), padding=[(1, 1), (1, 1)],
            dimension_numbers=("NCHW", "OIHW", "NCHW"))
        mean = jnp.mean(h, axis=(0, 2, 3), keepdims=True)
        var = jnp.mean(jnp.square(h - mean), axis=(0, 2, 3), keepdims=True)
        h = (h - mean) * jax.lax.rsqrt(var + BN_EPS)
        h = h * gamma.reshape(1, -1, 1, 1) + beta.reshape(1, -1, 1, 1)
        h = jnp.where(h > 0, h, LRELU_SLOPE * h)
    h = jax.lax.conv_general_dilated(
        h, params["final_w"], window_strides=(1, 1), padding=[(0, 0), (0, 0)],
        dimension_numbers=("NCHW", "OIHW", "NCHW"))
    return jax.nn.sigmoid(h)


if __name__ == "__main__":
    nc, ndf = 3, 8
    n, hw = 2, 64   # DCGAN discriminator geometry: 64 -> 32 -> 16 -> 8 -> 4 -> 1

    key = jax.random.PRNGKey(0)
    key, kx = jax.random.split(key)
    x = jax.random.normal(kx, (n, nc, hw, hw), jnp.float32)
    params = init_params(key, nc, ndf)

    fwd = jax.jit(discriminator_forward)
    y = jax.block_until_ready(fwd(x, params))

    assert y.shape == (n, 1, 1, 1), y.shape
    assert bool(jnp.all(jnp.isfinite(y)))
    assert bool(jnp.all((y >= 0.0) & (y <= 1.0)))

    # Loose check against a pure-JAX f32 reference (kernel uses bf16 MXU operands).
    y_ref = jax.block_until_ready(jax.jit(reference_forward)(x, params))
    err = float(jnp.max(jnp.abs(y.astype(jnp.float32) - y_ref)))
    assert err < 5e-2, f"max |diff| vs reference = {err}"

    print("KERNEL_OK")
</pallas_src>

<mosaic_0001>
module attributes {stable_mosaic.version = 11 : i64} {
  func.func @kernel(%arg0: i32, %arg1: i32, %arg2: memref<1x1056x24xbf16, #tpu.memory_space<vmem>>, %arg3: memref<2x24x8xbf16, #tpu.memory_space<vmem>>, %arg4: memref<1x8xf32, #tpu.memory_space<vmem>>, %arg5: memref<1x8xf32, #tpu.memory_space<vmem>>, %arg6: memref<1x1024x8xbf16, #tpu.memory_space<vmem>>, %arg7: memref<8x8xf32, #tpu.memory_space<vmem>>) attributes {dimension_semantics = [#tpu.dimension_semantics<arbitrary>, #tpu.dimension_semantics<arbitrary>], iteration_bounds = array<i64: 2, 2>, scalar_prefetch = 0 : i64, scratch_operands = 1 : i64, tpu.core_type = #tpu.core_type<tc>, window_params = [{transform_indices = @transform_0, window_bounds = array<i64: 1, 1056, 24>}, {pipeline_mode = #tpu.pipeline_mode<synchronous>, transform_indices = @transform_1, window_bounds = array<i64: 2, 24, 8>}, {pipeline_mode = #tpu.pipeline_mode<synchronous>, transform_indices = @transform_2, window_bounds = array<i64: 1, 8>}, {pipeline_mode = #tpu.pipeline_mode<synchronous>, transform_indices = @transform_3, window_bounds = array<i64: 1, 8>}, {transform_indices = @transform_4, window_bounds = array<i64: 1, 1024, 8>}]} {
    %c0_i32 = arith.constant 0 : i32
    %0 = arith.cmpi eq, %arg0, %c0_i32 : i32
    %c0_i32_0 = arith.constant 0 : i32
    %1 = arith.cmpi eq, %arg1, %c0_i32_0 : i32
    %2 = arith.andi %0, %1 : i1
    %3 = arith.extui %2 : i1 to i32
    %c0_i32_1 = arith.constant 0 : i32
    %4 = arith.cmpi ne, %3, %c0_i32_1 : i32
    scf.if %4 {
      %cst_18 = arith.constant 0.000000e+00 : f32
      %27 = vector.broadcast %cst_18 : f32 to vector<8x8xf32>
      %c0_19 = arith.constant 0 : index
      %c0_20 = arith.constant 0 : index
      %28 = vector.load %arg7[%c0_19, %c0_20] : memref<8x8xf32, #tpu.memory_space<vmem>>, vector<8x8xf32>
      tpu.vector_store %arg7[%c0_19, %c0_20], %27 {strides = array<i32>} : memref<8x8xf32, #tpu.memory_space<vmem>>, vector<8x8xf32>,
    } else {
    }
    %c0 = arith.constant 0 : index
    %c0_2 = arith.constant 0 : index
    %c0_3 = arith.constant 0 : index
    %5 = vector.load %arg2[%c0, %c0_2, %c0_3] : memref<1x1056x24xbf16, #tpu.memory_space<vmem>>, vector<1x1024x24xbf16>
    %6 = vector.shape_cast %5 : vector<1x1024x24xbf16> to vector<1024x24xbf16>
    %c0_4 = arith.constant 0 : index
    %c0_5 = arith.constant 0 : index
    %c0_6 = arith.constant 0 : index
    %7 = vector.load %arg3[%c0_4, %c0_5, %c0_6] : memref<2x24x8xbf16, #tpu.memory_space<vmem>>, vector<1x24x8xbf16>
    %8 = vector.shape_cast %7 : vector<1x24x8xbf16> to vector<24x8xbf16>
    %cst = arith.constant dense<0.000000e+00> : vector<1024x8xf32>
    %9 = tpu.matmul %6, %8, %cst {dimension_numbers = #tpu.dot_dimension_numbers<[1], [0], [0], [1], [0, 0, 1, 1], [], []>} : vector<1024x24xbf16>, vector<24x8xbf16>, vector<1024x8xf32> -> vector<1024x8xf32>
    %c0_7 = arith.constant 0 : index
    %c32 = arith.constant 32 : index
    %c0_8 = arith.constant 0 : index
    %10 = vector.load %arg2[%c0_7, %c32, %c0_8] : memref<1x1056x24xbf16, #tpu.memory_space<vmem>>, vector<1x1024x24xbf16>
    %11 = vector.shape_cast %10 : vector<1x1024x24xbf16> to vector<1024x24xbf16>
    %c1 = arith.constant 1 : index
    %c0_9 = arith.constant 0 : index
    %c0_10 = arith.constant 0 : index
    %12 = vector.load %arg3[%c1, %c0_9, %c0_10] : memref<2x24x8xbf16, #tpu.memory_space<vmem>>, vector<1x24x8xbf16>
    %13 = vector.shape_cast %12 : vector<1x24x8xbf16> to vector<24x8xbf16>
    %cst_11 = arith.constant dense<0.000000e+00> : vector<1024x8xf32>
    %14 = tpu.matmul %11, %13, %cst_11 {dimension_numbers = #tpu.dot_dimension_numbers<[1], [0], [0], [1], [0, 0, 1, 1], [], []>} : vector<1024x24xbf16>, vector<24x8xbf16>, vector<1024x8xf32> -> vector<1024x8xf32>
    %15 = arith.addf %9, %14 : vector<1024x8xf32>
    %c0_i32_12 = arith.constant 0 : i32
    %16 = arith.cmpi eq, %arg0, %c0_i32_12 : i32
    %17 = arith.extui %16 : i1 to i32
    %c0_i32_13 = arith.constant 0 : i32
    %18 = arith.cmpi ne, %17, %c0_i32_13 : i32
    scf.if %18 {
      %c0_18 = arith.constant 0 : index
      %c0_19 = arith.constant 0 : index
      %27 = vector.load %arg7[%c0_18, %c0_19] : memref<8x8xf32, #tpu.memory_space<vmem>>, vector<1x8xf32>
      %cst_20 = arith.constant dense<0.000000e+00> : vector<8xf32>
      %28 = vector.multi_reduction <add>, %15, %cst_20 [0] : vector<1024x8xf32> to vector<8xf32>
      %29 = vector.shape_cast %28 : vector<8xf32> to vector<1x8xf32>
      %30 = arith.addf %27, %29 : vector<1x8xf32>
      %c0_21 = arith.constant 0 : index
      %c0_22 = arith.constant 0 : index
      %31 = vector.load %arg7[%c0_21, %c0_22] : memref<8x8xf32, #tpu.memory_space<vmem>>, vector<1x8xf32>
      tpu.vector_store %arg7[%c0_21, %c0_22], %30 {strides = array<i32>} : memref<8x8xf32, #tpu.memory_space<vmem>>, vector<1x8xf32>,
      %c1_23 = arith.constant 1 : index
      %c0_24 = arith.constant 0 : index
      %32 = vector.load %arg7[%c1_23, %c0_24] : memref<8x8xf32, #tpu.memory_space<vmem>>, vector<1x8xf32>
      %33 = arith.mulf %15, %15 : vector<1024x8xf32>
      %cst_25 = arith.constant dense<0.000000e+00> : vector<8xf32>
      %34 = vector.multi_reduction <add>, %33, %cst_25 [0] : vector<1024x8xf32> to vector<8xf32>
      %35 = vector.shape_cast %34 : vector<8xf32> to vector<1x8xf32>
      %36 = arith.addf %32, %35 : vector<1x8xf32>
      %c1_26 = arith.constant 1 : index
      %c0_27 = arith.constant 0 : index
      %37 = vector.load %arg7[%c1_26, %c0_27] : memref<8x8xf32, #tpu.memory_space<vmem>>, vector<1x8xf32>
      tpu.vector_store %arg7[%c1_26, %c0_27], %36 {strides = array<i32>} : memref<8x8xf32, #tpu.memory_space<vmem>>, vector<1x8xf32>,
    } else {
    }
    %c0_i32_14 = arith.constant 0 : i32
    %19 = arith.cmpi eq, %arg0, %c0_i32_14 : i32
    %c1_i32 = arith.constant 1 : i32
    %20 = arith.cmpi eq, %arg1, %c1_i32 : i32
    %21 = arith.andi %19, %20 : i1
    %22 = arith.extui %21 : i1 to i32
    %c0_i32_15 = arith.constant 0 : i32
    %23 = arith.cmpi ne, %22, %c0_i32_15 : i32
    scf.if %23 {
      %c0_18 = arith.constant 0 : index
      %c0_19 = arith.constant 0 : index
      %27 = vector.load %arg7[%c0_18, %c0_19] : memref<8x8xf32, #tpu.memory_space<vmem>>, vector<1x8xf32>
      %cst_20 = arith.constant 4.8828125E-4 : f32
      %28 = vector.broadcast %cst_20 : f32 to vector<1x8xf32>
      %29 = arith.mulf %27, %28 : vector<1x8xf32>
      %c1_21 = arith.constant 1 : index
      %c0_22 = arith.constant 0 : index
      %30 = vector.load %arg7[%c1_21, %c0_22] : memref<8x8xf32, #tpu.memory_space<vmem>>, vector<1x8xf32>
      %cst_23 = arith.constant 4.8828125E-4 : f32
      %31 = vector.broadcast %cst_23 : f32 to vector<1x8xf32>
      %32 = arith.mulf %30, %31 : vector<1x8xf32>
      %33 = arith.mulf %29, %29 : vector<1x8xf32>
      %34 = arith.subf %32, %33 : vector<1x8xf32>
      %cst_24 = arith.constant 0.000000e+00 : f32
      %35 = vector.broadcast %cst_24 : f32 to vector<1x8xf32>
      %36 = arith.maximumf %34, %35 : vector<1x8xf32>
      %c0_25 = arith.constant 0 : index
      %c0_26 = arith.constant 0 : index
      %37 = vector.load %arg4[%c0_25, %c0_26] : memref<1x8xf32, #tpu.memory_space<vmem>>, vector<1x8xf32>
      %cst_27 = arith.constant 9.99999974E-6 : f32
      %38 = vector.broadcast %cst_27 : f32 to vector<1x8xf32>
      %39 = arith.addf %36, %38 : vector<1x8xf32>
      %40 = math.rsqrt %39 : vector<1x8xf32>
      %41 = arith.mulf %37, %40 : vector<1x8xf32>
      %c2 = arith.constant 2 : index
      %c0_28 = arith.constant 0 : index
      %42 = vector.load %arg7[%c2, %c0_28] : memref<8x8xf32, #tpu.memory_space<vmem>>, vector<1x8xf32>
      tpu.vector_store %arg7[%c2, %c0_28], %41 {strides = array<i32>} : memref<8x8xf32, #tpu.memory_space<vmem>>, vector<1x8xf32>,
      %c0_29 = arith.constant 0 : index
      %c0_30 = arith.constant 0 : index
      %43 = vector.load %arg5[%c0_29, %c0_30] : memref<1x8xf32, #tpu.memory_space<vmem>>, vector<1x8xf32>
      %44 = arith.mulf %29, %41 : vector<1x8xf32>
      %45 = arith.subf %43, %44 : vector<1x8xf32>
      %c3 = arith.constant 3 : index
      %c0_31 = arith.constant 0 : index
      %46 = vector.load %arg7[%c3, %c0_31] : memref<8x8xf32, #tpu.memory_space<vmem>>, vector<1x8xf32>
      tpu.vector_store %arg7[%c3, %c0_31], %45 {strides = array<i32>} : memref<8x8xf32, #tpu.memory_space<vmem>>, vector<1x8xf32>,
    } else {
    }
    %c1_i32_16 = arith.constant 1 : i32
    %24 = arith.cmpi eq, %arg0, %c1_i32_16 : i32
    %25 = arith.extui %24 : i1 to i32
    %c0_i32_17 = arith.constant 0 : i32
    %26 = arith.cmpi ne, %25, %c0_i32_17 : i32
    scf.if %26 {
      %c2 = arith.constant 2 : index
      %c0_18 = arith.constant 0 : index
      %27 = vector.load %arg7[%c2, %c0_18] : memref<8x8xf32, #tpu.memory_space<vmem>>, vector<1x8xf32>
      %28 = vector.broadcast %27 : vector<1x8xf32> to vector<1024x8xf32>
      %29 = arith.mulf %15, %28 : vector<1024x8xf32>
      %c3 = arith.constant 3 : index
      %c0_19 = arith.constant 0 : index
      %30 = vector.load %arg7[%c3, %c0_19] : memref<8x8xf32, #tpu.memory_space<vmem>>, vector<1x8xf32>
      %31 = vector.broadcast %30 : vector<1x8xf32> to vector<1024x8xf32>
      %32 = arith.addf %29, %31 : vector<1024x8xf32>
      %cst_20 = arith.constant 0.000000e+00 : f32
      %33 = vector.broadcast %cst_20 : f32 to vector<1024x8xf32>
      %34 = arith.cmpf ogt, %32, %33 : vector<1024x8xf32>
      %cst_21 = arith.constant 2.000000e-01 : f32
      %35 = vector.broadcast %cst_21 : f32 to vector<1024x8xf32>
      %36 = arith.mulf %35, %32 : vector<1024x8xf32>
      %37 = arith.select %34, %32, %36 : vector<1024x8xi1>, vector<1024x8xf32>
      %38 = arith.truncf %37 : vector<1024x8xf32> to vector<1024x8xbf16>
      %c0_22 = arith.constant 0 : index
      %c0_23 = arith.constant 0 : index
      %c0_24 = arith.constant 0 : index
      %39 = vector.load %arg6[%c0_22, %c0_23, %c0_24] : memref<1x1024x8xbf16, #tpu.memory_space<vmem>>, vector<1x1024x8xbf16>
      %40 = vector.shape_cast %39 : vector<1x1024x8xbf16> to vector<1024x8xbf16>
      %41 = vector.shape_cast %38 : vector<1024x8xbf16> to vector<1x1024x8xbf16>
      tpu.vector_store %arg6[%c0_22, %c0_23, %c0_24], %41 {strides = array<i32>} : memref<1x1024x8xbf16, #tpu.memory_space<vmem>>, vector<1x1024x8xbf16>,
    } else {
    }
    return
  }
  func.func @transform_0(%arg0: i32, %arg1: i32) -> (i32, i32, i32) {
    %c0_i32 = arith.constant 0 : i32
    %c0_i32_0 = arith.constant 0 : i32
    %c0_i32_1 = arith.constant 0 : i32
    return %arg1, %c0_i32, %c0_i32_0 : i32, i32, i32
  }
  func.func @transform_1(%arg0: i32, %arg1: i32) -> (i32, i32, i32) {
    %c0_i32 = arith.constant 0 : i32
    %c0_i32_0 = arith.constant 0 : i32
    %c0_i32_1 = arith.constant 0 : i32
    %c0_i32_2 = arith.constant 0 : i32
    return %c0_i32, %c0_i32_0, %c0_i32_1 : i32, i32, i32
  }
  func.func @transform_2(%arg0: i32, %arg1: i32) -> (i32, i32) {
    %c0_i32 = arith.constant 0 : i32
    %c0_i32_0 = arith.constant 0 : i32
    %c0_i32_1 = arith.constant 0 : i32
    return %c0_i32, %c0_i32_0 : i32, i32
  }
  func.func @transform_3(%arg0: i32, %arg1: i32) -> (i32, i32) {
    %c0_i32 = arith.constant 0 : i32
    %c0_i32_0 = arith.constant 0 : i32
    %c0_i32_1 = arith.constant 0 : i32
    return %c0_i32, %c0_i32_0 : i32, i32
  }
  func.func @transform_4(%arg0: i32, %arg1: i32) -> (i32, i32, i32) {
    %0 = arith.muli %arg0, %arg1 : i32
    %c0_i32 = arith.constant 0 : i32
    %c0_i32_0 = arith.constant 0 : i32
    %c0_i32_1 = arith.constant 0 : i32
    return %0, %c0_i32, %c0_i32_0 : i32, i32, i32
  }
}

module attributes {stable_mosaic.version = 11 : i64} {
  func.func @kernel(%arg0: i32, %arg1: i32, %arg2: memref<1x272x64xbf16, #tpu.memory_space<vmem>>, %arg3: memref<2x64x16xbf16, #tpu.memory_space<vmem>>, %arg4: memref<1x16xf32, #tpu.memory_space<vmem>>, %arg5: memref<1x16xf32, #tpu.memory_space<vmem>>, %arg6: memref<1x256x16xbf16, #tpu.memory_space<vmem>>, %arg7: memref<8x16xf32, #tpu.memory_space<vmem>>) attributes {dimension_semantics = [#tpu.dimension_semantics<arbitrary>, #tpu.dimension_semantics<arbitrary>], iteration_bounds = array<i64: 2, 2>, scalar_prefetch = 0 : i64, scratch_operands = 1 : i64, tpu.core_type = #tpu.core_type<tc>, window_params = [{transform_indices = @transform_0, window_bounds = array<i64: 1, 272, 64>}, {pipeline_mode = #tpu.pipeline_mode<synchronous>, transform_indices = @transform_1, window_bounds = array<i64: 2, 64, 16>}, {pipeline_mode = #tpu.pipeline_mode<synchronous>, transform_indices = @transform_2, window_bounds = array<i64: 1, 16>}, {pipeline_mode = #tpu.pipeline_mode<synchronous>, transform_indices = @transform_3, window_bounds = array<i64: 1, 16>}, {transform_indices = @transform_4, window_bounds = array<i64: 1, 256, 16>}]} {
    %c0_i32 = arith.constant 0 : i32
    %0 = arith.cmpi eq, %arg0, %c0_i32 : i32
    %c0_i32_0 = arith.constant 0 : i32
    %1 = arith.cmpi eq, %arg1, %c0_i32_0 : i32
    %2 = arith.andi %0, %1 : i1
    %3 = arith.extui %2 : i1 to i32
    %c0_i32_1 = arith.constant 0 : i32
    %4 = arith.cmpi ne, %3, %c0_i32_1 : i32
    scf.if %4 {
      %cst_18 = arith.constant 0.000000e+00 : f32
      %27 = vector.broadcast %cst_18 : f32 to vector<8x16xf32>
      %c0_19 = arith.constant 0 : index
      %c0_20 = arith.constant 0 : index
      %28 = vector.load %arg7[%c0_19, %c0_20] : memref<8x16xf32, #tpu.memory_space<vmem>>, vector<8x16xf32>
      tpu.vector_store %arg7[%c0_19, %c0_20], %27 {strides = array<i32>} : memref<8x16xf32, #tpu.memory_space<vmem>>, vector<8x16xf32>,
    } else {
    }
    %c0 = arith.constant 0 : index
    %c0_2 = arith.constant 0 : index
    %c0_3 = arith.constant 0 : index
    %5 = vector.load %arg2[%c0, %c0_2, %c0_3] : memref<1x272x64xbf16, #tpu.memory_space<vmem>>, vector<1x256x64xbf16>
    %6 = vector.shape_cast %5 : vector<1x256x64xbf16> to vector<256x64xbf16>
    %c0_4 = arith.constant 0 : index
    %c0_5 = arith.constant 0 : index
    %c0_6 = arith.constant 0 : index
    %7 = vector.load %arg3[%c0_4, %c0_5, %c0_6] : memref<2x64x16xbf16, #tpu.memory_space<vmem>>, vector<1x64x16xbf16>
    %8 = vector.shape_cast %7 : vector<1x64x16xbf16> to vector<64x16xbf16>
    %cst = arith.constant dense<0.000000e+00> : vector<256x16xf32>
    %9 = tpu.matmul %6, %8, %cst {dimension_numbers = #tpu.dot_dimension_numbers<[1], [0], [0], [1], [0, 0, 1, 1], [], []>} : vector<256x64xbf16>, vector<64x16xbf16>, vector<256x16xf32> -> vector<256x16xf32>
    %c0_7 = arith.constant 0 : index
    %c16 = arith.constant 16 : index
    %c0_8 = arith.constant 0 : index
    %10 = vector.load %arg2[%c0_7, %c16, %c0_8] : memref<1x272x64xbf16, #tpu.memory_space<vmem>>, vector<1x256x64xbf16>
    %11 = vector.shape_cast %10 : vector<1x256x64xbf16> to vector<256x64xbf16>
    %c1 = arith.constant 1 : index
    %c0_9 = arith.constant 0 : index
    %c0_10 = arith.constant 0 : index
    %12 = vector.load %arg3[%c1, %c0_9, %c0_10] : memref<2x64x16xbf16, #tpu.memory_space<vmem>>, vector<1x64x16xbf16>
    %13 = vector.shape_cast %12 : vector<1x64x16xbf16> to vector<64x16xbf16>
    %cst_11 = arith.constant dense<0.000000e+00> : vector<256x16xf32>
    %14 = tpu.matmul %11, %13, %cst_11 {dimension_numbers = #tpu.dot_dimension_numbers<[1], [0], [0], [1], [0, 0, 1, 1], [], []>} : vector<256x64xbf16>, vector<64x16xbf16>, vector<256x16xf32> -> vector<256x16xf32>
    %15 = arith.addf %9, %14 : vector<256x16xf32>
    %c0_i32_12 = arith.constant 0 : i32
    %16 = arith.cmpi eq, %arg0, %c0_i32_12 : i32
    %17 = arith.extui %16 : i1 to i32
    %c0_i32_13 = arith.constant 0 : i32
    %18 = arith.cmpi ne, %17, %c0_i32_13 : i32
    scf.if %18 {
      %c0_18 = arith.constant 0 : index
      %c0_19 = arith.constant 0 : index
      %27 = vector.load %arg7[%c0_18, %c0_19] : memref<8x16xf32, #tpu.memory_space<vmem>>, vector<1x16xf32>
      %cst_20 = arith.constant dense<0.000000e+00> : vector<16xf32>
      %28 = vector.multi_reduction <add>, %15, %cst_20 [0] : vector<256x16xf32> to vector<16xf32>
      %29 = vector.shape_cast %28 : vector<16xf32> to vector<1x16xf32>
      %30 = arith.addf %27, %29 : vector<1x16xf32>
      %c0_21 = arith.constant 0 : index
      %c0_22 = arith.constant 0 : index
      %31 = vector.load %arg7[%c0_21, %c0_22] : memref<8x16xf32, #tpu.memory_space<vmem>>, vector<1x16xf32>
      tpu.vector_store %arg7[%c0_21, %c0_22], %30 {strides = array<i32>} : memref<8x16xf32, #tpu.memory_space<vmem>>, vector<1x16xf32>,
      %c1_23 = arith.constant 1 : index
      %c0_24 = arith.constant 0 : index
      %32 = vector.load %arg7[%c1_23, %c0_24] : memref<8x16xf32, #tpu.memory_space<vmem>>, vector<1x16xf32>
      %33 = arith.mulf %15, %15 : vector<256x16xf32>
      %cst_25 = arith.constant dense<0.000000e+00> : vector<16xf32>
      %34 = vector.multi_reduction <add>, %33, %cst_25 [0] : vector<256x16xf32> to vector<16xf32>
      %35 = vector.shape_cast %34 : vector<16xf32> to vector<1x16xf32>
      %36 = arith.addf %32, %35 : vector<1x16xf32>
      %c1_26 = arith.constant 1 : index
      %c0_27 = arith.constant 0 : index
      %37 = vector.load %arg7[%c1_26, %c0_27] : memref<8x16xf32, #tpu.memory_space<vmem>>, vector<1x16xf32>
      tpu.vector_store %arg7[%c1_26, %c0_27], %36 {strides = array<i32>} : memref<8x16xf32, #tpu.memory_space<vmem>>, vector<1x16xf32>,
    } else {
    }
    %c0_i32_14 = arith.constant 0 : i32
    %19 = arith.cmpi eq, %arg0, %c0_i32_14 : i32
    %c1_i32 = arith.constant 1 : i32
    %20 = arith.cmpi eq, %arg1, %c1_i32 : i32
    %21 = arith.andi %19, %20 : i1
    %22 = arith.extui %21 : i1 to i32
    %c0_i32_15 = arith.constant 0 : i32
    %23 = arith.cmpi ne, %22, %c0_i32_15 : i32
    scf.if %23 {
      %c0_18 = arith.constant 0 : index
      %c0_19 = arith.constant 0 : index
      %27 = vector.load %arg7[%c0_18, %c0_19] : memref<8x16xf32, #tpu.memory_space<vmem>>, vector<1x16xf32>
      %cst_20 = arith.constant 0.001953125 : f32
      %28 = vector.broadcast %cst_20 : f32 to vector<1x16xf32>
      %29 = arith.mulf %27, %28 : vector<1x16xf32>
      %c1_21 = arith.constant 1 : index
      %c0_22 = arith.constant 0 : index
      %30 = vector.load %arg7[%c1_21, %c0_22] : memref<8x16xf32, #tpu.memory_space<vmem>>, vector<1x16xf32>
      %cst_23 = arith.constant 0.001953125 : f32
      %31 = vector.broadcast %cst_23 : f32 to vector<1x16xf32>
      %32 = arith.mulf %30, %31 : vector<1x16xf32>
      %33 = arith.mulf %29, %29 : vector<1x16xf32>
      %34 = arith.subf %32, %33 : vector<1x16xf32>
      %cst_24 = arith.constant 0.000000e+00 : f32
      %35 = vector.broadcast %cst_24 : f32 to vector<1x16xf32>
      %36 = arith.maximumf %34, %35 : vector<1x16xf32>
      %c0_25 = arith.constant 0 : index
      %c0_26 = arith.constant 0 : index
      %37 = vector.load %arg4[%c0_25, %c0_26] : memref<1x16xf32, #tpu.memory_space<vmem>>, vector<1x16xf32>
      %cst_27 = arith.constant 9.99999974E-6 : f32
      %38 = vector.broadcast %cst_27 : f32 to vector<1x16xf32>
      %39 = arith.addf %36, %38 : vector<1x16xf32>
      %40 = math.rsqrt %39 : vector<1x16xf32>
      %41 = arith.mulf %37, %40 : vector<1x16xf32>
      %c2 = arith.constant 2 : index
      %c0_28 = arith.constant 0 : index
      %42 = vector.load %arg7[%c2, %c0_28] : memref<8x16xf32, #tpu.memory_space<vmem>>, vector<1x16xf32>
      tpu.vector_store %arg7[%c2, %c0_28], %41 {strides = array<i32>} : memref<8x16xf32, #tpu.memory_space<vmem>>, vector<1x16xf32>,
      %c0_29 = arith.constant 0 : index
      %c0_30 = arith.constant 0 : index
      %43 = vector.load %arg5[%c0_29, %c0_30] : memref<1x16xf32, #tpu.memory_space<vmem>>, vector<1x16xf32>
      %44 = arith.mulf %29, %41 : vector<1x16xf32>
      %45 = arith.subf %43, %44 : vector<1x16xf32>
      %c3 = arith.constant 3 : index
      %c0_31 = arith.constant 0 : index
      %46 = vector.load %arg7[%c3, %c0_31] : memref<8x16xf32, #tpu.memory_space<vmem>>, vector<1x16xf32>
      tpu.vector_store %arg7[%c3, %c0_31], %45 {strides = array<i32>} : memref<8x16xf32, #tpu.memory_space<vmem>>, vector<1x16xf32>,
    } else {
    }
    %c1_i32_16 = arith.constant 1 : i32
    %24 = arith.cmpi eq, %arg0, %c1_i32_16 : i32
    %25 = arith.extui %24 : i1 to i32
    %c0_i32_17 = arith.constant 0 : i32
    %26 = arith.cmpi ne, %25, %c0_i32_17 : i32
    scf.if %26 {
      %c2 = arith.constant 2 : index
      %c0_18 = arith.constant 0 : index
      %27 = vector.load %arg7[%c2, %c0_18] : memref<8x16xf32, #tpu.memory_space<vmem>>, vector<1x16xf32>
      %28 = vector.broadcast %27 : vector<1x16xf32> to vector<256x16xf32>
      %29 = arith.mulf %15, %28 : vector<256x16xf32>
      %c3 = arith.constant 3 : index
      %c0_19 = arith.constant 0 : index
      %30 = vector.load %arg7[%c3, %c0_19] : memref<8x16xf32, #tpu.memory_space<vmem>>, vector<1x16xf32>
      %31 = vector.broadcast %30 : vector<1x16xf32> to vector<256x16xf32>
      %32 = arith.addf %29, %31 : vector<256x16xf32>
      %cst_20 = arith.constant 0.000000e+00 : f32
      %33 = vector.broadcast %cst_20 : f32 to vector<256x16xf32>
      %34 = arith.cmpf ogt, %32, %33 : vector<256x16xf32>
      %cst_21 = arith.constant 2.000000e-01 : f32
      %35 = vector.broadcast %cst_21 : f32 to vector<256x16xf32>
      %36 = arith.mulf %35, %32 : vector<256x16xf32>
      %37 = arith.select %34, %32, %36 : vector<256x16xi1>, vector<256x16xf32>
      %38 = arith.truncf %37 : vector<256x16xf32> to vector<256x16xbf16>
      %c0_22 = arith.constant 0 : index
      %c0_23 = arith.constant 0 : index
      %c0_24 = arith.constant 0 : index
      %39 = vector.load %arg6[%c0_22, %c0_23, %c0_24] : memref<1x256x16xbf16, #tpu.memory_space<vmem>>, vector<1x256x16xbf16>
      %40 = vector.shape_cast %39 : vector<1x256x16xbf16> to vector<256x16xbf16>
      %41 = vector.shape_cast %38 : vector<256x16xbf16> to vector<1x256x16xbf16>
      tpu.vector_store %arg6[%c0_22, %c0_23, %c0_24], %41 {strides = array<i32>} : memref<1x256x16xbf16, #tpu.memory_space<vmem>>, vector<1x256x16xbf16>,
    } else {
    }
    return
  }
  func.func @transform_0(%arg0: i32, %arg1: i32) -> (i32, i32, i32) {
    %c0_i32 = arith.constant 0 : i32
    %c0_i32_0 = arith.constant 0 : i32
    %c0_i32_1 = arith.constant 0 : i32
    return %arg1, %c0_i32, %c0_i32_0 : i32, i32, i32
  }
  func.func @transform_1(%arg0: i32, %arg1: i32) -> (i32, i32, i32) {
    %c0_i32 = arith.constant 0 : i32
    %c0_i32_0 = arith.constant 0 : i32
    %c0_i32_1 = arith.constant 0 : i32
    %c0_i32_2 = arith.constant 0 : i32
    return %c0_i32, %c0_i32_0, %c0_i32_1 : i32, i32, i32
  }
  func.func @transform_2(%arg0: i32, %arg1: i32) -> (i32, i32) {
    %c0_i32 = arith.constant 0 : i32
    %c0_i32_0 = arith.constant 0 : i32
    %c0_i32_1 = arith.constant 0 : i32
    return %c0_i32, %c0_i32_0 : i32, i32
  }
  func.func @transform_3(%arg0: i32, %arg1: i32) -> (i32, i32) {
    %c0_i32 = arith.constant 0 : i32
    %c0_i32_0 = arith.constant 0 : i32
    %c0_i32_1 = arith.constant 0 : i32
    return %c0_i32, %c0_i32_0 : i32, i32
  }
  func.func @transform_4(%arg0: i32, %arg1: i32) -> (i32, i32, i32) {
    %0 = arith.muli %arg0, %arg1 : i32
    %c0_i32 = arith.constant 0 : i32
    %c0_i32_0 = arith.constant 0 : i32
    %c0_i32_1 = arith.constant 0 : i32
    return %0, %c0_i32, %c0_i32_0 : i32, i32, i32
  }
}

module attributes {stable_mosaic.version = 11 : i64} {
  func.func @kernel(%arg0: i32, %arg1: i32, %arg2: memref<1x72x128xbf16, #tpu.memory_space<vmem>>, %arg3: memref<2x128x32xbf16, #tpu.memory_space<vmem>>, %arg4: memref<1x32xf32, #tpu.memory_space<vmem>>, %arg5: memref<1x32xf32, #tpu.memory_space<vmem>>, %arg6: memref<1x64x32xbf16, #tpu.memory_space<vmem>>, %arg7: memref<8x32xf32, #tpu.memory_space<vmem>>) attributes {dimension_semantics = [#tpu.dimension_semantics<arbitrary>, #tpu.dimension_semantics<arbitrary>], iteration_bounds = array<i64: 2, 2>, scalar_prefetch = 0 : i64, scratch_operands = 1 : i64, tpu.core_type = #tpu.core_type<tc>, window_params = [{transform_indices = @transform_0, window_bounds = array<i64: 1, 72, 128>}, {pipeline_mode = #tpu.pipeline_mode<synchronous>, transform_indices = @transform_1, window_bounds = array<i64: 2, 128, 32>}, {pipeline_mode = #tpu.pipeline_mode<synchronous>, transform_indices = @transform_2, window_bounds = array<i64: 1, 32>}, {pipeline_mode = #tpu.pipeline_mode<synchronous>, transform_indices = @transform_3, window_bounds = array<i64: 1, 32>}, {transform_indices = @transform_4, window_bounds = array<i64: 1, 64, 32>}]} {
    %c0_i32 = arith.constant 0 : i32
    %0 = arith.cmpi eq, %arg0, %c0_i32 : i32
    %c0_i32_0 = arith.constant 0 : i32
    %1 = arith.cmpi eq, %arg1, %c0_i32_0 : i32
    %2 = arith.andi %0, %1 : i1
    %3 = arith.extui %2 : i1 to i32
    %c0_i32_1 = arith.constant 0 : i32
    %4 = arith.cmpi ne, %3, %c0_i32_1 : i32
    scf.if %4 {
      %cst_18 = arith.constant 0.000000e+00 : f32
      %27 = vector.broadcast %cst_18 : f32 to vector<8x32xf32>
      %c0_19 = arith.constant 0 : index
      %c0_20 = arith.constant 0 : index
      %28 = vector.load %arg7[%c0_19, %c0_20] : memref<8x32xf32, #tpu.memory_space<vmem>>, vector<8x32xf32>
      tpu.vector_store %arg7[%c0_19, %c0_20], %27 {strides = array<i32>} : memref<8x32xf32, #tpu.memory_space<vmem>>, vector<8x32xf32>,
    } else {
    }
    %c0 = arith.constant 0 : index
    %c0_2 = arith.constant 0 : index
    %c0_3 = arith.constant 0 : index
    %5 = vector.load %arg2[%c0, %c0_2, %c0_3] : memref<1x72x128xbf16, #tpu.memory_space<vmem>>, vector<1x64x128xbf16>
    %6 = vector.shape_cast %5 : vector<1x64x128xbf16> to vector<64x128xbf16>
    %c0_4 = arith.constant 0 : index
    %c0_5 = arith.constant 0 : index
    %c0_6 = arith.constant 0 : index
    %7 = vector.load %arg3[%c0_4, %c0_5, %c0_6] : memref<2x128x32xbf16, #tpu.memory_space<vmem>>, vector<1x128x32xbf16>
    %8 = vector.shape_cast %7 : vector<1x128x32xbf16> to vector<128x32xbf16>
    %cst = arith.constant dense<0.000000e+00> : vector<64x32xf32>
    %9 = tpu.matmul %6, %8, %cst {dimension_numbers = #tpu.dot_dimension_numbers<[1], [0], [0], [1], [0, 0, 1, 1], [], []>} : vector<64x128xbf16>, vector<128x32xbf16>, vector<64x32xf32> -> vector<64x32xf32>
    %c0_7 = arith.constant 0 : index
    %c8 = arith.constant 8 : index
    %c0_8 = arith.constant 0 : index
    %10 = vector.load %arg2[%c0_7, %c8, %c0_8] : memref<1x72x128xbf16, #tpu.memory_space<vmem>>, vector<1x64x128xbf16>
    %11 = vector.shape_cast %10 : vector<1x64x128xbf16> to vector<64x128xbf16>
    %c1 = arith.constant 1 : index
    %c0_9 = arith.constant 0 : index
    %c0_10 = arith.constant 0 : index
    %12 = vector.load %arg3[%c1, %c0_9, %c0_10] : memref<2x128x32xbf16, #tpu.memory_space<vmem>>, vector<1x128x32xbf16>
    %13 = vector.shape_cast %12 : vector<1x128x32xbf16> to vector<128x32xbf16>
    %cst_11 = arith.constant dense<0.000000e+00> : vector<64x32xf32>
    %14 = tpu.matmul %11, %13, %cst_11 {dimension_numbers = #tpu.dot_dimension_numbers<[1], [0], [0], [1], [0, 0, 1, 1], [], []>} : vector<64x128xbf16>, vector<128x32xbf16>, vector<64x32xf32> -> vector<64x32xf32>
    %15 = arith.addf %9, %14 : vector<64x32xf32>
    %c0_i32_12 = arith.constant 0 : i32
    %16 = arith.cmpi eq, %arg0, %c0_i32_12 : i32
    %17 = arith.extui %16 : i1 to i32
    %c0_i32_13 = arith.constant 0 : i32
    %18 = arith.cmpi ne, %17, %c0_i32_13 : i32
    scf.if %18 {
      %c0_18 = arith.constant 0 : index
      %c0_19 = arith.constant 0 : index
      %27 = vector.load %arg7[%c0_18, %c0_19] : memref<8x32xf32, #tpu.memory_space<vmem>>, vector<1x32xf32>
      %cst_20 = arith.constant dense<0.000000e+00> : vector<32xf32>
      %28 = vector.multi_reduction <add>, %15, %cst_20 [0] : vector<64x32xf32> to vector<32xf32>
      %29 = vector.shape_cast %28 : vector<32xf32> to vector<1x32xf32>
      %30 = arith.addf %27, %29 : vector<1x32xf32>
      %c0_21 = arith.constant 0 : index
      %c0_22 = arith.constant 0 : index
      %31 = vector.load %arg7[%c0_21, %c0_22] : memref<8x32xf32, #tpu.memory_space<vmem>>, vector<1x32xf32>
      tpu.vector_store %arg7[%c0_21, %c0_22], %30 {strides = array<i32>} : memref<8x32xf32, #tpu.memory_space<vmem>>, vector<1x32xf32>,
      %c1_23 = arith.constant 1 : index
      %c0_24 = arith.constant 0 : index
      %32 = vector.load %arg7[%c1_23, %c0_24] : memref<8x32xf32, #tpu.memory_space<vmem>>, vector<1x32xf32>
      %33 = arith.mulf %15, %15 : vector<64x32xf32>
      %cst_25 = arith.constant dense<0.000000e+00> : vector<32xf32>
      %34 = vector.multi_reduction <add>, %33, %cst_25 [0] : vector<64x32xf32> to vector<32xf32>
      %35 = vector.shape_cast %34 : vector<32xf32> to vector<1x32xf32>
      %36 = arith.addf %32, %35 : vector<1x32xf32>
      %c1_26 = arith.constant 1 : index
      %c0_27 = arith.constant 0 : index
      %37 = vector.load %arg7[%c1_26, %c0_27] : memref<8x32xf32, #tpu.memory_space<vmem>>, vector<1x32xf32>
      tpu.vector_store %arg7[%c1_26, %c0_27], %36 {strides = array<i32>} : memref<8x32xf32, #tpu.memory_space<vmem>>, vector<1x32xf32>,
    } else {
    }
    %c0_i32_14 = arith.constant 0 : i32
    %19 = arith.cmpi eq, %arg0, %c0_i32_14 : i32
    %c1_i32 = arith.constant 1 : i32
    %20 = arith.cmpi eq, %arg1, %c1_i32 : i32
    %21 = arith.andi %19, %20 : i1
    %22 = arith.extui %21 : i1 to i32
    %c0_i32_15 = arith.constant 0 : i32
    %23 = arith.cmpi ne, %22, %c0_i32_15 : i32
    scf.if %23 {
      %c0_18 = arith.constant 0 : index
      %c0_19 = arith.constant 0 : index
      %27 = vector.load %arg7[%c0_18, %c0_19] : memref<8x32xf32, #tpu.memory_space<vmem>>, vector<1x32xf32>
      %cst_20 = arith.constant 7.812500e-03 : f32
      %28 = vector.broadcast %cst_20 : f32 to vector<1x32xf32>
      %29 = arith.mulf %27, %28 : vector<1x32xf32>
      %c1_21 = arith.constant 1 : index
      %c0_22 = arith.constant 0 : index
      %30 = vector.load %arg7[%c1_21, %c0_22] : memref<8x32xf32, #tpu.memory_space<vmem>>, vector<1x32xf32>
      %cst_23 = arith.constant 7.812500e-03 : f32
      %31 = vector.broadcast %cst_23 : f32 to vector<1x32xf32>
      %32 = arith.mulf %30, %31 : vector<1x32xf32>
      %33 = arith.mulf %29, %29 : vector<1x32xf32>
      %34 = arith.subf %32, %33 : vector<1x32xf32>
      %cst_24 = arith.constant 0.000000e+00 : f32
      %35 = vector.broadcast %cst_24 : f32 to vector<1x32xf32>
      %36 = arith.maximumf %34, %35 : vector<1x32xf32>
      %c0_25 = arith.constant 0 : index
      %c0_26 = arith.constant 0 : index
      %37 = vector.load %arg4[%c0_25, %c0_26] : memref<1x32xf32, #tpu.memory_space<vmem>>, vector<1x32xf32>
      %cst_27 = arith.constant 9.99999974E-6 : f32
      %38 = vector.broadcast %cst_27 : f32 to vector<1x32xf32>
      %39 = arith.addf %36, %38 : vector<1x32xf32>
      %40 = math.rsqrt %39 : vector<1x32xf32>
      %41 = arith.mulf %37, %40 : vector<1x32xf32>
      %c2 = arith.constant 2 : index
      %c0_28 = arith.constant 0 : index
      %42 = vector.load %arg7[%c2, %c0_28] : memref<8x32xf32, #tpu.memory_space<vmem>>, vector<1x32xf32>
      tpu.vector_store %arg7[%c2, %c0_28], %41 {strides = array<i32>} : memref<8x32xf32, #tpu.memory_space<vmem>>, vector<1x32xf32>,
      %c0_29 = arith.constant 0 : index
      %c0_30 = arith.constant 0 : index
      %43 = vector.load %arg5[%c0_29, %c0_30] : memref<1x32xf32, #tpu.memory_space<vmem>>, vector<1x32xf32>
      %44 = arith.mulf %29, %41 : vector<1x32xf32>
      %45 = arith.subf %43, %44 : vector<1x32xf32>
      %c3 = arith.constant 3 : index
      %c0_31 = arith.constant 0 : index
      %46 = vector.load %arg7[%c3, %c0_31] : memref<8x32xf32, #tpu.memory_space<vmem>>, vector<1x32xf32>
      tpu.vector_store %arg7[%c3, %c0_31], %45 {strides = array<i32>} : memref<8x32xf32, #tpu.memory_space<vmem>>, vector<1x32xf32>,
    } else {
    }
    %c1_i32_16 = arith.constant 1 : i32
    %24 = arith.cmpi eq, %arg0, %c1_i32_16 : i32
    %25 = arith.extui %24 : i1 to i32
    %c0_i32_17 = arith.constant 0 : i32
    %26 = arith.cmpi ne, %25, %c0_i32_17 : i32
    scf.if %26 {
      %c2 = arith.constant 2 : index
      %c0_18 = arith.constant 0 : index
      %27 = vector.load %arg7[%c2, %c0_18] : memref<8x32xf32, #tpu.memory_space<vmem>>, vector<1x32xf32>
      %28 = vector.broadcast %27 : vector<1x32xf32> to vector<64x32xf32>
      %29 = arith.mulf %15, %28 : vector<64x32xf32>
      %c3 = arith.constant 3 : index
      %c0_19 = arith.constant 0 : index
      %30 = vector.load %arg7[%c3, %c0_19] : memref<8x32xf32, #tpu.memory_space<vmem>>, vector<1x32xf32>
      %31 = vector.broadcast %30 : vector<1x32xf32> to vector<64x32xf32>
      %32 = arith.addf %29, %31 : vector<64x32xf32>
      %cst_20 = arith.constant 0.000000e+00 : f32
      %33 = vector.broadcast %cst_20 : f32 to vector<64x32xf32>
      %34 = arith.cmpf ogt, %32, %33 : vector<64x32xf32>
      %cst_21 = arith.constant 2.000000e-01 : f32
      %35 = vector.broadcast %cst_21 : f32 to vector<64x32xf32>
      %36 = arith.mulf %35, %32 : vector<64x32xf32>
      %37 = arith.select %34, %32, %36 : vector<64x32xi1>, vector<64x32xf32>
      %38 = arith.truncf %37 : vector<64x32xf32> to vector<64x32xbf16>
      %c0_22 = arith.constant 0 : index
      %c0_23 = arith.constant 0 : index
      %c0_24 = arith.constant 0 : index
      %39 = vector.load %arg6[%c0_22, %c0_23, %c0_24] : memref<1x64x32xbf16, #tpu.memory_space<vmem>>, vector<1x64x32xbf16>
      %40 = vector.shape_cast %39 : vector<1x64x32xbf16> to vector<64x32xbf16>
      %41 = vector.shape_cast %38 : vector<64x32xbf16> to vector<1x64x32xbf16>
      tpu.vector_store %arg6[%c0_22, %c0_23, %c0_24], %41 {strides = array<i32>} : memref<1x64x32xbf16, #tpu.memory_space<vmem>>, vector<1x64x32xbf16>,
    } else {
    }
    return
  }
  func.func @transform_0(%arg0: i32, %arg1: i32) -> (i32, i32, i32) {
    %c0_i32 = arith.constant 0 : i32
    %c0_i32_0 = arith.constant 0 : i32
    %c0_i32_1 = arith.constant 0 : i32
    return %arg1, %c0_i32, %c0_i32_0 : i32, i32, i32
  }
  func.func @transform_1(%arg0: i32, %arg1: i32) -> (i32, i32, i32) {
    %c0_i32 = arith.constant 0 : i32
    %c0_i32_0 = arith.constant 0 : i32
    %c0_i32_1 = arith.constant 0 : i32
    %c0_i32_2 = arith.constant 0 : i32
    return %c0_i32, %c0_i32_0, %c0_i32_1 : i32, i32, i32
  }
  func.func @transform_2(%arg0: i32, %arg1: i32) -> (i32, i32) {
    %c0_i32 = arith.constant 0 : i32
    %c0_i32_0 = arith.constant 0 : i32
    %c0_i32_1 = arith.constant 0 : i32
    return %c0_i32, %c0_i32_0 : i32, i32
  }
  func.func @transform_3(%arg0: i32, %arg1: i32) -> (i32, i32) {
    %c0_i32 = arith.constant 0 : i32
    %c0_i32_0 = arith.constant 0 : i32
    %c0_i32_1 = arith.constant 0 : i32
    return %c0_i32, %c0_i32_0 : i32, i32
  }
  func.func @transform_4(%arg0: i32, %arg1: i32) -> (i32, i32, i32) {
    %0 = arith.muli %arg0, %arg1 : i32
    %c0_i32 = arith.constant 0 : i32
    %c0_i32_0 = arith.constant 0 : i32
    %c0_i32_1 = arith.constant 0 : i32
    return %0, %c0_i32, %c0_i32_0 : i32, i32, i32
  }
}

module attributes {stable_mosaic.version = 11 : i64} {
  func.func @kernel(%arg0: i32, %arg1: i32, %arg2: memref<1x20x256xbf16, #tpu.memory_space<vmem>>, %arg3: memref<2x256x64xbf16, #tpu.memory_space<vmem>>, %arg4: memref<1x64xf32, #tpu.memory_space<vmem>>, %arg5: memref<1x64xf32, #tpu.memory_space<vmem>>, %arg6: memref<1x16x64xbf16, #tpu.memory_space<vmem>>, %arg7: memref<8x64xf32, #tpu.memory_space<vmem>>) attributes {dimension_semantics = [#tpu.dimension_semantics<arbitrary>, #tpu.dimension_semantics<arbitrary>], iteration_bounds = array<i64: 2, 2>, scalar_prefetch = 0 : i64, scratch_operands = 1 : i64, tpu.core_type = #tpu.core_type<tc>, window_params = [{transform_indices = @transform_0, window_bounds = array<i64: 1, 20, 256>}, {pipeline_mode = #tpu.pipeline_mode<synchronous>, transform_indices = @transform_1, window_bounds = array<i64: 2, 256, 64>}, {pipeline_mode = #tpu.pipeline_mode<synchronous>, transform_indices = @transform_2, window_bounds = array<i64: 1, 64>}, {pipeline_mode = #tpu.pipeline_mode<synchronous>, transform_indices = @transform_3, window_bounds = array<i64: 1, 64>}, {transform_indices = @transform_4, window_bounds = array<i64: 1, 16, 64>}]} {
    %c0_i32 = arith.constant 0 : i32
    %0 = arith.cmpi eq, %arg0, %c0_i32 : i32
    %c0_i32_0 = arith.constant 0 : i32
    %1 = arith.cmpi eq, %arg1, %c0_i32_0 : i32
    %2 = arith.andi %0, %1 : i1
    %3 = arith.extui %2 : i1 to i32
    %c0_i32_1 = arith.constant 0 : i32
    %4 = arith.cmpi ne, %3, %c0_i32_1 : i32
    scf.if %4 {
      %cst_18 = arith.constant 0.000000e+00 : f32
      %27 = vector.broadcast %cst_18 : f32 to vector<8x64xf32>
      %c0_19 = arith.constant 0 : index
      %c0_20 = arith.constant 0 : index
      %28 = vector.load %arg7[%c0_19, %c0_20] : memref<8x64xf32, #tpu.memory_space<vmem>>, vector<8x64xf32>
      tpu.vector_store %arg7[%c0_19, %c0_20], %27 {strides = array<i32>} : memref<8x64xf32, #tpu.memory_space<vmem>>, vector<8x64xf32>,
    } else {
    }
    %c0 = arith.constant 0 : index
    %c0_2 = arith.constant 0 : index
    %c0_3 = arith.constant 0 : index
    %5 = vector.load %arg2[%c0, %c0_2, %c0_3] : memref<1x20x256xbf16, #tpu.memory_space<vmem>>, vector<1x16x256xbf16>
    %6 = vector.shape_cast %5 : vector<1x16x256xbf16> to vector<16x256xbf16>
    %c0_4 = arith.constant 0 : index
    %c0_5 = arith.constant 0 : index
    %c0_6 = arith.constant 0 : index
    %7 = vector.load %arg3[%c0_4, %c0_5, %c0_6] : memref<2x256x64xbf16, #tpu.memory_space<vmem>>, vector<1x256x64xbf16>
    %8 = vector.shape_cast %7 : vector<1x256x64xbf16> to vector<256x64xbf16>
    %cst = arith.constant dense<0.000000e+00> : vector<16x64xf32>
    %9 = tpu.matmul %6, %8, %cst {dimension_numbers = #tpu.dot_dimension_numbers<[1], [0], [0], [1], [0, 0, 1, 1], [], []>} : vector<16x256xbf16>, vector<256x64xbf16>, vector<16x64xf32> -> vector<16x64xf32>
    %c0_7 = arith.constant 0 : index
    %c4 = arith.constant 4 : index
    %c0_8 = arith.constant 0 : index
    %10 = vector.load %arg2[%c0_7, %c4, %c0_8] : memref<1x20x256xbf16, #tpu.memory_space<vmem>>, vector<1x16x256xbf16>
    %11 = vector.shape_cast %10 : vector<1x16x256xbf16> to vector<16x256xbf16>
    %c1 = arith.constant 1 : index
    %c0_9 = arith.constant 0 : index
    %c0_10 = arith.constant 0 : index
    %12 = vector.load %arg3[%c1, %c0_9, %c0_10] : memref<2x256x64xbf16, #tpu.memory_space<vmem>>, vector<1x256x64xbf16>
    %13 = vector.shape_cast %12 : vector<1x256x64xbf16> to vector<256x64xbf16>
    %cst_11 = arith.constant dense<0.000000e+00> : vector<16x64xf32>
    %14 = tpu.matmul %11, %13, %cst_11 {dimension_numbers = #tpu.dot_dimension_numbers<[1], [0], [0], [1], [0, 0, 1, 1], [], []>} : vector<16x256xbf16>, vector<256x64xbf16>, vector<16x64xf32> -> vector<16x64xf32>
    %15 = arith.addf %9, %14 : vector<16x64xf32>
    %c0_i32_12 = arith.constant 0 : i32
    %16 = arith.cmpi eq, %arg0, %c0_i32_12 : i32
    %17 = arith.extui %16 : i1 to i32
    %c0_i32_13 = arith.constant 0 : i32
    %18 = arith.cmpi ne, %17, %c0_i32_13 : i32
    scf.if %18 {
      %c0_18 = arith.constant 0 : index
      %c0_19 = arith.constant 0 : index
      %27 = vector.load %arg7[%c0_18, %c0_19] : memref<8x64xf32, #tpu.memory_space<vmem>>, vector<1x64xf32>
      %cst_20 = arith.constant dense<0.000000e+00> : vector<64xf32>
      %28 = vector.multi_reduction <add>, %15, %cst_20 [0] : vector<16x64xf32> to vector<64xf32>
      %29 = vector.shape_cast %28 : vector<64xf32> to vector<1x64xf32>
      %30 = arith.addf %27, %29 : vector<1x64xf32>
      %c0_21 = arith.constant 0 : index
      %c0_22 = arith.constant 0 : index
      %31 = vector.load %arg7[%c0_21, %c0_22] : memref<8x64xf32, #tpu.memory_space<vmem>>, vector<1x64xf32>
      tpu.vector_store %arg7[%c0_21, %c0_22], %30 {strides = array<i32>} : memref<8x64xf32, #tpu.memory_space<vmem>>, vector<1x64xf32>,
      %c1_23 = arith.constant 1 : index
      %c0_24 = arith.constant 0 : index
      %32 = vector.load %arg7[%c1_23, %c0_24] : memref<8x64xf32, #tpu.memory_space<vmem>>, vector<1x64xf32>
      %33 = arith.mulf %15, %15 : vector<16x64xf32>
      %cst_25 = arith.constant dense<0.000000e+00> : vector<64xf32>
      %34 = vector.multi_reduction <add>, %33, %cst_25 [0] : vector<16x64xf32> to vector<64xf32>
      %35 = vector.shape_cast %34 : vector<64xf32> to vector<1x64xf32>
      %36 = arith.addf %32, %35 : vector<1x64xf32>
      %c1_26 = arith.constant 1 : index
      %c0_27 = arith.constant 0 : index
      %37 = vector.load %arg7[%c1_26, %c0_27] : memref<8x64xf32, #tpu.memory_space<vmem>>, vector<1x64xf32>
      tpu.vector_store %arg7[%c1_26, %c0_27], %36 {strides = array<i32>} : memref<8x64xf32, #tpu.memory_space<vmem>>, vector<1x64xf32>,
    } else {
    }
    %c0_i32_14 = arith.constant 0 : i32
    %19 = arith.cmpi eq, %arg0, %c0_i32_14 : i32
    %c1_i32 = arith.constant 1 : i32
    %20 = arith.cmpi eq, %arg1, %c1_i32 : i32
    %21 = arith.andi %19, %20 : i1
    %22 = arith.extui %21 : i1 to i32
    %c0_i32_15 = arith.constant 0 : i32
    %23 = arith.cmpi ne, %22, %c0_i32_15 : i32
    scf.if %23 {
      %c0_18 = arith.constant 0 : index
      %c0_19 = arith.constant 0 : index
      %27 = vector.load %arg7[%c0_18, %c0_19] : memref<8x64xf32, #tpu.memory_space<vmem>>, vector<1x64xf32>
      %cst_20 = arith.constant 3.125000e-02 : f32
      %28 = vector.broadcast %cst_20 : f32 to vector<1x64xf32>
      %29 = arith.mulf %27, %28 : vector<1x64xf32>
      %c1_21 = arith.constant 1 : index
      %c0_22 = arith.constant 0 : index
      %30 = vector.load %arg7[%c1_21, %c0_22] : memref<8x64xf32, #tpu.memory_space<vmem>>, vector<1x64xf32>
      %cst_23 = arith.constant 3.125000e-02 : f32
      %31 = vector.broadcast %cst_23 : f32 to vector<1x64xf32>
      %32 = arith.mulf %30, %31 : vector<1x64xf32>
      %33 = arith.mulf %29, %29 : vector<1x64xf32>
      %34 = arith.subf %32, %33 : vector<1x64xf32>
      %cst_24 = arith.constant 0.000000e+00 : f32
      %35 = vector.broadcast %cst_24 : f32 to vector<1x64xf32>
      %36 = arith.maximumf %34, %35 : vector<1x64xf32>
      %c0_25 = arith.constant 0 : index
      %c0_26 = arith.constant 0 : index
      %37 = vector.load %arg4[%c0_25, %c0_26] : memref<1x64xf32, #tpu.memory_space<vmem>>, vector<1x64xf32>
      %cst_27 = arith.constant 9.99999974E-6 : f32
      %38 = vector.broadcast %cst_27 : f32 to vector<1x64xf32>
      %39 = arith.addf %36, %38 : vector<1x64xf32>
      %40 = math.rsqrt %39 : vector<1x64xf32>
      %41 = arith.mulf %37, %40 : vector<1x64xf32>
      %c2 = arith.constant 2 : index
      %c0_28 = arith.constant 0 : index
      %42 = vector.load %arg7[%c2, %c0_28] : memref<8x64xf32, #tpu.memory_space<vmem>>, vector<1x64xf32>
      tpu.vector_store %arg7[%c2, %c0_28], %41 {strides = array<i32>} : memref<8x64xf32, #tpu.memory_space<vmem>>, vector<1x64xf32>,
      %c0_29 = arith.constant 0 : index
      %c0_30 = arith.constant 0 : index
      %43 = vector.load %arg5[%c0_29, %c0_30] : memref<1x64xf32, #tpu.memory_space<vmem>>, vector<1x64xf32>
      %44 = arith.mulf %29, %41 : vector<1x64xf32>
      %45 = arith.subf %43, %44 : vector<1x64xf32>
      %c3 = arith.constant 3 : index
      %c0_31 = arith.constant 0 : index
      %46 = vector.load %arg7[%c3, %c0_31] : memref<8x64xf32, #tpu.memory_space<vmem>>, vector<1x64xf32>
      tpu.vector_store %arg7[%c3, %c0_31], %45 {strides = array<i32>} : memref<8x64xf32, #tpu.memory_space<vmem>>, vector<1x64xf32>,
    } else {
    }
    %c1_i32_16 = arith.constant 1 : i32
    %24 = arith.cmpi eq, %arg0, %c1_i32_16 : i32
    %25 = arith.extui %24 : i1 to i32
    %c0_i32_17 = arith.constant 0 : i32
    %26 = arith.cmpi ne, %25, %c0_i32_17 : i32
    scf.if %26 {
      %c2 = arith.constant 2 : index
      %c0_18 = arith.constant 0 : index
      %27 = vector.load %arg7[%c2, %c0_18] : memref<8x64xf32, #tpu.memory_space<vmem>>, vector<1x64xf32>
      %28 = vector.broadcast %27 : vector<1x64xf32> to vector<16x64xf32>
      %29 = arith.mulf %15, %28 : vector<16x64xf32>
      %c3 = arith.constant 3 : index
      %c0_19 = arith.constant 0 : index
      %30 = vector.load %arg7[%c3, %c0_19] : memref<8x64xf32, #tpu.memory_space<vmem>>, vector<1x64xf32>
      %31 = vector.broadcast %30 : vector<1x64xf32> to vector<16x64xf32>
      %32 = arith.addf %29, %31 : vector<16x64xf32>
      %cst_20 = arith.constant 0.000000e+00 : f32
      %33 = vector.broadcast %cst_20 : f32 to vector<16x64xf32>
      %34 = arith.cmpf ogt, %32, %33 : vector<16x64xf32>
      %cst_21 = arith.constant 2.000000e-01 : f32
      %35 = vector.broadcast %cst_21 : f32 to vector<16x64xf32>
      %36 = arith.mulf %35, %32 : vector<16x64xf32>
      %37 = arith.select %34, %32, %36 : vector<16x64xi1>, vector<16x64xf32>
      %38 = arith.truncf %37 : vector<16x64xf32> to vector<16x64xbf16>
      %c0_22 = arith.constant 0 : index
      %c0_23 = arith.constant 0 : index
      %c0_24 = arith.constant 0 : index
      %39 = vector.load %arg6[%c0_22, %c0_23, %c0_24] : memref<1x16x64xbf16, #tpu.memory_space<vmem>>, vector<1x16x64xbf16>
      %40 = vector.shape_cast %39 : vector<1x16x64xbf16> to vector<16x64xbf16>
      %41 = vector.shape_cast %38 : vector<16x64xbf16> to vector<1x16x64xbf16>
      tpu.vector_store %arg6[%c0_22, %c0_23, %c0_24], %41 {strides = array<i32>} : memref<1x16x64xbf16, #tpu.memory_space<vmem>>, vector<1x16x64xbf16>,
    } else {
    }
    return
  }
  func.func @transform_0(%arg0: i32, %arg1: i32) -> (i32, i32, i32) {
    %c0_i32 = arith.constant 0 : i32
    %c0_i32_0 = arith.constant 0 : i32
    %c0_i32_1 = arith.constant 0 : i32
    return %arg1, %c0_i32, %c0_i32_0 : i32, i32, i32
  }
  func.func @transform_1(%arg0: i32, %arg1: i32) -> (i32, i32, i32) {
    %c0_i32 = arith.constant 0 : i32
    %c0_i32_0 = arith.constant 0 : i32
    %c0_i32_1 = arith.constant 0 : i32
    %c0_i32_2 = arith.constant 0 : i32
    return %c0_i32, %c0_i32_0, %c0_i32_1 : i32, i32, i32
  }
  func.func @transform_2(%arg0: i32, %arg1: i32) -> (i32, i32) {
    %c0_i32 = arith.constant 0 : i32
    %c0_i32_0 = arith.constant 0 : i32
    %c0_i32_1 = arith.constant 0 : i32
    return %c0_i32, %c0_i32_0 : i32, i32
  }
  func.func @transform_3(%arg0: i32, %arg1: i32) -> (i32, i32) {
    %c0_i32 = arith.constant 0 : i32
    %c0_i32_0 = arith.constant 0 : i32
    %c0_i32_1 = arith.constant 0 : i32
    return %c0_i32, %c0_i32_0 : i32, i32
  }
  func.func @transform_4(%arg0: i32, %arg1: i32) -> (i32, i32, i32) {
    %0 = arith.muli %arg0, %arg1 : i32
    %c0_i32 = arith.constant 0 : i32
    %c0_i32_0 = arith.constant 0 : i32
    %c0_i32_1 = arith.constant 0 : i32
    return %0, %c0_i32, %c0_i32_0 : i32, i32, i32
  }
}

</mosaic_0001>

<bundles_post_ra>
// kernel: discriminator_forward.4
= control target key start
LH: loop header
LB: loop body
LE: loop exit
PB: predicated region body
PF: predicated region fallthrough
CT: control target
= control target key end

     0   :  { %s3844_s15 = smov 0   ;;  %s3846_s16 = smov 0   ;;  %s5680_s0 = inlined_call_operand.vmem [shape: bf16[2,1056,24], index: 0, kind: input, shape index: {}]   ;;  %s5681_s1 = inlined_call_operand.vmem [shape: bf16[2,24,8], index: 1, kind: input, shape index: {}]   ;;  %s5682_s2 = inlined_call_operand.vmem [shape: f32[1,8], index: 2, kind: input, shape index: {}]   ;;  %s5683_s3 = inlined_call_operand.vmem [shape: f32[1,8], index: 3, kind: input, shape index: {}]   ;;  %s5684_s4 = inlined_call_operand.vmem [shape: bf16[2,1024,8], index: 4, kind: output, shape index: {}]  }
   0x1   :  { %s3848_s17 = smov 0   ;;  %s3850_s18 = smov 0  }
   0x2   :  { %s3852_s19 = smov 0  }
   0x3 LB: > { %s23_s20 = sadd.s32 1, %s3808_s17  ;;  %s26_s21 = sadd.s32 1, %s3812_s18  ;;  %s3816_s19 = sphi %s3852_s19, %s14_s19   ;;  %s3812_s18 = sphi %s3850_s18, %s6033_s18   ;;  %s3808_s17 = sphi %s3848_s17, %s6032_s17   ;;  %s3804_s16 = sphi %s3846_s16, %s6031_s16   ;;  %s3800_s15 = sphi %s3844_s15, %s6030_s15  }
   0x4   : > { %p24_p0 = scmp.ge.s32.totalorder %s23_s20, 2  ;;  %p3246_p1 = scmp.ge.s32.totalorder %s3816_s19, 1 }
   0x5   : > { %p176_p2 = scmp.lt.s32.totalorder %s3816_s19, 5 }
   0x6   : > { %s6035_s20 = smov (%p24_p0, %s23_s20), 0  ;;  %s6037_s21 = smov (!%p24_p0, %s26_s21), %s3812_s18 }
   0x7   : > { %p177_p3 = pnand %p3246_p1, %p176_p2  ;;  %p28_p4 = scmp.ge.s32.totalorder %s6037_s21, 2 }
   0x9   : > { %s6039_s21 = smov (%p28_p4, %s6037_s21), 0  ;;  %180 = sbr.rel (%p177_p3) target bundleno = 1211 (0x4bb), region = 36 }
   0xe   : > { %p203_p5 = scmp.lt.s32.totalorder %s3800_s15, 1  ;;  %s208_s22 = smul.u32 %s3800_s15, %s3804_s16 }
   0xf   : > { %p216_p6 = scmp.eq.s32.totalorder %s3804_s16, 0  ;;  %p217_p7 = scmp.eq.s32.totalorder %s3800_s15, 0 }
  0x10   : > { %s204_s23 = scalar_select %p203_p5, %s3800_s15, 1 }
  0x11   : > { %p209_p8 = scmp.lt.s32.totalorder %s208_s22, 1  ;;  %p218_p9 = pnand %p217_p7, %p216_p6 }
  0x12   : > { %s3730_s24 = smul.u32 528, %s204_s23 }
  0x13   : > { %s6041_s22 = smov (!%p209_p8, %s208_s22), 1  ;;  %221 = sbr.rel (%p218_p9) target bundleno = 26 (0x1a), region = 40 }
  0x14   : > { %s3889_s27 = scalar_lea.vmem %s5680_s0, %s3730_s24  ;;  %s3657_s28 = sshll.u32 %s6041_s22, 9 }
  0x15   : > { %s3894_s5 = scalar_lea.vmem %s5684_s4, %s3657_s28 }
  0x18   : > { %vm222_vm0 = vcmask 64512   ;;  %v3818_v0 = vmov 0.0  }
  0x19   : > { %223 = vst.msk [vmem:[#allocation2] sm:$0xff] %vm222_vm0, %v3818_v0 }
  0x1a PF: > { %v3252_v1 = vld [vmem:[%s5681_s1 + $0x14] sm:$0xf]  ;;  %v354_v2 = vld [vmem:[%s5681_s1 + $0x8] sm:$0xf]  ;;  %vm885_vm1 = vcmask 1043456   ;;  %v3725_v9 = vld [vmem:[%s5681_s1 + $0xc] sm:$0xff] }
  0x1b   : > { %v688_v3 = vunpack.c.l.b16 %v3252_v1  ;;  %v1233_v4 = vunpack.c.l.b16 %v354_v2  ;;  %v3722_v10 = vld [vmem:[%s5681_s1] sm:$0xff]  ;;  %v3660_v11 = vld [vmem:[%s3889_s27 + $0x10] sm:$0xff]  ;;  %vm692_vm2 = vcmask 195584   ;;  %v3661_v15 = vld [vmem:[%s3889_s27 + $0x18] sm:$0xff]  ;;  %p3653_p10 = scmp.ne.s32.totalorder %s3804_s16, 0 }
  0x1c   : > { %v3692_v12 = vld [vmem:[%s3889_s27 + $0x110] sm:$0xff]  ;;  %v3658_v13 = vld [vmem:[%s3889_s27] sm:$0xff]  ;;  %v3693_v16 = vld [vmem:[%s3889_s27 + $0x118] sm:$0xff] }
  0x1d   : > { %v690_v5 = vpack.c.b16 %v688_v3, %v688_v3  ;;  %v1235_v6 = vpack.c.b16 %v1233_v4, %v1233_v4  ;;  %v3912_v14 = vld [vmem:[%s3889_s27 + $0x100] sm:$0xff]  ;;  %v3659_v17 = vld [vmem:[%s3889_s27 + $0x8] sm:$0xff]  ;;  %v3664_v23 = vld [vmem:[%s3889_s27 + $0x30] sm:$0xff] }
  0x1e   : > { %v3923_v18 = vld [vmem:[%s3889_s27 + $0x108] sm:$0xff]  ;;  %v3662_v19 = vld [vmem:[%s3889_s27 + $0x20] sm:$0xff]  ;;  %v3696_v24 = vld [vmem:[%s3889_s27 + $0x130] sm:$0xff] }
  0x1f   : > { %v887_v7 = vsel %vm885_vm1, %v690_v5, 0  ;;  %v1244_v8 = vsel %vm885_vm1, %v1235_v6, 0  ;;  %v3694_v20 = vld [vmem:[%s3889_s27 + $0x120] sm:$0xff]  ;;  %v3663_v21 = vld [vmem:[%s3889_s27 + $0x28] sm:$0xff]  ;;  %v3665_v25 = vld [vmem:[%s3889_s27 + $0x38] sm:$0xff] }
  0x20   : > { %895 = vmatpush.bf16.msra.mxu0 %v887_v7  ;;  %3726 = vmatpush.bf16.msra.mxu2 %v887_v7  ;;  %v3695_v22 = vld [vmem:[%s3889_s27 + $0x128] sm:$0xff]  ;;  %v3697_v26 = vld [vmem:[%s3889_s27 + $0x138] sm:$0xff]  ;;  %v3666_v27 = vld [vmem:[%s3889_s27 + $0x40] sm:$0xff] }
  0x21   : > { %1252 = vmatpush.bf16.msra.mxu1 %v1244_v8  ;;  %3728 = vmatpush.bf16.msra.mxu3 %v1244_v8  ;;  %v3698_v28 = vld [vmem:[%s3889_s27 + $0x140] sm:$0xff]  ;;  %v3667_v29 = vld [vmem:[%s3889_s27 + $0x48] sm:$0xff]  ;;  %v3668_v31 = vld [vmem:[%s3889_s27 + $0x50] sm:$0xff] }
  0x22   : > { %v3699_v30 = vld [vmem:[%s3889_s27 + $0x148] sm:$0xff]  ;;  %v3700_v32 = vld [vmem:[%s3889_s27 + $0x150] sm:$0xff]  ;;  %v3669_v44 = vld [vmem:[%s3889_s27 + $0x58] sm:$0xff] }
  0x23   : > { %v3701_v45 = vld [vmem:[%s3889_s27 + $0x158] sm:$0xff]  ;;  %v3670_v58 = vld [vmem:[%s3889_s27 + $0x60] sm:$0xff]  ;;  %v3671_v8 = vld [vmem:[%s3889_s27 + $0x68] sm:$0xff] }
  0x24   : > { %896 = vmatpush.bf16.msra.mxu0 %v3725_v9  ;;  %3727 = vmatpush.bf16.msra.mxu2 %v3725_v9  ;;  %v3702_v59 = vld [vmem:[%s3889_s27 + $0x160] sm:$0xff]  ;;  %v3703_v9 = vld [vmem:[%s3889_s27 + $0x168] sm:$0xff] }
  0x25   : > { %1253 = vmatpush.bf16.msra.mxu1 %v3722_v10  ;;  %3729 = vmatpush.bf16.msra.mxu3 %v3722_v10 }
  0x27   : > { %3513 = vmatmul.msk.bf16.vlgmr.msra.gmra.mxu0 %vm692_vm2, %v3660_v11  ;;  %3545 = vmatmul.msk.bf16.vlgmr.msra.gmra.mxu2 %vm692_vm2, %v3692_v12 }
  0x28   : > { %3589 = vmatmul.msk.bf16.vlgmr.msra.gmra.mxu1 %vm692_vm2, %v3658_v13  ;;  %3621 = vmatmul.msk.bf16.vlgmr.msra.gmra.mxu3 %vm692_vm2, %v3912_v14 }
  0x37   : > { %3514 = vmatmul.msk.bf16.gmra.mxu0 %vm692_vm2, %v3661_v15  ;;  %3546 = vmatmul.msk.bf16.gmra.mxu2 %vm692_vm2, %v3693_v16 }
  0x38   : > { %3590 = vmatmul.msk.bf16.gmra.mxu1 %vm692_vm2, %v3659_v17  ;;  %3622 = vmatmul.msk.bf16.gmra.mxu3 %vm692_vm2, %v3923_v18 }
  0x47   : > { %3515 = vmatmul.msk.bf16.gmra.mxu0 %vm692_vm2, %v3662_v19  ;;  %3547 = vmatmul.msk.bf16.gmra.mxu2 %vm692_vm2, %v3694_v20 }
  0x48   : > { %3591 = vmatmul.msk.bf16.gmra.mxu1 %vm692_vm2, %v3660_v11  ;;  %3623 = vmatmul.msk.bf16.gmra.mxu3 %vm692_vm2, %v3692_v12 }
  0x57   : > { %3516 = vmatmul.msk.bf16.gmra.mxu0 %vm692_vm2, %v3663_v21  ;;  %3548 = vmatmul.msk.bf16.gmra.mxu2 %vm692_vm2, %v3695_v22 }
  0x58   : > { %3592 = vmatmul.msk.bf16.gmra.mxu1 %vm692_vm2, %v3661_v15  ;;  %3624 = vmatmul.msk.bf16.gmra.mxu3 %vm692_vm2, %v3693_v16 }
  0x67   : > { %3517 = vmatmul.msk.bf16.gmra.mxu0 %vm692_vm2, %v3664_v23  ;;  %3549 = vmatmul.msk.bf16.gmra.mxu2 %vm692_vm2, %v3696_v24 }
  0x68   : > { %3593 = vmatmul.msk.bf16.gmra.mxu1 %vm692_vm2, %v3662_v19  ;;  %3625 = vmatmul.msk.bf16.gmra.mxu3 %vm692_vm2, %v3694_v20 }
  0x77   : > { %3518 = vmatmul.msk.bf16.gmra.mxu0 %vm692_vm2, %v3665_v25  ;;  %3550 = vmatmul.msk.bf16.gmra.mxu2 %vm692_vm2, %v3697_v26 }
  0x78   : > { %3594 = vmatmul.msk.bf16.gmra.mxu1 %vm692_vm2, %v3663_v21  ;;  %3626 = vmatmul.msk.bf16.gmra.mxu3 %vm692_vm2, %v3695_v22 }
  0x87   : > { %3519 = vmatmul.msk.bf16.gmra.mxu0 %vm692_vm2, %v3666_v27  ;;  %3551 = vmatmul.msk.bf16.gmra.mxu2 %vm692_vm2, %v3698_v28 }
  0x88   : > { %3595 = vmatmul.msk.bf16.gmra.mxu1 %vm692_vm2, %v3664_v23  ;;  %3627 = vmatmul.msk.bf16.gmra.mxu3 %vm692_vm2, %v3696_v24  ;;  %v3672_v24 = vld [vmem:[%s3889_s27 + $0x70] sm:$0xff] }
  0x97   : > { %3520 = vmatmul.msk.bf16.gmra.mxu0 %vm692_vm2, %v3667_v29  ;;  %3552 = vmatmul.msk.bf16.gmra.mxu2 %vm692_vm2, %v3699_v30 }
  0x98   : > { %3596 = vmatmul.msk.bf16.gmra.mxu1 %vm692_vm2, %v3665_v25  ;;  %3628 = vmatmul.msk.bf16.gmra.mxu3 %vm692_vm2, %v3697_v26  ;;  %v3704_v25 = vld [vmem:[%s3889_s27 + $0x170] sm:$0xff] }
  0xa4   : > { %v898_v33 = vpop.f32.mrf.mxu0 }
  0xa5   : > { %v1255_v34 = vpop.f32.mrf.mxu1 }
  0xa6   : > { %v3968_v35 = vadd.f32 %v1255_v34, %v898_v33 }
  0xa7   : > { %3521 = vmatmul.msk.bf16.gmra.mxu0 %vm692_vm2, %v3668_v31  ;;  %3553 = vmatmul.msk.bf16.gmra.mxu2 %vm692_vm2, %v3700_v32 }
  0xa8   : > { %5774 = vst [vmem:[#allocation3_spill] sm:$0xff] %v3968_v35  ;;  %3597 = vmatmul.msk.bf16.gmra.mxu1 %vm692_vm2, %v3666_v27  ;;  %3629 = vmatmul.msk.bf16.gmra.mxu3 %vm692_vm2, %v3698_v28 }
  0xaa   : > { %v1058_v36 = vpop.f32.mrf.mxu2 }
  0xab   : > { %v1415_v37 = vpop.f32.mrf.mxu3 }
  0xac   : > { %v3974_v38 = vadd.f32 %v1415_v37, %v1058_v36  ;;  %v900_v39 = vpop.f32.mrf.mxu0 }
  0xad   : > { %v1257_v40 = vpop.f32.mrf.mxu1 }
  0xae   : > { %5775 = vst [vmem:[#allocation4_spill] sm:$0xff] %v3974_v38  ;;  %v3976_v41 = vadd.f32 %v1257_v40, %v900_v39  ;;  %v3673_v40 = vld [vmem:[%s3889_s27 + $0x78] sm:$0xff] }
  0xb0   : > { %5776 = vst [vmem:[#allocation5_spill] sm:$0xff] %v3976_v41 }
  0xb2   : > { %v1060_v42 = vpop.f32.mrf.mxu2 }
  0xb3   : > { %v1417_v43 = vpop.f32.mrf.mxu3 }
  0xb4   : > { %v3980_v46 = vadd.f32 %v1417_v43, %v1060_v42  ;;  %v903_v47 = vpop.f32.mrf.mxu0  ;;  %v3705_v42 = vld [vmem:[%s3889_s27 + $0x178] sm:$0xff] }
  0xb5   : > { %v1260_v48 = vpop.f32.mrf.mxu1 }
  0xb6   : > { %5777 = vst [vmem:[#allocation6_spill] sm:$0xff] %v3980_v46  ;;  %v3982_v49 = vadd.f32 %v1260_v48, %v903_v47 }
  0xb7   : > { %3522 = vmatmul.msk.bf16.gmra.mxu0 %vm692_vm2, %v3669_v44  ;;  %3554 = vmatmul.msk.bf16.gmra.mxu2 %vm692_vm2, %v3701_v45 }
  0xb8   : > { %5778 = vst [vmem:[#allocation7_spill] sm:$0xff] %v3982_v49  ;;  %3598 = vmatmul.msk.bf16.gmra.mxu1 %vm692_vm2, %v3667_v29  ;;  %3630 = vmatmul.msk.bf16.gmra.mxu3 %vm692_vm2, %v3699_v30 }
  0xba   : > { %v1063_v50 = vpop.f32.mrf.mxu2 }
  0xbb   : > { %v1420_v51 = vpop.f32.mrf.mxu3 }
  0xbc   : > { %v3988_v52 = vadd.f32 %v1420_v51, %v1063_v50  ;;  %v905_v53 = vpop.f32.mrf.mxu0 }
  0xbd   : > { %v1262_v54 = vpop.f32.mrf.mxu1 }
  0xbe   : > { %5779 = vst [vmem:[#allocation8_spill] sm:$0xff] %v3988_v52  ;;  %v3990_v55 = vadd.f32 %v1262_v54, %v905_v53 }
  0xc0   : > { %5780 = vst [vmem:[#allocation9_spill] sm:$0xff] %v3990_v55 }
  0xc2   : > { %v1065_v56 = vpop.f32.mrf.mxu2 }
  0xc3   : > { %v1422_v57 = vpop.f32.mrf.mxu3 }
  0xc4   : > { %v3994_v60 = vadd.f32 %v1422_v57, %v1065_v56  ;;  %v908_v61 = vpop.f32.mrf.mxu0 }
  0xc5   : > { %v1265_v62 = vpop.f32.mrf.mxu1 }
  0xc6   : > { %5781 = vst [vmem:[#allocation10_spill] sm:$0xff] %v3994_v60  ;;  %v3996_v63 = vadd.f32 %v1265_v62, %v908_v61  ;;  %v3706_v61 = vld [vmem:[%s3889_s27 + $0x180] sm:$0xff] }
  0xc7   : > { %3523 = vmatmul.msk.bf16.gmra.mxu0 %vm692_vm2, %v3670_v58  ;;  %3555 = vmatmul.msk.bf16.gmra.mxu2 %vm692_vm2, %v3702_v59 }
  0xc8   : > { %5782 = vst [vmem:[#allocation11_spill] sm:$0xff] %v3996_v63  ;;  %3599 = vmatmul.msk.bf16.gmra.mxu1 %vm692_vm2, %v3668_v31  ;;  %3631 = vmatmul.msk.bf16.gmra.mxu3 %vm692_vm2, %v3700_v32 }
  0xca   : > { %v1068_v0 = vpop.f32.mrf.mxu2 }
  0xcb   : > { %v1425_v1 = vpop.f32.mrf.mxu3 }
  0xcc   : > { %v4002_v2 = vadd.f32 %v1425_v1, %v1068_v0  ;;  %v910_v3 = vpop.f32.mrf.mxu0 }
  0xcd   : > { %v1267_v4 = vpop.f32.mrf.mxu1 }
  0xce   : > { %5783 = vst [vmem:[#allocation12_spill] sm:$0xff] %v4002_v2  ;;  %v4004_v5 = vadd.f32 %v1267_v4, %v910_v3 }
  0xd2   : > { %v1070_v6 = vpop.f32.mrf.mxu2 }
  0xd3   : > { %v1427_v7 = vpop.f32.mrf.mxu3 }
  0xd4   : > { %v4008_v10 = vadd.f32 %v1427_v7, %v1070_v6  ;;  %v913_v11 = vpop.f32.mrf.mxu0 }
  0xd5   : > { %v1270_v12 = vpop.f32.mrf.mxu1 }
  0xd6   : > { %5784 = vst [vmem:[#allocation13_spill] sm:$0xff] %v4008_v10  ;;  %v4010_v13 = vadd.f32 %v1270_v12, %v913_v11 }
  0xd7   : > { %3524 = vmatmul.msk.bf16.gmra.mxu0 %vm692_vm2, %v3671_v8  ;;  %3556 = vmatmul.msk.bf16.gmra.mxu2 %vm692_vm2, %v3703_v9 }
  0xd8   : > { %3600 = vmatmul.msk.bf16.gmra.mxu1 %vm692_vm2, %v3669_v44  ;;  %3632 = vmatmul.msk.bf16.gmra.mxu3 %vm692_vm2, %v3701_v45 }
  0xda   : > { %v1073_v15 = vpop.f32.mrf.mxu2 }
  0xdb   : > { %v1430_v16 = vpop.f32.mrf.mxu3 }
  0xdc   : > { %v4016_v17 = vadd.f32 %v1430_v16, %v1073_v15  ;;  %v915_v19 = vpop.f32.mrf.mxu0  ;;  %v3675_v16 = vld [vmem:[%s3889_s27 + $0x88] sm:$0xff] }
  0xdd   : > { %v1272_v20 = vpop.f32.mrf.mxu1 }
  0xde   : > { %5785 = vst [vmem:[#allocation14_spill] sm:$0xff] %v4016_v17  ;;  %v4018_v21 = vadd.f32 %v1272_v20, %v915_v19  ;;  %v3707_v19 = vld [vmem:[%s3889_s27 + $0x188] sm:$0xff] }
  0xe2   : > { %v1075_v22 = vpop.f32.mrf.mxu2 }
  0xe3   : > { %v1432_v23 = vpop.f32.mrf.mxu3 }
  0xe4   : > { %v4022_v26 = vadd.f32 %v1432_v23, %v1075_v22  ;;  %v918_v27 = vpop.f32.mrf.mxu0 }
  0xe5   : > { %v1275_v28 = vpop.f32.mrf.mxu1 }
  0xe6   : > { %5786 = vst [vmem:[#allocation15_spill] sm:$0xff] %v4022_v26  ;;  %v4024_v29 = vadd.f32 %v1275_v28, %v918_v27 }
  0xe7   : > { %3525 = vmatmul.msk.bf16.gmra.mxu0 %vm692_vm2, %v3672_v24  ;;  %3557 = vmatmul.msk.bf16.gmra.mxu2 %vm692_vm2, %v3704_v25 }
  0xe8   : > { %3601 = vmatmul.msk.bf16.gmra.mxu1 %vm692_vm2, %v3670_v58  ;;  %3633 = vmatmul.msk.bf16.gmra.mxu3 %vm692_vm2, %v3702_v59  ;;  %v3674_v59 = vld [vmem:[%s3889_s27 + $0x80] sm:$0xff] }
  0xea   : > { %v1078_v30 = vpop.f32.mrf.mxu2 }
  0xeb   : > { %v1435_v31 = vpop.f32.mrf.mxu3 }
  0xec   : > { %v4030_v32 = vadd.f32 %v1435_v31, %v1078_v30  ;;  %v920_v33 = vpop.f32.mrf.mxu0 }
  0xed   : > { %v1277_v34 = vpop.f32.mrf.mxu1 }
  0xee   : > { %5787 = vst [vmem:[#allocation16_spill] sm:$0xff] %v4030_v32  ;;  %v4032_v36 = vadd.f32 %v1277_v34, %v920_v33 }
  0xf2   : > { %v1080_v37 = vpop.f32.mrf.mxu2 }
  0xf3   : > { %v1437_v39 = vpop.f32.mrf.mxu3 }
  0xf4   : > { %v4036_v43 = vadd.f32 %v1437_v39, %v1080_v37  ;;  %v923_v44 = vpop.f32.mrf.mxu0  ;;  %v3676_v39 = vld [vmem:[%s3889_s27 + $0x90] sm:$0xff] }
  0xf5   : > { %v1280_v45 = vpop.f32.mrf.mxu1 }
  0xf6   : > { %5788 = vst [vmem:[#allocation17_spill] sm:$0xff] %v4036_v43  ;;  %v4038_v47 = vadd.f32 %v1280_v45, %v923_v44  ;;  %v3708_v44 = vld [vmem:[%s3889_s27 + $0x190] sm:$0xff] }
  0xf7   : > { %3526 = vmatmul.msk.bf16.gmra.mxu0 %vm692_vm2, %v3673_v40  ;;  %3558 = vmatmul.msk.bf16.gmra.mxu2 %vm692_vm2, %v3705_v42 }
  0xf8   : > { %3602 = vmatmul.msk.bf16.gmra.mxu1 %vm692_vm2, %v3671_v8  ;;  %3634 = vmatmul.msk.bf16.gmra.mxu3 %vm692_vm2, %v3703_v9 }
  0xfa   : > { %v1083_v48 = vpop.f32.mrf.mxu2 }
  0xfb   : > { %v1440_v50 = vpop.f32.mrf.mxu3 }
  0xfc   : > { %v4044_v51 = vadd.f32 %v1440_v50, %v1083_v48  ;;  %v925_v53 = vpop.f32.mrf.mxu0 }
  0xfd   : > { %v1282_v54 = vpop.f32.mrf.mxu1 }
  0xfe   : > { %5789 = vst [vmem:[#allocation18_spill] sm:$0xff] %v4044_v51  ;;  %v4046_v56 = vadd.f32 %v1282_v54, %v925_v53 }
 0x102   : > { %v1085_v57 = vpop.f32.mrf.mxu2 }
 0x103   : > { %v1442_v58 = vpop.f32.mrf.mxu3 }
 0x104   : > { %v4050_v62 = vadd.f32 %v1442_v58, %v1085_v57  ;;  %v928_v0 = vpop.f32.mrf.mxu0 }
 0x105   : > { %v1285_v1 = vpop.f32.mrf.mxu1 }
 0x106   : > { %5790 = vst [vmem:[#allocation19_spill] sm:$0xff] %v4050_v62  ;;  %v4052_v3 = vadd.f32 %v1285_v1, %v928_v0 }
 0x107   : > { %3527 = vmatmul.msk.bf16.gmra.mxu0 %vm692_vm2, %v3674_v59  ;;  %3559 = vmatmul.msk.bf16.gmra.mxu2 %vm692_vm2, %v3706_v61 }
 0x108   : > { %3603 = vmatmul.msk.bf16.gmra.mxu1 %vm692_vm2, %v3672_v24  ;;  %3635 = vmatmul.msk.bf16.gmra.mxu3 %vm692_vm2, %v3704_v25 }
 0x10a   : > { %v1088_v4 = vpop.f32.mrf.mxu2 }
 0x10b   : > { %v1445_v6 = vpop.f32.mrf.mxu3 }
 0x10c   : > { %v4058_v7 = vadd.f32 %v1445_v6, %v1088_v4  ;;  %v930_v8 = vpop.f32.mrf.mxu0  ;;  %v3677_v6 = vld [vmem:[%s3889_s27 + $0x98] sm:$0xff] }
 0x10d   : > { %v1287_v9 = vpop.f32.mrf.mxu1 }
 0x10e   : > { %5791 = vst [vmem:[#allocation20_spill] sm:$0xff] %v4058_v7  ;;  %v4060_v11 = vadd.f32 %v1287_v9, %v930_v8  ;;  %v3709_v8 = vld [vmem:[%s3889_s27 + $0x198] sm:$0xff] }
 0x112   : > { %v1090_v12 = vpop.f32.mrf.mxu2 }
 0x113   : > { %v1447_v15 = vpop.f32.mrf.mxu3 }
 0x114   : > { %v4064_v20 = vadd.f32 %v1447_v15, %v1090_v12  ;;  %v933_v22 = vpop.f32.mrf.mxu0 }
 0x115   : > { %v1290_v23 = vpop.f32.mrf.mxu1 }
 0x116   : > { %5792 = vst [vmem:[#allocation21_spill] sm:$0xff] %v4064_v20  ;;  %v4066_v24 = vadd.f32 %v1290_v23, %v933_v22 }
 0x117   : > { %3528 = vmatmul.msk.bf16.gmra.mxu0 %vm692_vm2, %v3675_v16  ;;  %3560 = vmatmul.msk.bf16.gmra.mxu2 %vm692_vm2, %v3707_v19 }
 0x118   : > { %3604 = vmatmul.msk.bf16.gmra.mxu1 %vm692_vm2, %v3673_v40  ;;  %3636 = vmatmul.msk.bf16.gmra.mxu3 %vm692_vm2, %v3705_v42 }
 0x11a   : > { %v1093_v25 = vpop.f32.mrf.mxu2 }
 0x11b   : > { %v1450_v27 = vpop.f32.mrf.mxu3 }
 0x11c   : > { %v4072_v28 = vadd.f32 %v1450_v27, %v1093_v25  ;;  %v935_v30 = vpop.f32.mrf.mxu0 }
 0x11d   : > { %v1292_v31 = vpop.f32.mrf.mxu1 }
 0x11e   : > { %5793 = vst [vmem:[#allocation22_spill] sm:$0xff] %v4072_v28  ;;  %v4074_v33 = vadd.f32 %v1292_v31, %v935_v30 }
 0x122   : > { %v1095_v34 = vpop.f32.mrf.mxu2 }
 0x123   : > { %v1452_v37 = vpop.f32.mrf.mxu3 }
 0x124   : > { %v4078_v45 = vadd.f32 %v1452_v37, %v1095_v34  ;;  %v938_v48 = vpop.f32.mrf.mxu0  ;;  %v3678_v37 = vld [vmem:[%s3889_s27 + $0xa0] sm:$0xff] }
 0x125   : > { %v1295_v40 = vpop.f32.mrf.mxu1 }
 0x126   : > { %5794 = vst [vmem:[#allocation23_spill] sm:$0xff] %v4078_v45  ;;  %v4080_v50 = vadd.f32 %v1295_v40, %v938_v48  ;;  %v3710_v48 = vld [vmem:[%s3889_s27 + $0x1a0] sm:$0xff] }
 0x127   : > { %3529 = vmatmul.msk.bf16.gmra.mxu0 %vm692_vm2, %v3676_v39  ;;  %3561 = vmatmul.msk.bf16.gmra.mxu2 %vm692_vm2, %v3708_v44 }
 0x128   : > { %3605 = vmatmul.msk.bf16.gmra.mxu1 %vm692_vm2, %v3674_v59  ;;  %3637 = vmatmul.msk.bf16.gmra.mxu3 %vm692_vm2, %v3706_v61 }
 0x12a   : > { %v1098_v42 = vpop.f32.mrf.mxu2 }
 0x12b   : > { %v1455_v53 = vpop.f32.mrf.mxu3 }
 0x12c   : > { %v4086_v54 = vadd.f32 %v1455_v53, %v1098_v42  ;;  %v940_v57 = vpop.f32.mrf.mxu0 }
 0x12d   : > { %v1297_v58 = vpop.f32.mrf.mxu1 }
 0x12e   : > { %5795 = vst [vmem:[#allocation24_spill] sm:$0xff] %v4086_v54  ;;  %v4088_v0 = vadd.f32 %v1297_v58, %v940_v57 }
 0x132   : > { %v1100_v1 = vpop.f32.mrf.mxu2 }
 0x133   : > { %v1457_v4 = vpop.f32.mrf.mxu3 }
 0x134   : > { %v4092_v9 = vadd.f32 %v1457_v4, %v1100_v1  ;;  %v943_v12 = vpop.f32.mrf.mxu0 }
 0x135   : > { %v1300_v59 = vpop.f32.mrf.mxu1 }
 0x136   : > { %5796 = vst [vmem:[#allocation25_spill] sm:$0xff] %v4092_v9  ;;  %v4094_v15 = vadd.f32 %v1300_v59, %v943_v12 }
 0x137   : > { %3530 = vmatmul.msk.bf16.gmra.mxu0 %vm692_vm2, %v3677_v6  ;;  %3562 = vmatmul.msk.bf16.gmra.mxu2 %vm692_vm2, %v3709_v8 }
 0x138   : > { %3606 = vmatmul.msk.bf16.gmra.mxu1 %vm692_vm2, %v3675_v16  ;;  %3638 = vmatmul.msk.bf16.gmra.mxu3 %vm692_vm2, %v3707_v19 }
 0x13a   : > { %v1103_v61 = vpop.f32.mrf.mxu2 }
 0x13b   : > { %v1460_v22 = vpop.f32.mrf.mxu3 }
 0x13c   : > { %v4100_v23 = vadd.f32 %v1460_v22, %v1103_v61  ;;  %v945_v25 = vpop.f32.mrf.mxu0  ;;  %v3679_v22 = vld [vmem:[%s3889_s27 + $0xa8] sm:$0xff] }
 0x13d   : > { %v1302_v27 = vpop.f32.mrf.mxu1 }
 0x13e   : > { %5797 = vst [vmem:[#allocation26_spill] sm:$0xff] %v4100_v23  ;;  %v4102_v30 = vadd.f32 %v1302_v27, %v945_v25  ;;  %v3711_v25 = vld [vmem:[%s3889_s27 + $0x1a8] sm:$0xff] }
 0x142   : > { %v1105_v31 = vpop.f32.mrf.mxu2 }
 0x143   : > { %v1462_v34 = vpop.f32.mrf.mxu3 }
 0x144   : > { %v4106_v40 = vadd.f32 %v1462_v34, %v1105_v31  ;;  %v948_v42 = vpop.f32.mrf.mxu0 }
 0x145   : > { %v1305_v16 = vpop.f32.mrf.mxu1 }
 0x146   : > { %5798 = vst [vmem:[#allocation27_spill] sm:$0xff] %v4106_v40  ;;  %v4108_v53 = vadd.f32 %v1305_v16, %v948_v42 }
 0x147   : > { %3531 = vmatmul.msk.bf16.gmra.mxu0 %vm692_vm2, %v3678_v37  ;;  %3563 = vmatmul.msk.bf16.gmra.mxu2 %vm692_vm2, %v3710_v48 }
 0x148   : > { %3607 = vmatmul.msk.bf16.gmra.mxu1 %vm692_vm2, %v3676_v39  ;;  %3639 = vmatmul.msk.bf16.gmra.mxu3 %vm692_vm2, %v3708_v44 }
 0x14a   : > { %v1108_v19 = vpop.f32.mrf.mxu2 }
 0x14b   : > { %v1465_v57 = vpop.f32.mrf.mxu3 }
 0x14c   : > { %v4114_v58 = vadd.f32 %v1465_v57, %v1108_v19  ;;  %v950_v1 = vpop.f32.mrf.mxu0 }
 0x14d   : > { %v1307_v4 = vpop.f32.mrf.mxu1 }
 0x14e   : > { %5799 = vst [vmem:[#allocation28_spill] sm:$0xff] %v4114_v58  ;;  %v4116_v12 = vadd.f32 %v1307_v4, %v950_v1 }
 0x152   : > { %v1110_v59 = vpop.f32.mrf.mxu2 }
 0x153   : > { %v1467_v61 = vpop.f32.mrf.mxu3 }
 0x154   : > { %v4120_v27 = vadd.f32 %v1467_v61, %v1110_v59  ;;  %v953_v31 = vpop.f32.mrf.mxu0  ;;  %v3680_v61 = vld [vmem:[%s3889_s27 + $0xb0] sm:$0xff] }
 0x155   : > { %v1310_v39 = vpop.f32.mrf.mxu1 }
 0x156   : > { %5800 = vst [vmem:[#allocation29_spill] sm:$0xff] %v4120_v27  ;;  %v4122_v34 = vadd.f32 %v1310_v39, %v953_v31  ;;  %v3712_v31 = vld [vmem:[%s3889_s27 + $0x1b0] sm:$0xff] }
 0x157   : > { %3532 = vmatmul.msk.bf16.gmra.mxu0 %vm692_vm2, %v3679_v22  ;;  %3564 = vmatmul.msk.bf16.gmra.mxu2 %vm692_vm2, %v3711_v25 }
 0x158   : > { %3608 = vmatmul.msk.bf16.gmra.mxu1 %vm692_vm2, %v3677_v6  ;;  %3640 = vmatmul.msk.bf16.gmra.mxu3 %vm692_vm2, %v3709_v8 }
 0x15a   : > { %v1113_v44 = vpop.f32.mrf.mxu2 }
 0x15b   : > { %v1470_v42 = vpop.f32.mrf.mxu3 }
 0x15c   : > { %v4128_v16 = vadd.f32 %v1470_v42, %v1113_v44  ;;  %v955_v19 = vpop.f32.mrf.mxu0 }
 0x15d   : > { %v1312_v57 = vpop.f32.mrf.mxu1 }
 0x15e   : > { %5801 = vst [vmem:[#allocation30_spill] sm:$0xff] %v4128_v16  ;;  %v4130_v1 = vadd.f32 %v1312_v57, %v955_v19 }
 0x162   : > { %v1115_v4 = vpop.f32.mrf.mxu2 }
 0x163   : > { %v1472_v59 = vpop.f32.mrf.mxu3 }
 0x164   : > { %v4134_v39 = vadd.f32 %v1472_v59, %v1115_v4  ;;  %v958_v27 = vpop.f32.mrf.mxu0 }
 0x165   : > { %v1315_v6 = vpop.f32.mrf.mxu1 }
 0x166   : > { %5802 = vst [vmem:[#allocation31_spill] sm:$0xff] %v4134_v39  ;;  %v4136_v58 = vadd.f32 %v1315_v6, %v958_v27  ;;  %v3681_v27 = vld [vmem:[%s3889_s27 + $0xb8] sm:$0xff] }
 0x167   : > { %3533 = vmatmul.msk.bf16.gmra.mxu0 %vm692_vm2, %v3680_v61  ;;  %3565 = vmatmul.msk.bf16.gmra.mxu2 %vm692_vm2, %v3712_v31  ;;  %v3713_v6 = vld [vmem:[%s3889_s27 + $0x1b8] sm:$0xff] }
 0x168   : > { %3609 = vmatmul.msk.bf16.gmra.mxu1 %vm692_vm2, %v3678_v37  ;;  %3641 = vmatmul.msk.bf16.gmra.mxu3 %vm692_vm2, %v3710_v48 }
 0x16a   : > { %v1118_v8 = vpop.f32.mrf.mxu2 }
 0x16b   : > { %v1475_v44 = vpop.f32.mrf.mxu3 }
 0x16c   : > { %v4142_v42 = vadd.f32 %v1475_v44, %v1118_v8  ;;  %v960_v19 = vpop.f32.mrf.mxu0 }
 0x16d   : > { %v1317_v57 = vpop.f32.mrf.mxu1 }
 0x16e   : > { %5803 = vst [vmem:[#allocation32_spill] sm:$0xff] %v4142_v42  ;;  %v4144_v4 = vadd.f32 %v1317_v57, %v960_v19 }
 0x172   : > { %v1120_v59 = vpop.f32.mrf.mxu2 }
 0x173   : > { %v1477_v39 = vpop.f32.mrf.mxu3 }
 0x174   : > { %v4148_v16 = vadd.f32 %v1477_v39, %v1120_v59  ;;  %v963_v40 = vpop.f32.mrf.mxu0 }
 0x175   : > { %v1320_v37 = vpop.f32.mrf.mxu1 }
 0x176   : > { %5804 = vst [vmem:[#allocation33_spill] sm:$0xff] %v4148_v16  ;;  %v4150_v23 = vadd.f32 %v1320_v37, %v963_v40  ;;  %v3682_v40 = vld [vmem:[%s3889_s27 + $0xc0] sm:$0xff] }
 0x177   : > { %3534 = vmatmul.msk.bf16.gmra.mxu0 %vm692_vm2, %v3681_v27  ;;  %3566 = vmatmul.msk.bf16.gmra.mxu2 %vm692_vm2, %v3713_v6  ;;  %v3714_v37 = vld [vmem:[%s3889_s27 + $0x1c0] sm:$0xff] }
 0x178   : > { %3610 = vmatmul.msk.bf16.gmra.mxu1 %vm692_vm2, %v3679_v22  ;;  %3642 = vmatmul.msk.bf16.gmra.mxu3 %vm692_vm2, %v3711_v25 }
 0x17a   : > { %v1123_v48 = vpop.f32.mrf.mxu2 }
 0x17b   : > { %v1480_v8 = vpop.f32.mrf.mxu3 }
 0x17c   : > { %v4156_v44 = vadd.f32 %v1480_v8, %v1123_v48  ;;  %v965_v39 = vpop.f32.mrf.mxu0 }
 0x17d   : > { %v1322_v19 = vpop.f32.mrf.mxu1 }
 0x17e   : > { %5805 = vst [vmem:[#allocation34_spill] sm:$0xff] %v4156_v44  ;;  %v4158_v57 = vadd.f32 %v1322_v19, %v965_v39 }
 0x182   : > { %v1125_v59 = vpop.f32.mrf.mxu2 }
 0x183   : > { %v1482_v16 = vpop.f32.mrf.mxu3 }
 0x184   : > { %v4162_v42 = vadd.f32 %v1482_v16, %v1125_v59  ;;  %v968_v9 = vpop.f32.mrf.mxu0 }
 0x185   : > { %v1325_v22 = vpop.f32.mrf.mxu1 }
 0x186   : > { %5806 = vst [vmem:[#allocation35_spill] sm:$0xff] %v4162_v42  ;;  %v4164_v54 = vadd.f32 %v1325_v22, %v968_v9  ;;  %v3683_v9 = vld [vmem:[%s3889_s27 + $0xc8] sm:$0xff] }
 0x187   : > { %3535 = vmatmul.msk.bf16.gmra.mxu0 %vm692_vm2, %v3682_v40  ;;  %3567 = vmatmul.msk.bf16.gmra.mxu2 %vm692_vm2, %v3714_v37  ;;  %v3715_v22 = vld [vmem:[%s3889_s27 + $0x1c8] sm:$0xff] }
 0x188   : > { %3611 = vmatmul.msk.bf16.gmra.mxu1 %vm692_vm2, %v3680_v61  ;;  %3643 = vmatmul.msk.bf16.gmra.mxu3 %vm692_vm2, %v3712_v31 }
 0x18a   : > { %v1128_v25 = vpop.f32.mrf.mxu2 }
 0x18b   : > { %v1485_v48 = vpop.f32.mrf.mxu3 }
 0x18c   : > { %v4170_v8 = vadd.f32 %v1485_v48, %v1128_v25  ;;  %v970_v16 = vpop.f32.mrf.mxu0 }
 0x18d   : > { %v1327_v39 = vpop.f32.mrf.mxu1 }
 0x18e   : > { %5807 = vst [vmem:[#allocation36_spill] sm:$0xff] %v4170_v8  ;;  %v4172_v19 = vadd.f32 %v1327_v39, %v970_v16 }
 0x192   : > { %v1130_v59 = vpop.f32.mrf.mxu2 }
 0x193   : > { %v1487_v42 = vpop.f32.mrf.mxu3 }
 0x194   : > { %v4176_v44 = vadd.f32 %v1487_v42, %v1130_v59  ;;  %v973_v45 = vpop.f32.mrf.mxu0 }
 0x195   : > { %v1330_v61 = vpop.f32.mrf.mxu1 }
 0x196   : > { %5808 = vst [vmem:[#allocation37_spill] sm:$0xff] %v4176_v44  ;;  %v4178_v28 = vadd.f32 %v1330_v61, %v973_v45  ;;  %v3684_v45 = vld [vmem:[%s3889_s27 + $0xd0] sm:$0xff] }
 0x197   : > { %3536 = vmatmul.msk.bf16.gmra.mxu0 %vm692_vm2, %v3683_v9  ;;  %3568 = vmatmul.msk.bf16.gmra.mxu2 %vm692_vm2, %v3715_v22  ;;  %v3716_v61 = vld [vmem:[%s3889_s27 + $0x1d0] sm:$0xff] }
 0x198   : > { %3612 = vmatmul.msk.bf16.gmra.mxu1 %vm692_vm2, %v3681_v27  ;;  %3644 = vmatmul.msk.bf16.gmra.mxu3 %vm692_vm2, %v3713_v6 }
 0x19a   : > { %v1133_v31 = vpop.f32.mrf.mxu2 }
 0x19b   : > { %v1490_v25 = vpop.f32.mrf.mxu3 }
 0x19c   : > { %v4184_v48 = vadd.f32 %v1490_v25, %v1133_v31  ;;  %v975_v42 = vpop.f32.mrf.mxu0 }
 0x19d   : > { %v1332_v16 = vpop.f32.mrf.mxu1 }
 0x19e   : > { %5809 = vst [vmem:[#allocation38_spill] sm:$0xff] %v4184_v48  ;;  %v4186_v39 = vadd.f32 %v1332_v16, %v975_v42 }
 0x1a2   : > { %v1135_v59 = vpop.f32.mrf.mxu2 }
 0x1a3   : > { %v1492_v44 = vpop.f32.mrf.mxu3 }
 0x1a4   : > { %v4190_v8 = vadd.f32 %v1492_v44, %v1135_v59  ;;  %v978_v20 = vpop.f32.mrf.mxu0 }
 0x1a5   : > { %v1335_v27 = vpop.f32.mrf.mxu1 }
 0x1a6   : > { %5810 = vst [vmem:[#allocation39_spill] sm:$0xff] %v4190_v8  ;;  %v4192_v7 = vadd.f32 %v1335_v27, %v978_v20  ;;  %v3685_v20 = vld [vmem:[%s3889_s27 + $0xd8] sm:$0xff] }
 0x1a7   : > { %3537 = vmatmul.msk.bf16.gmra.mxu0 %vm692_vm2, %v3684_v45  ;;  %3569 = vmatmul.msk.bf16.gmra.mxu2 %vm692_vm2, %v3716_v61  ;;  %v3717_v27 = vld [vmem:[%s3889_s27 + $0x1d8] sm:$0xff] }
 0x1a8   : > { %3613 = vmatmul.msk.bf16.gmra.mxu1 %vm692_vm2, %v3682_v40  ;;  %3645 = vmatmul.msk.bf16.gmra.mxu3 %vm692_vm2, %v3714_v37 }
 0x1aa   : > { %v1138_v6 = vpop.f32.mrf.mxu2 }
 0x1ab   : > { %v1495_v31 = vpop.f32.mrf.mxu3 }
 0x1ac   : > { %v4198_v25 = vadd.f32 %v1495_v31, %v1138_v6  ;;  %v980_v44 = vpop.f32.mrf.mxu0 }
 0x1ad   : > { %v1337_v42 = vpop.f32.mrf.mxu1 }
 0x1ae   : > { %5811 = vst [vmem:[#allocation40_spill] sm:$0xff] %v4198_v25  ;;  %v4200_v16 = vadd.f32 %v1337_v42, %v980_v44 }
 0x1b2   : > { %v1140_v59 = vpop.f32.mrf.mxu2 }
 0x1b3   : > { %v1497_v8 = vpop.f32.mrf.mxu3 }
 0x1b4   : > { %v4204_v48 = vadd.f32 %v1497_v8, %v1140_v59  ;;  %v983_v62 = vpop.f32.mrf.mxu0 }
 0x1b5   : > { %v1340_v40 = vpop.f32.mrf.mxu1 }
 0x1b6   : > { %5812 = vst [vmem:[#allocation41_spill] sm:$0xff] %v4204_v48  ;;  %v4206_v51 = vadd.f32 %v1340_v40, %v983_v62  ;;  %v3686_v62 = vld [vmem:[%s3889_s27 + $0xe0] sm:$0xff] }
 0x1b7   : > { %3538 = vmatmul.msk.bf16.gmra.mxu0 %vm692_vm2, %v3685_v20  ;;  %3570 = vmatmul.msk.bf16.gmra.mxu2 %vm692_vm2, %v3717_v27  ;;  %v3718_v40 = vld [vmem:[%s3889_s27 + $0x1e0] sm:$0xff] }
 0x1b8   : > { %3614 = vmatmul.msk.bf16.gmra.mxu1 %vm692_vm2, %v3683_v9  ;;  %3646 = vmatmul.msk.bf16.gmra.mxu3 %vm692_vm2, %v3715_v22 }
 0x1ba   : > { %v1143_v37 = vpop.f32.mrf.mxu2 }
 0x1bb   : > { %v1500_v6 = vpop.f32.mrf.mxu3 }
 0x1bc   : > { %v4212_v31 = vadd.f32 %v1500_v6, %v1143_v37  ;;  %v985_v8 = vpop.f32.mrf.mxu0 }
 0x1bd   : > { %v1342_v44 = vpop.f32.mrf.mxu1 }
 0x1be   : > { %5813 = vst [vmem:[#allocation42_spill] sm:$0xff] %v4212_v31  ;;  %v4214_v42 = vadd.f32 %v1342_v44, %v985_v8 }
 0x1c2   : > { %v1145_v59 = vpop.f32.mrf.mxu2 }
 0x1c3   : > { %v1502_v48 = vpop.f32.mrf.mxu3 }
 0x1c4   : > { %v4218_v25 = vadd.f32 %v1502_v48, %v1145_v59  ;;  %v988_v43 = vpop.f32.mrf.mxu0 }
 0x1c5   : > { %v1345_v9 = vpop.f32.mrf.mxu1 }
 0x1c6   : > { %5814 = vst [vmem:[#allocation43_spill] sm:$0xff] %v4218_v25  ;;  %v4220_v32 = vadd.f32 %v1345_v9, %v988_v43  ;;  %v3687_v43 = vld [vmem:[%s3889_s27 + $0xe8] sm:$0xff] }
 0x1c7   : > { %3539 = vmatmul.msk.bf16.gmra.mxu0 %vm692_vm2, %v3686_v62  ;;  %3571 = vmatmul.msk.bf16.gmra.mxu2 %vm692_vm2, %v3718_v40  ;;  %v3719_v9 = vld [vmem:[%s3889_s27 + $0x1e8] sm:$0xff] }
 0x1c8   : > { %3615 = vmatmul.msk.bf16.gmra.mxu1 %vm692_vm2, %v3684_v45  ;;  %3647 = vmatmul.msk.bf16.gmra.mxu3 %vm692_vm2, %v3716_v61 }
 0x1ca   : > { %v1148_v22 = vpop.f32.mrf.mxu2 }
 0x1cb   : > { %v1505_v37 = vpop.f32.mrf.mxu3 }
 0x1cc   : > { %v4226_v6 = vadd.f32 %v1505_v37, %v1148_v22  ;;  %v990_v48 = vpop.f32.mrf.mxu0 }
 0x1cd   : > { %v1347_v8 = vpop.f32.mrf.mxu1 }
 0x1ce   : > { %5815 = vst [vmem:[#allocation44_spill] sm:$0xff] %v4226_v6  ;;  %v4228_v44 = vadd.f32 %v1347_v8, %v990_v48 }
 0x1d2   : > { %v1150_v59 = vpop.f32.mrf.mxu2 }
 0x1d3   : > { %v1507_v25 = vpop.f32.mrf.mxu3 }
 0x1d4   : > { %v4232_v31 = vadd.f32 %v1507_v25, %v1150_v59  ;;  %v993_v26 = vpop.f32.mrf.mxu0 }
 0x1d5   : > { %v1350_v45 = vpop.f32.mrf.mxu1 }
 0x1d6   : > { %5816 = vst [vmem:[#allocation45_spill] sm:$0xff] %v4232_v31  ;;  %v4234_v17 = vadd.f32 %v1350_v45, %v993_v26  ;;  %v3688_v26 = vld [vmem:[%s3889_s27 + $0xf0] sm:$0xff] }
 0x1d7   : > { %3540 = vmatmul.msk.bf16.gmra.mxu0 %vm692_vm2, %v3687_v43  ;;  %3572 = vmatmul.msk.bf16.gmra.mxu2 %vm692_vm2, %v3719_v9  ;;  %v3720_v45 = vld [vmem:[%s3889_s27 + $0x1f0] sm:$0xff] }
 0x1d8   : > { %3616 = vmatmul.msk.bf16.gmra.mxu1 %vm692_vm2, %v3685_v20  ;;  %3648 = vmatmul.msk.bf16.gmra.mxu3 %vm692_vm2, %v3717_v27 }
 0x1da   : > { %v1153_v61 = vpop.f32.mrf.mxu2 }
 0x1db   : > { %v1510_v22 = vpop.f32.mrf.mxu3 }
 0x1dc   : > { %v4240_v37 = vadd.f32 %v1510_v22, %v1153_v61  ;;  %v995_v25 = vpop.f32.mrf.mxu0 }
 0x1dd   : > { %v1352_v48 = vpop.f32.mrf.mxu1 }
 0x1de   : > { %5817 = vst [vmem:[#allocation46_spill] sm:$0xff] %v4240_v37  ;;  %v4242_v8 = vadd.f32 %v1352_v48, %v995_v25 }
 0x1e2   : > { %v1155_v59 = vpop.f32.mrf.mxu2 }
 0x1e3   : > { %v1512_v31 = vpop.f32.mrf.mxu3 }
 0x1e4   : > { %v4246_v6 = vadd.f32 %v1512_v31, %v1155_v59  ;;  %v998_v10 = vpop.f32.mrf.mxu0 }
 0x1e5   : > { %v1355_v20 = vpop.f32.mrf.mxu1 }
 0x1e6   : > { %5818 = vst [vmem:[#allocation47_spill] sm:$0xff] %v4246_v6  ;;  %v4248_v2 = vadd.f32 %v1355_v20, %v998_v10  ;;  %v3689_v10 = vld [vmem:[%s3889_s27 + $0xf8] sm:$0xff] }
 0x1e7   : > { %3541 = vmatmul.msk.bf16.gmra.mxu0 %vm692_vm2, %v3688_v26  ;;  %3573 = vmatmul.msk.bf16.gmra.mxu2 %vm692_vm2, %v3720_v45  ;;  %v3721_v20 = vld [vmem:[%s3889_s27 + $0x1f8] sm:$0xff] }
 0x1e8   : > { %3617 = vmatmul.msk.bf16.gmra.mxu1 %vm692_vm2, %v3686_v62  ;;  %3649 = vmatmul.msk.bf16.gmra.mxu3 %vm692_vm2, %v3718_v40 }
 0x1ea   : > { %v1158_v27 = vpop.f32.mrf.mxu2 }
 0x1eb   : > { %v1515_v61 = vpop.f32.mrf.mxu3 }
 0x1ec   : > { %v4254_v22 = vadd.f32 %v1515_v61, %v1158_v27  ;;  %v1000_v31 = vpop.f32.mrf.mxu0 }
 0x1ed   : > { %v1357_v25 = vpop.f32.mrf.mxu1 }
 0x1ee   : > { %5819 = vst [vmem:[#allocation48_spill] sm:$0xff] %v4254_v22  ;;  %v4256_v48 = vadd.f32 %v1357_v25, %v1000_v31 }
 0x1f2   : > { %v1160_v59 = vpop.f32.mrf.mxu2 }
 0x1f3   : > { %v1517_v6 = vpop.f32.mrf.mxu3 }
 0x1f4   : > { %v4260_v37 = vadd.f32 %v1517_v6, %v1160_v59  ;;  %v1003_v60 = vpop.f32.mrf.mxu0 }
 0x1f5   : > { %v1360_v52 = vpop.f32.mrf.mxu1 }
 0x1f6   : > { %5820 = vst [vmem:[#allocation49_spill] sm:$0xff] %v4260_v37  ;;  %v4262_v62 = vadd.f32 %v1360_v52, %v1003_v60  ;;  %v3723_v52 = vld [vmem:[%s3889_s27 + $0x200] sm:$0xff] }
 0x1f7   : > { %3542 = vmatmul.msk.bf16.gmra.mxu0 %vm692_vm2, %v3689_v10  ;;  %3574 = vmatmul.msk.bf16.gmra.mxu2 %vm692_vm2, %v3721_v20 }
 0x1f8   : > { %5821 = vst [vmem:[#allocation50_spill] sm:$0xff] %v4262_v62  ;;  %3618 = vmatmul.msk.bf16.gmra.mxu1 %vm692_vm2, %v3687_v43  ;;  %3650 = vmatmul.msk.bf16.gmra.mxu3 %vm692_vm2, %v3719_v9 }
 0x1fa   : > { %v1163_v40 = vpop.f32.mrf.mxu2 }
 0x1fb   : > { %v1520_v27 = vpop.f32.mrf.mxu3 }
 0x1fc   : > { %v4268_v61 = vadd.f32 %v1520_v27, %v1163_v40  ;;  %v1005_v31 = vpop.f32.mrf.mxu0 }
 0x1fd   : > { %v1362_v6 = vpop.f32.mrf.mxu1 }
 0x1fe   : > { %5822 = vst [vmem:[#allocation51_spill] sm:$0xff] %v4268_v61  ;;  %v4270_v25 = vadd.f32 %v1362_v6, %v1005_v31 }
 0x200   : > { %5823 = vst [vmem:[#allocation52_spill] sm:$0xff] %v4270_v25 }
 0x202   : > { %v1165_v59 = vpop.f32.mrf.mxu2 }
 0x203   : > { %v1522_v37 = vpop.f32.mrf.mxu3 }
 0x204   : > { %v4273_v60 = vadd.f32 %v1522_v37, %v1165_v59  ;;  %v1008_v22 = vpop.f32.mrf.mxu0 }
 0x205   : > { %v1365_v46 = vpop.f32.mrf.mxu1 }
 0x206   : > { %5824 = vst [vmem:[#allocation53_spill] sm:$0xff] %v4273_v60  ;;  %v4275_v38 = vadd.f32 %v1365_v46, %v1008_v22  ;;  %v3724_v22 = vld [vmem:[%s3889_s27 + $0x208] sm:$0xff] }
 0x207   : > { %3543 = vmatmul.msk.bf16.gmra.mxu0 %vm692_vm2, %v3912_v14  ;;  %3575 = vmatmul.msk.bf16.gmra.mxu2 %vm692_vm2, %v3723_v52 }
 0x208   : > { %5825 = vst [vmem:[#allocation54_spill] sm:$0xff] %v4275_v38  ;;  %3619 = vmatmul.msk.bf16.gmra.mxu1 %vm692_vm2, %v3688_v26  ;;  %3651 = vmatmul.msk.bf16.gmra.mxu3 %vm692_vm2, %v3720_v45 }
 0x20a   : > { %v1168_v43 = vpop.f32.mrf.mxu2 }
 0x20b   : > { %v1525_v9 = vpop.f32.mrf.mxu3 }
 0x20c   : > { %v4282_v40 = vadd.f32 %v1525_v9, %v1168_v43  ;;  %v1010_v37 = vpop.f32.mrf.mxu0 }
 0x20d   : > { %v1367_v27 = vpop.f32.mrf.mxu1 }
 0x20e   : > { %5826 = vst [vmem:[#allocation55_spill] sm:$0xff] %v4282_v40  ;;  %v4284_v31 = vadd.f32 %v1367_v27, %v1010_v37 }
 0x210   : > { %5827 = vst [vmem:[#allocation56_spill] sm:$0xff] %v4284_v31 }
 0x212   : > { %v1170_v6 = vpop.f32.mrf.mxu2 }
 0x213   : > { %v1527_v46 = vpop.f32.mrf.mxu3 }
 0x214   : > { %v4287_v59 = vadd.f32 %v1527_v46, %v1170_v6  ;;  %v1013_v14 = vpop.f32.mrf.mxu0 }
 0x215   : > { %v1370_v60 = vpop.f32.mrf.mxu1 }
 0x216   : > { %5828 = vst [vmem:[#allocation57_spill] sm:$0xff] %v4287_v59  ;;  %v4289_v52 = vadd.f32 %v1370_v60, %v1013_v14 }
 0x217   : > { %3544 = vmatmul.msk.bf16.gmra.mxu0 %vm692_vm2, %v3923_v18  ;;  %3576 = vmatmul.msk.bf16.gmra.mxu2 %vm692_vm2, %v3724_v22 }
 0x218   : > { %5829 = vst [vmem:[#allocation58_spill] sm:$0xff] %v4289_v52  ;;  %3620 = vmatmul.msk.bf16.gmra.mxu1 %vm692_vm2, %v3689_v10  ;;  %3652 = vmatmul.msk.bf16.gmra.mxu3 %vm692_vm2, %v3721_v20 }
 0x21a   : > { %v1173_v26 = vpop.f32.mrf.mxu2 }
 0x21b   : > { %v1530_v45 = vpop.f32.mrf.mxu3 }
 0x21c   : > { %v4296_v43 = vadd.f32 %v1530_v45, %v1173_v26  ;;  %v1015_v9 = vpop.f32.mrf.mxu0 }
 0x21d   : > { %v1372_v37 = vpop.f32.mrf.mxu1 }
 0x21e   : > { %5830 = vst [vmem:[#allocation59_spill] sm:$0xff] %v4296_v43  ;;  %v4298_v27 = vadd.f32 %v1372_v37, %v1015_v9 }
 0x220   : > { %5831 = vst [vmem:[#allocation60_spill] sm:$0xff] %v4298_v27 }
 0x222   : > { %v1175_v6 = vpop.f32.mrf.mxu2 }
 0x223   : > { %v1532_v60 = vpop.f32.mrf.mxu3 }
 0x224   : > { %v4300_v46 = vadd.f32 %v1532_v60, %v1175_v6  ;;  %v1018_v14 = vpop.f32.mrf.mxu0 }
 0x225   : > { %v1375_v18 = vpop.f32.mrf.mxu1 }
 0x226   : > { %5832 = vst [vmem:[#allocation61_spill] sm:$0xff] %v4300_v46  ;;  %v4302_v59 = vadd.f32 %v1375_v18, %v1018_v14 }
 0x228   : > { %5833 = vst [vmem:[#allocation62_spill] sm:$0xff] %v4302_v59 }
 0x22a   : > { %v1178_v22 = vpop.f32.mrf.mxu2 }
 0x22b   : > { %v1535_v10 = vpop.f32.mrf.mxu3 }
 0x22c   : > { %v4304_v40 = vadd.f32 %v1535_v10, %v1178_v22  ;;  %v1020_v20 = vpop.f32.mrf.mxu0 }
 0x22d   : > { %v1377_v61 = vpop.f32.mrf.mxu1 }
 0x22e   : > { %5834 = vst [vmem:[#allocation63_spill] sm:$0xff] %v4304_v40  ;;  %v4306_v26 = vadd.f32 %v1377_v61, %v1020_v20 }
 0x230   : > { %5835 = vst [vmem:[#allocation64_spill] sm:$0xff] %v4306_v26 }
 0x232   : > { %v1180_v45 = vpop.f32.mrf.mxu2 }
 0x233   : > { %v1537_v43 = vpop.f32.mrf.mxu3 }
 0x234   : > { %v4308_v9 = vadd.f32 %v1537_v43, %v1180_v45  ;;  %v1023_v37 = vpop.f32.mrf.mxu0 }
 0x235   : > { %v1380_v27 = vpop.f32.mrf.mxu1 }
 0x236   : > { %5836 = vst [vmem:[#allocation65_spill] sm:$0xff] %v4308_v9  ;;  %v4310_v6 = vadd.f32 %v1380_v27, %v1023_v37 }
 0x238   : > { %5837 = vst [vmem:[#allocation66_spill] sm:$0xff] %v4310_v6 }
 0x23a   : > { %v1183_v60 = vpop.f32.mrf.mxu2 }
 0x23b   : > { %v1540_v46 = vpop.f32.mrf.mxu3 }
 0x23c   : > { %v4312_v14 = vadd.f32 %v1540_v46, %v1183_v60  ;;  %v1025_v18 = vpop.f32.mrf.mxu0 }
 0x23d   : > { %v1382_v59 = vpop.f32.mrf.mxu1 }
 0x23e   : > { %5838 = vst [vmem:[#allocation67_spill] sm:$0xff] %v4312_v14  ;;  %v4314_v22 = vadd.f32 %v1382_v59, %v1025_v18 }
 0x240   : > { %5839 = vst [vmem:[#allocation68_spill] sm:$0xff] %v4314_v22 }
 0x242   : > { %v1185_v10 = vpop.f32.mrf.mxu2 }
 0x243   : > { %v1542_v40 = vpop.f32.mrf.mxu3 }
 0x244   : > { %v4316_v61 = vadd.f32 %v1542_v40, %v1185_v10  ;;  %v1028_v20 = vpop.f32.mrf.mxu0 }
 0x245   : > { %v1385_v26 = vpop.f32.mrf.mxu1 }
 0x246   : > { %5840 = vst [vmem:[#allocation69_spill] sm:$0xff] %v4316_v61  ;;  %v4318_v43 = vadd.f32 %v1385_v26, %v1028_v20 }
 0x248   : > { %5841 = vst [vmem:[#allocation70_spill] sm:$0xff] %v4318_v43 }
 0x24a   : > { %v1188_v45 = vpop.f32.mrf.mxu2 }
 0x24b   : > { %v1545_v9 = vpop.f32.mrf.mxu3 }
 0x24c   : > { %v4320_v27 = vadd.f32 %v1545_v9, %v1188_v45  ;;  %v1030_v37 = vpop.f32.mrf.mxu0 }
 0x24d   : > { %v1387_v6 = vpop.f32.mrf.mxu1 }
 0x24e   : > { %5842 = vst [vmem:[#allocation71_spill] sm:$0xff] %v4320_v27  ;;  %v4322_v46 = vadd.f32 %v1387_v6, %v1030_v37 }
 0x250   : > { %5843 = vst [vmem:[#allocation72_spill] sm:$0xff] %v4322_v46 }
 0x252   : > { %v1190_v60 = vpop.f32.mrf.mxu2 }
 0x253   : > { %v1547_v14 = vpop.f32.mrf.mxu3 }
 0x254   : > { %v4324_v59 = vadd.f32 %v1547_v14, %v1190_v60  ;;  %v1033_v18 = vpop.f32.mrf.mxu0 }
 0x255   : > { %v1390_v22 = vpop.f32.mrf.mxu1 }
 0x256   : > { %5844 = vst [vmem:[#allocation73_spill] sm:$0xff] %v4324_v59  ;;  %v4326_v40 = vadd.f32 %v1390_v22, %v1033_v18 }
 0x258   : > { %5845 = vst [vmem:[#allocation74_spill] sm:$0xff] %v4326_v40 }
 0x25a   : > { %v1193_v10 = vpop.f32.mrf.mxu2 }
 0x25b   : > { %v1550_v61 = vpop.f32.mrf.mxu3 }
 0x25c   : > { %v4328_v26 = vadd.f32 %v1550_v61, %v1193_v10  ;;  %v1035_v20 = vpop.f32.mrf.mxu0 }
 0x25d   : > { %v1392_v43 = vpop.f32.mrf.mxu1 }
 0x25e   : > { %5846 = vst [vmem:[#allocation75_spill] sm:$0xff] %v4328_v26  ;;  %v4330_v9 = vadd.f32 %v1392_v43, %v1035_v20 }
 0x260   : > { %5847 = vst [vmem:[#allocation76_spill] sm:$0xff] %v4330_v9 }
 0x262   : > { %v1195_v45 = vpop.f32.mrf.mxu2 }
 0x263   : > { %v1552_v27 = vpop.f32.mrf.mxu3 }
 0x264   : > { %v4332_v6 = vadd.f32 %v1552_v27, %v1195_v45  ;;  %v1038_v37 = vpop.f32.mrf.mxu0 }
 0x265   : > { %v1395_v46 = vpop.f32.mrf.mxu1 }
 0x266   : > { %5848 = vst [vmem:[#allocation77_spill] sm:$0xff] %v4332_v6  ;;  %v4334_v14 = vadd.f32 %v1395_v46, %v1038_v37 }
 0x268   : > { %5849 = vst [vmem:[#allocation78_spill] sm:$0xff] %v4334_v14 }
 0x26a   : > { %v1198_v60 = vpop.f32.mrf.mxu2 }
 0x26b   : > { %v1555_v59 = vpop.f32.mrf.mxu3 }
 0x26c   : > { %v4336_v22 = vadd.f32 %v1555_v59, %v1198_v60  ;;  %v1040_v18 = vpop.f32.mrf.mxu0 }
 0x26d   : > { %v1397_v40 = vpop.f32.mrf.mxu1 }
 0x26e   : > { %5850 = vst [vmem:[#allocation79_spill] sm:$0xff] %v4336_v22  ;;  %v4338_v61 = vadd.f32 %v1397_v40, %v1040_v18 }
 0x270   : > { %5851 = vst [vmem:[#allocation80_spill] sm:$0xff] %v4338_v61 }
 0x272   : > { %v1200_v10 = vpop.f32.mrf.mxu2 }
 0x273   : > { %v1557_v26 = vpop.f32.mrf.mxu3 }
 0x274   : > { %v4340_v43 = vadd.f32 %v1557_v26, %v1200_v10  ;;  %v1043_v20 = vpop.f32.mrf.mxu0 }
 0x275   : > { %v1400_v9 = vpop.f32.mrf.mxu1 }
 0x276   : > { %5852 = vst [vmem:[#allocation81_spill] sm:$0xff] %v4340_v43  ;;  %v4342_v27 = vadd.f32 %v1400_v9, %v1043_v20 }
 0x278   : > { %5853 = vst [vmem:[#allocation82_spill] sm:$0xff] %v4342_v27 }
 0x27a   : > { %v1203_v45 = vpop.f32.mrf.mxu2 }
 0x27b   : > { %v1560_v6 = vpop.f32.mrf.mxu3 }
 0x27c   : > { %v4344_v46 = vadd.f32 %v1560_v6, %v1203_v45  ;;  %v1045_v37 = vpop.f32.mrf.mxu0 }
 0x27d   : > { %v1402_v14 = vpop.f32.mrf.mxu1 }
 0x27e   : > { %5854 = vst [vmem:[#allocation83_spill] sm:$0xff] %v4344_v46  ;;  %v4346_v59 = vadd.f32 %v1402_v14, %v1045_v37 }
 0x280   : > { %5855 = vst [vmem:[#allocation84_spill] sm:$0xff] %v4346_v59 }
 0x282   : > { %v1205_v60 = vpop.f32.mrf.mxu2 }
 0x283   : > { %v1562_v22 = vpop.f32.mrf.mxu3 }
 0x284   : > { %v4348_v40 = vadd.f32 %v1562_v22, %v1205_v60  ;;  %v1048_v18 = vpop.f32.mrf.mxu0 }
 0x285   : > { %v1405_v61 = vpop.f32.mrf.mxu1 }
 0x286   : > { %5856 = vst [vmem:[#allocation85_spill] sm:$0xff] %v4348_v40  ;;  %v4350_v26 = vadd.f32 %v1405_v61, %v1048_v18 }
 0x288   : > { %5857 = vst [vmem:[#allocation86_spill] sm:$0xff] %v4350_v26 }
 0x28a   : > { %v1208_v10 = vpop.f32.mrf.mxu2 }
 0x28b   : > { %v1565_v43 = vpop.f32.mrf.mxu3 }
 0x28c   : > { %v4352_v9 = vadd.f32 %v1565_v43, %v1208_v10  ;;  %v1050_v20 = vpop.f32.mrf.mxu0 }
 0x28d   : > { %v1407_v27 = vpop.f32.mrf.mxu1 }
 0x28e   : > { %5858 = vst [vmem:[#allocation87_spill] sm:$0xff] %v4352_v9  ;;  %v4354_v6 = vadd.f32 %v1407_v27, %v1050_v20 }
 0x292   : > { %v1210_v45 = vpop.f32.mrf.mxu2 }
 0x293   : > { %v1567_v46 = vpop.f32.mrf.mxu3 }
 0x294   : > { %v4356_v14 = vadd.f32 %v1567_v46, %v1210_v45  ;;  %v1053_v37 = vpop.f32.mrf.mxu0 }
 0x295   : > { %v1410_v59 = vpop.f32.mrf.mxu1 }
 0x296   : > { %5859 = vst [vmem:[#allocation88_spill] sm:$0xff] %v4356_v14  ;;  %v4358_v22 = vadd.f32 %v1410_v59, %v1053_v37 }
 0x29a   : > { %v1213_v60 = vpop.f32.mrf.mxu2 }
 0x29b   : > { %v1570_v40 = vpop.f32.mrf.mxu3 }
 0x29c   : > { %v4360_v61 = vadd.f32 %v1570_v40, %v1213_v60  ;;  %v1055_v18 = vpop.f32.mrf.mxu0 }
 0x29d   : > { %v1412_v26 = vpop.f32.mrf.mxu1 }
 0x29e   : > { %5860 = vst [vmem:[#allocation89_spill] sm:$0xff] %v4360_v61  ;;  %v4362_v43 = vadd.f32 %v1412_v26, %v1055_v18 }
 0x2a0   : > { %5861 = vst [vmem:[#allocation90_spill] sm:$0xff] %v4362_v43 }
 0x2a2   : > { %v1215_v10 = vpop.f32.mrf.mxu2  ;;  %1577 = sbr.rel (%p3653_p10) target bundleno = 959 (0x3bf), region = 44 }
 0x2a3   : > { %v1572_v9 = vpop.f32.mrf.mxu3 }
 0x2a4   : > { %v4364_v27 = vadd.f32 %v1572_v9, %v1215_v10 }
 0x2a6   : > { %5862 = vst [vmem:[#allocation91_spill] sm:$0xff] %v4364_v27 }
 0x2a7   : > { %vm1579_vm3 = vcmask 64512   ;;  %v1845_v27 = vmul.f32 %v3968_v35, %v3968_v35  ;;  %vm1842_vm4 = vcmask 57344  }
 0x2a8   : > { %v1580_v46 = vsel %vm1579_vm3, %v3968_v35, 0.0  ;;  %v1581_v59 = vsel %vm1579_vm3, %v3976_v41, 0.0  ;;  %v1583_v40 = vsel %vm1579_vm3, %v3982_v49, 0.0  ;;  %v1585_v26 = vsel %vm1579_vm3, %v3990_v55, 0.0 }
 0x2a9   : > { %v1582_v20 = vadd.f32 %v1581_v59, %v1580_v46  ;;  %v1587_v9 = vsel %vm1579_vm3, %v3996_v63, 0.0  ;;  %v1589_v60 = vsel %vm1579_vm3, %v4004_v5, 0.0  ;;  %v1591_v10 = vsel %vm1579_vm3, %v4010_v13, 0.0 }
 0x2aa   : > { %v1846_v46 = vmul.f32 %v3976_v41, %v3976_v41  ;;  %v1973_v35 = vsel %vm1579_vm3, %v1845_v27, 0.0  ;;  %v1597_v61 = vsel %vm1579_vm3, %v4032_v36, 0.0  ;;  %v1851_v27 = vmul.f32 %v4010_v13, %v4010_v13 }
 0x2ab   : > { %v1584_v45 = vadd.f32 %v1583_v40, %v1582_v20  ;;  %v1847_v40 = vmul.f32 %v3982_v49, %v3982_v49  ;;  %v1593_v20 = vsel %vm1579_vm3, %v4018_v21, 0.0 }
 0x2ad   : > { %v1586_v37 = vadd.f32 %v1585_v26, %v1584_v45  ;;  %v1848_v26 = vmul.f32 %v3990_v55, %v3990_v55  ;;  %v1976_v49 = vsel %vm1579_vm3, %v1847_v40, 0.0 }
 0x2af   : > { %v1588_v18 = vadd.f32 %v1587_v9, %v1586_v37  ;;  %v1595_v9 = vsel %vm1579_vm3, %v4024_v29, 0.0  ;;  %v1849_v37 = vmul.f32 %v3996_v63, %v3996_v63  ;;  %v1599_v63 = vsel %vm1579_vm3, %v4038_v47, 0.0 }
 0x2b1   : > { %v1590_v59 = vadd.f32 %v1589_v60, %v1588_v18  ;;  %v1974_v60 = vsel %vm1579_vm3, %v1846_v46, 0.0 }
 0x2b2   : > { %v1975_v41 = vadd.f32 %v1974_v60, %v1973_v35  ;;  %v1980_v35 = vsel %vm1579_vm3, %v1849_v37, 0.0  ;;  %v1853_v60 = vmul.f32 %v4024_v29, %v4024_v29  ;;  %v1984_v37 = vsel %vm1579_vm3, %v1851_v27, 0.0 }
 0x2b3   : > { %v1592_v45 = vadd.f32 %v1591_v10, %v1590_v59  ;;  %v1850_v10 = vmul.f32 %v4004_v5, %v4004_v5  ;;  %v1978_v59 = vsel %vm1579_vm3, %v1848_v26, 0.0 }
 0x2b4   : > { %v1977_v14 = vadd.f32 %v1976_v49, %v1975_v41  ;;  %v1603_v49 = vsel %vm1579_vm3, %v4052_v3, 0.0  ;;  %v1988_v27 = vsel %vm1579_vm3, %v1853_v60, 0.0 }
 0x2b5   : > { %v1594_v18 = vadd.f32 %v1593_v20, %v1592_v45  ;;  %v1601_v20 = vsel %vm1579_vm3, %v4046_v56, 0.0  ;;  %v1852_v45 = vmul.f32 %v4018_v21, %v4018_v21  ;;  %v1982_v26 = vsel %vm1579_vm3, %v1850_v10, 0.0 }
 0x2b6   : > { %v1979_v40 = vadd.f32 %v1978_v59, %v1977_v14 }
 0x2b7   : > { %v1596_v55 = vadd.f32 %v1595_v9, %v1594_v18  ;;  %v1854_v18 = vmul.f32 %v4032_v36, %v4032_v36  ;;  %v1986_v10 = vsel %vm1579_vm3, %v1852_v45, 0.0 }
 0x2b8   : > { %v1981_v41 = vadd.f32 %v1980_v35, %v1979_v40  ;;  %v1607_v35 = vsel %vm1579_vm3, %v4066_v24, 0.0 }
 0x2b9   : > { %v1598_v46 = vadd.f32 %v1597_v61, %v1596_v55  ;;  %v1605_v61 = vsel %vm1579_vm3, %v4060_v11, 0.0  ;;  %v1990_v45 = vsel %vm1579_vm3, %v1854_v18, 0.0 }
 0x2ba   : > { %v1983_v14 = vadd.f32 %v1982_v26, %v1981_v41  ;;  %v1609_v26 = vsel %vm1579_vm3, %v4074_v33, 0.0 }
 0x2bb   : > { %v1600_v9 = vadd.f32 %v1599_v63, %v1598_v46  ;;  %v1855_v46 = vmul.f32 %v4038_v47, %v4038_v47 }
 0x2bc   : > { %v1985_v59 = vadd.f32 %v1984_v37, %v1983_v14  ;;  %v1611_v37 = vsel %vm1579_vm3, %v4080_v50, 0.0 }
 0x2bd   : > { %v1602_v55 = vadd.f32 %v1601_v20, %v1600_v9  ;;  %v1856_v9 = vmul.f32 %v4046_v56, %v4046_v56  ;;  %v1992_v60 = vsel %vm1579_vm3, %v1855_v46, 0.0 }
 0x2be   : > { %v1987_v20 = vadd.f32 %v1986_v10, %v1985_v59  ;;  %v1613_v10 = vsel %vm1579_vm3, %v4088_v0, 0.0 }
 0x2bf   : > { %v1604_v63 = vadd.f32 %v1603_v49, %v1602_v55  ;;  %v1857_v55 = vmul.f32 %v4052_v3, %v4052_v3  ;;  %v1994_v18 = vsel %vm1579_vm3, %v1856_v9, 0.0 }
 0x2c0   : > { %v1989_v49 = vadd.f32 %v1988_v27, %v1987_v20  ;;  %v1615_v27 = vsel %vm1579_vm3, %v4094_v15, 0.0 }
 0x2c1   : > { %v1606_v40 = vadd.f32 %v1605_v61, %v1604_v63  ;;  %v1858_v63 = vmul.f32 %v4060_v11, %v4060_v11  ;;  %v1996_v46 = vsel %vm1579_vm3, %v1857_v55, 0.0 }
 0x2c2   : > { %v1991_v61 = vadd.f32 %v1990_v45, %v1989_v49  ;;  %v1617_v45 = vsel %vm1579_vm3, %v4102_v30, 0.0 }
 0x2c3   : > { %v1608_v41 = vadd.f32 %v1607_v35, %v1606_v40  ;;  %v1859_v40 = vmul.f32 %v4066_v24, %v4066_v24  ;;  %v1998_v9 = vsel %vm1579_vm3, %v1858_v63, 0.0 }
 0x2c4   : > { %v1993_v35 = vadd.f32 %v1992_v60, %v1991_v61  ;;  %v1619_v60 = vsel %vm1579_vm3, %v4108_v53, 0.0 }
 0x2c5   : > { %v1610_v14 = vadd.f32 %v1609_v26, %v1608_v41  ;;  %v1860_v41 = vmul.f32 %v4074_v33, %v4074_v33  ;;  %v2000_v55 = vsel %vm1579_vm3, %v1859_v40, 0.0 }
 0x2c6   : > { %v1995_v26 = vadd.f32 %v1994_v18, %v1993_v35  ;;  %v1621_v18 = vsel %vm1579_vm3, %v4116_v12, 0.0 }
 0x2c7   : > { %v1612_v59 = vadd.f32 %v1611_v37, %v1610_v14  ;;  %v1861_v14 = vmul.f32 %v4080_v50, %v4080_v50  ;;  %v2002_v63 = vsel %vm1579_vm3, %v1860_v41, 0.0 }
 0x2c8   : > { %v1997_v37 = vadd.f32 %v1996_v46, %v1995_v26  ;;  %v1623_v46 = vsel %vm1579_vm3, %v4122_v34, 0.0 }
 0x2c9   : > { %v1614_v20 = vadd.f32 %v1613_v10, %v1612_v59  ;;  %v1862_v59 = vmul.f32 %v4088_v0, %v4088_v0  ;;  %v2004_v40 = vsel %vm1579_vm3, %v1861_v14, 0.0 }
 0x2ca   : > { %v1999_v10 = vadd.f32 %v1998_v9, %v1997_v37  ;;  %v1625_v9 = vsel %vm1579_vm3, %v4130_v1, 0.0 }
 0x2cb   : > { %v1616_v49 = vadd.f32 %v1615_v27, %v1614_v20  ;;  %v1863_v20 = vmul.f32 %v4094_v15, %v4094_v15  ;;  %v2006_v41 = vsel %vm1579_vm3, %v1862_v59, 0.0 }
 0x2cc   : > { %v2001_v27 = vadd.f32 %v2000_v55, %v1999_v10  ;;  %v1627_v55 = vsel %vm1579_vm3, %v4136_v58, 0.0 }
 0x2cd   : > { %v1618_v61 = vadd.f32 %v1617_v45, %v1616_v49  ;;  %v1864_v49 = vmul.f32 %v4102_v30, %v4102_v30  ;;  %v2008_v14 = vsel %vm1579_vm3, %v1863_v20, 0.0 }
 0x2ce   : > { %v2003_v45 = vadd.f32 %v2002_v63, %v2001_v27  ;;  %v1629_v63 = vsel %vm1579_vm3, %v4144_v4, 0.0 }
 0x2cf   : > { %v1620_v35 = vadd.f32 %v1619_v60, %v1618_v61  ;;  %v1865_v61 = vmul.f32 %v4108_v53, %v4108_v53  ;;  %v2010_v59 = vsel %vm1579_vm3, %v1864_v49, 0.0 }
 0x2d0   : > { %v2005_v60 = vadd.f32 %v2004_v40, %v2003_v45  ;;  %v1631_v40 = vsel %vm1579_vm3, %v4150_v23, 0.0 }
 0x2d1   : > { %v1622_v26 = vadd.f32 %v1621_v18, %v1620_v35  ;;  %v1866_v35 = vmul.f32 %v4116_v12, %v4116_v12  ;;  %v2012_v20 = vsel %vm1579_vm3, %v1865_v61, 0.0 }
 0x2d2   : > { %v2007_v18 = vadd.f32 %v2006_v41, %v2005_v60  ;;  %v1633_v41 = vsel %vm1579_vm3, %v4158_v57, 0.0 }
 0x2d3   : > { %v1624_v37 = vadd.f32 %v1623_v46, %v1622_v26  ;;  %v1867_v26 = vmul.f32 %v4122_v34, %v4122_v34  ;;  %v2014_v49 = vsel %vm1579_vm3, %v1866_v35, 0.0 }
 0x2d4   : > { %v2009_v46 = vadd.f32 %v2008_v14, %v2007_v18  ;;  %v1635_v14 = vsel %vm1579_vm3, %v4164_v54, 0.0 }
 0x2d5   : > { %v1626_v10 = vadd.f32 %v1625_v9, %v1624_v37  ;;  %v1868_v37 = vmul.f32 %v4130_v1, %v4130_v1  ;;  %v2016_v61 = vsel %vm1579_vm3, %v1867_v26, 0.0 }
 0x2d6   : > { %v2011_v9 = vadd.f32 %v2010_v59, %v2009_v46  ;;  %v1637_v59 = vsel %vm1579_vm3, %v4172_v19, 0.0 }
 0x2d7   : > { %v1628_v27 = vadd.f32 %v1627_v55, %v1626_v10  ;;  %v1869_v10 = vmul.f32 %v4136_v58, %v4136_v58  ;;  %v2018_v35 = vsel %vm1579_vm3, %v1868_v37, 0.0 }
 0x2d8   : > { %v2013_v55 = vadd.f32 %v2012_v20, %v2011_v9  ;;  %v1639_v20 = vsel %vm1579_vm3, %v4178_v28, 0.0 }
 0x2d9   : > { %v1630_v45 = vadd.f32 %v1629_v63, %v1628_v27  ;;  %v1870_v27 = vmul.f32 %v4144_v4, %v4144_v4  ;;  %v2020_v26 = vsel %vm1579_vm3, %v1869_v10, 0.0 }
 0x2da   : > { %v2015_v63 = vadd.f32 %v2014_v49, %v2013_v55  ;;  %v1641_v49 = vsel %vm1579_vm3, %v4186_v39, 0.0 }
 0x2db   : > { %v1632_v60 = vadd.f32 %v1631_v40, %v1630_v45  ;;  %v1871_v45 = vmul.f32 %v4150_v23, %v4150_v23  ;;  %v2022_v37 = vsel %vm1579_vm3, %v1870_v27, 0.0 }
 0x2dc   : > { %v2017_v40 = vadd.f32 %v2016_v61, %v2015_v63  ;;  %v1643_v61 = vsel %vm1579_vm3, %v4192_v7, 0.0 }
 0x2dd   : > { %v1634_v18 = vadd.f32 %v1633_v41, %v1632_v60  ;;  %v1872_v60 = vmul.f32 %v4158_v57, %v4158_v57  ;;  %v2024_v10 = vsel %vm1579_vm3, %v1871_v45, 0.0 }
 0x2de   : > { %v2019_v41 = vadd.f32 %v2018_v35, %v2017_v40  ;;  %v1645_v35 = vsel %vm1579_vm3, %v4200_v16, 0.0 }
 0x2df   : > { %v1636_v46 = vadd.f32 %v1635_v14, %v1634_v18  ;;  %v1873_v18 = vmul.f32 %v4164_v54, %v4164_v54  ;;  %v2026_v27 = vsel %vm1579_vm3, %v1872_v60, 0.0 }
 0x2e0   : > { %v2021_v14 = vadd.f32 %v2020_v26, %v2019_v41  ;;  %v1647_v26 = vsel %vm1579_vm3, %v4206_v51, 0.0 }
 0x2e1   : > { %v1638_v9 = vadd.f32 %v1637_v59, %v1636_v46  ;;  %v1874_v46 = vmul.f32 %v4172_v19, %v4172_v19  ;;  %v2028_v45 = vsel %vm1579_vm3, %v1873_v18, 0.0 }
 0x2e2   : > { %v2023_v59 = vadd.f32 %v2022_v37, %v2021_v14  ;;  %v1649_v37 = vsel %vm1579_vm3, %v4214_v42, 0.0 }
 0x2e3   : > { %v1640_v55 = vadd.f32 %v1639_v20, %v1638_v9  ;;  %v1875_v9 = vmul.f32 %v4178_v28, %v4178_v28  ;;  %v2030_v60 = vsel %vm1579_vm3, %v1874_v46, 0.0 }
 0x2e4   : > { %v2025_v20 = vadd.f32 %v2024_v10, %v2023_v59  ;;  %v1651_v10 = vsel %vm1579_vm3, %v4220_v32, 0.0 }
 0x2e5   : > { %v1642_v63 = vadd.f32 %v1641_v49, %v1640_v55  ;;  %v1876_v55 = vmul.f32 %v4186_v39, %v4186_v39  ;;  %v2032_v18 = vsel %vm1579_vm3, %v1875_v9, 0.0 }
 0x2e6   : > { %v2027_v49 = vadd.f32 %v2026_v27, %v2025_v20  ;;  %v1653_v27 = vsel %vm1579_vm3, %v4228_v44, 0.0 }
 0x2e7   : > { %v1644_v40 = vadd.f32 %v1643_v61, %v1642_v63  ;;  %v1877_v63 = vmul.f32 %v4192_v7, %v4192_v7  ;;  %v2034_v46 = vsel %vm1579_vm3, %v1876_v55, 0.0 }
 0x2e8   : > { %v2029_v61 = vadd.f32 %v2028_v45, %v2027_v49  ;;  %v1655_v45 = vsel %vm1579_vm3, %v4234_v17, 0.0 }
 0x2e9   : > { %v1646_v41 = vadd.f32 %v1645_v35, %v1644_v40  ;;  %v1878_v40 = vmul.f32 %v4200_v16, %v4200_v16  ;;  %v2036_v9 = vsel %vm1579_vm3, %v1877_v63, 0.0 }
 0x2ea   : > { %v2031_v35 = vadd.f32 %v2030_v60, %v2029_v61  ;;  %v1657_v60 = vsel %vm1579_vm3, %v4242_v8, 0.0 }
 0x2eb   : > { %v1648_v14 = vadd.f32 %v1647_v26, %v1646_v41  ;;  %v1879_v41 = vmul.f32 %v4206_v51, %v4206_v51  ;;  %v2038_v55 = vsel %vm1579_vm3, %v1878_v40, 0.0 }
 0x2ec   : > { %v2033_v26 = vadd.f32 %v2032_v18, %v2031_v35  ;;  %v1659_v18 = vsel %vm1579_vm3, %v4248_v2, 0.0 }
 0x2ed   : > { %v1650_v59 = vadd.f32 %v1649_v37, %v1648_v14  ;;  %v1880_v14 = vmul.f32 %v4214_v42, %v4214_v42  ;;  %v2040_v63 = vsel %vm1579_vm3, %v1879_v41, 0.0 }
 0x2ee   : > { %v2035_v37 = vadd.f32 %v2034_v46, %v2033_v26  ;;  %v1661_v46 = vsel %vm1579_vm3, %v4256_v48, 0.0 }
 0x2ef   : > { %v1652_v20 = vadd.f32 %v1651_v10, %v1650_v59  ;;  %v1881_v59 = vmul.f32 %v4220_v32, %v4220_v32  ;;  %v2042_v40 = vsel %vm1579_vm3, %v1880_v14, 0.0 }
 0x2f0   : > { %v2037_v10 = vadd.f32 %v2036_v9, %v2035_v37  ;;  %v1663_v9 = vsel %vm1579_vm3, %v4262_v62, 0.0 }
 0x2f1   : > { %v1654_v49 = vadd.f32 %v1653_v27, %v1652_v20  ;;  %v1882_v20 = vmul.f32 %v4228_v44, %v4228_v44  ;;  %v2044_v41 = vsel %vm1579_vm3, %v1881_v59, 0.0 }
 0x2f2   : > { %v2039_v27 = vadd.f32 %v2038_v55, %v2037_v10  ;;  %v1665_v55 = vsel %vm1579_vm3, %v4270_v25, 0.0 }
 0x2f3   : > { %v1656_v61 = vadd.f32 %v1655_v45, %v1654_v49  ;;  %v1883_v49 = vmul.f32 %v4234_v17, %v4234_v17  ;;  %v2046_v14 = vsel %vm1579_vm3, %v1882_v20, 0.0 }
 0x2f4   : > { %v2041_v45 = vadd.f32 %v2040_v63, %v2039_v27  ;;  %v1667_v63 = vsel %vm1579_vm3, %v4275_v38, 0.0 }
 0x2f5   : > { %v1658_v35 = vadd.f32 %v1657_v60, %v1656_v61  ;;  %v1884_v61 = vmul.f32 %v4242_v8, %v4242_v8  ;;  %v2048_v59 = vsel %vm1579_vm3, %v1883_v49, 0.0 }
 0x2f6   : > { %v2043_v60 = vadd.f32 %v2042_v40, %v2041_v45  ;;  %v1669_v40 = vsel %vm1579_vm3, %v4284_v31, 0.0 }
 0x2f7   : > { %v1660_v26 = vadd.f32 %v1659_v18, %v1658_v35  ;;  %v1885_v35 = vmul.f32 %v4248_v2, %v4248_v2  ;;  %v2050_v20 = vsel %vm1579_vm3, %v1884_v61, 0.0 }
 0x2f8   : > { %v2045_v18 = vadd.f32 %v2044_v41, %v2043_v60  ;;  %v1671_v41 = vsel %vm1579_vm3, %v4289_v52, 0.0 }
 0x2f9   : > { %v1662_v37 = vadd.f32 %v1661_v46, %v1660_v26  ;;  %v1886_v26 = vmul.f32 %v4256_v48, %v4256_v48  ;;  %v2052_v49 = vsel %vm1579_vm3, %v1885_v35, 0.0 }
 0x2fa   : > { %v2047_v46 = vadd.f32 %v2046_v14, %v2045_v18  ;;  %v5863_v14 = vld [vmem:[#allocation60_spill] sm:$0xff]  ;;  %v1888_v18 = vmul.f32 %v4270_v25, %v4270_v25  ;;  %v1890_v25 = vmul.f32 %v4284_v31, %v4284_v31 }
 0x2fb   : > { %v1664_v10 = vadd.f32 %v1663_v9, %v1662_v37  ;;  %v1887_v37 = vmul.f32 %v4262_v62, %v4262_v62  ;;  %v2054_v61 = vsel %vm1579_vm3, %v1886_v26, 0.0  ;;  %v1889_v62 = vmul.f32 %v4275_v38, %v4275_v38 }
 0x2fc   : > { %v2049_v9 = vadd.f32 %v2048_v59, %v2047_v46  ;;  %v2058_v26 = vsel %vm1579_vm3, %v1888_v18, 0.0  ;;  %v1891_v38 = vmul.f32 %v4289_v52, %v4289_v52  ;;  %v1892_v31 = vmul.f32 %v5863_v14, %v5863_v14 }
 0x2fd   : > { %v1666_v27 = vadd.f32 %v1665_v55, %v1664_v10  ;;  %v1673_v10 = vsel %vm1579_vm3, %v5863_v14, 0.0  ;;  %v2056_v35 = vsel %vm1579_vm3, %v1887_v37, 0.0  ;;  %v2060_v37 = vsel %vm1579_vm3, %v1889_v62, 0.0 }
 0x2fe   : > { %v2051_v55 = vadd.f32 %v2050_v20, %v2049_v9  ;;  %v2062_v18 = vsel %vm1579_vm3, %v1890_v25, 0.0  ;;  %v2064_v62 = vsel %vm1579_vm3, %v1891_v38, 0.0  ;;  %v2066_v25 = vsel %vm1579_vm3, %v1892_v31, 0.0 }
 0x2ff   : > { %v1668_v45 = vadd.f32 %v1667_v63, %v1666_v27  ;;  %v5864_v27 = vld [vmem:[#allocation62_spill] sm:$0xff] }
 0x300   : > { %v2053_v59 = vadd.f32 %v2052_v49, %v2051_v55  ;;  %v1675_v46 = vsel %vm1579_vm3, %v5864_v27, 0.0  ;;  %v1893_v52 = vmul.f32 %v5864_v27, %v5864_v27 }
 0x301   : > { %v1670_v60 = vadd.f32 %v1669_v40, %v1668_v45  ;;  %v5865_v45 = vld [vmem:[#allocation64_spill] sm:$0xff] }
 0x302   : > { %v2055_v20 = vadd.f32 %v2054_v61, %v2053_v59  ;;  %v1677_v9 = vsel %vm1579_vm3, %v5865_v45, 0.0  ;;  %v1894_v14 = vmul.f32 %v5865_v45, %v5865_v45  ;;  %v2068_v38 = vsel %vm1579_vm3, %v1893_v52, 0.0 }
 0x303   : > { %v1672_v63 = vadd.f32 %v1671_v41, %v1670_v60  ;;  %v5866_v60 = vld [vmem:[#allocation66_spill] sm:$0xff] }
 0x304   : > { %v2057_v49 = vadd.f32 %v2056_v35, %v2055_v20  ;;  %v1679_v55 = vsel %vm1579_vm3, %v5866_v60, 0.0  ;;  %v1895_v27 = vmul.f32 %v5866_v60, %v5866_v60  ;;  %v2070_v31 = vsel %vm1579_vm3, %v1894_v14, 0.0 }
 0x305   : > { %v1674_v40 = vadd.f32 %v1673_v10, %v1672_v63  ;;  %v5867_v63 = vld [vmem:[#allocation68_spill] sm:$0xff] }
 0x306   : > { %v2059_v61 = vadd.f32 %v2058_v26, %v2057_v49  ;;  %v1681_v59 = vsel %vm1579_vm3, %v5867_v63, 0.0  ;;  %v1896_v45 = vmul.f32 %v5867_v63, %v5867_v63  ;;  %v2072_v52 = vsel %vm1579_vm3, %v1895_v27, 0.0 }
 0x307   : > { %v1676_v41 = vadd.f32 %v1675_v46, %v1674_v40  ;;  %v5868_v40 = vld [vmem:[#allocation70_spill] sm:$0xff] }
 0x308   : > { %v2061_v35 = vadd.f32 %v2060_v37, %v2059_v61  ;;  %v1683_v20 = vsel %vm1579_vm3, %v5868_v40, 0.0  ;;  %v1897_v60 = vmul.f32 %v5868_v40, %v5868_v40  ;;  %v2074_v14 = vsel %vm1579_vm3, %v1896_v45, 0.0 }
 0x309   : > { %v1678_v10 = vadd.f32 %v1677_v9, %v1676_v41  ;;  %v5869_v41 = vld [vmem:[#allocation72_spill] sm:$0xff] }
 0x30a   : > { %v2063_v26 = vadd.f32 %v2062_v18, %v2061_v35  ;;  %v1685_v49 = vsel %vm1579_vm3, %v5869_v41, 0.0  ;;  %v1898_v63 = vmul.f32 %v5869_v41, %v5869_v41  ;;  %v2076_v27 = vsel %vm1579_vm3, %v1897_v60, 0.0 }
 0x30b   : > { %v1680_v46 = vadd.f32 %v1679_v55, %v1678_v10  ;;  %v5870_v10 = vld [vmem:[#allocation74_spill] sm:$0xff] }
 0x30c   : > { %v2065_v37 = vadd.f32 %v2064_v62, %v2063_v26  ;;  %v1687_v61 = vsel %vm1579_vm3, %v5870_v10, 0.0  ;;  %v1899_v40 = vmul.f32 %v5870_v10, %v5870_v10  ;;  %v2078_v45 = vsel %vm1579_vm3, %v1898_v63, 0.0 }
 0x30d   : > { %v1682_v9 = vadd.f32 %v1681_v59, %v1680_v46  ;;  %v5871_v46 = vld [vmem:[#allocation76_spill] sm:$0xff] }
 0x30e   : > { %v2067_v18 = vadd.f32 %v2066_v25, %v2065_v37  ;;  %v1689_v35 = vsel %vm1579_vm3, %v5871_v46, 0.0  ;;  %v1900_v41 = vmul.f32 %v5871_v46, %v5871_v46  ;;  %v2080_v60 = vsel %vm1579_vm3, %v1899_v40, 0.0 }
 0x30f   : > { %v1684_v55 = vadd.f32 %v1683_v20, %v1682_v9  ;;  %v5872_v9 = vld [vmem:[#allocation78_spill] sm:$0xff] }
 0x310   : > { %v2069_v62 = vadd.f32 %v2068_v38, %v2067_v18  ;;  %v1691_v26 = vsel %vm1579_vm3, %v5872_v9, 0.0  ;;  %v1901_v10 = vmul.f32 %v5872_v9, %v5872_v9  ;;  %v2082_v63 = vsel %vm1579_vm3, %v1900_v41, 0.0 }
 0x311   : > { %v1686_v59 = vadd.f32 %v1685_v49, %v1684_v55  ;;  %v5873_v55 = vld [vmem:[#allocation80_spill] sm:$0xff] }
 0x312   : > { %v2071_v25 = vadd.f32 %v2070_v31, %v2069_v62  ;;  %v1693_v37 = vsel %vm1579_vm3, %v5873_v55, 0.0  ;;  %v1902_v46 = vmul.f32 %v5873_v55, %v5873_v55  ;;  %v2084_v40 = vsel %vm1579_vm3, %v1901_v10, 0.0 }
 0x313   : > { %v1688_v20 = vadd.f32 %v1687_v61, %v1686_v59  ;;  %v5874_v59 = vld [vmem:[#allocation82_spill] sm:$0xff] }
 0x314   : > { %v2073_v38 = vadd.f32 %v2072_v52, %v2071_v25  ;;  %v1695_v18 = vsel %vm1579_vm3, %v5874_v59, 0.0  ;;  %v1903_v9 = vmul.f32 %v5874_v59, %v5874_v59  ;;  %v2086_v41 = vsel %vm1579_vm3, %v1902_v46, 0.0 }
 0x315   : > { %v1690_v49 = vadd.f32 %v1689_v35, %v1688_v20  ;;  %v5875_v20 = vld [vmem:[#allocation84_spill] sm:$0xff] }
 0x316   : > { %v2075_v31 = vadd.f32 %v2074_v14, %v2073_v38  ;;  %v1697_v62 = vsel %vm1579_vm3, %v5875_v20, 0.0  ;;  %v1904_v55 = vmul.f32 %v5875_v20, %v5875_v20  ;;  %v2088_v10 = vsel %vm1579_vm3, %v1903_v9, 0.0 }
 0x317   : > { %v1692_v61 = vadd.f32 %v1691_v26, %v1690_v49  ;;  %v5876_v49 = vld [vmem:[#allocation86_spill] sm:$0xff]  ;;  %v1906_v20 = vmul.f32 %v4354_v6, %v4354_v6 }
 0x318   : > { %v2077_v52 = vadd.f32 %v2076_v27, %v2075_v31  ;;  %v1699_v25 = vsel %vm1579_vm3, %v5876_v49, 0.0  ;;  %v1703_v27 = vsel %vm1579_vm3, %v4358_v22, 0.0  ;;  %v1905_v59 = vmul.f32 %v5876_v49, %v5876_v49 }
 0x319   : > { %v1694_v35 = vadd.f32 %v1693_v37, %v1692_v61  ;;  %v1701_v61 = vsel %vm1579_vm3, %v4354_v6, 0.0  ;;  %v2090_v46 = vsel %vm1579_vm3, %v1904_v55, 0.0  ;;  %v1907_v49 = vmul.f32 %v4358_v22, %v4358_v22 }
 0x31a   : > { %v2079_v14 = vadd.f32 %v2078_v45, %v2077_v52  ;;  %v5877_v52 = vld [vmem:[#allocation4_spill] sm:$0xff]  ;;  %v2092_v9 = vsel %vm1579_vm3, %v1905_v59, 0.0  ;;  %v2094_v55 = vsel %vm1579_vm3, %v1906_v20, 0.0 }
 0x31b   : > { %v1696_v26 = vadd.f32 %v1695_v18, %v1694_v35  ;;  %v2096_v59 = vsel %vm1579_vm3, %v1907_v49, 0.0 }
 0x31c   : > { %v2081_v18 = vadd.f32 %v2080_v60, %v2079_v14  ;;  %v5878_v14 = vld [vmem:[#allocation6_spill] sm:$0xff] }
 0x31d   : > { %v1698_v37 = vadd.f32 %v1697_v62, %v1696_v26  ;;  %v1705_v62 = vsel %vm1579_vm3, %v4362_v43, 0.0 }
 0x31e   : > { %v2083_v31 = vadd.f32 %v2082_v63, %v2081_v18  ;;  %v5879_v18 = vld [vmem:[#allocation8_spill] sm:$0xff] }
 0x31f   : > { %v1700_v38 = vadd.f32 %v1699_v25, %v1698_v37  ;;  %v1707_v25 = vsel %vm1579_vm3, %v5877_v52, 0.0 }
 0x320   : > { %v2085_v26 = vadd.f32 %v2084_v40, %v2083_v31  ;;  %v5880_v31 = vld [vmem:[#allocation10_spill] sm:$0xff] }
 0x321   : > { %v1702_v35 = vadd.f32 %v1701_v61, %v1700_v38  ;;  %v1709_v61 = vsel %vm1579_vm3, %v5878_v14, 0.0 }
 0x322   : > { %v2087_v37 = vadd.f32 %v2086_v41, %v2085_v26  ;;  %v1908_v41 = vmul.f32 %v4362_v43, %v4362_v43 }
 0x323   : > { %v1704_v45 = vadd.f32 %v1703_v27, %v1702_v35  ;;  %v1711_v27 = vsel %vm1579_vm3, %v5879_v18, 0.0 }
 0x324   : > { %v2089_v38 = vadd.f32 %v2088_v10, %v2087_v37  ;;  %v2098_v20 = vsel %vm1579_vm3, %v1908_v41, 0.0 }
 0x325   : > { %v1706_v60 = vadd.f32 %v1705_v62, %v1704_v45  ;;  %v1713_v62 = vsel %vm1579_vm3, %v5880_v31, 0.0 }
 0x326   : > { %v2091_v35 = vadd.f32 %v2090_v46, %v2089_v38  ;;  %v5882_v46 = vld [vmem:[#allocation13_spill] sm:$0xff]  ;;  %v1910_v38 = vmul.f32 %v5878_v14, %v5878_v14  ;;  %v1912_v14 = vmul.f32 %v5880_v31, %v5880_v31 }
 0x327   : > { %v1708_v63 = vadd.f32 %v1707_v25, %v1706_v60  ;;  %v5881_v25 = vld [vmem:[#allocation12_spill] sm:$0xff]  ;;  %v1909_v60 = vmul.f32 %v5877_v52, %v5877_v52  ;;  %v1911_v52 = vmul.f32 %v5879_v18, %v5879_v18  ;;  %v1914_v31 = vmul.f32 %v5882_v46, %v5882_v46 }
 0x328   : > { %v2093_v26 = vadd.f32 %v2092_v9, %v2091_v35  ;;  %v1715_v10 = vsel %vm1579_vm3, %v5881_v25, 0.0  ;;  %v2102_v41 = vsel %vm1579_vm3, %v1910_v38, 0.0  ;;  %v1913_v18 = vmul.f32 %v5881_v25, %v5881_v25 }
 0x329   : > { %v1710_v40 = vadd.f32 %v1709_v61, %v1708_v63  ;;  %v1717_v63 = vsel %vm1579_vm3, %v5882_v46, 0.0  ;;  %v2100_v49 = vsel %vm1579_vm3, %v1909_v60, 0.0  ;;  %v2104_v60 = vsel %vm1579_vm3, %v1911_v52, 0.0 }
 0x32a   : > { %v2095_v61 = vadd.f32 %v2094_v55, %v2093_v26  ;;  %v2106_v38 = vsel %vm1579_vm3, %v1912_v14, 0.0  ;;  %v2108_v52 = vsel %vm1579_vm3, %v1913_v18, 0.0  ;;  %v2110_v14 = vsel %vm1579_vm3, %v1914_v31, 0.0 }
 0x32b   : > { %v1712_v45 = vadd.f32 %v1711_v27, %v1710_v40  ;;  %v5883_v40 = vld [vmem:[#allocation14_spill] sm:$0xff] }
 0x32c   : > { %v2097_v9 = vadd.f32 %v2096_v59, %v2095_v61  ;;  %v1719_v35 = vsel %vm1579_vm3, %v5883_v40, 0.0  ;;  %v1915_v25 = vmul.f32 %v5883_v40, %v5883_v40 }
 0x32d   : > { %v1714_v37 = vadd.f32 %v1713_v62, %v1712_v45  ;;  %v5884_v45 = vld [vmem:[#allocation15_spill] sm:$0xff] }
 0x32e   : > { %v2099_v55 = vadd.f32 %v2098_v20, %v2097_v9  ;;  %v1721_v26 = vsel %vm1579_vm3, %v5884_v45, 0.0  ;;  %v1916_v46 = vmul.f32 %v5884_v45, %v5884_v45  ;;  %v2112_v18 = vsel %vm1579_vm3, %v1915_v25, 0.0 }
 0x32f   : > { %v1716_v27 = vadd.f32 %v1715_v10, %v1714_v37  ;;  %v5885_v37 = vld [vmem:[#allocation16_spill] sm:$0xff] }
 0x330   : > { %v2101_v59 = vadd.f32 %v2100_v49, %v2099_v55  ;;  %v1723_v61 = vsel %vm1579_vm3, %v5885_v37, 0.0  ;;  %v1917_v40 = vmul.f32 %v5885_v37, %v5885_v37  ;;  %v2114_v31 = vsel %vm1579_vm3, %v1916_v46, 0.0 }
 0x331   : > { %v1718_v62 = vadd.f32 %v1717_v63, %v1716_v27  ;;  %v5886_v27 = vld [vmem:[#allocation17_spill] sm:$0xff] }
 0x332   : > { %v2103_v20 = vadd.f32 %v2102_v41, %v2101_v59  ;;  %v1725_v9 = vsel %vm1579_vm3, %v5886_v27, 0.0  ;;  %v1918_v45 = vmul.f32 %v5886_v27, %v5886_v27  ;;  %v2116_v25 = vsel %vm1579_vm3, %v1917_v40, 0.0 }
 0x333   : > { %v1720_v10 = vadd.f32 %v1719_v35, %v1718_v62  ;;  %v5887_v62 = vld [vmem:[#allocation18_spill] sm:$0xff] }
 0x334   : > { %v2105_v49 = vadd.f32 %v2104_v60, %v2103_v20  ;;  %v1727_v55 = vsel %vm1579_vm3, %v5887_v62, 0.0  ;;  %v1919_v37 = vmul.f32 %v5887_v62, %v5887_v62  ;;  %v2118_v46 = vsel %vm1579_vm3, %v1918_v45, 0.0 }
 0x335   : > { %v1722_v63 = vadd.f32 %v1721_v26, %v1720_v10  ;;  %v5888_v10 = vld [vmem:[#allocation19_spill] sm:$0xff] }
 0x336   : > { %v2107_v41 = vadd.f32 %v2106_v38, %v2105_v49  ;;  %v1729_v59 = vsel %vm1579_vm3, %v5888_v10, 0.0  ;;  %v1920_v27 = vmul.f32 %v5888_v10, %v5888_v10  ;;  %v2120_v40 = vsel %vm1579_vm3, %v1919_v37, 0.0 }
 0x337   : > { %v1724_v35 = vadd.f32 %v1723_v61, %v1722_v63  ;;  %v5889_v63 = vld [vmem:[#allocation20_spill] sm:$0xff] }
 0x338   : > { %v2109_v60 = vadd.f32 %v2108_v52, %v2107_v41  ;;  %v1731_v20 = vsel %vm1579_vm3, %v5889_v63, 0.0  ;;  %v1921_v62 = vmul.f32 %v5889_v63, %v5889_v63  ;;  %v2122_v45 = vsel %vm1579_vm3, %v1920_v27, 0.0 }
 0x339   : > { %v1726_v26 = vadd.f32 %v1725_v9, %v1724_v35  ;;  %v5890_v35 = vld [vmem:[#allocation21_spill] sm:$0xff] }
 0x33a   : > { %v2111_v38 = vadd.f32 %v2110_v14, %v2109_v60  ;;  %v1733_v49 = vsel %vm1579_vm3, %v5890_v35, 0.0  ;;  %v1922_v10 = vmul.f32 %v5890_v35, %v5890_v35  ;;  %v2124_v37 = vsel %vm1579_vm3, %v1921_v62, 0.0 }
 0x33b   : > { %v1728_v61 = vadd.f32 %v1727_v55, %v1726_v26  ;;  %v5891_v26 = vld [vmem:[#allocation22_spill] sm:$0xff] }
 0x33c   : > { %v2113_v52 = vadd.f32 %v2112_v18, %v2111_v38  ;;  %v1735_v41 = vsel %vm1579_vm3, %v5891_v26, 0.0  ;;  %v1923_v63 = vmul.f32 %v5891_v26, %v5891_v26  ;;  %v2126_v27 = vsel %vm1579_vm3, %v1922_v10, 0.0 }
 0x33d   : > { %v1730_v9 = vadd.f32 %v1729_v59, %v1728_v61  ;;  %v5892_v61 = vld [vmem:[#allocation23_spill] sm:$0xff] }
 0x33e   : > { %v2115_v14 = vadd.f32 %v2114_v31, %v2113_v52  ;;  %v1737_v60 = vsel %vm1579_vm3, %v5892_v61, 0.0  ;;  %v1924_v35 = vmul.f32 %v5892_v61, %v5892_v61  ;;  %v2128_v62 = vsel %vm1579_vm3, %v1923_v63, 0.0 }
 0x33f   : > { %v1732_v55 = vadd.f32 %v1731_v20, %v1730_v9  ;;  %v5893_v9 = vld [vmem:[#allocation24_spill] sm:$0xff] }
 0x340   : > { %v2117_v18 = vadd.f32 %v2116_v25, %v2115_v14  ;;  %v1739_v38 = vsel %vm1579_vm3, %v5893_v9, 0.0  ;;  %v1925_v26 = vmul.f32 %v5893_v9, %v5893_v9  ;;  %v2130_v10 = vsel %vm1579_vm3, %v1924_v35, 0.0 }
 0x341   : > { %v1734_v59 = vadd.f32 %v1733_v49, %v1732_v55  ;;  %v5894_v55 = vld [vmem:[#allocation25_spill] sm:$0xff] }
 0x342   : > { %v2119_v31 = vadd.f32 %v2118_v46, %v2117_v18  ;;  %v1741_v52 = vsel %vm1579_vm3, %v5894_v55, 0.0  ;;  %v1926_v61 = vmul.f32 %v5894_v55, %v5894_v55  ;;  %v2132_v63 = vsel %vm1579_vm3, %v1925_v26, 0.0 }
 0x343   : > { %v1736_v20 = vadd.f32 %v1735_v41, %v1734_v59  ;;  %v5895_v59 = vld [vmem:[#allocation26_spill] sm:$0xff] }
 0x344   : > { %v2121_v25 = vadd.f32 %v2120_v40, %v2119_v31  ;;  %v1743_v14 = vsel %vm1579_vm3, %v5895_v59, 0.0  ;;  %v1927_v9 = vmul.f32 %v5895_v59, %v5895_v59  ;;  %v2134_v35 = vsel %vm1579_vm3, %v1926_v61, 0.0 }
 0x345   : > { %v1738_v49 = vadd.f32 %v1737_v60, %v1736_v20  ;;  %v5896_v20 = vld [vmem:[#allocation27_spill] sm:$0xff] }
 0x346   : > { %v2123_v46 = vadd.f32 %v2122_v45, %v2121_v25  ;;  %v1745_v18 = vsel %vm1579_vm3, %v5896_v20, 0.0  ;;  %v1928_v55 = vmul.f32 %v5896_v20, %v5896_v20  ;;  %v2136_v26 = vsel %vm1579_vm3, %v1927_v9, 0.0 }
 0x347   : > { %v1740_v41 = vadd.f32 %v1739_v38, %v1738_v49  ;;  %v5897_v49 = vld [vmem:[#allocation28_spill] sm:$0xff] }
 0x348   : > { %v2125_v40 = vadd.f32 %v2124_v37, %v2123_v46  ;;  %v1747_v31 = vsel %vm1579_vm3, %v5897_v49, 0.0  ;;  %v1929_v59 = vmul.f32 %v5897_v49, %v5897_v49  ;;  %v2138_v61 = vsel %vm1579_vm3, %v1928_v55, 0.0 }
 0x349   : > { %v1742_v60 = vadd.f32 %v1741_v52, %v1740_v41  ;;  %v5898_v41 = vld [vmem:[#allocation29_spill] sm:$0xff] }
 0x34a   : > { %v2127_v45 = vadd.f32 %v2126_v27, %v2125_v40  ;;  %v1749_v25 = vsel %vm1579_vm3, %v5898_v41, 0.0  ;;  %v1930_v20 = vmul.f32 %v5898_v41, %v5898_v41  ;;  %v2140_v9 = vsel %vm1579_vm3, %v1929_v59, 0.0 }
 0x34b   : > { %v1744_v38 = vadd.f32 %v1743_v14, %v1742_v60  ;;  %v5899_v60 = vld [vmem:[#allocation30_spill] sm:$0xff] }
 0x34c   : > { %v2129_v37 = vadd.f32 %v2128_v62, %v2127_v45  ;;  %v1751_v46 = vsel %vm1579_vm3, %v5899_v60, 0.0  ;;  %v1931_v49 = vmul.f32 %v5899_v60, %v5899_v60  ;;  %v2142_v55 = vsel %vm1579_vm3, %v1930_v20, 0.0 }
 0x34d   : > { %v1746_v52 = vadd.f32 %v1745_v18, %v1744_v38  ;;  %v5900_v38 = vld [vmem:[#allocation31_spill] sm:$0xff] }
 0x34e   : > { %v2131_v27 = vadd.f32 %v2130_v10, %v2129_v37  ;;  %v1753_v40 = vsel %vm1579_vm3, %v5900_v38, 0.0  ;;  %v1932_v41 = vmul.f32 %v5900_v38, %v5900_v38  ;;  %v2144_v59 = vsel %vm1579_vm3, %v1931_v49, 0.0 }
 0x34f   : > { %v1748_v14 = vadd.f32 %v1747_v31, %v1746_v52  ;;  %v5901_v52 = vld [vmem:[#allocation32_spill] sm:$0xff] }
 0x350   : > { %v2133_v62 = vadd.f32 %v2132_v63, %v2131_v27  ;;  %v1755_v45 = vsel %vm1579_vm3, %v5901_v52, 0.0  ;;  %v1933_v60 = vmul.f32 %v5901_v52, %v5901_v52  ;;  %v2146_v20 = vsel %vm1579_vm3, %v1932_v41, 0.0 }
 0x351   : > { %v1750_v18 = vadd.f32 %v1749_v25, %v1748_v14  ;;  %v5902_v14 = vld [vmem:[#allocation33_spill] sm:$0xff] }
 0x352   : > { %v2135_v10 = vadd.f32 %v2134_v35, %v2133_v62  ;;  %v1757_v37 = vsel %vm1579_vm3, %v5902_v14, 0.0  ;;  %v1934_v38 = vmul.f32 %v5902_v14, %v5902_v14  ;;  %v2148_v49 = vsel %vm1579_vm3, %v1933_v60, 0.0 }
 0x353   : > { %v1752_v31 = vadd.f32 %v1751_v46, %v1750_v18  ;;  %v5903_v18 = vld [vmem:[#allocation34_spill] sm:$0xff] }
 0x354   : > { %v2137_v63 = vadd.f32 %v2136_v26, %v2135_v10  ;;  %v1759_v27 = vsel %vm1579_vm3, %v5903_v18, 0.0  ;;  %v1935_v52 = vmul.f32 %v5903_v18, %v5903_v18  ;;  %v2150_v41 = vsel %vm1579_vm3, %v1934_v38, 0.0 }
 0x355   : > { %v1754_v25 = vadd.f32 %v1753_v40, %v1752_v31  ;;  %v5904_v31 = vld [vmem:[#allocation35_spill] sm:$0xff] }
 0x356   : > { %v2139_v35 = vadd.f32 %v2138_v61, %v2137_v63  ;;  %v1761_v62 = vsel %vm1579_vm3, %v5904_v31, 0.0  ;;  %v1936_v14 = vmul.f32 %v5904_v31, %v5904_v31  ;;  %v2152_v60 = vsel %vm1579_vm3, %v1935_v52, 0.0 }
 0x357   : > { %v1756_v46 = vadd.f32 %v1755_v45, %v1754_v25  ;;  %v5905_v25 = vld [vmem:[#allocation36_spill] sm:$0xff] }
 0x358   : > { %v2141_v26 = vadd.f32 %v2140_v9, %v2139_v35  ;;  %v1763_v10 = vsel %vm1579_vm3, %v5905_v25, 0.0  ;;  %v1937_v18 = vmul.f32 %v5905_v25, %v5905_v25  ;;  %v2154_v38 = vsel %vm1579_vm3, %v1936_v14, 0.0 }
 0x359   : > { %v1758_v40 = vadd.f32 %v1757_v37, %v1756_v46  ;;  %v5906_v46 = vld [vmem:[#allocation37_spill] sm:$0xff] }
 0x35a   : > { %v2143_v61 = vadd.f32 %v2142_v55, %v2141_v26  ;;  %v1765_v63 = vsel %vm1579_vm3, %v5906_v46, 0.0  ;;  %v1938_v31 = vmul.f32 %v5906_v46, %v5906_v46  ;;  %v2156_v52 = vsel %vm1579_vm3, %v1937_v18, 0.0 }
 0x35b   : > { %v1760_v45 = vadd.f32 %v1759_v27, %v1758_v40  ;;  %v5907_v40 = vld [vmem:[#allocation38_spill] sm:$0xff] }
 0x35c   : > { %v2145_v9 = vadd.f32 %v2144_v59, %v2143_v61  ;;  %v1767_v35 = vsel %vm1579_vm3, %v5907_v40, 0.0  ;;  %v1939_v25 = vmul.f32 %v5907_v40, %v5907_v40  ;;  %v2158_v14 = vsel %vm1579_vm3, %v1938_v31, 0.0 }
 0x35d   : > { %v1762_v37 = vadd.f32 %v1761_v62, %v1760_v45  ;;  %v5908_v45 = vld [vmem:[#allocation39_spill] sm:$0xff] }
 0x35e   : > { %v2147_v55 = vadd.f32 %v2146_v20, %v2145_v9  ;;  %v1769_v26 = vsel %vm1579_vm3, %v5908_v45, 0.0  ;;  %v1940_v46 = vmul.f32 %v5908_v45, %v5908_v45  ;;  %v2160_v18 = vsel %vm1579_vm3, %v1939_v25, 0.0 }
 0x35f   : > { %v1764_v27 = vadd.f32 %v1763_v10, %v1762_v37  ;;  %v5909_v37 = vld [vmem:[#allocation40_spill] sm:$0xff] }
 0x360   : > { %v2149_v59 = vadd.f32 %v2148_v49, %v2147_v55  ;;  %v1771_v61 = vsel %vm1579_vm3, %v5909_v37, 0.0  ;;  %v1941_v40 = vmul.f32 %v5909_v37, %v5909_v37  ;;  %v2162_v31 = vsel %vm1579_vm3, %v1940_v46, 0.0 }
 0x361   : > { %v1766_v62 = vadd.f32 %v1765_v63, %v1764_v27  ;;  %v5910_v27 = vld [vmem:[#allocation41_spill] sm:$0xff] }
 0x362   : > { %v2151_v20 = vadd.f32 %v2150_v41, %v2149_v59  ;;  %v1773_v9 = vsel %vm1579_vm3, %v5910_v27, 0.0  ;;  %v1942_v45 = vmul.f32 %v5910_v27, %v5910_v27  ;;  %v2164_v25 = vsel %vm1579_vm3, %v1941_v40, 0.0 }
 0x363   : > { %v1768_v10 = vadd.f32 %v1767_v35, %v1766_v62  ;;  %v5911_v62 = vld [vmem:[#allocation42_spill] sm:$0xff] }
 0x364   : > { %v2153_v49 = vadd.f32 %v2152_v60, %v2151_v20  ;;  %v1775_v55 = vsel %vm1579_vm3, %v5911_v62, 0.0  ;;  %v1943_v37 = vmul.f32 %v5911_v62, %v5911_v62  ;;  %v2166_v46 = vsel %vm1579_vm3, %v1942_v45, 0.0 }
 0x365   : > { %v1770_v63 = vadd.f32 %v1769_v26, %v1768_v10  ;;  %v5912_v10 = vld [vmem:[#allocation43_spill] sm:$0xff] }
 0x366   : > { %v2155_v41 = vadd.f32 %v2154_v38, %v2153_v49  ;;  %v1777_v59 = vsel %vm1579_vm3, %v5912_v10, 0.0  ;;  %v1944_v27 = vmul.f32 %v5912_v10, %v5912_v10  ;;  %v2168_v40 = vsel %vm1579_vm3, %v1943_v37, 0.0 }
 0x367   : > { %v1772_v35 = vadd.f32 %v1771_v61, %v1770_v63  ;;  %v5913_v63 = vld [vmem:[#allocation44_spill] sm:$0xff] }
 0x368   : > { %v2157_v60 = vadd.f32 %v2156_v52, %v2155_v41  ;;  %v1779_v20 = vsel %vm1579_vm3, %v5913_v63, 0.0  ;;  %v1945_v62 = vmul.f32 %v5913_v63, %v5913_v63  ;;  %v2170_v45 = vsel %vm1579_vm3, %v1944_v27, 0.0 }
 0x369   : > { %v1774_v26 = vadd.f32 %v1773_v9, %v1772_v35  ;;  %v5914_v35 = vld [vmem:[#allocation45_spill] sm:$0xff] }
 0x36a   : > { %v2159_v38 = vadd.f32 %v2158_v14, %v2157_v60  ;;  %v1781_v49 = vsel %vm1579_vm3, %v5914_v35, 0.0  ;;  %v1946_v10 = vmul.f32 %v5914_v35, %v5914_v35  ;;  %v2172_v37 = vsel %vm1579_vm3, %v1945_v62, 0.0 }
 0x36b   : > { %v1776_v61 = vadd.f32 %v1775_v55, %v1774_v26  ;;  %v5915_v26 = vld [vmem:[#allocation46_spill] sm:$0xff] }
 0x36c   : > { %v2161_v52 = vadd.f32 %v2160_v18, %v2159_v38  ;;  %v1783_v41 = vsel %vm1579_vm3, %v5915_v26, 0.0  ;;  %v1947_v63 = vmul.f32 %v5915_v26, %v5915_v26  ;;  %v2174_v27 = vsel %vm1579_vm3, %v1946_v10, 0.0 }
 0x36d   : > { %v1778_v9 = vadd.f32 %v1777_v59, %v1776_v61  ;;  %v5916_v61 = vld [vmem:[#allocation47_spill] sm:$0xff] }
 0x36e   : > { %v2163_v14 = vadd.f32 %v2162_v31, %v2161_v52  ;;  %v1785_v60 = vsel %vm1579_vm3, %v5916_v61, 0.0  ;;  %v1948_v35 = vmul.f32 %v5916_v61, %v5916_v61  ;;  %v2176_v62 = vsel %vm1579_vm3, %v1947_v63, 0.0 }
 0x36f   : > { %v1780_v55 = vadd.f32 %v1779_v20, %v1778_v9  ;;  %v5917_v9 = vld [vmem:[#allocation48_spill] sm:$0xff] }
 0x370   : > { %v2165_v18 = vadd.f32 %v2164_v25, %v2163_v14  ;;  %v1787_v38 = vsel %vm1579_vm3, %v5917_v9, 0.0  ;;  %v1949_v26 = vmul.f32 %v5917_v9, %v5917_v9  ;;  %v2178_v10 = vsel %vm1579_vm3, %v1948_v35, 0.0 }
 0x371   : > { %v1782_v59 = vadd.f32 %v1781_v49, %v1780_v55  ;;  %v5918_v55 = vld [vmem:[#allocation49_spill] sm:$0xff] }
 0x372   : > { %v2167_v31 = vadd.f32 %v2166_v46, %v2165_v18  ;;  %v1789_v52 = vsel %vm1579_vm3, %v5918_v55, 0.0  ;;  %v1950_v61 = vmul.f32 %v5918_v55, %v5918_v55  ;;  %v2180_v63 = vsel %vm1579_vm3, %v1949_v26, 0.0 }
 0x373   : > { %v1784_v20 = vadd.f32 %v1783_v41, %v1782_v59  ;;  %v5919_v59 = vld [vmem:[#allocation51_spill] sm:$0xff] }
 0x374   : > { %v2169_v25 = vadd.f32 %v2168_v40, %v2167_v31  ;;  %v1791_v14 = vsel %vm1579_vm3, %v5919_v59, 0.0  ;;  %v1951_v9 = vmul.f32 %v5919_v59, %v5919_v59  ;;  %v2182_v35 = vsel %vm1579_vm3, %v1950_v61, 0.0 }
 0x375   : > { %v1786_v49 = vadd.f32 %v1785_v60, %v1784_v20  ;;  %v5920_v20 = vld [vmem:[#allocation53_spill] sm:$0xff] }
 0x376   : > { %v2171_v46 = vadd.f32 %v2170_v45, %v2169_v25  ;;  %v1793_v18 = vsel %vm1579_vm3, %v5920_v20, 0.0  ;;  %v1952_v55 = vmul.f32 %v5920_v20, %v5920_v20  ;;  %v2184_v26 = vsel %vm1579_vm3, %v1951_v9, 0.0 }
 0x377   : > { %v1788_v41 = vadd.f32 %v1787_v38, %v1786_v49  ;;  %v5921_v49 = vld [vmem:[#allocation55_spill] sm:$0xff] }
 0x378   : > { %v2173_v40 = vadd.f32 %v2172_v37, %v2171_v46  ;;  %v1795_v31 = vsel %vm1579_vm3, %v5921_v49, 0.0  ;;  %v1953_v59 = vmul.f32 %v5921_v49, %v5921_v49  ;;  %v2186_v61 = vsel %vm1579_vm3, %v1952_v55, 0.0 }
 0x379   : > { %v1790_v60 = vadd.f32 %v1789_v52, %v1788_v41  ;;  %v5922_v41 = vld [vmem:[#allocation57_spill] sm:$0xff] }
 0x37a   : > { %v2175_v45 = vadd.f32 %v2174_v27, %v2173_v40  ;;  %v1797_v25 = vsel %vm1579_vm3, %v5922_v41, 0.0  ;;  %v1954_v20 = vmul.f32 %v5922_v41, %v5922_v41  ;;  %v2188_v9 = vsel %vm1579_vm3, %v1953_v59, 0.0 }
 0x37b   : > { %v1792_v38 = vadd.f32 %v1791_v14, %v1790_v60  ;;  %v5923_v60 = vld [vmem:[#allocation59_spill] sm:$0xff] }
 0x37c   : > { %v2177_v37 = vadd.f32 %v2176_v62, %v2175_v45  ;;  %v1799_v46 = vsel %vm1579_vm3, %v5923_v60, 0.0  ;;  %v1955_v49 = vmul.f32 %v5923_v60, %v5923_v60  ;;  %v2190_v55 = vsel %vm1579_vm3, %v1954_v20, 0.0 }
 0x37d   : > { %v1794_v52 = vadd.f32 %v1793_v18, %v1792_v38  ;;  %v5924_v38 = vld [vmem:[#allocation61_spill] sm:$0xff] }
 0x37e   : > { %v2179_v27 = vadd.f32 %v2178_v10, %v2177_v37  ;;  %v1801_v40 = vsel %vm1579_vm3, %v5924_v38, 0.0  ;;  %v1956_v41 = vmul.f32 %v5924_v38, %v5924_v38  ;;  %v2192_v59 = vsel %vm1579_vm3, %v1955_v49, 0.0 }
 0x37f   : > { %v1796_v14 = vadd.f32 %v1795_v31, %v1794_v52  ;;  %v5925_v52 = vld [vmem:[#allocation63_spill] sm:$0xff] }
 0x380   : > { %v2181_v62 = vadd.f32 %v2180_v63, %v2179_v27  ;;  %v1803_v45 = vsel %vm1579_vm3, %v5925_v52, 0.0  ;;  %v1957_v60 = vmul.f32 %v5925_v52, %v5925_v52  ;;  %v2194_v20 = vsel %vm1579_vm3, %v1956_v41, 0.0 }
 0x381   : > { %v1798_v18 = vadd.f32 %v1797_v25, %v1796_v14  ;;  %v5926_v14 = vld [vmem:[#allocation65_spill] sm:$0xff] }
 0x382   : > { %v2183_v10 = vadd.f32 %v2182_v35, %v2181_v62  ;;  %v1805_v37 = vsel %vm1579_vm3, %v5926_v14, 0.0  ;;  %v1958_v38 = vmul.f32 %v5926_v14, %v5926_v14  ;;  %v2196_v49 = vsel %vm1579_vm3, %v1957_v60, 0.0 }
 0x383   : > { %v1800_v31 = vadd.f32 %v1799_v46, %v1798_v18  ;;  %v5927_v18 = vld [vmem:[#allocation67_spill] sm:$0xff] }
 0x384   : > { %v2185_v63 = vadd.f32 %v2184_v26, %v2183_v10  ;;  %v1807_v27 = vsel %vm1579_vm3, %v5927_v18, 0.0  ;;  %v1959_v52 = vmul.f32 %v5927_v18, %v5927_v18  ;;  %v2198_v41 = vsel %vm1579_vm3, %v1958_v38, 0.0 }
 0x385   : > { %v1802_v25 = vadd.f32 %v1801_v40, %v1800_v31  ;;  %v5928_v31 = vld [vmem:[#allocation69_spill] sm:$0xff] }
 0x386   : > { %v2187_v35 = vadd.f32 %v2186_v61, %v2185_v63  ;;  %v1809_v62 = vsel %vm1579_vm3, %v5928_v31, 0.0  ;;  %v1960_v14 = vmul.f32 %v5928_v31, %v5928_v31  ;;  %v2200_v60 = vsel %vm1579_vm3, %v1959_v52, 0.0 }
 0x387   : > { %v1804_v46 = vadd.f32 %v1803_v45, %v1802_v25  ;;  %v5929_v25 = vld [vmem:[#allocation71_spill] sm:$0xff] }
 0x388   : > { %v2189_v26 = vadd.f32 %v2188_v9, %v2187_v35  ;;  %v1811_v10 = vsel %vm1579_vm3, %v5929_v25, 0.0  ;;  %v1961_v18 = vmul.f32 %v5929_v25, %v5929_v25  ;;  %v2202_v38 = vsel %vm1579_vm3, %v1960_v14, 0.0 }
 0x389   : > { %v1806_v40 = vadd.f32 %v1805_v37, %v1804_v46  ;;  %v5930_v46 = vld [vmem:[#allocation73_spill] sm:$0xff] }
 0x38a   : > { %v2191_v61 = vadd.f32 %v2190_v55, %v2189_v26  ;;  %v1813_v63 = vsel %vm1579_vm3, %v5930_v46, 0.0  ;;  %v1962_v31 = vmul.f32 %v5930_v46, %v5930_v46  ;;  %v2204_v52 = vsel %vm1579_vm3, %v1961_v18, 0.0 }
 0x38b   : > { %v1808_v45 = vadd.f32 %v1807_v27, %v1806_v40  ;;  %v5931_v40 = vld [vmem:[#allocation75_spill] sm:$0xff] }
 0x38c   : > { %v2193_v9 = vadd.f32 %v2192_v59, %v2191_v61  ;;  %v1815_v35 = vsel %vm1579_vm3, %v5931_v40, 0.0  ;;  %v1963_v25 = vmul.f32 %v5931_v40, %v5931_v40  ;;  %v2206_v14 = vsel %vm1579_vm3, %v1962_v31, 0.0 }
 0x38d   : > { %v1810_v37 = vadd.f32 %v1809_v62, %v1808_v45  ;;  %v5932_v45 = vld [vmem:[#allocation77_spill] sm:$0xff] }
 0x38e   : > { %v2195_v55 = vadd.f32 %v2194_v20, %v2193_v9  ;;  %v1817_v26 = vsel %vm1579_vm3, %v5932_v45, 0.0  ;;  %v1964_v46 = vmul.f32 %v5932_v45, %v5932_v45  ;;  %v2208_v18 = vsel %vm1579_vm3, %v1963_v25, 0.0 }
 0x38f   : > { %v1812_v27 = vadd.f32 %v1811_v10, %v1810_v37  ;;  %v5933_v37 = vld [vmem:[#allocation79_spill] sm:$0xff] }
 0x390   : > { %v2197_v59 = vadd.f32 %v2196_v49, %v2195_v55  ;;  %v1819_v61 = vsel %vm1579_vm3, %v5933_v37, 0.0  ;;  %v1965_v40 = vmul.f32 %v5933_v37, %v5933_v37  ;;  %v2210_v31 = vsel %vm1579_vm3, %v1964_v46, 0.0 }
 0x391   : > { %v1814_v62 = vadd.f32 %v1813_v63, %v1812_v27  ;;  %v5934_v27 = vld [vmem:[#allocation81_spill] sm:$0xff] }
 0x392   : > { %v2199_v20 = vadd.f32 %v2198_v41, %v2197_v59  ;;  %v1821_v9 = vsel %vm1579_vm3, %v5934_v27, 0.0  ;;  %v1966_v45 = vmul.f32 %v5934_v27, %v5934_v27  ;;  %v2212_v25 = vsel %vm1579_vm3, %v1965_v40, 0.0 }
 0x393   : > { %v1816_v10 = vadd.f32 %v1815_v35, %v1814_v62  ;;  %v5935_v62 = vld [vmem:[#allocation83_spill] sm:$0xff] }
 0x394   : > { %v2201_v49 = vadd.f32 %v2200_v60, %v2199_v20  ;;  %v1823_v55 = vsel %vm1579_vm3, %v5935_v62, 0.0  ;;  %v1967_v37 = vmul.f32 %v5935_v62, %v5935_v62  ;;  %v2214_v46 = vsel %vm1579_vm3, %v1966_v45, 0.0 }
 0x395   : > { %v1818_v63 = vadd.f32 %v1817_v26, %v1816_v10  ;;  %v5936_v10 = vld [vmem:[#allocation85_spill] sm:$0xff] }
 0x396   : > { %v2203_v41 = vadd.f32 %v2202_v38, %v2201_v49  ;;  %v1825_v59 = vsel %vm1579_vm3, %v5936_v10, 0.0  ;;  %v1968_v27 = vmul.f32 %v5936_v10, %v5936_v10 }
 0x397   : > { %v1820_v35 = vadd.f32 %v1819_v61, %v1818_v63  ;;  %v5937_v63 = vld [vmem:[#allocation87_spill] sm:$0xff] }
 0x398   : > { %v2205_v60 = vadd.f32 %v2204_v52, %v2203_v41  ;;  %v1827_v20 = vsel %vm1579_vm3, %v5937_v63, 0.0 }
 0x399   : > { %v1822_v26 = vadd.f32 %v1821_v9, %v1820_v35  ;;  %v5938_v35 = vld [vmem:[#allocation88_spill] sm:$0xff] }
 0x39a   : > { %v2207_v38 = vadd.f32 %v2206_v14, %v2205_v60  ;;  %v1829_v49 = vsel %vm1579_vm3, %v5938_v35, 0.0  ;;  %v1970_v40 = vmul.f32 %v5938_v35, %v5938_v35 }
 0x39b   : > { %v1824_v61 = vadd.f32 %v1823_v55, %v1822_v26  ;;  %v5939_v26 = vld [vmem:[#allocation89_spill] sm:$0xff] }
 0x39c   : > { %v2209_v52 = vadd.f32 %v2208_v18, %v2207_v38  ;;  %v1831_v41 = vsel %vm1579_vm3, %v5939_v26, 0.0  ;;  %v2216_v38 = vsel %vm1579_vm3, %v1967_v37, 0.0  ;;  %v1971_v10 = vmul.f32 %v5939_v26, %v5939_v26  ;;  %v1578_v26 = vld [vmem:[#allocation2] sm:$0x1] }
 0x39d   : > { %v1826_v9 = vadd.f32 %v1825_v59, %v1824_v61  ;;  %v5940_v61 = vld [vmem:[#allocation91_spill] sm:$0xff]  ;;  %v2222_v37 = vsel %vm1579_vm3, %v1970_v40, 0.0 }
 0x39e   : > { %v2211_v14 = vadd.f32 %v2210_v31, %v2209_v52  ;;  %v1833_v60 = vsel %vm1579_vm3, %v5940_v61, 0.0  ;;  %v2224_v35 = vsel %vm1579_vm3, %v1971_v10, 0.0 }
 0x39f   : > { %v1828_v55 = vadd.f32 %v1827_v20, %v1826_v9  ;;  %v1969_v9 = vmul.f32 %v5937_v63, %v5937_v63  ;;  %v1972_v63 = vmul.f32 %v5940_v61, %v5940_v61 }
 0x3a0   : > { %v2213_v18 = vadd.f32 %v2212_v25, %v2211_v14 }
 0x3a1   : > { %v1830_v59 = vadd.f32 %v1829_v49, %v1828_v55  ;;  %v2218_v49 = vsel %vm1579_vm3, %v1968_v27, 0.0  ;;  %v2220_v45 = vsel %vm1579_vm3, %v1969_v9, 0.0 }
 0x3a2   : > { %v2215_v43 = vadd.f32 %v2214_v46, %v2213_v18 }
 0x3a3   : > { %v1832_v20 = vadd.f32 %v1831_v41, %v1830_v59 }
 0x3a4   : > { %v2217_v55 = vadd.f32 %v2216_v38, %v2215_v43  ;;  %v2226_v43 = vsel %vm1579_vm3, %v1972_v63, 0.0 }
 0x3a5   : > { %v1834_v62 = vadd.f32 %v1833_v60, %v1832_v20 }
 0x3a6   : > { %v2219_v41 = vadd.f32 %v2218_v49, %v2217_v55 }
 0x3a7   : > { %v1835_v31 = vrot.slane %v1834_v62, 4 }
 0x3a8   : > { %v2221_v59 = vadd.f32 %v2220_v45, %v2219_v41 }
 0x3a9   : > { %v1836_v52 = vadd.f32 %v1835_v31, %v1834_v62  ;;  %v1844_v31 = vld [vmem:[#allocation2 + $0x1] sm:$0x1] }
 0x3aa   : > { %v2223_v60 = vadd.f32 %v2222_v37, %v2221_v59 }
 0x3ab   : > { %v1837_v25 = vrot.slane %v1836_v52, 2 }
 0x3ac   : > { %v2225_v46 = vadd.f32 %v2224_v35, %v2223_v60 }
 0x3ad   : > { %v1838_v14 = vadd.f32 %v1837_v25, %v1836_v52 }
 0x3ae   : > { %v2227_v18 = vadd.f32 %v2226_v43, %v2225_v46 }
 0x3af   : > { %v1839_v27 = vrot.slane %v1838_v14, 1 }
 0x3b0   : > { %v2228_v38 = vrot.slane %v2227_v18, 4 }
 0x3b1   : > { %v1840_v20 = vadd.f32 %v1839_v27, %v1838_v14 }
 0x3b2   : > { %v2229_v61 = vadd.f32 %v2228_v38, %v2227_v18 }
 0x3b3   : > { %v1841_v9 = vadd.f32 %v1840_v20, %v1578_v26 }
 0x3b4   : > { %v2230_v62 = vrot.slane %v2229_v61, 2 }
 0x3b5   : > { %1843 = vst.msk [vmem:[#allocation2] sm:$0x1] %vm1842_vm4, %v1841_v9 }
 0x3b6   : > { %v2231_v40 = vadd.f32 %v2230_v62, %v2229_v61 }
 0x3b8   : > { %v2232_v49 = vrot.slane %v2231_v40, 1 }
 0x3ba   : > { %v2233_v55 = vadd.f32 %v2232_v49, %v2231_v40 }
 0x3bc   : > { %v2234_v10 = vadd.f32 %v2233_v55, %v1844_v31 }
 0x3be   : > { %2235 = vst.msk [vmem:[#allocation2 + $0x1] sm:$0x1] %vm1842_vm4, %v2234_v10 }
 0x3bf PF: > { %p2236_p11 = scmp.eq.s32.totalorder %s3800_s15, 1 }
 0x3c1   : > { %p2237_p12 = pnand %p2236_p11, %p216_p6 }
 0x3c3   : > { %2240 = sbr.rel (%p2237_p12) target bundleno = 1004 (0x3ec), region = 48 }
 0x3c8   : > { %v2241_v45 = vld [vmem:[#allocation2] sm:$0x1]  ;;  %v2243_v52 = vld [vmem:[#allocation2 + $0x1] sm:$0x1]  ;;  %vm2261_vm8 = vcmask 57344  }
 0x3c9   : > { %v2242_v41 = vmul.f32 0.00048828125, %v2241_v45  ;;  %v2244_v63 = vmul.f32 0.00048828125, %v2243_v52  ;;  %v2248_v26 = vld [vmem:[%s5682_s2] sm:$0x1] }
 0x3ca   : > { %v2263_v38 = vld [vmem:[%s5683_s3] sm:$0x1] }
 0x3cb   : > { %v2245_v37 = vmul.f32 %v2242_v41, %v2242_v41 }
 0x3cd   : > { %v2246_v25 = vsub.f32 %v2244_v63, %v2245_v37 }
 0x3cf   : > { %v2247_v59 = vmax.f32 %v2246_v25, 0.0 }
 0x3d1   : > { %v2249_v35 = vadd.f32 1e-05, %v2247_v59 }
 0x3d3   : > { %3772 = vrsqrt.f32 %v2249_v35  ;;  %vm2256_vm5 = vweird.f32 %v2249_v35 }
 0x3d9   : > { %v3773_v14 = vpop.eup %3772 }
 0x3da   : > { %v2251_v60 = vmul.f32 %v3773_v14, %v2249_v35  ;;  %vm2257_vm6 = vweird.f32 %v3773_v14 }
 0x3db   : > { %vm2258_vm7 = vmor %vm2256_vm5, %vm2257_vm6 }
 0x3dc   : > { %v2252_v43 = vmul.f32 %v3773_v14, %v2251_v60 }
 0x3de   : > { %v2253_v27 = vmul.f32 0.5, %v2252_v43 }
 0x3e0   : > { %v2254_v46 = vsub.f32 1.5, %v2253_v27 }
 0x3e2   : > { %v2255_v20 = vmul.f32 %v3773_v14, %v2254_v46 }
 0x3e4   : > { %v2259_v18 = vsel %vm2258_vm7, %v3773_v14, %v2255_v20 }
 0x3e5   : > { %v2260_v9 = vmul.f32 %v2259_v18, %v2248_v26 }
 0x3e7   : > { %2262 = vst.msk [vmem:[#allocation2 + $0x2] sm:$0x1] %vm2261_vm8, %v2260_v9  ;;  %v2264_v61 = vmul.f32 %v2260_v9, %v2242_v41 }
 0x3e9   : > { %v2265_v62 = vsub.f32 %v2263_v38, %v2264_v61 }
 0x3eb   : > { %2266 = vst.msk [vmem:[#allocation2 + $0x3] sm:$0x1] %vm2261_vm8, %v2265_v62 }
 0x3ec PF: > { %p3654_p13 = scmp.ne.s32.totalorder %s3804_s16, 1 }
 0x3ee   : > { %2270 = sbr.rel (%p3654_p13) target bundleno = 1211 (0x4bb), region = 52 }
 0x3f3   : > { %v5017_v40 = vld [vmem:[#allocation2 + $0x2] ss:$0 sm:$0xff]  ;;  %v5019_v49 = vld [vmem:[#allocation2 + $0x3] ss:$0 sm:$0xff]  ;;  %vm3043_vm9 = vcmask 60416   ;;  %v5941_v31 = vld [vmem:[#allocation3_spill] sm:$0xff] }
 0x3f4   : > { %v2273_v55 = vmul.f32 %v5017_v40, %v5941_v31  ;;  %v5942_v10 = vld [vmem:[#allocation5_spill] sm:$0xff]  ;;  %v5943_v52 = vld [vmem:[#allocation7_spill] sm:$0xff]  ;;  %v2278_v35 = vmul.f32 %v5017_v40, %v4004_v5  ;;  %v2279_v14 = vmul.f32 %v5017_v40, %v4010_v13  ;;  %v2280_v60 = vmul.f32 %v5017_v40, %v4018_v21 }
 0x3f5   : > { %v2274_v45 = vmul.f32 %v5017_v40, %v5942_v10  ;;  %v2275_v41 = vmul.f32 %v5017_v40, %v5943_v52  ;;  %v5944_v63 = vld [vmem:[#allocation9_spill] sm:$0xff]  ;;  %v5945_v25 = vld [vmem:[#allocation11_spill] sm:$0xff] }
 0x3f6   : > { %v2276_v37 = vmul.f32 %v5017_v40, %v5944_v63  ;;  %v2277_v59 = vmul.f32 %v5017_v40, %v5945_v25  ;;  %v2403_v43 = vadd.f32 %v5019_v49, %v2273_v55  ;;  %v2408_v18 = vadd.f32 %v5019_v49, %v2278_v35 }
 0x3f7   : > { %v2404_v27 = vadd.f32 %v5019_v49, %v2274_v45  ;;  %v2405_v46 = vadd.f32 %v5019_v49, %v2275_v41  ;;  %v2409_v5 = vadd.f32 %v5019_v49, %v2279_v14  ;;  %v2410_v9 = vadd.f32 %v5019_v49, %v2280_v60 }
 0x3f8   : > { %v2406_v26 = vadd.f32 %v5019_v49, %v2276_v37  ;;  %v2407_v20 = vadd.f32 %v5019_v49, %v2277_v59  ;;  %vm2531_vm10 = vcmp.gt.f32.partialorder %v2403_v43, 0.0  ;;  %v2659_v13 = vmul.f32 0.2, %v2403_v43 }
 0x3f9   : > { %vm2532_vm11 = vcmp.gt.f32.partialorder %v2404_v27, 0.0  ;;  %v2660_v21 = vmul.f32 0.2, %v2404_v27  ;;  %vm2533_vm12 = vcmp.gt.f32.partialorder %v2405_v46, 0.0  ;;  %v2661_v38 = vmul.f32 0.2, %v2405_v46 }
 0x3fa   : > { %vm2534_vm13 = vcmp.gt.f32.partialorder %v2406_v26, 0.0  ;;  %v2662_v61 = vmul.f32 0.2, %v2406_v26  ;;  %v2787_v62 = vsel %vm2531_vm10, %v2403_v43, %v2659_v13  ;;  %vm2535_vm14 = vcmp.gt.f32.partialorder %v2407_v20, 0.0 }
 0x3fb   : > { %v2788_v31 = vsel %vm2532_vm11, %v2404_v27, %v2660_v21  ;;  %v2663_v55 = vmul.f32 0.2, %v2407_v20  ;;  %v2915_v10 = vpack.c.bf16 %v2787_v62, %v2787_v62  ;;  %v2789_v52 = vsel %vm2533_vm12, %v2405_v46, %v2661_v38 }
 0x3fc   : > { %v2916_v45 = vpack.c.bf16 %v2788_v31, %v2788_v31  ;;  %v2790_v41 = vsel %vm2534_vm13, %v2406_v26, %v2662_v61  ;;  %v2917_v63 = vpack.c.bf16 %v2789_v52, %v2789_v52  ;;  %vm2536_vm15 = vcmp.gt.f32.partialorder %v2408_v18, 0.0 }
 0x3fd   : > { %v2918_v37 = vpack.c.bf16 %v2790_v41, %v2790_v41  ;;  %v2791_v25 = vsel %vm2535_vm14, %v2407_v20, %v2663_v55  ;;  %3044 = vst.msk [vmem:[%s3894_s5] sm:$0xf] %vm3043_vm9, %v2915_v10  ;;  %v2664_v35 = vmul.f32 0.2, %v2408_v18  ;;  %vm2537_vm0 = vcmp.gt.f32.partialorder %v2409_v5, 0.0 }
 0x3fe   : > { %v2919_v59 = vpack.c.bf16 %v2791_v25, %v2791_v25  ;;  %vm2538_vm1 = vcmp.gt.f32.partialorder %v2410_v9, 0.0  ;;  %3045 = vst.msk [vmem:[%s3894_s5 + $0x4] sm:$0xf] %vm3043_vm9, %v2916_v45  ;;  %v2665_v14 = vmul.f32 0.2, %v2409_v5  ;;  %v2281_v43 = vmul.f32 %v5017_v40, %v4024_v29 }
 0x3ff   : > { %v2666_v60 = vmul.f32 0.2, %v2410_v9  ;;  %v2282_v27 = vmul.f32 %v5017_v40, %v4032_v36  ;;  %3046 = vst.msk [vmem:[%s3894_s5 + $0x8] sm:$0xf] %vm3043_vm9, %v2917_v63  ;;  %v2792_v46 = vsel %vm2536_vm15, %v2408_v18, %v2664_v35  ;;  %v2283_v26 = vmul.f32 %v5017_v40, %v4038_v47 }
 0x400   : > { %v2284_v20 = vmul.f32 %v5017_v40, %v4046_v56  ;;  %v2285_v13 = vmul.f32 %v5017_v40, %v4052_v3  ;;  %3047 = vst.msk [vmem:[%s3894_s5 + $0xc] sm:$0xf] %vm3043_vm9, %v2918_v37  ;;  %v2920_v29 = vpack.c.bf16 %v2792_v46, %v2792_v46  ;;  %v2793_v21 = vsel %vm2537_vm0, %v2409_v5, %v2665_v14 }
 0x401   : > { %v2794_v38 = vsel %vm2538_vm1, %v2410_v9, %v2666_v60  ;;  %v2411_v36 = vadd.f32 %v5019_v49, %v2281_v43  ;;  %3048 = vst.msk [vmem:[%s3894_s5 + $0x10] sm:$0xf] %vm3043_vm9, %v2919_v59  ;;  %v2921_v18 = vpack.c.bf16 %v2793_v21, %v2793_v21  ;;  %v2412_v47 = vadd.f32 %v5019_v49, %v2282_v27 }
 0x402   : > { %v2922_v61 = vpack.c.bf16 %v2794_v38, %v2794_v38  ;;  %v2413_v56 = vadd.f32 %v5019_v49, %v2283_v26  ;;  %3049 = vst.msk [vmem:[%s3894_s5 + $0x14] sm:$0xf] %vm3043_vm9, %v2920_v29  ;;  %v2414_v62 = vadd.f32 %v5019_v49, %v2284_v20  ;;  %v2415_v5 = vadd.f32 %v5019_v49, %v2285_v13 }
 0x403   : > { %vm2539_vm2 = vcmp.gt.f32.partialorder %v2411_v36, 0.0  ;;  %v2667_v3 = vmul.f32 0.2, %v2411_v36  ;;  %3050 = vst.msk [vmem:[%s3894_s5 + $0x18] sm:$0xf] %vm3043_vm9, %v2921_v18  ;;  %vm2540_vm3 = vcmp.gt.f32.partialorder %v2412_v47, 0.0  ;;  %v2286_v31 = vmul.f32 %v5017_v40, %v4060_v11 }
 0x404   : > { %v2668_v9 = vmul.f32 0.2, %v2412_v47  ;;  %vm2541_vm4 = vcmp.gt.f32.partialorder %v2413_v56, 0.0  ;;  %3051 = vst.msk [vmem:[%s3894_s5 + $0x1c] sm:$0xf] %vm3043_vm9, %v2922_v61  ;;  %vm2542_vm5 = vcmp.gt.f32.partialorder %v2414_v62, 0.0  ;;  %v2287_v35 = vmul.f32 %v5017_v40, %v4066_v24 }
 0x405   : > { %v2795_v55 = vsel %vm2539_vm2, %v2411_v36, %v2667_v3  ;;  %v2669_v10 = vmul.f32 0.2, %v2413_v56  ;;  %vm2543_vm6 = vcmp.gt.f32.partialorder %v2415_v5, 0.0  ;;  %v2670_v41 = vmul.f32 0.2, %v2414_v62 }
 0x406   : > { %v2923_v45 = vpack.c.bf16 %v2795_v55, %v2795_v55  ;;  %v2796_v52 = vsel %vm2540_vm3, %v2412_v47, %v2668_v9  ;;  %v2671_v63 = vmul.f32 0.2, %v2415_v5  ;;  %v2416_v59 = vadd.f32 %v5019_v49, %v2286_v31 }
 0x407   : > { %v2924_v37 = vpack.c.bf16 %v2796_v52, %v2796_v52  ;;  %v2797_v25 = vsel %vm2541_vm4, %v2413_v56, %v2669_v10  ;;  %v2798_v14 = vsel %vm2542_vm5, %v2414_v62, %v2670_v41  ;;  %v2288_v43 = vmul.f32 %v5017_v40, %v4074_v33 }
 0x408   : > { %3052 = vst.msk [vmem:[%s3894_s5 + $0x20] sm:$0xf] %vm3043_vm9, %v2923_v45  ;;  %v2925_v11 = vpack.c.bf16 %v2797_v25, %v2797_v25  ;;  %v2799_v60 = vsel %vm2543_vm6, %v2415_v5, %v2671_v63  ;;  %v2926_v27 = vpack.c.bf16 %v2798_v14, %v2798_v14  ;;  %vm2544_vm7 = vcmp.gt.f32.partialorder %v2416_v59, 0.0 }
 0x409   : > { %3053 = vst.msk [vmem:[%s3894_s5 + $0x24] sm:$0xf] %vm3043_vm9, %v2924_v37  ;;  %v2927_v46 = vpack.c.bf16 %v2799_v60, %v2799_v60  ;;  %v2672_v26 = vmul.f32 0.2, %v2416_v59  ;;  %v2417_v24 = vadd.f32 %v5019_v49, %v2287_v35  ;;  %v2418_v20 = vadd.f32 %v5019_v49, %v2288_v43 }
 0x40a   : > { %3054 = vst.msk [vmem:[%s3894_s5 + $0x28] sm:$0xf] %vm3043_vm9, %v2925_v11  ;;  %v2289_v13 = vmul.f32 %v5017_v40, %v4080_v50  ;;  %v2290_v33 = vmul.f32 %v5017_v40, %v4088_v0  ;;  %v2291_v21 = vmul.f32 %v5017_v40, %v4094_v15  ;;  %v2292_v38 = vmul.f32 %v5017_v40, %v4102_v30 }
 0x40b   : > { %3055 = vst.msk [vmem:[%s3894_s5 + $0x2c] sm:$0xf] %vm3043_vm9, %v2926_v27  ;;  %v2800_v29 = vsel %vm2544_vm7, %v2416_v59, %v2672_v26  ;;  %v2293_v36 = vmul.f32 %v5017_v40, %v4108_v53  ;;  %vm2545_vm8 = vcmp.gt.f32.partialorder %v2417_v24, 0.0  ;;  %v2673_v50 = vmul.f32 0.2, %v2417_v24 }
 0x40c   : > { %3056 = vst.msk [vmem:[%s3894_s5 + $0x30] sm:$0xf] %vm3043_vm9, %v2927_v46  ;;  %v2928_v18 = vpack.c.bf16 %v2800_v29, %v2800_v29  ;;  %vm2546_vm10 = vcmp.gt.f32.partialorder %v2418_v20, 0.0  ;;  %v2674_v61 = vmul.f32 0.2, %v2418_v20  ;;  %v2419_v0 = vadd.f32 %v5019_v49, %v2289_v13 }
 0x40d   : > { %v2420_v47 = vadd.f32 %v5019_v49, %v2290_v33  ;;  %v2421_v15 = vadd.f32 %v5019_v49, %v2291_v21  ;;  %v2801_v30 = vsel %vm2545_vm8, %v2417_v24, %v2673_v50  ;;  %v2422_v56 = vadd.f32 %v5019_v49, %v2292_v38 }
 0x40e   : > { %3057 = vst.msk [vmem:[%s3894_s5 + $0x34] sm:$0xf] %vm3043_vm9, %v2928_v18  ;;  %v2423_v53 = vadd.f32 %v5019_v49, %v2293_v36  ;;  %v2294_v3 = vmul.f32 %v5017_v40, %v4116_v12  ;;  %v2929_v62 = vpack.c.bf16 %v2801_v30, %v2801_v30  ;;  %v2802_v5 = vsel %vm2546_vm10, %v2418_v20, %v2674_v61 }
 0x40f   : > { %vm2547_vm11 = vcmp.gt.f32.partialorder %v2419_v0, 0.0  ;;  %v2675_v9 = vmul.f32 0.2, %v2419_v0  ;;  %v2930_v31 = vpack.c.bf16 %v2802_v5, %v2802_v5  ;;  %vm2548_vm12 = vcmp.gt.f32.partialorder %v2420_v47, 0.0 }
 0x410   : > { %v2676_v55 = vmul.f32 0.2, %v2420_v47  ;;  %vm2549_vm13 = vcmp.gt.f32.partialorder %v2421_v15, 0.0  ;;  %3058 = vst.msk [vmem:[%s3894_s5 + $0x38] sm:$0xf] %vm3043_vm9, %v2929_v62  ;;  %vm2550_vm14 = vcmp.gt.f32.partialorder %v2422_v56, 0.0  ;;  %v2424_v59 = vadd.f32 %v5019_v49, %v2294_v3 }
 0x411   : > { %v2803_v10 = vsel %vm2547_vm11, %v2419_v0, %v2675_v9  ;;  %v2677_v45 = vmul.f32 0.2, %v2421_v15  ;;  %vm2551_vm15 = vcmp.gt.f32.partialorder %v2423_v53, 0.0  ;;  %3059 = vst.msk [vmem:[%s3894_s5 + $0x3c] sm:$0xf] %vm3043_vm9, %v2930_v31  ;;  %v2295_v35 = vmul.f32 %v5017_v40, %v4122_v34 }
 0x412   : > { %v2931_v52 = vpack.c.bf16 %v2803_v10, %v2803_v10  ;;  %v2804_v12 = vsel %vm2548_vm12, %v2420_v47, %v2676_v55  ;;  %v2678_v41 = vmul.f32 0.2, %v2422_v56  ;;  %v2679_v63 = vmul.f32 0.2, %v2423_v53 }
 0x413   : > { %v2932_v37 = vpack.c.bf16 %v2804_v12, %v2804_v12  ;;  %v2805_v25 = vsel %vm2549_vm13, %v2421_v15, %v2677_v45  ;;  %v2296_v43 = vmul.f32 %v5017_v40, %v4130_v1  ;;  %vm2552_vm0 = vcmp.gt.f32.partialorder %v2424_v59, 0.0 }
 0x414   : > { %3060 = vst.msk [vmem:[%s3894_s5 + $0x40] sm:$0xf] %vm3043_vm9, %v2931_v52  ;;  %v2933_v11 = vpack.c.bf16 %v2805_v25, %v2805_v25  ;;  %v2806_v14 = vsel %vm2550_vm14, %v2422_v56, %v2678_v41  ;;  %v2807_v60 = vsel %vm2551_vm15, %v2423_v53, %v2679_v63  ;;  %v2680_v26 = vmul.f32 0.2, %v2424_v59 }
 0x415   : > { %3061 = vst.msk [vmem:[%s3894_s5 + $0x44] sm:$0xf] %vm3043_vm9, %v2932_v37  ;;  %v2934_v27 = vpack.c.bf16 %v2806_v14, %v2806_v14  ;;  %v2935_v46 = vpack.c.bf16 %v2807_v60, %v2807_v60  ;;  %v2425_v34 = vadd.f32 %v5019_v49, %v2295_v35  ;;  %v2426_v24 = vadd.f32 %v5019_v49, %v2296_v43 }
 0x416   : > { %3062 = vst.msk [vmem:[%s3894_s5 + $0x48] sm:$0xf] %vm3043_vm9, %v2933_v11  ;;  %v2297_v20 = vmul.f32 %v5017_v40, %v4136_v58  ;;  %v2298_v1 = vmul.f32 %v5017_v40, %v4144_v4  ;;  %v2808_v13 = vsel %vm2552_vm0, %v2424_v59, %v2680_v26  ;;  %v2299_v33 = vmul.f32 %v5017_v40, %v4150_v23 }
 0x417   : > { %3063 = vst.msk [vmem:[%s3894_s5 + $0x4c] sm:$0xf] %vm3043_vm9, %v2934_v27  ;;  %v2300_v29 = vmul.f32 %v5017_v40, %v4158_v57  ;;  %v2301_v21 = vmul.f32 %v5017_v40, %v4164_v54  ;;  %v2936_v38 = vpack.c.bf16 %v2808_v13, %v2808_v13  ;;  %vm2553_vm1 = vcmp.gt.f32.partialorder %v2425_v34, 0.0 }
 0x418   : > { %3064 = vst.msk [vmem:[%s3894_s5 + $0x50] sm:$0xf] %vm3043_vm9, %v2935_v46  ;;  %v2681_v58 = vmul.f32 0.2, %v2425_v34  ;;  %vm2554_vm2 = vcmp.gt.f32.partialorder %v2426_v24, 0.0  ;;  %v2427_v4 = vadd.f32 %v5019_v49, %v2297_v20  ;;  %v2428_v18 = vadd.f32 %v5019_v49, %v2298_v1 }
 0x419   : > { %v2682_v36 = vmul.f32 0.2, %v2426_v24  ;;  %v2429_v23 = vadd.f32 %v5019_v49, %v2299_v33  ;;  %3065 = vst.msk [vmem:[%s3894_s5 + $0x54] sm:$0xf] %vm3043_vm9, %v2936_v38  ;;  %v2430_v50 = vadd.f32 %v5019_v49, %v2300_v29  ;;  %v2431_v54 = vadd.f32 %v5019_v49, %v2301_v21 }
 0x41a   : > { %v2809_v57 = vsel %vm2553_vm1, %v2425_v34, %v2681_v58  ;;  %v2302_v61 = vmul.f32 %v5017_v40, %v4172_v19  ;;  %vm2555_vm3 = vcmp.gt.f32.partialorder %v2427_v4, 0.0  ;;  %v2683_v15 = vmul.f32 0.2, %v2427_v4 }
 0x41b   : > { %v2937_v0 = vpack.c.bf16 %v2809_v57, %v2809_v57  ;;  %v2810_v47 = vsel %vm2554_vm2, %v2426_v24, %v2682_v36  ;;  %vm2556_vm4 = vcmp.gt.f32.partialorder %v2428_v18, 0.0  ;;  %v2684_v56 = vmul.f32 0.2, %v2428_v18 }
 0x41c   : > { %v2938_v30 = vpack.c.bf16 %v2810_v47, %v2810_v47  ;;  %vm2557_vm5 = vcmp.gt.f32.partialorder %v2429_v23, 0.0  ;;  %v2811_v53 = vsel %vm2555_vm3, %v2427_v4, %v2683_v15  ;;  %v2685_v3 = vmul.f32 0.2, %v2429_v23 }
 0x41d   : > { %3066 = vst.msk [vmem:[%s3894_s5 + $0x58] sm:$0xf] %vm3043_vm9, %v2937_v0  ;;  %vm2558_vm6 = vcmp.gt.f32.partialorder %v2430_v50, 0.0  ;;  %vm2559_vm7 = vcmp.gt.f32.partialorder %v2431_v54, 0.0  ;;  %v2939_v62 = vpack.c.bf16 %v2811_v53, %v2811_v53  ;;  %v2812_v19 = vsel %vm2556_vm4, %v2428_v18, %v2684_v56 }
 0x41e   : > { %3067 = vst.msk [vmem:[%s3894_s5 + $0x5c] sm:$0xf] %vm3043_vm9, %v2938_v30  ;;  %v2686_v5 = vmul.f32 0.2, %v2430_v50  ;;  %v2687_v9 = vmul.f32 0.2, %v2431_v54  ;;  %v2940_v31 = vpack.c.bf16 %v2812_v19, %v2812_v19  ;;  %v2813_v55 = vsel %vm2557_vm5, %v2429_v23, %v2685_v3 }
 0x41f   : > { %v2432_v10 = vadd.f32 %v5019_v49, %v2302_v61  ;;  %v2303_v45 = vmul.f32 %v5017_v40, %v4178_v28  ;;  %3068 = vst.msk [vmem:[%s3894_s5 + $0x60] sm:$0xf] %vm3043_vm9, %v2939_v62  ;;  %v2941_v52 = vpack.c.bf16 %v2813_v55, %v2813_v55  ;;  %v2304_v63 = vmul.f32 %v5017_v40, %v4186_v39 }
 0x420   : > { %v2814_v12 = vsel %vm2558_vm6, %v2430_v50, %v2686_v5  ;;  %v2815_v41 = vsel %vm2559_vm7, %v2431_v54, %v2687_v9  ;;  %3069 = vst.msk [vmem:[%s3894_s5 + $0x64] sm:$0xf] %vm3043_vm9, %v2940_v31  ;;  %v2305_v11 = vmul.f32 %v5017_v40, %v4192_v7  ;;  %v2306_v39 = vmul.f32 %v5017_v40, %v4200_v16  ;;  %v5946_v5 = vld [vmem:[#allocation50_spill] sm:$0xff]  ;;  %v5947_v31 = vld [vmem:[#allocation52_spill] sm:$0xff] }
 0x421   : > { %v2942_v37 = vpack.c.bf16 %v2814_v12, %v2814_v12  ;;  %v2943_v25 = vpack.c.bf16 %v2815_v41, %v2815_v41  ;;  %vm2560_vm8 = vcmp.gt.f32.partialorder %v2432_v10, 0.0  ;;  %v2688_v59 = vmul.f32 0.2, %v2432_v10  ;;  %3070 = vst.msk [vmem:[%s3894_s5 + $0x68] sm:$0xf] %vm3043_vm9, %v2941_v52 }
 0x422   : > { %v2433_v28 = vadd.f32 %v5019_v49, %v2303_v45  ;;  %v2434_v35 = vadd.f32 %v5019_v49, %v2304_v63  ;;  %v2307_v60 = vmul.f32 %v5017_v40, %v4206_v51  ;;  %v2308_v43 = vmul.f32 %v5017_v40, %v4214_v42 }
 0x423   : > { %3071 = vst.msk [vmem:[%s3894_s5 + $0x6c] sm:$0xf] %vm3043_vm9, %v2942_v37  ;;  %v2816_v14 = vsel %vm2560_vm8, %v2432_v10, %v2688_v59  ;;  %v2309_v27 = vmul.f32 %v5017_v40, %v4220_v32  ;;  %v2435_v16 = vadd.f32 %v5019_v49, %v2305_v11  ;;  %v2436_v34 = vadd.f32 %v5019_v49, %v2306_v39  ;;  %v5948_v10 = vld [vmem:[#allocation54_spill] sm:$0xff] }
 0x424   : > { %3072 = vst.msk [vmem:[%s3894_s5 + $0x70] sm:$0xf] %vm3043_vm9, %v2943_v25  ;;  %v2944_v46 = vpack.c.bf16 %v2816_v14, %v2816_v14  ;;  %vm2561_vm10 = vcmp.gt.f32.partialorder %v2433_v28, 0.0  ;;  %v2689_v7 = vmul.f32 0.2, %v2433_v28  ;;  %vm2562_vm11 = vcmp.gt.f32.partialorder %v2434_v35, 0.0 }
 0x425   : > { %v2690_v26 = vmul.f32 0.2, %v2434_v35  ;;  %v2437_v51 = vadd.f32 %v5019_v49, %v2307_v60  ;;  %v2438_v24 = vadd.f32 %v5019_v49, %v2308_v43  ;;  %v2439_v32 = vadd.f32 %v5019_v49, %v2309_v27 }
 0x426   : > { %3073 = vst.msk [vmem:[%s3894_s5 + $0x74] sm:$0xf] %vm3043_vm9, %v2944_v46  ;;  %v2817_v42 = vsel %vm2561_vm10, %v2433_v28, %v2689_v7  ;;  %v2310_v20 = vmul.f32 %v5017_v40, %v4228_v44  ;;  %vm2563_vm12 = vcmp.gt.f32.partialorder %v2435_v16, 0.0  ;;  %v2691_v33 = vmul.f32 0.2, %v2435_v16  ;;  %v5949_v28 = vld [vmem:[#allocation56_spill] sm:$0xff] }
 0x427   : > { %v2945_v1 = vpack.c.bf16 %v2817_v42, %v2817_v42  ;;  %v2818_v13 = vsel %vm2562_vm11, %v2434_v35, %v2690_v26  ;;  %vm2564_vm13 = vcmp.gt.f32.partialorder %v2436_v34, 0.0  ;;  %v2692_v21 = vmul.f32 0.2, %v2436_v34 }
 0x428   : > { %v2946_v29 = vpack.c.bf16 %v2818_v13, %v2818_v13  ;;  %vm2565_vm14 = vcmp.gt.f32.partialorder %v2437_v51, 0.0  ;;  %v2819_v38 = vsel %vm2563_vm12, %v2435_v16, %v2691_v33  ;;  %v2693_v58 = vmul.f32 0.2, %v2437_v51 }
 0x429   : > { %3074 = vst.msk [vmem:[%s3894_s5 + $0x78] sm:$0xf] %vm3043_vm9, %v2945_v1  ;;  %vm2566_vm15 = vcmp.gt.f32.partialorder %v2438_v24, 0.0  ;;  %vm2567_vm0 = vcmp.gt.f32.partialorder %v2439_v32, 0.0  ;;  %v2947_v36 = vpack.c.bf16 %v2819_v38, %v2819_v38  ;;  %v2820_v44 = vsel %vm2564_vm13, %v2436_v34, %v2692_v21 }
 0x42a   : > { %3075 = vst.msk [vmem:[%s3894_s5 + $0x7c] sm:$0xf] %vm3043_vm9, %v2946_v29  ;;  %v2694_v4 = vmul.f32 0.2, %v2438_v24  ;;  %v2695_v18 = vmul.f32 0.2, %v2439_v32  ;;  %v2948_v23 = vpack.c.bf16 %v2820_v44, %v2820_v44  ;;  %v2821_v57 = vsel %vm2565_vm14, %v2437_v51, %v2693_v58 }
 0x42b   : > { %v2440_v50 = vadd.f32 %v5019_v49, %v2310_v20  ;;  %v2311_v54 = vmul.f32 %v5017_v40, %v4234_v17  ;;  %3076 = vst.msk [vmem:[%s3894_s5 + $0x80] sm:$0xf] %vm3043_vm9, %v2947_v36  ;;  %v2949_v61 = vpack.c.bf16 %v2821_v57, %v2821_v57  ;;  %v2312_v15 = vmul.f32 %v5017_v40, %v4242_v8  ;;  %v5951_v29 = vld [vmem:[#allocation60_spill] sm:$0xff] }
 0x42c   : > { %v2822_v0 = vsel %vm2566_vm15, %v2438_v24, %v2694_v4  ;;  %v2823_v47 = vsel %vm2567_vm0, %v2439_v32, %v2695_v18  ;;  %3077 = vst.msk [vmem:[%s3894_s5 + $0x84] sm:$0xf] %vm3043_vm9, %v2948_v23  ;;  %v2313_v62 = vmul.f32 %v5017_v40, %v4248_v2  ;;  %v2314_v8 = vmul.f32 %v5017_v40, %v4256_v48  ;;  %v5950_v32 = vld [vmem:[#allocation58_spill] sm:$0xff]  ;;  %v5953_v57 = vld [vmem:[#allocation64_spill] sm:$0xff] }
 0x42d   : > { %v2950_v30 = vpack.c.bf16 %v2822_v0, %v2822_v0  ;;  %v2951_v56 = vpack.c.bf16 %v2823_v47, %v2823_v47  ;;  %vm2568_vm1 = vcmp.gt.f32.partialorder %v2440_v50, 0.0  ;;  %v2696_v53 = vmul.f32 0.2, %v2440_v50  ;;  %3078 = vst.msk [vmem:[%s3894_s5 + $0x88] sm:$0xf] %vm3043_vm9, %v2949_v61  ;;  %v5952_v18 = vld [vmem:[#allocation62_spill] sm:$0xff] }
 0x42e   : > { %v2441_v17 = vadd.f32 %v5019_v49, %v2311_v54  ;;  %v2442_v3 = vadd.f32 %v5019_v49, %v2312_v15  ;;  %v2315_v9 = vmul.f32 %v5017_v40, %v5946_v5  ;;  %v2316_v55 = vmul.f32 %v5017_v40, %v5947_v31  ;;  %v5954_v61 = vld [vmem:[#allocation66_spill] sm:$0xff]  ;;  %v5955_v47 = vld [vmem:[#allocation68_spill] sm:$0xff] }
 0x42f   : > { %3079 = vst.msk [vmem:[%s3894_s5 + $0x8c] sm:$0xf] %vm3043_vm9, %v2950_v30  ;;  %v2824_v19 = vsel %vm2568_vm1, %v2440_v50, %v2696_v53  ;;  %v2317_v45 = vmul.f32 %v5017_v40, %v5948_v10  ;;  %v2443_v48 = vadd.f32 %v5019_v49, %v2313_v62  ;;  %v2444_v41 = vadd.f32 %v5019_v49, %v2314_v8  ;;  %v5956_v30 = vld [vmem:[#allocation70_spill] sm:$0xff] }
 0x430   : > { %3080 = vst.msk [vmem:[%s3894_s5 + $0x90] sm:$0xf] %vm3043_vm9, %v2951_v56  ;;  %v2952_v52 = vpack.c.bf16 %v2824_v19, %v2824_v19  ;;  %vm2569_vm2 = vcmp.gt.f32.partialorder %v2441_v17, 0.0  ;;  %v2697_v2 = vmul.f32 0.2, %v2441_v17  ;;  %vm2570_vm3 = vcmp.gt.f32.partialorder %v2442_v3, 0.0 }
 0x431   : > { %v2698_v12 = vmul.f32 0.2, %v2442_v3  ;;  %v2445_v63 = vadd.f32 %v5019_v49, %v2315_v9  ;;  %v2446_v25 = vadd.f32 %v5019_v49, %v2316_v55  ;;  %v2447_v59 = vadd.f32 %v5019_v49, %v2317_v45  ;;  %v5957_v55 = vld [vmem:[#allocation72_spill] sm:$0xff] }
 0x432   : > { %3081 = vst.msk [vmem:[%s3894_s5 + $0x94] sm:$0xf] %vm3043_vm9, %v2952_v52  ;;  %v2825_v37 = vsel %vm2569_vm2, %v2441_v17, %v2697_v2  ;;  %v2318_v35 = vmul.f32 %v5017_v40, %v5949_v28  ;;  %vm2571_vm4 = vcmp.gt.f32.partialorder %v2443_v48, 0.0  ;;  %v2699_v14 = vmul.f32 0.2, %v2443_v48 }
 0x433   : > { %v2953_v11 = vpack.c.bf16 %v2825_v37, %v2825_v37  ;;  %v2826_v39 = vsel %vm2570_vm3, %v2442_v3, %v2698_v12  ;;  %vm2572_vm5 = vcmp.gt.f32.partialorder %v2444_v41, 0.0  ;;  %v2700_v43 = vmul.f32 0.2, %v2444_v41 }
 0x434   : > { %v2954_v60 = vpack.c.bf16 %v2826_v39, %v2826_v39  ;;  %vm2573_vm6 = vcmp.gt.f32.partialorder %v2445_v63, 0.0  ;;  %v2827_v27 = vsel %vm2571_vm4, %v2443_v48, %v2699_v14  ;;  %v2701_v46 = vmul.f32 0.2, %v2445_v63  ;;  %v5958_v14 = vld [vmem:[#allocation74_spill] sm:$0xff] }
 0x435   : > { %3082 = vst.msk [vmem:[%s3894_s5 + $0x98] sm:$0xf] %vm3043_vm9, %v2953_v11  ;;  %vm2574_vm7 = vcmp.gt.f32.partialorder %v2446_v25, 0.0  ;;  %vm2575_vm8 = vcmp.gt.f32.partialorder %v2447_v59, 0.0  ;;  %v2955_v7 = vpack.c.bf16 %v2827_v27, %v2827_v27  ;;  %v2828_v26 = vsel %vm2572_vm5, %v2444_v41, %v2700_v43 }
 0x436   : > { %3083 = vst.msk [vmem:[%s3894_s5 + $0x9c] sm:$0xf] %vm3043_vm9, %v2954_v60  ;;  %v2702_v16 = vmul.f32 0.2, %v2446_v25  ;;  %v2703_v34 = vmul.f32 0.2, %v2447_v59  ;;  %v2956_v51 = vpack.c.bf16 %v2828_v26, %v2828_v26  ;;  %v2829_v42 = vsel %vm2573_vm6, %v2445_v63, %v2701_v46 }
 0x437   : > { %v2448_v24 = vadd.f32 %v5019_v49, %v2318_v35  ;;  %v2319_v20 = vmul.f32 %v5017_v40, %v5950_v32  ;;  %3084 = vst.msk [vmem:[%s3894_s5 + $0xa0] sm:$0xf] %vm3043_vm9, %v2955_v7  ;;  %v2957_v1 = vpack.c.bf16 %v2829_v42, %v2829_v42  ;;  %v2320_v21 = vmul.f32 %v5017_v40, %v5951_v29  ;;  %v5959_v7 = vld [vmem:[#allocation76_spill] sm:$0xff]  ;;  %v5960_v32 = vld [vmem:[#allocation78_spill] sm:$0xff] }
 0x438   : > { %v2830_v13 = vsel %vm2574_vm7, %v2446_v25, %v2702_v16  ;;  %v2831_v33 = vsel %vm2575_vm8, %v2447_v59, %v2703_v34  ;;  %3085 = vst.msk [vmem:[%s3894_s5 + $0xa4] sm:$0xf] %vm3043_vm9, %v2956_v51  ;;  %v2321_v23 = vmul.f32 %v5017_v40, %v5952_v18  ;;  %v2322_v50 = vmul.f32 %v5017_v40, %v5953_v57  ;;  %v5962_v29 = vld [vmem:[#allocation82_spill] sm:$0xff] }
 0x439   : > { %v2958_v38 = vpack.c.bf16 %v2830_v13, %v2830_v13  ;;  %v2959_v58 = vpack.c.bf16 %v2831_v33, %v2831_v33  ;;  %vm2576_vm10 = vcmp.gt.f32.partialorder %v2448_v24, 0.0  ;;  %v2704_v36 = vmul.f32 0.2, %v2448_v24  ;;  %3086 = vst.msk [vmem:[%s3894_s5 + $0xa8] sm:$0xf] %vm3043_vm9, %v2957_v1  ;;  %v5961_v1 = vld [vmem:[#allocation80_spill] sm:$0xff] }
 0x43a   : > { %v2449_v44 = vadd.f32 %v5019_v49, %v2319_v20  ;;  %v2450_v4 = vadd.f32 %v5019_v49, %v2320_v21  ;;  %v2323_v0 = vmul.f32 %v5017_v40, %v5954_v61  ;;  %v2324_v15 = vmul.f32 %v5017_v40, %v5955_v47 }
 0x43b   : > { %3087 = vst.msk [vmem:[%s3894_s5 + $0xac] sm:$0xf] %vm3043_vm9, %v2958_v38  ;;  %v2832_v54 = vsel %vm2576_vm10, %v2448_v24, %v2704_v36  ;;  %v2325_v56 = vmul.f32 %v5017_v40, %v5956_v30  ;;  %v2451_v62 = vadd.f32 %v5019_v49, %v2321_v23  ;;  %v2452_v8 = vadd.f32 %v5019_v49, %v2322_v50  ;;  %v5963_v38 = vld [vmem:[#allocation84_spill] sm:$0xff]  ;;  %v5964_v36 = vld [vmem:[#allocation86_spill] sm:$0xff] }
 0x43c   : > { %3088 = vst.msk [vmem:[%s3894_s5 + $0xb0] sm:$0xf] %vm3043_vm9, %v2959_v58  ;;  %v2960_v53 = vpack.c.bf16 %v2832_v54, %v2832_v54  ;;  %vm2577_vm11 = vcmp.gt.f32.partialorder %v2449_v44, 0.0  ;;  %v2705_v17 = vmul.f32 0.2, %v2449_v44  ;;  %vm2578_vm12 = vcmp.gt.f32.partialorder %v2450_v4, 0.0 }
 0x43d   : > { %v2706_v3 = vmul.f32 0.2, %v2450_v4  ;;  %v2453_v19 = vadd.f32 %v5019_v49, %v2323_v0  ;;  %v2454_v9 = vadd.f32 %v5019_v49, %v2324_v15  ;;  %v2455_v31 = vadd.f32 %v5019_v49, %v2325_v56 }
 0x43e   : > { %3089 = vst.msk [vmem:[%s3894_s5 + $0xb4] sm:$0xf] %vm3043_vm9, %v2960_v53  ;;  %v2833_v5 = vsel %vm2577_vm11, %v2449_v44, %v2705_v17  ;;  %v2326_v10 = vmul.f32 %v5017_v40, %v5957_v55  ;;  %vm2579_vm13 = vcmp.gt.f32.partialorder %v2451_v62, 0.0  ;;  %v2707_v2 = vmul.f32 0.2, %v2451_v62 }
 0x43f   : > { %v2961_v45 = vpack.c.bf16 %v2833_v5, %v2833_v5  ;;  %v2834_v52 = vsel %vm2578_vm12, %v2450_v4, %v2706_v3  ;;  %vm2580_vm14 = vcmp.gt.f32.partialorder %v2452_v8, 0.0  ;;  %v2708_v48 = vmul.f32 0.2, %v2452_v8 }
 0x440   : > { %v2962_v12 = vpack.c.bf16 %v2834_v52, %v2834_v52  ;;  %vm2581_vm15 = vcmp.gt.f32.partialorder %v2453_v19, 0.0  ;;  %v2835_v41 = vsel %vm2579_vm13, %v2451_v62, %v2707_v2  ;;  %v2709_v63 = vmul.f32 0.2, %v2453_v19 }
 0x441   : > { %3090 = vst.msk [vmem:[%s3894_s5 + $0xb8] sm:$0xf] %vm3043_vm9, %v2961_v45  ;;  %vm2582_vm0 = vcmp.gt.f32.partialorder %v2454_v9, 0.0  ;;  %vm2583_vm1 = vcmp.gt.f32.partialorder %v2455_v31, 0.0  ;;  %v2963_v37 = vpack.c.bf16 %v2835_v41, %v2835_v41  ;;  %v2836_v25 = vsel %vm2580_vm14, %v2452_v8, %v2708_v48  ;;  %v5965_v48 = vld [vmem:[#allocation90_spill] sm:$0xff] }
 0x442   : > { %3091 = vst.msk [vmem:[%s3894_s5 + $0xbc] sm:$0xf] %vm3043_vm9, %v2962_v12  ;;  %v2710_v59 = vmul.f32 0.2, %v2454_v9  ;;  %v2711_v28 = vmul.f32 0.2, %v2455_v31  ;;  %v2964_v35 = vpack.c.bf16 %v2836_v25, %v2836_v25  ;;  %v2837_v11 = vsel %vm2581_vm15, %v2453_v19, %v2709_v63 }
 0x443   : > { %v2456_v39 = vadd.f32 %v5019_v49, %v2326_v10  ;;  %v2327_v60 = vmul.f32 %v5017_v40, %v5958_v14  ;;  %3092 = vst.msk [vmem:[%s3894_s5 + $0xc0] sm:$0xf] %vm3043_vm9, %v2963_v37  ;;  %v2965_v43 = vpack.c.bf16 %v2837_v11, %v2837_v11  ;;  %v2328_v26 = vmul.f32 %v5017_v40, %v5959_v7  ;;  %v5967_v11 = vld [vmem:[#allocation6_spill] sm:$0xff]  ;;  %v5970_v7 = vld [vmem:[#allocation12_spill] sm:$0xff] }
 0x444   : > { %v2838_v27 = vsel %vm2582_vm0, %v2454_v9, %v2710_v59  ;;  %v2839_v46 = vsel %vm2583_vm1, %v2455_v31, %v2711_v28  ;;  %3093 = vst.msk [vmem:[%s3894_s5 + $0xc4] sm:$0xf] %vm3043_vm9, %v2964_v35  ;;  %v2329_v20 = vmul.f32 %v5017_v40, %v5960_v32  ;;  %v2330_v13 = vmul.f32 %v5017_v40, %v5961_v1  ;;  %v5966_v28 = vld [vmem:[#allocation4_spill] sm:$0xff] }
 0x445   : > { %v2966_v16 = vpack.c.bf16 %v2838_v27, %v2838_v27  ;;  %v2967_v34 = vpack.c.bf16 %v2839_v46, %v2839_v46  ;;  %vm2584_vm2 = vcmp.gt.f32.partialorder %v2456_v39, 0.0  ;;  %v2712_v51 = vmul.f32 0.2, %v2456_v39  ;;  %3094 = vst.msk [vmem:[%s3894_s5 + $0xc8] sm:$0xf] %vm3043_vm9, %v2965_v43  ;;  %v5969_v27 = vld [vmem:[#allocation10_spill] sm:$0xff] }
 0x446   : > { %v2457_v42 = vadd.f32 %v5019_v49, %v2327_v60  ;;  %v2458_v24 = vadd.f32 %v5019_v49, %v2328_v26  ;;  %v2331_v21 = vmul.f32 %v5017_v40, %v5962_v29  ;;  %v2332_v58 = vmul.f32 %v5017_v40, %v5963_v38  ;;  %v5968_v60 = vld [vmem:[#allocation8_spill] sm:$0xff] }
 0x447   : > { %3095 = vst.msk [vmem:[%s3894_s5 + $0xcc] sm:$0xf] %vm3043_vm9, %v2966_v16  ;;  %v2840_v33 = vsel %vm2584_vm2, %v2456_v39, %v2712_v51  ;;  %v2333_v44 = vmul.f32 %v5017_v40, %v5964_v36  ;;  %v2459_v57 = vadd.f32 %v5019_v49, %v2329_v20  ;;  %v2460_v50 = vadd.f32 %v5019_v49, %v2330_v13 }
 0x448   : > { %3096 = vst.msk [vmem:[%s3894_s5 + $0xd0] sm:$0xf] %vm3043_vm9, %v2967_v34  ;;  %v2968_v4 = vpack.c.bf16 %v2840_v33, %v2840_v33  ;;  %vm2585_vm3 = vcmp.gt.f32.partialorder %v2457_v42, 0.0  ;;  %v2713_v18 = vmul.f32 0.2, %v2457_v42  ;;  %vm2586_vm4 = vcmp.gt.f32.partialorder %v2458_v24, 0.0 }
 0x449   : > { %v2714_v23 = vmul.f32 0.2, %v2458_v24  ;;  %v2461_v54 = vadd.f32 %v5019_v49, %v2331_v21  ;;  %v2462_v0 = vadd.f32 %v5019_v49, %v2332_v58  ;;  %v2463_v47 = vadd.f32 %v5019_v49, %v2333_v44  ;;  %v5971_v33 = vld [vmem:[#allocation13_spill] sm:$0xff] }
 0x44a   : > { %3097 = vst.msk [vmem:[%s3894_s5 + $0xd4] sm:$0xf] %vm3043_vm9, %v2968_v4  ;;  %v2841_v61 = vsel %vm2585_vm3, %v2457_v42, %v2713_v18  ;;  %v2334_v15 = vmul.f32 %v5017_v40, %v4354_v6  ;;  %vm2587_vm5 = vcmp.gt.f32.partialorder %v2459_v57, 0.0  ;;  %v2715_v53 = vmul.f32 0.2, %v2459_v57 }
 0x44b   : > { %v2969_v30 = vpack.c.bf16 %v2841_v61, %v2841_v61  ;;  %v2842_v56 = vsel %vm2586_vm4, %v2458_v24, %v2714_v23  ;;  %vm2588_vm6 = vcmp.gt.f32.partialorder %v2460_v50, 0.0  ;;  %v2716_v3 = vmul.f32 0.2, %v2460_v50 }
 0x44c   : > { %v2970_v17 = vpack.c.bf16 %v2842_v56, %v2842_v56  ;;  %vm2589_vm7 = vcmp.gt.f32.partialorder %v2461_v54, 0.0  ;;  %v2843_v62 = vsel %vm2587_vm5, %v2459_v57, %v2715_v53  ;;  %v2717_v8 = vmul.f32 0.2, %v2461_v54 }
 0x44d   : > { %3098 = vst.msk [vmem:[%s3894_s5 + $0xd8] sm:$0xf] %vm3043_vm9, %v2969_v30  ;;  %vm2590_vm8 = vcmp.gt.f32.partialorder %v2462_v0, 0.0  ;;  %vm2591_vm10 = vcmp.gt.f32.partialorder %v2463_v47, 0.0  ;;  %v2971_v19 = vpack.c.bf16 %v2843_v62, %v2843_v62  ;;  %v2844_v6 = vsel %vm2588_vm6, %v2460_v50, %v2716_v3  ;;  %v5973_v3 = vld [vmem:[#allocation15_spill] sm:$0xff] }
 0x44e   : > { %3099 = vst.msk [vmem:[%s3894_s5 + $0xdc] sm:$0xf] %vm3043_vm9, %v2970_v17  ;;  %v2718_v5 = vmul.f32 0.2, %v2462_v0  ;;  %v2719_v9 = vmul.f32 0.2, %v2463_v47  ;;  %v2972_v31 = vpack.c.bf16 %v2844_v6, %v2844_v6  ;;  %v2845_v55 = vsel %vm2589_vm7, %v2461_v54, %v2717_v8 }
 0x44f   : > { %v2464_v10 = vadd.f32 %v5019_v49, %v2334_v15  ;;  %v2335_v45 = vmul.f32 %v5017_v40, %v4358_v22  ;;  %3100 = vst.msk [vmem:[%s3894_s5 + $0xe0] sm:$0xf] %vm3043_vm9, %v2971_v19  ;;  %v2973_v52 = vpack.c.bf16 %v2845_v55, %v2845_v55  ;;  %v2336_v41 = vmul.f32 %v5017_v40, %v5965_v48  ;;  %v5972_v15 = vld [vmem:[#allocation14_spill] sm:$0xff]  ;;  %v5977_v48 = vld [vmem:[#allocation19_spill] sm:$0xff] }
 0x450   : > { %v2846_v2 = vsel %vm2590_vm8, %v2462_v0, %v2718_v5  ;;  %v2847_v12 = vsel %vm2591_vm10, %v2463_v47, %v2719_v9  ;;  %3101 = vst.msk [vmem:[%s3894_s5 + $0xe4] sm:$0xf] %vm3043_vm9, %v2972_v31  ;;  %v2337_v35 = vmul.f32 %v5017_v40, %v5966_v28  ;;  %v2338_v39 = vmul.f32 %v5017_v40, %v5967_v11  ;;  %v5974_v31 = vld [vmem:[#allocation16_spill] sm:$0xff] }
 0x451   : > { %v2974_v63 = vpack.c.bf16 %v2846_v2, %v2846_v2  ;;  %v2975_v37 = vpack.c.bf16 %v2847_v12, %v2847_v12  ;;  %vm2592_vm11 = vcmp.gt.f32.partialorder %v2464_v10, 0.0  ;;  %v2720_v25 = vmul.f32 0.2, %v2464_v10  ;;  %3102 = vst.msk [vmem:[%s3894_s5 + $0xe8] sm:$0xf] %vm3043_vm9, %v2973_v52  ;;  %v5976_v2 = vld [vmem:[#allocation18_spill] sm:$0xff] }
 0x452   : > { %v2465_v22 = vadd.f32 %v5019_v49, %v2335_v45  ;;  %v2466_v59 = vadd.f32 %v5019_v49, %v2336_v41  ;;  %v2339_v43 = vmul.f32 %v5017_v40, %v5968_v60  ;;  %v2340_v46 = vmul.f32 %v5017_v40, %v5969_v27  ;;  %v5392_v60 = vld [vmem:[#allocation2 + $0x2] ss:$0 sm:$0xff] }
 0x453   : > { %3103 = vst.msk [vmem:[%s3894_s5 + $0xec] sm:$0xf] %vm3043_vm9, %v2974_v63  ;;  %v2848_v14 = vsel %vm2592_vm11, %v2464_v10, %v2720_v25  ;;  %v2341_v26 = vmul.f32 %v5017_v40, %v5970_v7  ;;  %v2467_v42 = vadd.f32 %v5019_v49, %v2337_v35  ;;  %v2468_v24 = vadd.f32 %v5019_v49, %v2338_v39  ;;  %v5975_v10 = vld [vmem:[#allocation17_spill] sm:$0xff]  ;;  %v5978_v63 = vld [vmem:[#allocation20_spill] sm:$0xff] }
 0x454   : > { %3104 = vst.msk [vmem:[%s3894_s5 + $0xf0] sm:$0xf] %vm3043_vm9, %v2975_v37  ;;  %v2976_v16 = vpack.c.bf16 %v2848_v14, %v2848_v14  ;;  %vm2593_vm12 = vcmp.gt.f32.partialorder %v2465_v22, 0.0  ;;  %v2721_v34 = vmul.f32 0.2, %v2465_v22  ;;  %vm2594_vm13 = vcmp.gt.f32.partialorder %v2466_v59, 0.0 }
 0x455   : > { %v2722_v51 = vmul.f32 0.2, %v2466_v59  ;;  %v2469_v32 = vadd.f32 %v5019_v49, %v2339_v43  ;;  %v2470_v1 = vadd.f32 %v5019_v49, %v2340_v46  ;;  %v2471_v13 = vadd.f32 %v5019_v49, %v2341_v26  ;;  %v5979_v43 = vld [vmem:[#allocation21_spill] sm:$0xff] }
 0x456   : > { %3105 = vst.msk [vmem:[%s3894_s5 + $0xf4] sm:$0xf] %vm3043_vm9, %v2976_v16  ;;  %v2849_v20 = vsel %vm2593_vm12, %v2465_v22, %v2721_v34  ;;  %v2342_v29 = vmul.f32 %v5017_v40, %v5971_v33  ;;  %vm2595_vm14 = vcmp.gt.f32.partialorder %v2467_v42, 0.0  ;;  %v2723_v58 = vmul.f32 0.2, %v2467_v42 }
 0x457   : > { %v2977_v21 = vpack.c.bf16 %v2849_v20, %v2849_v20  ;;  %v2850_v38 = vsel %vm2594_vm13, %v2466_v59, %v2722_v51  ;;  %vm2596_vm15 = vcmp.gt.f32.partialorder %v2468_v24, 0.0  ;;  %v2724_v44 = vmul.f32 0.2, %v2468_v24  ;;  %v5400_v33 = vld [vmem:[#allocation2 + $0x3] ss:$0 sm:$0xff] }
 0x458   : > { %v2978_v36 = vpack.c.bf16 %v2850_v38, %v2850_v38  ;;  %vm2597_vm0 = vcmp.gt.f32.partialorder %v2469_v32, 0.0  ;;  %v2851_v4 = vsel %vm2595_vm14, %v2467_v42, %v2723_v58  ;;  %v2725_v18 = vmul.f32 0.2, %v2469_v32 }
 0x459   : > { %3106 = vst.msk [vmem:[%s3894_s5 + $0xf8] sm:$0xf] %vm3043_vm9, %v2977_v21  ;;  %vm2598_vm1 = vcmp.gt.f32.partialorder %v2470_v1, 0.0  ;;  %vm2599_vm2 = vcmp.gt.f32.partialorder %v2471_v13, 0.0  ;;  %v2979_v23 = vpack.c.bf16 %v2851_v4, %v2851_v4  ;;  %v2852_v57 = vsel %vm2596_vm15, %v2468_v24, %v2724_v44  ;;  %v5980_v21 = vld [vmem:[#allocation22_spill] sm:$0xff]  ;;  %v5981_v4 = vld [vmem:[#allocation23_spill] sm:$0xff] }
 0x45a   : > { %3107 = vst.msk [vmem:[%s3894_s5 + $0xfc] sm:$0xf] %vm3043_vm9, %v2978_v36  ;;  %v2726_v50 = vmul.f32 0.2, %v2470_v1  ;;  %v2727_v54 = vmul.f32 0.2, %v2471_v13  ;;  %v2980_v61 = vpack.c.bf16 %v2852_v57, %v2852_v57  ;;  %v2853_v0 = vsel %vm2597_vm0, %v2469_v32, %v2725_v18 }
 0x45b   : > { %v2472_v47 = vadd.f32 %v5019_v49, %v2342_v29  ;;  %v2343_v30 = vmul.f32 %v5017_v40, %v5972_v15  ;;  %3108 = vst.msk [vmem:[%s3894_s5 + $0x100] sm:$0xf] %vm3043_vm9, %v2979_v23  ;;  %v2981_v56 = vpack.c.bf16 %v2853_v0, %v2853_v0  ;;  %v2344_v62 = vmul.f32 %v5017_v40, %v5973_v3  ;;  %v5982_v0 = vld [vmem:[#allocation24_spill] sm:$0xff]  ;;  %v5983_v15 = vld [vmem:[#allocation25_spill] sm:$0xff]  ;;  %v5985_v3 = vld [vmem:[#allocation27_spill] sm:$0xff] }
 0x45c   : > { %v2854_v53 = vsel %vm2598_vm1, %v2470_v1, %v2726_v50  ;;  %v2855_v17 = vsel %vm2599_vm2, %v2471_v13, %v2727_v54  ;;  %3109 = vst.msk [vmem:[%s3894_s5 + $0x104] sm:$0xf] %vm3043_vm9, %v2980_v61  ;;  %v2345_v55 = vmul.f32 %v5017_v40, %v5974_v31  ;;  %v2346_v45 = vmul.f32 %v5017_v40, %v5975_v10 }
 0x45d   : > { %v2982_v8 = vpack.c.bf16 %v2854_v53, %v2854_v53  ;;  %v2983_v19 = vpack.c.bf16 %v2855_v17, %v2855_v17  ;;  %vm2600_vm3 = vcmp.gt.f32.partialorder %v2472_v47, 0.0  ;;  %v2728_v6 = vmul.f32 0.2, %v2472_v47  ;;  %3110 = vst.msk [vmem:[%s3894_s5 + $0x108] sm:$0xf] %vm3043_vm9, %v2981_v56  ;;  %v5984_v53 = vld [vmem:[#allocation26_spill] sm:$0xff] }
 0x45e   : > { %v2473_v5 = vadd.f32 %v5019_v49, %v2343_v30  ;;  %v2474_v9 = vadd.f32 %v5019_v49, %v2344_v62  ;;  %v2347_v12 = vmul.f32 %v5017_v40, %v5976_v2  ;;  %v2348_v41 = vmul.f32 %v5017_v40, %v5977_v48 }
 0x45f   : > { %3111 = vst.msk [vmem:[%s3894_s5 + $0x10c] sm:$0xf] %vm3043_vm9, %v2982_v8  ;;  %v2856_v52 = vsel %vm2600_vm3, %v2472_v47, %v2728_v6  ;;  %v2349_v37 = vmul.f32 %v5017_v40, %v5978_v63  ;;  %v2475_v28 = vadd.f32 %v5019_v49, %v2345_v55  ;;  %v2476_v35 = vadd.f32 %v5019_v49, %v2346_v45  ;;  %v5986_v8 = vld [vmem:[#allocation28_spill] sm:$0xff] }
 0x460   : > { %3112 = vst.msk [vmem:[%s3894_s5 + $0x110] sm:$0xf] %vm3043_vm9, %v2983_v19  ;;  %v2984_v25 = vpack.c.bf16 %v2856_v52, %v2856_v52  ;;  %vm2601_vm4 = vcmp.gt.f32.partialorder %v2473_v5, 0.0  ;;  %v2729_v22 = vmul.f32 0.2, %v2473_v5  ;;  %vm2602_vm5 = vcmp.gt.f32.partialorder %v2474_v9, 0.0 }
 0x461   : > { %v2730_v59 = vmul.f32 0.2, %v2474_v9  ;;  %v2477_v11 = vadd.f32 %v5019_v49, %v2347_v12  ;;  %v2478_v14 = vadd.f32 %v5019_v49, %v2348_v41  ;;  %v2479_v40 = vadd.f32 %v5019_v49, %v2349_v37  ;;  %v5987_v12 = vld [vmem:[#allocation29_spill] sm:$0xff] }
 0x462   : > { %3113 = vst.msk [vmem:[%s3894_s5 + $0x114] sm:$0xf] %vm3043_vm9, %v2984_v25  ;;  %v2857_v39 = vsel %vm2601_vm4, %v2473_v5, %v2729_v22  ;;  %v2350_v27 = vmul.f32 %v5392_v60, %v5979_v43  ;;  %vm2603_vm6 = vcmp.gt.f32.partialorder %v2475_v28, 0.0  ;;  %v2731_v26 = vmul.f32 0.2, %v2475_v28 }
 0x463   : > { %v2985_v46 = vpack.c.bf16 %v2857_v39, %v2857_v39  ;;  %v2858_v7 = vsel %vm2602_vm5, %v2474_v9, %v2730_v59  ;;  %vm2604_vm7 = vcmp.gt.f32.partialorder %v2476_v35, 0.0  ;;  %v2732_v34 = vmul.f32 0.2, %v2476_v35 }
 0x464   : > { %v2986_v16 = vpack.c.bf16 %v2858_v7, %v2858_v7  ;;  %vm2605_vm8 = vcmp.gt.f32.partialorder %v2477_v11, 0.0  ;;  %v2859_v51 = vsel %vm2603_vm6, %v2475_v28, %v2731_v26  ;;  %v2733_v42 = vmul.f32 0.2, %v2477_v11 }
 0x465   : > { %3114 = vst.msk [vmem:[%s3894_s5 + $0x118] sm:$0xf] %vm3043_vm9, %v2985_v46  ;;  %vm2606_vm10 = vcmp.gt.f32.partialorder %v2478_v14, 0.0  ;;  %vm2607_vm11 = vcmp.gt.f32.partialorder %v2479_v40, 0.0  ;;  %v2987_v49 = vpack.c.bf16 %v2859_v51, %v2859_v51  ;;  %v2860_v24 = vsel %vm2604_vm7, %v2476_v35, %v2732_v34  ;;  %v5988_v46 = vld [vmem:[#allocation30_spill] sm:$0xff]  ;;  %v5989_v51 = vld [vmem:[#allocation31_spill] sm:$0xff] }
 0x466   : > { %3115 = vst.msk [vmem:[%s3894_s5 + $0x11c] sm:$0xf] %vm3043_vm9, %v2986_v16  ;;  %v2734_v32 = vmul.f32 0.2, %v2478_v14  ;;  %v2735_v20 = vmul.f32 0.2, %v2479_v40  ;;  %v2988_v1 = vpack.c.bf16 %v2860_v24, %v2860_v24  ;;  %v2861_v13 = vsel %vm2605_vm8, %v2477_v11, %v2733_v42 }
 0x467   : > { %v2480_v29 = vadd.f32 %v5400_v33, %v2350_v27  ;;  %v2351_v38 = vmul.f32 %v5392_v60, %v5980_v21  ;;  %3116 = vst.msk [vmem:[%s3894_s5 + $0x120] sm:$0xf] %vm3043_vm9, %v2987_v49  ;;  %v2989_v58 = vpack.c.bf16 %v2861_v13, %v2861_v13  ;;  %v2352_v18 = vmul.f32 %v5392_v60, %v5981_v4  ;;  %v5990_v13 = vld [vmem:[#allocation32_spill] sm:$0xff]  ;;  %v5991_v21 = vld [vmem:[#allocation33_spill] sm:$0xff]  ;;  %v5993_v4 = vld [vmem:[#allocation35_spill] sm:$0xff] }
 0x468   : > { %v2862_v36 = vsel %vm2606_vm10, %v2478_v14, %v2734_v32  ;;  %v2863_v44 = vsel %vm2607_vm11, %v2479_v40, %v2735_v20  ;;  %3117 = vst.msk [vmem:[%s3894_s5 + $0x124] sm:$0xf] %vm3043_vm9, %v2988_v1  ;;  %v2353_v47 = vmul.f32 %v5392_v60, %v5982_v0  ;;  %v2354_v30 = vmul.f32 %v5392_v60, %v5983_v15 }
 0x469   : > { %v2990_v23 = vpack.c.bf16 %v2862_v36, %v2862_v36  ;;  %v2991_v57 = vpack.c.bf16 %v2863_v44, %v2863_v44  ;;  %vm2608_vm12 = vcmp.gt.f32.partialorder %v2480_v29, 0.0  ;;  %v2736_v50 = vmul.f32 0.2, %v2480_v29  ;;  %3118 = vst.msk [vmem:[%s3894_s5 + $0x128] sm:$0xf] %vm3043_vm9, %v2989_v58  ;;  %v5992_v36 = vld [vmem:[#allocation34_spill] sm:$0xff] }
 0x46a   : > { %v2481_v54 = vadd.f32 %v5400_v33, %v2351_v38  ;;  %v2482_v61 = vadd.f32 %v5400_v33, %v2352_v18  ;;  %v2355_v17 = vmul.f32 %v5392_v60, %v5984_v53  ;;  %v2356_v62 = vmul.f32 %v5392_v60, %v5985_v3 }
 0x46b   : > { %3119 = vst.msk [vmem:[%s3894_s5 + $0x12c] sm:$0xf] %vm3043_vm9, %v2990_v23  ;;  %v2864_v56 = vsel %vm2608_vm12, %v2480_v29, %v2736_v50  ;;  %v2357_v19 = vmul.f32 %v5392_v60, %v5986_v8  ;;  %v2483_v31 = vadd.f32 %v5400_v33, %v2353_v47  ;;  %v2484_v55 = vadd.f32 %v5400_v33, %v2354_v30  ;;  %v5994_v23 = vld [vmem:[#allocation36_spill] sm:$0xff] }
 0x46c   : > { %3120 = vst.msk [vmem:[%s3894_s5 + $0x130] sm:$0xf] %vm3043_vm9, %v2991_v57  ;;  %v2992_v6 = vpack.c.bf16 %v2864_v56, %v2864_v56  ;;  %vm2609_vm13 = vcmp.gt.f32.partialorder %v2481_v54, 0.0  ;;  %v2737_v5 = vmul.f32 0.2, %v2481_v54  ;;  %vm2610_vm14 = vcmp.gt.f32.partialorder %v2482_v61, 0.0 }
 0x46d   : > { %v2738_v9 = vmul.f32 0.2, %v2482_v61  ;;  %v2485_v10 = vadd.f32 %v5400_v33, %v2355_v17  ;;  %v2486_v52 = vadd.f32 %v5400_v33, %v2356_v62  ;;  %v2487_v2 = vadd.f32 %v5400_v33, %v2357_v19  ;;  %v5995_v17 = vld [vmem:[#allocation37_spill] sm:$0xff] }
 0x46e   : > { %3121 = vst.msk [vmem:[%s3894_s5 + $0x134] sm:$0xf] %vm3043_vm9, %v2992_v6  ;;  %v2865_v45 = vsel %vm2609_vm13, %v2481_v54, %v2737_v5  ;;  %v2358_v48 = vmul.f32 %v5392_v60, %v5987_v12  ;;  %vm2611_vm15 = vcmp.gt.f32.partialorder %v2483_v31, 0.0  ;;  %v2739_v37 = vmul.f32 0.2, %v2483_v31 }
 0x46f   : > { %v2993_v41 = vpack.c.bf16 %v2865_v45, %v2865_v45  ;;  %v2866_v63 = vsel %vm2610_vm14, %v2482_v61, %v2738_v9  ;;  %vm2612_vm0 = vcmp.gt.f32.partialorder %v2484_v55, 0.0  ;;  %v2740_v22 = vmul.f32 0.2, %v2484_v55 }
 0x470   : > { %v2994_v25 = vpack.c.bf16 %v2866_v63, %v2866_v63  ;;  %vm2613_vm1 = vcmp.gt.f32.partialorder %v2485_v10, 0.0  ;;  %v2867_v59 = vsel %vm2611_vm15, %v2483_v31, %v2739_v37  ;;  %v2741_v28 = vmul.f32 0.2, %v2485_v10 }
 0x471   : > { %3122 = vst.msk [vmem:[%s3894_s5 + $0x138] sm:$0xf] %vm3043_vm9, %v2993_v41  ;;  %vm2614_vm2 = vcmp.gt.f32.partialorder %v2486_v52, 0.0  ;;  %vm2615_vm3 = vcmp.gt.f32.partialorder %v2487_v2, 0.0  ;;  %v2995_v35 = vpack.c.bf16 %v2867_v59, %v2867_v59  ;;  %v2868_v11 = vsel %vm2612_vm0, %v2484_v55, %v2740_v22  ;;  %v5996_v41 = vld [vmem:[#allocation38_spill] sm:$0xff]  ;;  %v5997_v59 = vld [vmem:[#allocation39_spill] sm:$0xff] }
 0x472   : > { %3123 = vst.msk [vmem:[%s3894_s5 + $0x13c] sm:$0xf] %vm3043_vm9, %v2994_v25  ;;  %v2742_v39 = vmul.f32 0.2, %v2486_v52  ;;  %v2743_v14 = vmul.f32 0.2, %v2487_v2  ;;  %v2996_v40 = vpack.c.bf16 %v2868_v11, %v2868_v11  ;;  %v2869_v43 = vsel %vm2613_vm1, %v2485_v10, %v2741_v28 }
 0x473   : > { %v2488_v27 = vadd.f32 %v5400_v33, %v2358_v48  ;;  %v2359_v7 = vmul.f32 %v5392_v60, %v5988_v46  ;;  %3124 = vst.msk [vmem:[%s3894_s5 + $0x140] sm:$0xf] %vm3043_vm9, %v2995_v35  ;;  %v2997_v26 = vpack.c.bf16 %v2869_v43, %v2869_v43  ;;  %v2360_v42 = vmul.f32 %v5392_v60, %v5989_v51  ;;  %v5998_v43 = vld [vmem:[#allocation40_spill] sm:$0xff]  ;;  %v5999_v46 = vld [vmem:[#allocation41_spill] sm:$0xff]  ;;  %v6001_v51 = vld [vmem:[#allocation43_spill] sm:$0xff] }
 0x474   : > { %v2870_v16 = vsel %vm2614_vm2, %v2486_v52, %v2742_v39  ;;  %v2871_v34 = vsel %vm2615_vm3, %v2487_v2, %v2743_v14  ;;  %3125 = vst.msk [vmem:[%s3894_s5 + $0x144] sm:$0xf] %vm3043_vm9, %v2996_v40  ;;  %v2361_v29 = vmul.f32 %v5392_v60, %v5990_v13  ;;  %v2362_v38 = vmul.f32 %v5392_v60, %v5991_v21 }
 0x475   : > { %v2998_v49 = vpack.c.bf16 %v2870_v16, %v2870_v16  ;;  %v2999_v24 = vpack.c.bf16 %v2871_v34, %v2871_v34  ;;  %vm2616_vm4 = vcmp.gt.f32.partialorder %v2488_v27, 0.0  ;;  %v2744_v32 = vmul.f32 0.2, %v2488_v27  ;;  %3126 = vst.msk [vmem:[%s3894_s5 + $0x148] sm:$0xf] %vm3043_vm9, %v2997_v26  ;;  %v6000_v16 = vld [vmem:[#allocation42_spill] sm:$0xff] }
 0x476   : > { %v2489_v20 = vadd.f32 %v5400_v33, %v2359_v7  ;;  %v2490_v1 = vadd.f32 %v5400_v33, %v2360_v42  ;;  %v2363_v44 = vmul.f32 %v5392_v60, %v5992_v36  ;;  %v2364_v18 = vmul.f32 %v5392_v60, %v5993_v4 }
 0x477   : > { %3127 = vst.msk [vmem:[%s3894_s5 + $0x14c] sm:$0xf] %vm3043_vm9, %v2998_v49  ;;  %v2872_v58 = vsel %vm2616_vm4, %v2488_v27, %v2744_v32  ;;  %v2365_v57 = vmul.f32 %v5392_v60, %v5994_v23  ;;  %v2491_v0 = vadd.f32 %v5400_v33, %v2361_v29  ;;  %v2492_v47 = vadd.f32 %v5400_v33, %v2362_v38  ;;  %v6002_v49 = vld [vmem:[#allocation44_spill] sm:$0xff] }
 0x478   : > { %3128 = vst.msk [vmem:[%s3894_s5 + $0x150] sm:$0xf] %vm3043_vm9, %v2999_v24  ;;  %v3000_v50 = vpack.c.bf16 %v2872_v58, %v2872_v58  ;;  %vm2617_vm5 = vcmp.gt.f32.partialorder %v2489_v20, 0.0  ;;  %v2745_v54 = vmul.f32 0.2, %v2489_v20  ;;  %vm2618_vm6 = vcmp.gt.f32.partialorder %v2490_v1, 0.0 }
 0x479   : > { %v2746_v61 = vmul.f32 0.2, %v2490_v1  ;;  %v2493_v15 = vadd.f32 %v5400_v33, %v2363_v44  ;;  %v2494_v56 = vadd.f32 %v5400_v33, %v2364_v18  ;;  %v2495_v53 = vadd.f32 %v5400_v33, %v2365_v57  ;;  %v6003_v44 = vld [vmem:[#allocation45_spill] sm:$0xff] }
 0x47a   : > { %3129 = vst.msk [vmem:[%s3894_s5 + $0x154] sm:$0xf] %vm3043_vm9, %v3000_v50  ;;  %v2873_v30 = vsel %vm2617_vm5, %v2489_v20, %v2745_v54  ;;  %v2366_v3 = vmul.f32 %v5392_v60, %v5995_v17  ;;  %vm2619_vm7 = vcmp.gt.f32.partialorder %v2491_v0, 0.0  ;;  %v2747_v19 = vmul.f32 0.2, %v2491_v0 }
 0x47b   : > { %v3001_v62 = vpack.c.bf16 %v2873_v30, %v2873_v30  ;;  %v2874_v8 = vsel %vm2618_vm6, %v2490_v1, %v2746_v61  ;;  %vm2620_vm8 = vcmp.gt.f32.partialorder %v2492_v47, 0.0  ;;  %v2748_v5 = vmul.f32 0.2, %v2492_v47 }
 0x47c   : > { %v3002_v6 = vpack.c.bf16 %v2874_v8, %v2874_v8  ;;  %vm2621_vm10 = vcmp.gt.f32.partialorder %v2493_v15, 0.0  ;;  %v2875_v9 = vsel %vm2619_vm7, %v2491_v0, %v2747_v19  ;;  %v2749_v31 = vmul.f32 0.2, %v2493_v15 }
 0x47d   : > { %3130 = vst.msk [vmem:[%s3894_s5 + $0x158] sm:$0xf] %vm3043_vm9, %v3001_v62  ;;  %vm2622_vm11 = vcmp.gt.f32.partialorder %v2494_v56, 0.0  ;;  %vm2623_vm12 = vcmp.gt.f32.partialorder %v2495_v53, 0.0  ;;  %v3003_v55 = vpack.c.bf16 %v2875_v9, %v2875_v9  ;;  %v2876_v10 = vsel %vm2620_vm8, %v2492_v47, %v2748_v5  ;;  %v6004_v62 = vld [vmem:[#allocation46_spill] sm:$0xff]  ;;  %v6005_v9 = vld [vmem:[#allocation47_spill] sm:$0xff] }
 0x47e   : > { %3131 = vst.msk [vmem:[%s3894_s5 + $0x15c] sm:$0xf] %vm3043_vm9, %v3002_v6  ;;  %v2750_v45 = vmul.f32 0.2, %v2494_v56  ;;  %v2751_v52 = vmul.f32 0.2, %v2495_v53  ;;  %v3004_v2 = vpack.c.bf16 %v2876_v10, %v2876_v10  ;;  %v2877_v12 = vsel %vm2621_vm10, %v2493_v15, %v2749_v31 }
 0x47f   : > { %v2496_v48 = vadd.f32 %v5400_v33, %v2366_v3  ;;  %v2367_v63 = vmul.f32 %v5392_v60, %v5996_v41  ;;  %3132 = vst.msk [vmem:[%s3894_s5 + $0x160] sm:$0xf] %vm3043_vm9, %v3003_v55  ;;  %v3005_v37 = vpack.c.bf16 %v2877_v12, %v2877_v12  ;;  %v2368_v28 = vmul.f32 %v5392_v60, %v5997_v59  ;;  %v6006_v12 = vld [vmem:[#allocation48_spill] sm:$0xff]  ;;  %v6007_v41 = vld [vmem:[#allocation49_spill] sm:$0xff] }
 0x480   : > { %v2878_v25 = vsel %vm2622_vm11, %v2494_v56, %v2750_v45  ;;  %v2879_v22 = vsel %vm2623_vm12, %v2495_v53, %v2751_v52  ;;  %3133 = vst.msk [vmem:[%s3894_s5 + $0x164] sm:$0xf] %vm3043_vm9, %v3004_v2  ;;  %v2369_v27 = vmul.f32 %v5392_v60, %v5998_v43  ;;  %v2370_v7 = vmul.f32 %v5392_v60, %v5999_v46  ;;  %v6009_v59 = vld [vmem:[#allocation53_spill] sm:$0xff] }
 0x481   : > { %v3006_v35 = vpack.c.bf16 %v2878_v25, %v2878_v25  ;;  %v3007_v11 = vpack.c.bf16 %v2879_v22, %v2879_v22  ;;  %vm2624_vm13 = vcmp.gt.f32.partialorder %v2496_v48, 0.0  ;;  %v2752_v39 = vmul.f32 0.2, %v2496_v48  ;;  %3134 = vst.msk [vmem:[%s3894_s5 + $0x168] sm:$0xf] %vm3043_vm9, %v3005_v37  ;;  %v6008_v25 = vld [vmem:[#allocation51_spill] sm:$0xff] }
 0x482   : > { %v2497_v14 = vadd.f32 %v5400_v33, %v2367_v63  ;;  %v2498_v40 = vadd.f32 %v5400_v33, %v2368_v28  ;;  %v2371_v34 = vmul.f32 %v5392_v60, %v6000_v16  ;;  %v2372_v42 = vmul.f32 %v5392_v60, %v6001_v51 }
 0x483   : > { %3135 = vst.msk [vmem:[%s3894_s5 + $0x16c] sm:$0xf] %vm3043_vm9, %v3006_v35  ;;  %v2880_v26 = vsel %vm2624_vm13, %v2496_v48, %v2752_v39  ;;  %v2373_v24 = vmul.f32 %v5392_v60, %v6002_v49  ;;  %v2499_v13 = vadd.f32 %v5400_v33, %v2369_v27  ;;  %v2500_v29 = vadd.f32 %v5400_v33, %v2370_v7  ;;  %v6010_v35 = vld [vmem:[#allocation55_spill] sm:$0xff] }
 0x484   : > { %3136 = vst.msk [vmem:[%s3894_s5 + $0x170] sm:$0xf] %vm3043_vm9, %v3007_v11  ;;  %v3008_v32 = vpack.c.bf16 %v2880_v26, %v2880_v26  ;;  %vm2625_vm14 = vcmp.gt.f32.partialorder %v2497_v14, 0.0  ;;  %v2753_v20 = vmul.f32 0.2, %v2497_v14  ;;  %vm2626_vm15 = vcmp.gt.f32.partialorder %v2498_v40, 0.0 }
 0x485   : > { %v2754_v1 = vmul.f32 0.2, %v2498_v40  ;;  %v2501_v21 = vadd.f32 %v5400_v33, %v2371_v34  ;;  %v2502_v58 = vadd.f32 %v5400_v33, %v2372_v42  ;;  %v2503_v36 = vadd.f32 %v5400_v33, %v2373_v24  ;;  %v6011_v34 = vld [vmem:[#allocation57_spill] sm:$0xff] }
 0x486   : > { %3137 = vst.msk [vmem:[%s3894_s5 + $0x174] sm:$0xf] %vm3043_vm9, %v3008_v32  ;;  %v2881_v38 = vsel %vm2625_vm14, %v2497_v14, %v2753_v20  ;;  %v2374_v4 = vmul.f32 %v5392_v60, %v6003_v44  ;;  %vm2627_vm0 = vcmp.gt.f32.partialorder %v2499_v13, 0.0  ;;  %v2755_v57 = vmul.f32 0.2, %v2499_v13 }
 0x487   : > { %v3009_v18 = vpack.c.bf16 %v2881_v38, %v2881_v38  ;;  %v2882_v23 = vsel %vm2626_vm15, %v2498_v40, %v2754_v1  ;;  %vm2628_vm1 = vcmp.gt.f32.partialorder %v2500_v29, 0.0  ;;  %v2756_v54 = vmul.f32 0.2, %v2500_v29 }
 0x488   : > { %v3010_v50 = vpack.c.bf16 %v2882_v23, %v2882_v23  ;;  %vm2629_vm2 = vcmp.gt.f32.partialorder %v2501_v21, 0.0  ;;  %v2883_v61 = vsel %vm2627_vm0, %v2499_v13, %v2755_v57  ;;  %v2757_v0 = vmul.f32 0.2, %v2501_v21 }
 0x489   : > { %3138 = vst.msk [vmem:[%s3894_s5 + $0x178] sm:$0xf] %vm3043_vm9, %v3009_v18  ;;  %vm2630_vm3 = vcmp.gt.f32.partialorder %v2502_v58, 0.0  ;;  %vm2631_vm4 = vcmp.gt.f32.partialorder %v2503_v36, 0.0  ;;  %v3011_v47 = vpack.c.bf16 %v2883_v61, %v2883_v61  ;;  %v2884_v15 = vsel %vm2628_vm1, %v2500_v29, %v2756_v54  ;;  %v6012_v18 = vld [vmem:[#allocation59_spill] sm:$0xff]  ;;  %v6013_v61 = vld [vmem:[#allocation61_spill] sm:$0xff] }
 0x48a   : > { %3139 = vst.msk [vmem:[%s3894_s5 + $0x17c] sm:$0xf] %vm3043_vm9, %v3010_v50  ;;  %v2758_v30 = vmul.f32 0.2, %v2502_v58  ;;  %v2759_v56 = vmul.f32 0.2, %v2503_v36  ;;  %v3012_v53 = vpack.c.bf16 %v2884_v15, %v2884_v15  ;;  %v2885_v17 = vsel %vm2629_vm2, %v2501_v21, %v2757_v0 }
 0x48b   : > { %v2504_v3 = vadd.f32 %v5400_v33, %v2374_v4  ;;  %v2375_v8 = vmul.f32 %v5392_v60, %v6004_v62  ;;  %3140 = vst.msk [vmem:[%s3894_s5 + $0x180] sm:$0xf] %vm3043_vm9, %v3011_v47  ;;  %v3013_v19 = vpack.c.bf16 %v2885_v17, %v2885_v17  ;;  %v2376_v31 = vmul.f32 %v5392_v60, %v6005_v9  ;;  %v6014_v17 = vld [vmem:[#allocation63_spill] sm:$0xff]  ;;  %v6015_v62 = vld [vmem:[#allocation65_spill] sm:$0xff] }
 0x48c   : > { %v2886_v6 = vsel %vm2630_vm3, %v2502_v58, %v2758_v30  ;;  %v2887_v5 = vsel %vm2631_vm4, %v2503_v36, %v2759_v56  ;;  %3141 = vst.msk [vmem:[%s3894_s5 + $0x184] sm:$0xf] %vm3043_vm9, %v3012_v53  ;;  %v2377_v48 = vmul.f32 %v5392_v60, %v6006_v12  ;;  %v2378_v63 = vmul.f32 %v5392_v60, %v6007_v41  ;;  %v6017_v9 = vld [vmem:[#allocation69_spill] sm:$0xff] }
 0x48d   : > { %v3014_v55 = vpack.c.bf16 %v2886_v6, %v2886_v6  ;;  %v3015_v10 = vpack.c.bf16 %v2887_v5, %v2887_v5  ;;  %vm2632_vm5 = vcmp.gt.f32.partialorder %v2504_v3, 0.0  ;;  %v2760_v45 = vmul.f32 0.2, %v2504_v3  ;;  %3142 = vst.msk [vmem:[%s3894_s5 + $0x188] sm:$0xf] %vm3043_vm9, %v3013_v19  ;;  %v6016_v6 = vld [vmem:[#allocation67_spill] sm:$0xff] }
 0x48e   : > { %v2505_v52 = vadd.f32 %v5400_v33, %v2375_v8  ;;  %v2506_v2 = vadd.f32 %v5400_v33, %v2376_v31  ;;  %v2379_v22 = vmul.f32 %v5392_v60, %v6008_v25  ;;  %v2380_v28 = vmul.f32 %v5392_v60, %v6009_v59 }
 0x48f   : > { %3143 = vst.msk [vmem:[%s3894_s5 + $0x18c] sm:$0xf] %vm3043_vm9, %v3014_v55  ;;  %v2888_v37 = vsel %vm2632_vm5, %v2504_v3, %v2760_v45  ;;  %v2381_v11 = vmul.f32 %v5392_v60, %v6010_v35  ;;  %v2507_v43 = vadd.f32 %v5400_v33, %v2377_v48  ;;  %v2508_v27 = vadd.f32 %v5400_v33, %v2378_v63  ;;  %v6018_v55 = vld [vmem:[#allocation71_spill] sm:$0xff] }
 0x490   : > { %3144 = vst.msk [vmem:[%s3894_s5 + $0x190] sm:$0xf] %vm3043_vm9, %v3015_v10  ;;  %v3016_v39 = vpack.c.bf16 %v2888_v37, %v2888_v37  ;;  %vm2633_vm6 = vcmp.gt.f32.partialorder %v2505_v52, 0.0  ;;  %v2761_v14 = vmul.f32 0.2, %v2505_v52  ;;  %vm2634_vm7 = vcmp.gt.f32.partialorder %v2506_v2, 0.0 }
 0x491   : > { %v2762_v40 = vmul.f32 0.2, %v2506_v2  ;;  %v2509_v46 = vadd.f32 %v5400_v33, %v2379_v22  ;;  %v2510_v26 = vadd.f32 %v5400_v33, %v2380_v28  ;;  %v2511_v16 = vadd.f32 %v5400_v33, %v2381_v11  ;;  %v6019_v22 = vld [vmem:[#allocation73_spill] sm:$0xff] }
 0x492   : > { %3145 = vst.msk [vmem:[%s3894_s5 + $0x194] sm:$0xf] %vm3043_vm9, %v3016_v39  ;;  %v2889_v7 = vsel %vm2633_vm6, %v2505_v52, %v2761_v14  ;;  %v2382_v51 = vmul.f32 %v5392_v60, %v6011_v34  ;;  %vm2635_vm8 = vcmp.gt.f32.partialorder %v2507_v43, 0.0  ;;  %v2763_v24 = vmul.f32 0.2, %v2507_v43 }
 0x493   : > { %v3017_v42 = vpack.c.bf16 %v2889_v7, %v2889_v7  ;;  %v2890_v49 = vsel %vm2634_vm7, %v2506_v2, %v2762_v40  ;;  %vm2636_vm10 = vcmp.gt.f32.partialorder %v2508_v27, 0.0  ;;  %v2764_v20 = vmul.f32 0.2, %v2508_v27 }
 0x494   : > { %v3018_v32 = vpack.c.bf16 %v2890_v49, %v2890_v49  ;;  %vm2637_vm11 = vcmp.gt.f32.partialorder %v2509_v46, 0.0  ;;  %v2891_v1 = vsel %vm2635_vm8, %v2507_v43, %v2763_v24  ;;  %v2765_v13 = vmul.f32 0.2, %v2509_v46 }
 0x495   : > { %3146 = vst.msk [vmem:[%s3894_s5 + $0x198] sm:$0xf] %vm3043_vm9, %v3017_v42  ;;  %vm2638_vm12 = vcmp.gt.f32.partialorder %v2510_v26, 0.0  ;;  %vm2639_vm13 = vcmp.gt.f32.partialorder %v2511_v16, 0.0  ;;  %v3019_v29 = vpack.c.bf16 %v2891_v1, %v2891_v1  ;;  %v2892_v21 = vsel %vm2636_vm10, %v2508_v27, %v2764_v20  ;;  %v6020_v42 = vld [vmem:[#allocation75_spill] sm:$0xff]  ;;  %v6021_v1 = vld [vmem:[#allocation77_spill] sm:$0xff] }
 0x496   : > { %3147 = vst.msk [vmem:[%s3894_s5 + $0x19c] sm:$0xf] %vm3043_vm9, %v3018_v32  ;;  %v2766_v38 = vmul.f32 0.2, %v2510_v26  ;;  %v2767_v58 = vmul.f32 0.2, %v2511_v16  ;;  %v3020_v36 = vpack.c.bf16 %v2892_v21, %v2892_v21  ;;  %v2893_v44 = vsel %vm2637_vm11, %v2509_v46, %v2765_v13 }
 0x497   : > { %v2512_v4 = vadd.f32 %v5400_v33, %v2382_v51  ;;  %v2383_v23 = vmul.f32 %v5392_v60, %v6012_v18  ;;  %3148 = vst.msk [vmem:[%s3894_s5 + $0x1a0] sm:$0xf] %vm3043_vm9, %v3019_v29  ;;  %v3021_v57 = vpack.c.bf16 %v2893_v44, %v2893_v44  ;;  %v2384_v0 = vmul.f32 %v5392_v60, %v6013_v61  ;;  %v6022_v44 = vld [vmem:[#allocation79_spill] sm:$0xff]  ;;  %v6023_v18 = vld [vmem:[#allocation81_spill] sm:$0xff] }
 0x498   : > { %v2894_v50 = vsel %vm2638_vm12, %v2510_v26, %v2766_v38  ;;  %v2895_v54 = vsel %vm2639_vm13, %v2511_v16, %v2767_v58  ;;  %3149 = vst.msk [vmem:[%s3894_s5 + $0x1a4] sm:$0xf] %vm3043_vm9, %v3020_v36  ;;  %v2385_v3 = vmul.f32 %v5392_v60, %v6014_v17  ;;  %v2386_v8 = vmul.f32 %v5392_v60, %v6015_v62  ;;  %v6025_v61 = vld [vmem:[#allocation85_spill] sm:$0xff] }
 0x499   : > { %v3022_v47 = vpack.c.bf16 %v2894_v50, %v2894_v50  ;;  %v3023_v15 = vpack.c.bf16 %v2895_v54, %v2895_v54  ;;  %vm2640_vm14 = vcmp.gt.f32.partialorder %v2512_v4, 0.0  ;;  %v2768_v30 = vmul.f32 0.2, %v2512_v4  ;;  %3150 = vst.msk [vmem:[%s3894_s5 + $0x1a8] sm:$0xf] %vm3043_vm9, %v3021_v57  ;;  %v6024_v50 = vld [vmem:[#allocation83_spill] sm:$0xff] }
 0x49a   : > { %v2513_v56 = vadd.f32 %v5400_v33, %v2383_v23  ;;  %v2514_v53 = vadd.f32 %v5400_v33, %v2384_v0  ;;  %v2387_v5 = vmul.f32 %v5392_v60, %v6016_v6  ;;  %v2388_v31 = vmul.f32 %v5392_v60, %v6017_v9 }
 0x49b   : > { %3151 = vst.msk [vmem:[%s3894_s5 + $0x1ac] sm:$0xf] %vm3043_vm9, %v3022_v47  ;;  %v2896_v19 = vsel %vm2640_vm14, %v2512_v4, %v2768_v30  ;;  %v2389_v10 = vmul.f32 %v5392_v60, %v6018_v55  ;;  %v2515_v12 = vadd.f32 %v5400_v33, %v2385_v3  ;;  %v2516_v48 = vadd.f32 %v5400_v33, %v2386_v8  ;;  %v6026_v47 = vld [vmem:[#allocation87_spill] sm:$0xff] }
 0x49c   : > { %3152 = vst.msk [vmem:[%s3894_s5 + $0x1b0] sm:$0xf] %vm3043_vm9, %v3023_v15  ;;  %v3024_v45 = vpack.c.bf16 %v2896_v19, %v2896_v19  ;;  %vm2641_vm15 = vcmp.gt.f32.partialorder %v2513_v56, 0.0  ;;  %v2769_v52 = vmul.f32 0.2, %v2513_v56  ;;  %vm2642_vm0 = vcmp.gt.f32.partialorder %v2514_v53, 0.0 }
 0x49d   : > { %v2770_v2 = vmul.f32 0.2, %v2514_v53  ;;  %v2517_v41 = vadd.f32 %v5400_v33, %v2387_v5  ;;  %v2518_v37 = vadd.f32 %v5400_v33, %v2388_v31  ;;  %v2519_v25 = vadd.f32 %v5400_v33, %v2389_v10  ;;  %v6027_v5 = vld [vmem:[#allocation88_spill] sm:$0xff] }
 0x49e   : > { %3153 = vst.msk [vmem:[%s3894_s5 + $0x1b4] sm:$0xf] %vm3043_vm9, %v3024_v45  ;;  %v2897_v63 = vsel %vm2641_vm15, %v2513_v56, %v2769_v52  ;;  %v2390_v59 = vmul.f32 %v5392_v60, %v6019_v22  ;;  %vm2643_vm1 = vcmp.gt.f32.partialorder %v2515_v12, 0.0  ;;  %v2771_v11 = vmul.f32 0.2, %v2515_v12 }
 0x49f   : > { %v3025_v28 = vpack.c.bf16 %v2897_v63, %v2897_v63  ;;  %v2898_v35 = vsel %vm2642_vm0, %v2514_v53, %v2770_v2  ;;  %vm2644_vm2 = vcmp.gt.f32.partialorder %v2516_v48, 0.0  ;;  %v2772_v14 = vmul.f32 0.2, %v2516_v48 }
 0x4a0   : > { %v3026_v39 = vpack.c.bf16 %v2898_v35, %v2898_v35  ;;  %vm2645_vm3 = vcmp.gt.f32.partialorder %v2517_v41, 0.0  ;;  %v2899_v40 = vsel %vm2643_vm1, %v2515_v12, %v2771_v11  ;;  %v2773_v43 = vmul.f32 0.2, %v2517_v41 }
 0x4a1   : > { %3154 = vst.msk [vmem:[%s3894_s5 + $0x1b8] sm:$0xf] %vm3043_vm9, %v3025_v28  ;;  %vm2646_vm4 = vcmp.gt.f32.partialorder %v2518_v37, 0.0  ;;  %vm2647_vm5 = vcmp.gt.f32.partialorder %v2519_v25, 0.0  ;;  %v3027_v27 = vpack.c.bf16 %v2899_v40, %v2899_v40  ;;  %v2900_v46 = vsel %vm2644_vm2, %v2516_v48, %v2772_v14  ;;  %v6028_v28 = vld [vmem:[#allocation89_spill] sm:$0xff]  ;;  %v6029_v40 = vld [vmem:[#allocation91_spill] sm:$0xff] }
 0x4a2   : > { %3155 = vst.msk [vmem:[%s3894_s5 + $0x1bc] sm:$0xf] %vm3043_vm9, %v3026_v39  ;;  %v2774_v7 = vmul.f32 0.2, %v2518_v37  ;;  %v2775_v26 = vmul.f32 0.2, %v2519_v25  ;;  %v3028_v16 = vpack.c.bf16 %v2900_v46, %v2900_v46  ;;  %v2901_v34 = vsel %vm2645_vm3, %v2517_v41, %v2773_v43 }
 0x4a3   : > { %v2520_v51 = vadd.f32 %v5400_v33, %v2390_v59  ;;  %v2391_v49 = vmul.f32 %v5392_v60, %v6020_v42  ;;  %3156 = vst.msk [vmem:[%s3894_s5 + $0x1c0] sm:$0xf] %vm3043_vm9, %v3027_v27  ;;  %v3029_v24 = vpack.c.bf16 %v2901_v34, %v2901_v34  ;;  %v2392_v13 = vmul.f32 %v5392_v60, %v6021_v1 }
 0x4a4   : > { %v2902_v32 = vsel %vm2646_vm4, %v2518_v37, %v2774_v7  ;;  %v2903_v20 = vsel %vm2647_vm5, %v2519_v25, %v2775_v26  ;;  %3157 = vst.msk [vmem:[%s3894_s5 + $0x1c4] sm:$0xf] %vm3043_vm9, %v3028_v16  ;;  %v2393_v4 = vmul.f32 %v5392_v60, %v6022_v44  ;;  %v2394_v23 = vmul.f32 %v5392_v60, %v6023_v18 }
 0x4a5   : > { %v3030_v29 = vpack.c.bf16 %v2902_v32, %v2902_v32  ;;  %v3031_v21 = vpack.c.bf16 %v2903_v20, %v2903_v20  ;;  %vm2648_vm6 = vcmp.gt.f32.partialorder %v2520_v51, 0.0  ;;  %v2776_v38 = vmul.f32 0.2, %v2520_v51  ;;  %3158 = vst.msk [vmem:[%s3894_s5 + $0x1c8] sm:$0xf] %vm3043_vm9, %v3029_v24 }
 0x4a6   : > { %v2521_v58 = vadd.f32 %v5400_v33, %v2391_v49  ;;  %v2522_v36 = vadd.f32 %v5400_v33, %v2392_v13  ;;  %v2395_v54 = vmul.f32 %v5392_v60, %v6024_v50  ;;  %v2396_v0 = vmul.f32 %v5392_v60, %v6025_v61 }
 0x4a7   : > { %3159 = vst.msk [vmem:[%s3894_s5 + $0x1cc] sm:$0xf] %vm3043_vm9, %v3030_v29  ;;  %v2904_v57 = vsel %vm2648_vm6, %v2520_v51, %v2776_v38  ;;  %v2397_v15 = vmul.f32 %v5392_v60, %v6026_v47  ;;  %v2523_v17 = vadd.f32 %v5400_v33, %v2393_v4  ;;  %v2524_v3 = vadd.f32 %v5400_v33, %v2394_v23 }
 0x4a8   : > { %3160 = vst.msk [vmem:[%s3894_s5 + $0x1d0] sm:$0xf] %vm3043_vm9, %v3031_v21  ;;  %v3032_v30 = vpack.c.bf16 %v2904_v57, %v2904_v57  ;;  %vm2649_vm7 = vcmp.gt.f32.partialorder %v2521_v58, 0.0  ;;  %v2777_v56 = vmul.f32 0.2, %v2521_v58  ;;  %vm2650_vm8 = vcmp.gt.f32.partialorder %v2522_v36, 0.0 }
 0x4a9   : > { %v2778_v53 = vmul.f32 0.2, %v2522_v36  ;;  %v2525_v62 = vadd.f32 %v5400_v33, %v2395_v54  ;;  %v2526_v19 = vadd.f32 %v5400_v33, %v2396_v0  ;;  %v2527_v6 = vadd.f32 %v5400_v33, %v2397_v15 }
 0x4aa   : > { %3161 = vst.msk [vmem:[%s3894_s5 + $0x1d4] sm:$0xf] %vm3043_vm9, %v3032_v30  ;;  %v2905_v8 = vsel %vm2649_vm7, %v2521_v58, %v2777_v56  ;;  %v2398_v9 = vmul.f32 %v5392_v60, %v6027_v5  ;;  %vm2651_vm10 = vcmp.gt.f32.partialorder %v2523_v17, 0.0  ;;  %v2779_v10 = vmul.f32 0.2, %v2523_v17 }
 0x4ab   : > { %v3033_v31 = vpack.c.bf16 %v2905_v8, %v2905_v8  ;;  %v2906_v55 = vsel %vm2650_vm8, %v2522_v36, %v2778_v53  ;;  %vm2652_vm11 = vcmp.gt.f32.partialorder %v2524_v3, 0.0  ;;  %v2780_v52 = vmul.f32 0.2, %v2524_v3 }
 0x4ac   : > { %v3034_v45 = vpack.c.bf16 %v2906_v55, %v2906_v55  ;;  %vm2653_vm12 = vcmp.gt.f32.partialorder %v2525_v62, 0.0  ;;  %v2907_v2 = vsel %vm2651_vm10, %v2523_v17, %v2779_v10  ;;  %v2781_v12 = vmul.f32 0.2, %v2525_v62 }
 0x4ad   : > { %3162 = vst.msk [vmem:[%s3894_s5 + $0x1d8] sm:$0xf] %vm3043_vm9, %v3033_v31  ;;  %vm2654_vm13 = vcmp.gt.f32.partialorder %v2526_v19, 0.0  ;;  %vm2655_vm14 = vcmp.gt.f32.partialorder %v2527_v6, 0.0  ;;  %v3035_v48 = vpack.c.bf16 %v2907_v2, %v2907_v2  ;;  %v2908_v41 = vsel %vm2652_vm11, %v2524_v3, %v2780_v52 }
 0x4ae   : > { %3163 = vst.msk [vmem:[%s3894_s5 + $0x1dc] sm:$0xf] %vm3043_vm9, %v3034_v45  ;;  %v2782_v63 = vmul.f32 0.2, %v2526_v19  ;;  %v2783_v37 = vmul.f32 0.2, %v2527_v6  ;;  %v3036_v25 = vpack.c.bf16 %v2908_v41, %v2908_v41  ;;  %v2909_v22 = vsel %vm2653_vm12, %v2525_v62, %v2781_v12 }
 0x4af   : > { %v2528_v59 = vadd.f32 %v5400_v33, %v2398_v9  ;;  %v2399_v35 = vmul.f32 %v5392_v60, %v6028_v28  ;;  %3164 = vst.msk [vmem:[%s3894_s5 + $0x1e0] sm:$0xf] %vm3043_vm9, %v3035_v48  ;;  %v3037_v11 = vpack.c.bf16 %v2909_v22, %v2909_v22  ;;  %v2400_v43 = vmul.f32 %v5392_v60, %v6029_v40 }
 0x4b0   : > { %v2910_v39 = vsel %vm2654_vm13, %v2526_v19, %v2782_v63  ;;  %v2911_v14 = vsel %vm2655_vm14, %v2527_v6, %v2783_v37  ;;  %3165 = vst.msk [vmem:[%s3894_s5 + $0x1e4] sm:$0xf] %vm3043_vm9, %v3036_v25 }
 0x4b1   : > { %v3038_v27 = vpack.c.bf16 %v2910_v39, %v2910_v39  ;;  %v3039_v46 = vpack.c.bf16 %v2911_v14, %v2911_v14  ;;  %vm2656_vm15 = vcmp.gt.f32.partialorder %v2528_v59, 0.0  ;;  %v2784_v7 = vmul.f32 0.2, %v2528_v59  ;;  %3166 = vst.msk [vmem:[%s3894_s5 + $0x1e8] sm:$0xf] %vm3043_vm9, %v3037_v11 }
 0x4b2   : > { %v2529_v26 = vadd.f32 %v5400_v33, %v2399_v35  ;;  %v2530_v16 = vadd.f32 %v5400_v33, %v2400_v43 }
 0x4b3   : > { %3167 = vst.msk [vmem:[%s3894_s5 + $0x1ec] sm:$0xf] %vm3043_vm9, %v3038_v27  ;;  %v2912_v34 = vsel %vm2656_vm15, %v2528_v59, %v2784_v7 }
 0x4b4   : > { %3168 = vst.msk [vmem:[%s3894_s5 + $0x1f0] sm:$0xf] %vm3043_vm9, %v3039_v46  ;;  %v3040_v60 = vpack.c.bf16 %v2912_v34, %v2912_v34  ;;  %vm2657_vm0 = vcmp.gt.f32.partialorder %v2529_v26, 0.0  ;;  %v2785_v51 = vmul.f32 0.2, %v2529_v26  ;;  %vm2658_vm1 = vcmp.gt.f32.partialorder %v2530_v16, 0.0 }
 0x4b5   : > { %v2786_v42 = vmul.f32 0.2, %v2530_v16 }
 0x4b6   : > { %3169 = vst.msk [vmem:[%s3894_s5 + $0x1f4] sm:$0xf] %vm3043_vm9, %v3040_v60  ;;  %v2913_v49 = vsel %vm2657_vm0, %v2529_v26, %v2785_v51 }
 0x4b7   : > { %v3041_v24 = vpack.c.bf16 %v2913_v49, %v2913_v49  ;;  %v2914_v32 = vsel %vm2658_vm1, %v2530_v16, %v2786_v42 }
 0x4b8   : > { %v3042_v20 = vpack.c.bf16 %v2914_v32, %v2914_v32 }
 0x4b9   : > { %3170 = vst.msk [vmem:[%s3894_s5 + $0x1f8] sm:$0xf] %vm3043_vm9, %v3041_v24 }
 0x4ba   : > { %3171 = vst.msk [vmem:[%s3894_s5 + $0x1fc] sm:$0xf] %vm3043_vm9, %v3042_v20 }
 0x4bb PF: > { %s14_s19 = sadd.s32 1, %s3816_s19   ;;  %s6030_s15 = smov %s3808_s17 }
 0x4bc   : > { %p11_p0 = scmp.ge.s32.totalorder %s14_s19, 6   ;;  %s6031_s16 = smov %s3812_s18 }
 0x4bd   : > { %s6032_s17 = smov %s6035_s20  ;;  %s6033_s18 = smov %s6039_s21 }
 0x4be   :  { %13 = sbr.rel (!%p11_p0) target bundleno = 3 (0x3), region = 83 }

// kernel: discriminator_forward.5
= control target key start
LH: loop header
LB: loop body
LE: loop exit
PB: predicated region body
PF: predicated region fallthrough
CT: control target
= control target key end

     0   :  { %s1451_s15 = smov 0   ;;  %s1453_s16 = smov 0   ;;  %s1990_s0 = inlined_call_operand.vmem [shape: bf16[2,272,64], index: 0, kind: input, shape index: {}]   ;;  %s1991_s1 = inlined_call_operand.vmem [shape: bf16[2,64,16], index: 1, kind: input, shape index: {}]   ;;  %s1992_s2 = inlined_call_operand.vmem [shape: f32[1,16], index: 2, kind: input, shape index: {}]   ;;  %s1993_s3 = inlined_call_operand.vmem [shape: f32[1,16], index: 3, kind: input, shape index: {}]   ;;  %s1994_s4 = inlined_call_operand.vmem [shape: bf16[2,256,16], index: 4, kind: output, shape index: {}]  }
   0x1   :  { %s1455_s17 = smov 0   ;;  %s1457_s18 = smov 0  }
   0x2   :  { %s1459_s19 = smov 0  }
   0x3 LB: > { %s23_s20 = sadd.s32 1, %s1415_s17  ;;  %s26_s21 = sadd.s32 1, %s1419_s18  ;;  %s1423_s19 = sphi %s1459_s19, %s14_s19   ;;  %s1419_s18 = sphi %s1457_s18, %s1998_s18   ;;  %s1415_s17 = sphi %s1455_s17, %s1997_s17   ;;  %s1411_s16 = sphi %s1453_s16, %s1996_s16   ;;  %s1407_s15 = sphi %s1451_s15, %s1995_s15  }
   0x4   : > { %p24_p0 = scmp.ge.s32.totalorder %s23_s20, 2  ;;  %p1157_p1 = scmp.ge.s32.totalorder %s1423_s19, 1 }
   0x5   : > { %p176_p2 = scmp.lt.s32.totalorder %s1423_s19, 5 }
   0x6   : > { %s2000_s20 = smov (%p24_p0, %s23_s20), 0  ;;  %s2002_s21 = smov (!%p24_p0, %s26_s21), %s1419_s18 }
   0x7   : > { %p177_p3 = pnand %p1157_p1, %p176_p2  ;;  %p28_p4 = scmp.ge.s32.totalorder %s2002_s21, 2 }
   0x8   : > { %p203_p5 = scmp.lt.s32.totalorder (!%p177_p3), %s1407_s15, 1  ;;  %s208_s22 = smul.u32 (!%p177_p3), %s1407_s15, %s1411_s16 }
   0x9   : > { %s2004_s21 = smov (%p28_p4, %s2002_s21), 0  ;;  %180 = sbr.rel (%p177_p3) target bundleno = 481 (0x1e1), region = 36 }
   0xa   : > { %p216_p6 = scmp.eq.s32.totalorder (!%p177_p3), %s1411_s16, 0  ;;  %p217_p7 = scmp.eq.s32.totalorder (!%p177_p3), %s1407_s15, 0 }
   0xb   : > { %p209_p8 = scmp.lt.s32.totalorder (!%p177_p3), %s208_s22, 1 }
   0xc   : > { %p218_p9 = pnand (!%p177_p3), %p217_p7, %p216_p6 }
   0xe   : > { %s204_s23 = scalar_select %p203_p5, %s1407_s15, 1 }
   0xf   : > { %s2006_s22 = smov (!%p209_p8, %s208_s22), 1  ;;  %221 = sbr.rel (%p218_p9) target bundleno = 22 (0x16), region = 40 }
  0x10   : > { %s1339_s24 = smul.u32 136, %s204_s23  ;;  %s1305_s28 = sshll.u32 %s2006_s22, 7 }
  0x11   : > { %s1501_s5 = scalar_lea.vmem %s1994_s4, %s1305_s28 }
  0x12   : > { %s1496_s27 = scalar_lea.vmem %s1990_s0, %s1339_s24 }
  0x14   : > { %vm222_vm0 = vcmask 130048   ;;  %v1425_v0 = vmov 0.0  }
  0x15   : > { %223 = vst.msk [vmem:[#allocation2] sm:$0xff] %vm222_vm0, %v1425_v0 }
  0x16 PF: > { %v1330_v1 = vld [vmem:[%s1991_s1 + $0x38] sm:$0xff]  ;;  %v1329_v3 = vld [vmem:[%s1991_s1 + $0x30] sm:$0xff]  ;;  %v1328_v5 = vld [vmem:[%s1991_s1 + $0x28] sm:$0xff]  ;;  %vm379_vm1 = vcmask 523264   ;;  %p1301_p10 = scmp.ne.s32.totalorder %s1411_s16, 0 }
  0x17   : > { %v1325_v2 = vld [vmem:[%s1991_s1 + $0x18] sm:$0xff]  ;;  %432 = vmatpush.bf16.msra.mxu0 %v1330_v1  ;;  %1331 = vmatpush.bf16.msra.mxu2 %v1330_v1  ;;  %v1324_v4 = vld [vmem:[%s1991_s1 + $0x10] sm:$0xff]  ;;  %v1323_v6 = vld [vmem:[%s1991_s1 + $0x8] sm:$0xff] }
  0x18   : > { %553 = vmatpush.bf16.msra.mxu1 %v1325_v2  ;;  %1335 = vmatpush.bf16.msra.mxu3 %v1325_v2  ;;  %v1327_v7 = vld [vmem:[%s1991_s1 + $0x20] sm:$0xff]  ;;  %v1307_v9 = vld [vmem:[%s1496_s27 + $0x8] sm:$0xff]  ;;  %v1308_v13 = vld [vmem:[%s1496_s27 + $0x10] sm:$0xff] }
  0x19   : > { %v1322_v8 = vld [vmem:[%s1991_s1] sm:$0xff]  ;;  %v1315_v10 = vld [vmem:[%s1496_s27 + $0x48] sm:$0xff]  ;;  %v1316_v14 = vld [vmem:[%s1496_s27 + $0x50] sm:$0xff] }
  0x1a   : > { %v1306_v11 = vld [vmem:[%s1496_s27] sm:$0xff]  ;;  %v1309_v15 = vld [vmem:[%s1496_s27 + $0x18] sm:$0xff]  ;;  %v1311_v19 = vld [vmem:[%s1496_s27 + $0x28] sm:$0xff] }
  0x1b   : > { %433 = vmatpush.bf16.msra.mxu0 %v1329_v3  ;;  %1332 = vmatpush.bf16.msra.mxu2 %v1329_v3  ;;  %v1314_v12 = vld [vmem:[%s1496_s27 + $0x40] sm:$0xff]  ;;  %v1317_v16 = vld [vmem:[%s1496_s27 + $0x58] sm:$0xff]  ;;  %v1319_v20 = vld [vmem:[%s1496_s27 + $0x68] sm:$0xff] }
  0x1c   : > { %554 = vmatpush.bf16.msra.mxu1 %v1324_v4  ;;  %1336 = vmatpush.bf16.msra.mxu3 %v1324_v4  ;;  %v1310_v17 = vld [vmem:[%s1496_s27 + $0x20] sm:$0xff]  ;;  %v1312_v21 = vld [vmem:[%s1496_s27 + $0x30] sm:$0xff]  ;;  %v1313_v23 = vld [vmem:[%s1496_s27 + $0x38] sm:$0xff] }
  0x1d   : > { %v1318_v18 = vld [vmem:[%s1496_s27 + $0x60] sm:$0xff]  ;;  %v1320_v22 = vld [vmem:[%s1496_s27 + $0x70] sm:$0xff]  ;;  %v1321_v24 = vld [vmem:[%s1496_s27 + $0x78] sm:$0xff] }
  0x1e   : > { %v1326_v25 = vld [vmem:[%s1496_s27 + $0x80] sm:$0xff] }
  0x1f   : > { %434 = vmatpush.bf16.msra.mxu0 %v1328_v5  ;;  %1333 = vmatpush.bf16.msra.mxu2 %v1328_v5 }
  0x20   : > { %555 = vmatpush.bf16.msra.mxu1 %v1323_v6  ;;  %1337 = vmatpush.bf16.msra.mxu3 %v1323_v6 }
  0x23   : > { %435 = vmatpush.bf16.msra.mxu0 %v1327_v7  ;;  %1334 = vmatpush.bf16.msra.mxu2 %v1327_v7 }
  0x24   : > { %556 = vmatpush.bf16.msra.mxu1 %v1322_v8  ;;  %1338 = vmatpush.bf16.msra.mxu3 %v1322_v8 }
  0x26   : > { %1249 = vmatmul.msk.bf16.vlgmr.msra.gmra.mxu0 %vm379_vm1, %v1307_v9  ;;  %1257 = vmatmul.msk.bf16.vlgmr.msra.gmra.mxu2 %vm379_vm1, %v1315_v10 }
  0x27   : > { %1285 = vmatmul.msk.bf16.vlgmr.msra.gmra.mxu1 %vm379_vm1, %v1306_v11  ;;  %1293 = vmatmul.msk.bf16.vlgmr.msra.gmra.mxu3 %vm379_vm1, %v1314_v12 }
  0x36   : > { %1250 = vmatmul.msk.bf16.gmra.mxu0 %vm379_vm1, %v1308_v13  ;;  %1258 = vmatmul.msk.bf16.gmra.mxu2 %vm379_vm1, %v1316_v14 }
  0x37   : > { %1286 = vmatmul.msk.bf16.gmra.mxu1 %vm379_vm1, %v1307_v9  ;;  %1294 = vmatmul.msk.bf16.gmra.mxu3 %vm379_vm1, %v1315_v10 }
  0x46   : > { %1251 = vmatmul.msk.bf16.gmra.mxu0 %vm379_vm1, %v1309_v15  ;;  %1259 = vmatmul.msk.bf16.gmra.mxu2 %vm379_vm1, %v1317_v16 }
  0x47   : > { %1287 = vmatmul.msk.bf16.gmra.mxu1 %vm379_vm1, %v1308_v13  ;;  %1295 = vmatmul.msk.bf16.gmra.mxu3 %vm379_vm1, %v1316_v14 }
  0x56   : > { %1252 = vmatmul.msk.bf16.gmra.mxu0 %vm379_vm1, %v1310_v17  ;;  %1260 = vmatmul.msk.bf16.gmra.mxu2 %vm379_vm1, %v1318_v18 }
  0x57   : > { %1288 = vmatmul.msk.bf16.gmra.mxu1 %vm379_vm1, %v1309_v15  ;;  %1296 = vmatmul.msk.bf16.gmra.mxu3 %vm379_vm1, %v1317_v16 }
  0x66   : > { %1253 = vmatmul.msk.bf16.gmra.mxu0 %vm379_vm1, %v1311_v19  ;;  %1261 = vmatmul.msk.bf16.gmra.mxu2 %vm379_vm1, %v1319_v20 }
  0x67   : > { %1289 = vmatmul.msk.bf16.gmra.mxu1 %vm379_vm1, %v1310_v17  ;;  %1297 = vmatmul.msk.bf16.gmra.mxu3 %vm379_vm1, %v1318_v18 }
  0x76   : > { %1254 = vmatmul.msk.bf16.gmra.mxu0 %vm379_vm1, %v1312_v21  ;;  %1262 = vmatmul.msk.bf16.gmra.mxu2 %vm379_vm1, %v1320_v22 }
  0x77   : > { %1290 = vmatmul.msk.bf16.gmra.mxu1 %vm379_vm1, %v1311_v19  ;;  %1298 = vmatmul.msk.bf16.gmra.mxu3 %vm379_vm1, %v1319_v20 }
  0x86   : > { %1255 = vmatmul.msk.bf16.gmra.mxu0 %vm379_vm1, %v1313_v23  ;;  %1263 = vmatmul.msk.bf16.gmra.mxu2 %vm379_vm1, %v1321_v24 }
  0x87   : > { %1291 = vmatmul.msk.bf16.gmra.mxu1 %vm379_vm1, %v1312_v21  ;;  %1299 = vmatmul.msk.bf16.gmra.mxu3 %vm379_vm1, %v1320_v22 }
  0x96   : > { %1256 = vmatmul.msk.bf16.gmra.mxu0 %vm379_vm1, %v1314_v12  ;;  %1264 = vmatmul.msk.bf16.gmra.mxu2 %vm379_vm1, %v1326_v25 }
  0x97   : > { %1292 = vmatmul.msk.bf16.gmra.mxu1 %vm379_vm1, %v1313_v23  ;;  %1300 = vmatmul.msk.bf16.gmra.mxu3 %vm379_vm1, %v1321_v24 }
  0xa3   : > { %v437_v26 = vpop.f32.mrf.mxu0 }
  0xa4   : > { %v558_v27 = vpop.f32.mrf.mxu1 }
  0xa5   : > { %v1576_v28 = vadd.f32 %v558_v27, %v437_v26 }
  0xa9   : > { %v477_v29 = vpop.f32.mrf.mxu2 }
  0xaa   : > { %v598_v30 = vpop.f32.mrf.mxu3 }
  0xab   : > { %v1578_v31 = vadd.f32 %v598_v30, %v477_v29  ;;  %v439_v32 = vpop.f32.mrf.mxu0 }
  0xac   : > { %v560_v33 = vpop.f32.mrf.mxu1 }
  0xad   : > { %v1580_v34 = vadd.f32 %v560_v33, %v439_v32 }
  0xb1   : > { %v479_v35 = vpop.f32.mrf.mxu2 }
  0xb2   : > { %v600_v36 = vpop.f32.mrf.mxu3 }
  0xb3   : > { %v1582_v37 = vadd.f32 %v600_v36, %v479_v35  ;;  %v442_v38 = vpop.f32.mrf.mxu0 }
  0xb4   : > { %v563_v39 = vpop.f32.mrf.mxu1 }
  0xb5   : > { %v1584_v40 = vadd.f32 %v563_v39, %v442_v38 }
  0xb9   : > { %v482_v41 = vpop.f32.mrf.mxu2 }
  0xba   : > { %v603_v42 = vpop.f32.mrf.mxu3 }
  0xbb   : > { %v1586_v43 = vadd.f32 %v603_v42, %v482_v41  ;;  %v444_v44 = vpop.f32.mrf.mxu0 }
  0xbc   : > { %v565_v45 = vpop.f32.mrf.mxu1 }
  0xbd   : > { %v1588_v46 = vadd.f32 %v565_v45, %v444_v44 }
  0xc1   : > { %v484_v47 = vpop.f32.mrf.mxu2 }
  0xc2   : > { %v605_v48 = vpop.f32.mrf.mxu3 }
  0xc3   : > { %v1590_v49 = vadd.f32 %v605_v48, %v484_v47  ;;  %v447_v50 = vpop.f32.mrf.mxu0 }
  0xc4   : > { %v568_v51 = vpop.f32.mrf.mxu1 }
  0xc5   : > { %v1592_v52 = vadd.f32 %v568_v51, %v447_v50 }
  0xc9   : > { %v487_v53 = vpop.f32.mrf.mxu2 }
  0xca   : > { %v608_v54 = vpop.f32.mrf.mxu3 }
  0xcb   : > { %v1594_v55 = vadd.f32 %v608_v54, %v487_v53  ;;  %v449_v56 = vpop.f32.mrf.mxu0 }
  0xcc   : > { %v570_v57 = vpop.f32.mrf.mxu1 }
  0xcd   : > { %v1596_v58 = vadd.f32 %v570_v57, %v449_v56 }
  0xd1   : > { %v489_v59 = vpop.f32.mrf.mxu2 }
  0xd2   : > { %v610_v60 = vpop.f32.mrf.mxu3 }
  0xd3   : > { %v1598_v61 = vadd.f32 %v610_v60, %v489_v59  ;;  %v452_v62 = vpop.f32.mrf.mxu0 }
  0xd4   : > { %v573_v63 = vpop.f32.mrf.mxu1 }
  0xd5   : > { %v1600_v0 = vadd.f32 %v573_v63, %v452_v62 }
  0xd9   : > { %v492_v1 = vpop.f32.mrf.mxu2 }
  0xda   : > { %v613_v2 = vpop.f32.mrf.mxu3 }
  0xdb   : > { %v1602_v3 = vadd.f32 %v613_v2, %v492_v1  ;;  %v454_v4 = vpop.f32.mrf.mxu0 }
  0xdc   : > { %v575_v5 = vpop.f32.mrf.mxu1 }
  0xdd   : > { %v1604_v6 = vadd.f32 %v575_v5, %v454_v4 }
  0xe1   : > { %v494_v7 = vpop.f32.mrf.mxu2 }
  0xe2   : > { %v615_v8 = vpop.f32.mrf.mxu3 }
  0xe3   : > { %v1606_v9 = vadd.f32 %v615_v8, %v494_v7  ;;  %v457_v10 = vpop.f32.mrf.mxu0 }
  0xe4   : > { %v578_v11 = vpop.f32.mrf.mxu1 }
  0xe5   : > { %v1608_v12 = vadd.f32 %v578_v11, %v457_v10 }
  0xe9   : > { %v497_v13 = vpop.f32.mrf.mxu2 }
  0xea   : > { %v618_v14 = vpop.f32.mrf.mxu3 }
  0xeb   : > { %v1610_v15 = vadd.f32 %v618_v14, %v497_v13  ;;  %v459_v16 = vpop.f32.mrf.mxu0 }
  0xec   : > { %v580_v17 = vpop.f32.mrf.mxu1 }
  0xed   : > { %v1612_v18 = vadd.f32 %v580_v17, %v459_v16 }
  0xf1   : > { %v499_v19 = vpop.f32.mrf.mxu2 }
  0xf2   : > { %v620_v20 = vpop.f32.mrf.mxu3 }
  0xf3   : > { %v1614_v21 = vadd.f32 %v620_v20, %v499_v19  ;;  %v462_v22 = vpop.f32.mrf.mxu0 }
  0xf4   : > { %v583_v23 = vpop.f32.mrf.mxu1 }
  0xf5   : > { %v1616_v24 = vadd.f32 %v583_v23, %v462_v22 }
  0xf9   : > { %v502_v25 = vpop.f32.mrf.mxu2 }
  0xfa   : > { %v623_v26 = vpop.f32.mrf.mxu3 }
  0xfb   : > { %v1618_v27 = vadd.f32 %v623_v26, %v502_v25  ;;  %v464_v29 = vpop.f32.mrf.mxu0 }
  0xfc   : > { %v585_v30 = vpop.f32.mrf.mxu1 }
  0xfd   : > { %v1620_v32 = vadd.f32 %v585_v30, %v464_v29 }
 0x101   : > { %v504_v33 = vpop.f32.mrf.mxu2 }
 0x102   : > { %v625_v35 = vpop.f32.mrf.mxu3 }
 0x103   : > { %v1622_v36 = vadd.f32 %v625_v35, %v504_v33  ;;  %v467_v38 = vpop.f32.mrf.mxu0 }
 0x104   : > { %v588_v39 = vpop.f32.mrf.mxu1 }
 0x105   : > { %v1624_v41 = vadd.f32 %v588_v39, %v467_v38 }
 0x109   : > { %v507_v42 = vpop.f32.mrf.mxu2 }
 0x10a   : > { %v628_v44 = vpop.f32.mrf.mxu3 }
 0x10b   : > { %v1626_v45 = vadd.f32 %v628_v44, %v507_v42  ;;  %v469_v47 = vpop.f32.mrf.mxu0 }
 0x10c   : > { %v590_v48 = vpop.f32.mrf.mxu1 }
 0x10d   : > { %v1628_v50 = vadd.f32 %v590_v48, %v469_v47 }
 0x111   : > { %v509_v51 = vpop.f32.mrf.mxu2 }
 0x112   : > { %v630_v53 = vpop.f32.mrf.mxu3 }
 0x113   : > { %v1630_v54 = vadd.f32 %v630_v53, %v509_v51  ;;  %v472_v56 = vpop.f32.mrf.mxu0 }
 0x114   : > { %v593_v57 = vpop.f32.mrf.mxu1 }
 0x115   : > { %v1632_v59 = vadd.f32 %v593_v57, %v472_v56 }
 0x119   : > { %v512_v60 = vpop.f32.mrf.mxu2 }
 0x11a   : > { %v633_v62 = vpop.f32.mrf.mxu3 }
 0x11b   : > { %v1634_v63 = vadd.f32 %v633_v62, %v512_v60  ;;  %v474_v1 = vpop.f32.mrf.mxu0 }
 0x11c   : > { %v595_v2 = vpop.f32.mrf.mxu1 }
 0x11d   : > { %v1636_v4 = vadd.f32 %v595_v2, %v474_v1 }
 0x11f   : > { %640 = sbr.rel (%p1301_p10) target bundleno = 374 (0x176), region = 44 }
 0x121   : > { %v514_v5 = vpop.f32.mrf.mxu2 }
 0x122   : > { %v635_v7 = vpop.f32.mrf.mxu3 }
 0x123   : > { %v1638_v8 = vadd.f32 %v635_v7, %v514_v5 }
 0x124   : > { %vm642_vm2 = vcmask 130048   ;;  %v716_v26 = vmul.f32 %v1576_v28, %v1576_v28  ;;  %v717_v29 = vmul.f32 %v1580_v34, %v1580_v34  ;;  %v718_v33 = vmul.f32 %v1584_v40, %v1584_v40 }
 0x125   : > { %v643_v10 = vsel %vm642_vm2, %v1576_v28, 0.0  ;;  %v644_v11 = vsel %vm642_vm2, %v1580_v34, 0.0  ;;  %v646_v13 = vsel %vm642_vm2, %v1584_v40, 0.0  ;;  %v648_v16 = vsel %vm642_vm2, %v1588_v46, 0.0 }
 0x126   : > { %v645_v14 = vadd.f32 %v644_v11, %v643_v10  ;;  %v650_v19 = vsel %vm642_vm2, %v1592_v52, 0.0  ;;  %v652_v22 = vsel %vm642_vm2, %v1596_v58, 0.0  ;;  %v654_v25 = vsel %vm642_vm2, %v1600_v0, 0.0 }
 0x127   : > { %v656_v35 = vsel %vm642_vm2, %v1604_v6, 0.0  ;;  %v719_v38 = vmul.f32 %v1588_v46, %v1588_v46  ;;  %v658_v42 = vsel %vm642_vm2, %v1608_v12, 0.0  ;;  %v720_v44 = vmul.f32 %v1592_v52, %v1592_v52 }
 0x128   : > { %v647_v17 = vadd.f32 %v646_v13, %v645_v14  ;;  %v748_v47 = vsel %vm642_vm2, %v716_v26, 0.0  ;;  %v749_v48 = vsel %vm642_vm2, %v717_v29, 0.0  ;;  %v751_v56 = vsel %vm642_vm2, %v718_v33, 0.0 }
 0x129   : > { %v750_v53 = vadd.f32 %v749_v48, %v748_v47  ;;  %v660_v57 = vsel %vm642_vm2, %v1612_v18, 0.0  ;;  %v721_v60 = vmul.f32 %v1596_v58, %v1596_v58  ;;  %v753_v62 = vsel %vm642_vm2, %v719_v38, 0.0 }
 0x12a   : > { %v649_v20 = vadd.f32 %v648_v16, %v647_v17  ;;  %v662_v5 = vsel %vm642_vm2, %v1616_v24, 0.0  ;;  %v722_v7 = vmul.f32 %v1600_v0, %v1600_v0  ;;  %v755_v10 = vsel %vm642_vm2, %v720_v44, 0.0 }
 0x12b   : > { %v752_v2 = vadd.f32 %v751_v56, %v750_v53  ;;  %v664_v14 = vsel %vm642_vm2, %v1620_v32, 0.0  ;;  %v723_v16 = vmul.f32 %v1604_v6, %v1604_v6  ;;  %v757_v17 = vsel %vm642_vm2, %v721_v60, 0.0 }
 0x12c   : > { %v651_v23 = vadd.f32 %v650_v19, %v649_v20  ;;  %v725_v33 = vmul.f32 %v1612_v18, %v1612_v18  ;;  %v726_v44 = vmul.f32 %v1616_v24, %v1616_v24  ;;  %v672_v53 = vsel %vm642_vm2, %v1636_v4, 0.0 }
 0x12d   : > { %v754_v13 = vadd.f32 %v753_v62, %v752_v2  ;;  %v727_v56 = vmul.f32 %v1620_v32, %v1620_v32  ;;  %v728_v2 = vmul.f32 %v1624_v41, %v1624_v41  ;;  %vm713_vm3 = vcmask 122880  }
 0x12e   : > { %v653_v30 = vadd.f32 %v652_v22, %v651_v23  ;;  %v666_v22 = vsel %vm642_vm2, %v1624_v41, 0.0  ;;  %v724_v23 = vmul.f32 %v1608_v12, %v1608_v12 }
 0x12f   : > { %v756_v20 = vadd.f32 %v755_v10, %v754_v13  ;;  %v729_v13 = vmul.f32 %v1628_v50, %v1628_v50 }
 0x130   : > { %v655_v39 = vadd.f32 %v654_v25, %v653_v30  ;;  %v759_v25 = vsel %vm642_vm2, %v722_v7, 0.0  ;;  %v668_v30 = vsel %vm642_vm2, %v1628_v50, 0.0  ;;  %v763_v47 = vsel %vm642_vm2, %v724_v23, 0.0 }
 0x131   : > { %v758_v29 = vadd.f32 %v757_v17, %v756_v20  ;;  %v730_v20 = vmul.f32 %v1632_v59, %v1632_v59 }
 0x132   : > { %v657_v51 = vadd.f32 %v656_v35, %v655_v39  ;;  %v761_v35 = vsel %vm642_vm2, %v723_v16, 0.0 }
 0x133   : > { %v760_v39 = vadd.f32 %v759_v25, %v758_v29  ;;  %v731_v29 = vmul.f32 %v1636_v4, %v1636_v4 }
 0x134   : > { %v659_v1 = vadd.f32 %v658_v42, %v657_v51  ;;  %v670_v42 = vsel %vm642_vm2, %v1632_v59, 0.0 }
 0x135   : > { %v762_v51 = vadd.f32 %v761_v35, %v760_v39  ;;  %v732_v39 = vmul.f32 %v1578_v31, %v1578_v31 }
 0x136   : > { %v661_v11 = vadd.f32 %v660_v57, %v659_v1  ;;  %v765_v57 = vsel %vm642_vm2, %v725_v33, 0.0  ;;  %v674_v1 = vsel %vm642_vm2, %v1578_v31, 0.0 }
 0x137   : > { %v764_v62 = vadd.f32 %v763_v47, %v762_v51  ;;  %v733_v51 = vmul.f32 %v1582_v37, %v1582_v37 }
 0x138   : > { %v663_v19 = vadd.f32 %v662_v5, %v661_v11  ;;  %v767_v5 = vsel %vm642_vm2, %v726_v44, 0.0  ;;  %v676_v11 = vsel %vm642_vm2, %v1582_v37, 0.0 }
 0x139   : > { %v766_v10 = vadd.f32 %v765_v57, %v764_v62  ;;  %v734_v62 = vmul.f32 %v1586_v43, %v1586_v43 }
 0x13a   : > { %v665_v26 = vadd.f32 %v664_v14, %v663_v19  ;;  %v769_v14 = vsel %vm642_vm2, %v727_v56, 0.0  ;;  %v678_v19 = vsel %vm642_vm2, %v1586_v43, 0.0 }
 0x13b   : > { %v768_v17 = vadd.f32 %v767_v5, %v766_v10  ;;  %v735_v10 = vmul.f32 %v1590_v49, %v1590_v49 }
 0x13c   : > { %v667_v38 = vadd.f32 %v666_v22, %v665_v26  ;;  %v771_v22 = vsel %vm642_vm2, %v728_v2, 0.0  ;;  %v680_v26 = vsel %vm642_vm2, %v1590_v49, 0.0 }
 0x13d   : > { %v770_v25 = vadd.f32 %v769_v14, %v768_v17  ;;  %v736_v17 = vmul.f32 %v1594_v55, %v1594_v55 }
 0x13e   : > { %v669_v48 = vadd.f32 %v668_v30, %v667_v38  ;;  %v773_v30 = vsel %vm642_vm2, %v729_v13, 0.0  ;;  %v682_v38 = vsel %vm642_vm2, %v1594_v55, 0.0 }
 0x13f   : > { %v772_v35 = vadd.f32 %v771_v22, %v770_v25  ;;  %v737_v25 = vmul.f32 %v1598_v61, %v1598_v61 }
 0x140   : > { %v671_v60 = vadd.f32 %v670_v42, %v669_v48  ;;  %v775_v42 = vsel %vm642_vm2, %v730_v20, 0.0  ;;  %v684_v48 = vsel %vm642_vm2, %v1598_v61, 0.0 }
 0x141   : > { %v774_v47 = vadd.f32 %v773_v30, %v772_v35  ;;  %v738_v35 = vmul.f32 %v1602_v3, %v1602_v3 }
 0x142   : > { %v673_v7 = vadd.f32 %v672_v53, %v671_v60  ;;  %v777_v53 = vsel %vm642_vm2, %v731_v29, 0.0  ;;  %v686_v60 = vsel %vm642_vm2, %v1602_v3, 0.0 }
 0x143   : > { %v776_v57 = vadd.f32 %v775_v42, %v774_v47  ;;  %v739_v47 = vmul.f32 %v1606_v9, %v1606_v9 }
 0x144   : > { %v675_v16 = vadd.f32 %v674_v1, %v673_v7  ;;  %v779_v1 = vsel %vm642_vm2, %v732_v39, 0.0  ;;  %v688_v7 = vsel %vm642_vm2, %v1606_v9, 0.0 }
 0x145   : > { %v778_v5 = vadd.f32 %v777_v53, %v776_v57  ;;  %v740_v57 = vmul.f32 %v1610_v15, %v1610_v15 }
 0x146   : > { %v677_v23 = vadd.f32 %v676_v11, %v675_v16  ;;  %v781_v11 = vsel %vm642_vm2, %v733_v51, 0.0  ;;  %v690_v16 = vsel %vm642_vm2, %v1610_v15, 0.0 }
 0x147   : > { %v780_v14 = vadd.f32 %v779_v1, %v778_v5  ;;  %v741_v5 = vmul.f32 %v1614_v21, %v1614_v21 }
 0x148   : > { %v679_v33 = vadd.f32 %v678_v19, %v677_v23  ;;  %v783_v19 = vsel %vm642_vm2, %v734_v62, 0.0  ;;  %v692_v23 = vsel %vm642_vm2, %v1614_v21, 0.0 }
 0x149   : > { %v782_v22 = vadd.f32 %v781_v11, %v780_v14  ;;  %v742_v14 = vmul.f32 %v1618_v27, %v1618_v27 }
 0x14a   : > { %v681_v44 = vadd.f32 %v680_v26, %v679_v33  ;;  %v785_v26 = vsel %vm642_vm2, %v735_v10, 0.0  ;;  %v694_v33 = vsel %vm642_vm2, %v1618_v27, 0.0 }
 0x14b   : > { %v784_v30 = vadd.f32 %v783_v19, %v782_v22  ;;  %v743_v22 = vmul.f32 %v1622_v36, %v1622_v36 }
 0x14c   : > { %v683_v56 = vadd.f32 %v682_v38, %v681_v44  ;;  %v787_v38 = vsel %vm642_vm2, %v736_v17, 0.0  ;;  %v696_v44 = vsel %vm642_vm2, %v1622_v36, 0.0 }
 0x14d   : > { %v786_v42 = vadd.f32 %v785_v26, %v784_v30  ;;  %v799_v30 = vsel %vm642_vm2, %v742_v14, 0.0 }
 0x14e   : > { %v685_v2 = vadd.f32 %v684_v48, %v683_v56  ;;  %v789_v48 = vsel %vm642_vm2, %v737_v25, 0.0  ;;  %v698_v56 = vsel %vm642_vm2, %v1626_v45, 0.0 }
 0x14f   : > { %v788_v53 = vadd.f32 %v787_v38, %v786_v42  ;;  %v745_v38 = vmul.f32 %v1630_v54, %v1630_v54 }
 0x150   : > { %v687_v13 = vadd.f32 %v686_v60, %v685_v2  ;;  %v791_v60 = vsel %vm642_vm2, %v738_v35, 0.0  ;;  %v700_v2 = vsel %vm642_vm2, %v1630_v54, 0.0 }
 0x151   : > { %v790_v1 = vadd.f32 %v789_v48, %v788_v53 }
 0x152   : > { %v689_v20 = vadd.f32 %v688_v7, %v687_v13  ;;  %v793_v7 = vsel %vm642_vm2, %v739_v47, 0.0  ;;  %v702_v13 = vsel %vm642_vm2, %v1634_v63, 0.0  ;;  %v746_v47 = vmul.f32 %v1634_v63, %v1634_v63 }
 0x153   : > { %v792_v11 = vadd.f32 %v791_v60, %v790_v1 }
 0x154   : > { %v691_v29 = vadd.f32 %v690_v16, %v689_v20  ;;  %v795_v16 = vsel %vm642_vm2, %v740_v57, 0.0  ;;  %v704_v20 = vsel %vm642_vm2, %v1638_v8, 0.0  ;;  %v805_v57 = vsel %vm642_vm2, %v745_v38, 0.0 }
 0x155   : > { %v794_v19 = vadd.f32 %v793_v7, %v792_v11  ;;  %v807_v1 = vsel %vm642_vm2, %v746_v47, 0.0 }
 0x156   : > { %v693_v39 = vadd.f32 %v692_v23, %v691_v29  ;;  %v797_v23 = vsel %vm642_vm2, %v741_v5, 0.0  ;;  %v744_v29 = vmul.f32 %v1626_v45, %v1626_v45 }
 0x157   : > { %v796_v26 = vadd.f32 %v795_v16, %v794_v19 }
 0x158   : > { %v695_v51 = vadd.f32 %v694_v33, %v693_v39  ;;  %v801_v39 = vsel %vm642_vm2, %v743_v22, 0.0  ;;  %v803_v48 = vsel %vm642_vm2, %v744_v29, 0.0 }
 0x159   : > { %v798_v35 = vadd.f32 %v797_v23, %v796_v26  ;;  %v715_v26 = vld [vmem:[#allocation2 + $0x1] sm:$0x1] }
 0x15a   : > { %v697_v62 = vadd.f32 %v696_v44, %v695_v51 }
 0x15b   : > { %v800_v44 = vadd.f32 %v799_v30, %v798_v35 }
 0x15c   : > { %v699_v10 = vadd.f32 %v698_v56, %v697_v62  ;;  %v747_v56 = vmul.f32 %v1638_v8, %v1638_v8 }
 0x15d   : > { %v802_v53 = vadd.f32 %v801_v39, %v800_v44 }
 0x15e   : > { %v701_v17 = vadd.f32 %v700_v2, %v699_v10  ;;  %v809_v7 = vsel %vm642_vm2, %v747_v56, 0.0 }
 0x15f   : > { %v804_v62 = vadd.f32 %v803_v48, %v802_v53 }
 0x160   : > { %v703_v25 = vadd.f32 %v702_v13, %v701_v17  ;;  %v641_v13 = vld [vmem:[#allocation2] sm:$0x1] }
 0x161   : > { %v806_v5 = vadd.f32 %v805_v57, %v804_v62 }
 0x162   : > { %v705_v33 = vadd.f32 %v704_v20, %v703_v25 }
 0x163   : > { %v808_v11 = vadd.f32 %v807_v1, %v806_v5 }
 0x164   : > { %v706_v42 = vrot.slane %v705_v33, 4 }
 0x165   : > { %v810_v16 = vadd.f32 %v809_v7, %v808_v11 }
 0x166   : > { %v707_v51 = vadd.f32 %v706_v42, %v705_v33 }
 0x167   : > { %v811_v19 = vrot.slane %v810_v16, 4 }
 0x168   : > { %v708_v60 = vrot.slane %v707_v51, 2 }
 0x169   : > { %v812_v20 = vadd.f32 %v811_v19, %v810_v16 }
 0x16a   : > { %v709_v2 = vadd.f32 %v708_v60, %v707_v51 }
 0x16b   : > { %v813_v22 = vrot.slane %v812_v20, 2 }
 0x16c   : > { %v710_v10 = vrot.slane %v709_v2, 1 }
 0x16d   : > { %v814_v23 = vadd.f32 %v813_v22, %v812_v20 }
 0x16e   : > { %v711_v14 = vadd.f32 %v710_v10, %v709_v2 }
 0x16f   : > { %v815_v25 = vrot.slane %v814_v23, 1 }
 0x170   : > { %v712_v17 = vadd.f32 %v711_v14, %v641_v13 }
 0x171   : > { %v816_v29 = vadd.f32 %v815_v25, %v814_v23 }
 0x172   : > { %714 = vst.msk [vmem:[#allocation2] sm:$0x1] %vm713_vm3, %v712_v17 }
 0x173   : > { %v817_v30 = vadd.f32 %v816_v29, %v715_v26 }
 0x175   : > { %818 = vst.msk [vmem:[#allocation2 + $0x1] sm:$0x1] %vm713_vm3, %v817_v30 }
 0x176 PF: > { %p819_p11 = scmp.eq.s32.totalorder %s1407_s15, 1 }
 0x178   : > { %p820_p12 = pnand %p819_p11, %p216_p6 }
 0x17a   : > { %823 = sbr.rel (%p820_p12) target bundleno = 419 (0x1a3), region = 48 }
 0x17f   : > { %v824_v33 = vld [vmem:[#allocation2] sm:$0x1]  ;;  %v826_v35 = vld [vmem:[#allocation2 + $0x1] sm:$0x1]  ;;  %vm844_vm7 = vcmask 122880  }
 0x180   : > { %v825_v38 = vmul.f32 0.001953125, %v824_v33  ;;  %v827_v39 = vmul.f32 0.001953125, %v826_v35  ;;  %v831_v62 = vld [vmem:[%s1992_s2] sm:$0x1] }
 0x181   : > { %v846_v7 = vld [vmem:[%s1993_s3] sm:$0x1] }
 0x182   : > { %v828_v42 = vmul.f32 %v825_v38, %v825_v38 }
 0x184   : > { %v829_v44 = vsub.f32 %v827_v39, %v828_v42 }
 0x186   : > { %v830_v47 = vmax.f32 %v829_v44, 0.0 }
 0x188   : > { %v832_v48 = vadd.f32 1e-05, %v830_v47 }
 0x18a   : > { %1381 = vrsqrt.f32 %v832_v48  ;;  %vm839_vm4 = vweird.f32 %v832_v48 }
 0x190   : > { %v1382_v51 = vpop.eup %1381 }
 0x191   : > { %v834_v53 = vmul.f32 %v1382_v51, %v832_v48  ;;  %vm840_vm5 = vweird.f32 %v1382_v51 }
 0x192   : > { %vm841_vm6 = vmor %vm839_vm4, %vm840_vm5 }
 0x193   : > { %v835_v56 = vmul.f32 %v1382_v51, %v834_v53 }
 0x195   : > { %v836_v57 = vmul.f32 0.5, %v835_v56 }
 0x197   : > { %v837_v60 = vsub.f32 1.5, %v836_v57 }
 0x199   : > { %v838_v1 = vmul.f32 %v1382_v51, %v837_v60 }
 0x19b   : > { %v842_v2 = vsel %vm841_vm6, %v1382_v51, %v838_v1 }
 0x19c   : > { %v843_v5 = vmul.f32 %v842_v2, %v831_v62 }
 0x19e   : > { %845 = vst.msk [vmem:[#allocation2 + $0x2] sm:$0x1] %vm844_vm7, %v843_v5  ;;  %v847_v10 = vmul.f32 %v843_v5, %v825_v38 }
 0x1a0   : > { %v848_v11 = vsub.f32 %v846_v7, %v847_v10 }
 0x1a2   : > { %849 = vst.msk [vmem:[#allocation2 + $0x3] sm:$0x1] %vm844_vm7, %v848_v11 }
 0x1a3 PF: > { %p1302_p13 = scmp.ne.s32.totalorder %s1411_s16, 1 }
 0x1a5   : > { %853 = sbr.rel (%p1302_p13) target bundleno = 481 (0x1e1), region = 52 }
 0x1aa   : > { %v1811_v13 = vld [vmem:[#allocation2 + $0x2] ss:$0 sm:$0xff]  ;;  %v1813_v14 = vld [vmem:[#allocation2 + $0x3] ss:$0 sm:$0xff]  ;;  %vm1050_vm8 = vcmask 125952  }
 0x1ab   : > { %v856_v16 = vmul.f32 %v1811_v13, %v1576_v28  ;;  %v857_v17 = vmul.f32 %v1811_v13, %v1580_v34  ;;  %v858_v19 = vmul.f32 %v1811_v13, %v1584_v40  ;;  %v859_v20 = vmul.f32 %v1811_v13, %v1588_v46 }
 0x1ac   : > { %v860_v22 = vmul.f32 %v1811_v13, %v1592_v52  ;;  %v861_v23 = vmul.f32 %v1811_v13, %v1596_v58  ;;  %v862_v25 = vmul.f32 %v1811_v13, %v1600_v0  ;;  %v863_v28 = vmul.f32 %v1811_v13, %v1604_v6 }
 0x1ad   : > { %v890_v34 = vadd.f32 %v1813_v14, %v856_v16  ;;  %v891_v26 = vadd.f32 %v1813_v14, %v857_v17  ;;  %v892_v40 = vadd.f32 %v1813_v14, %v858_v19  ;;  %v893_v46 = vadd.f32 %v1813_v14, %v859_v20 }
 0x1ae   : > { %v894_v29 = vadd.f32 %v1813_v14, %v860_v22  ;;  %v895_v52 = vadd.f32 %v1813_v14, %v861_v23  ;;  %v896_v58 = vadd.f32 %v1813_v14, %v862_v25  ;;  %v897_v30 = vadd.f32 %v1813_v14, %v863_v28 }
 0x1af   : > { %vm922_vm9 = vcmp.gt.f32.partialorder %v890_v34, 0.0  ;;  %v954_v0 = vmul.f32 0.2, %v890_v34  ;;  %vm923_vm10 = vcmp.gt.f32.partialorder %v891_v26, 0.0  ;;  %v955_v6 = vmul.f32 0.2, %v891_v26 }
 0x1b0   : > { %vm924_vm11 = vcmp.gt.f32.partialorder %v892_v40, 0.0  ;;  %v956_v33 = vmul.f32 0.2, %v892_v40  ;;  %vm925_vm12 = vcmp.gt.f32.partialorder %v893_v46, 0.0  ;;  %v957_v35 = vmul.f32 0.2, %v893_v46 }
 0x1b1   : > { %v986_v38 = vsel %vm922_vm9, %v890_v34, %v954_v0  ;;  %v987_v39 = vsel %vm923_vm10, %v891_v26, %v955_v6  ;;  %vm926_vm13 = vcmp.gt.f32.partialorder %v894_v29, 0.0  ;;  %v958_v42 = vmul.f32 0.2, %v894_v29 }
 0x1b2   : > { %v1018_v44 = vpack.c.bf16 %v986_v38, %v986_v38  ;;  %v1019_v47 = vpack.c.bf16 %v987_v39, %v987_v39  ;;  %v988_v48 = vsel %vm924_vm11, %v892_v40, %v956_v33  ;;  %v989_v51 = vsel %vm925_vm12, %v893_v46, %v957_v35 }
 0x1b3   : > { %v1020_v53 = vpack.c.bf16 %v988_v48, %v988_v48  ;;  %v1021_v56 = vpack.c.bf16 %v989_v51, %v989_v51  ;;  %v990_v57 = vsel %vm926_vm13, %v894_v29, %v958_v42  ;;  %vm927_vm14 = vcmp.gt.f32.partialorder %v895_v52, 0.0 }
 0x1b4   : > { %1051 = vst.msk [vmem:[%s1501_s5] sm:$0xf] %vm1050_vm8, %v1018_v44  ;;  %v1022_v60 = vpack.c.bf16 %v990_v57, %v990_v57  ;;  %v959_v62 = vmul.f32 0.2, %v895_v52  ;;  %vm928_vm15 = vcmp.gt.f32.partialorder %v896_v58, 0.0  ;;  %vm929_vm0 = vcmp.gt.f32.partialorder %v897_v30, 0.0 }
 0x1b5   : > { %1052 = vst.msk [vmem:[%s1501_s5 + $0x4] sm:$0xf] %vm1050_vm8, %v1019_v47  ;;  %v960_v1 = vmul.f32 0.2, %v896_v58  ;;  %v961_v2 = vmul.f32 0.2, %v897_v30  ;;  %v864_v5 = vmul.f32 %v1811_v13, %v1608_v12  ;;  %v865_v7 = vmul.f32 %v1811_v13, %v1612_v18 }
 0x1b6   : > { %1053 = vst.msk [vmem:[%s1501_s5 + $0x8] sm:$0xf] %vm1050_vm8, %v1020_v53  ;;  %v991_v10 = vsel %vm927_vm14, %v895_v52, %v959_v62  ;;  %v866_v11 = vmul.f32 %v1811_v13, %v1616_v24  ;;  %v867_v16 = vmul.f32 %v1811_v13, %v1620_v32  ;;  %v868_v17 = vmul.f32 %v1811_v13, %v1624_v41 }
 0x1b7   : > { %1054 = vst.msk [vmem:[%s1501_s5 + $0xc] sm:$0xf] %vm1050_vm8, %v1021_v56  ;;  %v1023_v12 = vpack.c.bf16 %v991_v10, %v991_v10  ;;  %v992_v19 = vsel %vm928_vm15, %v896_v58, %v960_v1  ;;  %v993_v20 = vsel %vm929_vm0, %v897_v30, %v961_v2  ;;  %v898_v18 = vadd.f32 %v1813_v14, %v864_v5 }
 0x1b8   : > { %1055 = vst.msk [vmem:[%s1501_s5 + $0x10] sm:$0xf] %vm1050_vm8, %v1022_v60  ;;  %v1024_v22 = vpack.c.bf16 %v992_v19, %v992_v19  ;;  %v1025_v23 = vpack.c.bf16 %v993_v20, %v993_v20  ;;  %v899_v24 = vadd.f32 %v1813_v14, %v865_v7  ;;  %v900_v32 = vadd.f32 %v1813_v14, %v866_v11 }
 0x1b9   : > { %1056 = vst.msk [vmem:[%s1501_s5 + $0x14] sm:$0xf] %vm1050_vm8, %v1023_v12  ;;  %vm930_vm1 = vcmp.gt.f32.partialorder %v898_v18, 0.0  ;;  %v962_v41 = vmul.f32 0.2, %v898_v18  ;;  %v901_v25 = vadd.f32 %v1813_v14, %v867_v16  ;;  %v902_v28 = vadd.f32 %v1813_v14, %v868_v17 }
 0x1ba   : > { %1057 = vst.msk [vmem:[%s1501_s5 + $0x18] sm:$0xf] %vm1050_vm8, %v1024_v22  ;;  %vm931_vm2 = vcmp.gt.f32.partialorder %v899_v24, 0.0  ;;  %v963_v34 = vmul.f32 0.2, %v899_v24  ;;  %vm932_vm3 = vcmp.gt.f32.partialorder %v900_v32, 0.0  ;;  %v869_v26 = vmul.f32 %v1811_v13, %v1628_v50 }
 0x1bb   : > { %1058 = vst.msk [vmem:[%s1501_s5 + $0x1c] sm:$0xf] %vm1050_vm8, %v1025_v23  ;;  %v994_v40 = vsel %vm930_vm1, %v898_v18, %v962_v41  ;;  %v964_v46 = vmul.f32 0.2, %v900_v32  ;;  %vm933_vm4 = vcmp.gt.f32.partialorder %v901_v25, 0.0  ;;  %vm934_vm5 = vcmp.gt.f32.partialorder %v902_v28, 0.0 }
 0x1bc   : > { %v1026_v29 = vpack.c.bf16 %v994_v40, %v994_v40  ;;  %v995_v52 = vsel %vm931_vm2, %v899_v24, %v963_v34  ;;  %v965_v58 = vmul.f32 0.2, %v901_v25  ;;  %v966_v30 = vmul.f32 0.2, %v902_v28 }
 0x1bd   : > { %v1027_v0 = vpack.c.bf16 %v995_v52, %v995_v52  ;;  %v996_v6 = vsel %vm932_vm3, %v900_v32, %v964_v46  ;;  %v903_v33 = vadd.f32 %v1813_v14, %v869_v26  ;;  %v870_v35 = vmul.f32 %v1811_v13, %v1632_v59 }
 0x1be   : > { %1059 = vst.msk [vmem:[%s1501_s5 + $0x20] sm:$0xf] %vm1050_vm8, %v1026_v29  ;;  %v1028_v50 = vpack.c.bf16 %v996_v6, %v996_v6  ;;  %v997_v38 = vsel %vm933_vm4, %v901_v25, %v965_v58  ;;  %v998_v39 = vsel %vm934_vm5, %v902_v28, %v966_v30  ;;  %v871_v42 = vmul.f32 %v1811_v13, %v1636_v4 }
 0x1bf   : > { %1060 = vst.msk [vmem:[%s1501_s5 + $0x24] sm:$0xf] %vm1050_vm8, %v1027_v0  ;;  %v1029_v44 = vpack.c.bf16 %v997_v38, %v997_v38  ;;  %v1030_v47 = vpack.c.bf16 %v998_v39, %v998_v39  ;;  %vm935_vm6 = vcmp.gt.f32.partialorder %v903_v33, 0.0  ;;  %v967_v48 = vmul.f32 0.2, %v903_v33 }
 0x1c0   : > { %1061 = vst.msk [vmem:[%s1501_s5 + $0x28] sm:$0xf] %vm1050_vm8, %v1028_v50  ;;  %v904_v59 = vadd.f32 %v1813_v14, %v870_v35  ;;  %v905_v51 = vadd.f32 %v1813_v14, %v871_v42  ;;  %v872_v53 = vmul.f32 %v1811_v13, %v1578_v31  ;;  %v873_v4 = vmul.f32 %v1811_v13, %v1582_v37 }
 0x1c1   : > { %1062 = vst.msk [vmem:[%s1501_s5 + $0x2c] sm:$0xf] %vm1050_vm8, %v1029_v44  ;;  %v999_v56 = vsel %vm935_vm6, %v903_v33, %v967_v48  ;;  %v874_v57 = vmul.f32 %v1811_v13, %v1586_v43  ;;  %v875_v60 = vmul.f32 %v1811_v13, %v1590_v49  ;;  %v876_v62 = vmul.f32 %v1811_v13, %v1594_v55 }
 0x1c2   : > { %1063 = vst.msk [vmem:[%s1501_s5 + $0x30] sm:$0xf] %vm1050_vm8, %v1030_v47  ;;  %v1031_v1 = vpack.c.bf16 %v999_v56, %v999_v56  ;;  %vm936_vm7 = vcmp.gt.f32.partialorder %v904_v59, 0.0  ;;  %v968_v31 = vmul.f32 0.2, %v904_v59  ;;  %vm937_vm9 = vcmp.gt.f32.partialorder %v905_v51, 0.0 }
 0x1c3   : > { %v969_v2 = vmul.f32 0.2, %v905_v51  ;;  %v906_v37 = vadd.f32 %v1813_v14, %v872_v53  ;;  %v907_v5 = vadd.f32 %v1813_v14, %v873_v4  ;;  %v908_v43 = vadd.f32 %v1813_v14, %v874_v57 }
 0x1c4   : > { %1064 = vst.msk [vmem:[%s1501_s5 + $0x34] sm:$0xf] %vm1050_vm8, %v1031_v1  ;;  %v1000_v49 = vsel %vm936_vm7, %v904_v59, %v968_v31  ;;  %v909_v7 = vadd.f32 %v1813_v14, %v875_v60  ;;  %v910_v55 = vadd.f32 %v1813_v14, %v876_v62  ;;  %v877_v10 = vmul.f32 %v1811_v13, %v1598_v61 }
 0x1c5   : > { %v1032_v11 = vpack.c.bf16 %v1000_v49, %v1000_v49  ;;  %v1001_v16 = vsel %vm937_vm9, %v905_v51, %v969_v2  ;;  %vm938_vm10 = vcmp.gt.f32.partialorder %v906_v37, 0.0  ;;  %v970_v17 = vmul.f32 0.2, %v906_v37 }
 0x1c6   : > { %v1033_v12 = vpack.c.bf16 %v1001_v16, %v1001_v16  ;;  %vm939_vm11 = vcmp.gt.f32.partialorder %v907_v5, 0.0  ;;  %v971_v19 = vmul.f32 0.2, %v907_v5  ;;  %vm940_vm12 = vcmp.gt.f32.partialorder %v908_v43, 0.0 }
 0x1c7   : > { %1065 = vst.msk [vmem:[%s1501_s5 + $0x38] sm:$0xf] %vm1050_vm8, %v1032_v11  ;;  %v1002_v20 = vsel %vm938_vm10, %v906_v37, %v970_v17  ;;  %v972_v18 = vmul.f32 0.2, %v908_v43  ;;  %vm941_vm13 = vcmp.gt.f32.partialorder %v909_v7, 0.0  ;;  %vm942_vm14 = vcmp.gt.f32.partialorder %v910_v55, 0.0 }
 0x1c8   : > { %1066 = vst.msk [vmem:[%s1501_s5 + $0x3c] sm:$0xf] %vm1050_vm8, %v1033_v12  ;;  %v1034_v22 = vpack.c.bf16 %v1002_v20, %v1002_v20  ;;  %v1003_v61 = vsel %vm939_vm11, %v907_v5, %v971_v19  ;;  %v973_v23 = vmul.f32 0.2, %v909_v7  ;;  %v974_v24 = vmul.f32 0.2, %v910_v55 }
 0x1c9   : > { %v1035_v32 = vpack.c.bf16 %v1003_v61, %v1003_v61  ;;  %v1004_v41 = vsel %vm940_vm12, %v908_v43, %v972_v18  ;;  %v911_v25 = vadd.f32 %v1813_v14, %v877_v10  ;;  %v878_v28 = vmul.f32 %v1811_v13, %v1602_v3 }
 0x1ca   : > { %1067 = vst.msk [vmem:[%s1501_s5 + $0x40] sm:$0xf] %vm1050_vm8, %v1034_v22  ;;  %v1036_v34 = vpack.c.bf16 %v1004_v41, %v1004_v41  ;;  %v1005_v26 = vsel %vm941_vm13, %v909_v7, %v973_v23  ;;  %v1006_v40 = vsel %vm942_vm14, %v910_v55, %v974_v24  ;;  %v879_v46 = vmul.f32 %v1811_v13, %v1606_v9 }
 0x1cb   : > { %1068 = vst.msk [vmem:[%s1501_s5 + $0x44] sm:$0xf] %vm1050_vm8, %v1035_v32  ;;  %v1037_v29 = vpack.c.bf16 %v1005_v26, %v1005_v26  ;;  %v1038_v52 = vpack.c.bf16 %v1006_v40, %v1006_v40  ;;  %vm943_vm15 = vcmp.gt.f32.partialorder %v911_v25, 0.0  ;;  %v975_v58 = vmul.f32 0.2, %v911_v25 }
 0x1cc   : > { %1069 = vst.msk [vmem:[%s1501_s5 + $0x48] sm:$0xf] %vm1050_vm8, %v1036_v34  ;;  %v912_v3 = vadd.f32 %v1813_v14, %v878_v28  ;;  %v913_v30 = vadd.f32 %v1813_v14, %v879_v46  ;;  %v880_v0 = vmul.f32 %v1811_v13, %v1610_v15  ;;  %v881_v9 = vmul.f32 %v1811_v13, %v1614_v21 }
 0x1cd   : > { %1070 = vst.msk [vmem:[%s1501_s5 + $0x4c] sm:$0xf] %vm1050_vm8, %v1037_v29  ;;  %v1007_v6 = vsel %vm943_vm15, %v911_v25, %v975_v58  ;;  %v882_v33 = vmul.f32 %v1811_v13, %v1618_v27  ;;  %v883_v35 = vmul.f32 %v1811_v13, %v1622_v36  ;;  %v884_v50 = vmul.f32 %v1811_v13, %v1626_v45 }
 0x1ce   : > { %1071 = vst.msk [vmem:[%s1501_s5 + $0x50] sm:$0xf] %vm1050_vm8, %v1038_v52  ;;  %v1039_v38 = vpack.c.bf16 %v1007_v6, %v1007_v6  ;;  %vm944_vm0 = vcmp.gt.f32.partialorder %v912_v3, 0.0  ;;  %v976_v15 = vmul.f32 0.2, %v912_v3  ;;  %vm945_vm1 = vcmp.gt.f32.partialorder %v913_v30, 0.0 }
 0x1cf   : > { %v977_v39 = vmul.f32 0.2, %v913_v30  ;;  %v914_v21 = vadd.f32 %v1813_v14, %v880_v0  ;;  %v915_v42 = vadd.f32 %v1813_v14, %v881_v9  ;;  %v916_v27 = vadd.f32 %v1813_v14, %v882_v33 }
 0x1d0   : > { %1072 = vst.msk [vmem:[%s1501_s5 + $0x54] sm:$0xf] %vm1050_vm8, %v1039_v38  ;;  %v1008_v36 = vsel %vm944_vm0, %v912_v3, %v976_v15  ;;  %v917_v44 = vadd.f32 %v1813_v14, %v883_v35  ;;  %v918_v45 = vadd.f32 %v1813_v14, %v884_v50  ;;  %v885_v47 = vmul.f32 %v1811_v13, %v1630_v54 }
 0x1d1   : > { %v1040_v48 = vpack.c.bf16 %v1008_v36, %v1008_v36  ;;  %v1009_v59 = vsel %vm945_vm1, %v913_v30, %v977_v39  ;;  %vm946_vm2 = vcmp.gt.f32.partialorder %v914_v21, 0.0  ;;  %v978_v51 = vmul.f32 0.2, %v914_v21 }
 0x1d2   : > { %v1041_v53 = vpack.c.bf16 %v1009_v59, %v1009_v59  ;;  %vm947_vm3 = vcmp.gt.f32.partialorder %v915_v42, 0.0  ;;  %v979_v4 = vmul.f32 0.2, %v915_v42  ;;  %vm948_vm4 = vcmp.gt.f32.partialorder %v916_v27, 0.0 }
 0x1d3   : > { %1073 = vst.msk [vmem:[%s1501_s5 + $0x58] sm:$0xf] %vm1050_vm8, %v1040_v48  ;;  %v1010_v56 = vsel %vm946_vm2, %v914_v21, %v978_v51  ;;  %v980_v57 = vmul.f32 0.2, %v916_v27  ;;  %vm949_vm5 = vcmp.gt.f32.partialorder %v917_v44, 0.0  ;;  %vm950_vm6 = vcmp.gt.f32.partialorder %v918_v45, 0.0 }
 0x1d4   : > { %1074 = vst.msk [vmem:[%s1501_s5 + $0x5c] sm:$0xf] %vm1050_vm8, %v1041_v53  ;;  %v1042_v60 = vpack.c.bf16 %v1010_v56, %v1010_v56  ;;  %v1011_v54 = vsel %vm947_vm3, %v915_v42, %v979_v4  ;;  %v981_v62 = vmul.f32 0.2, %v917_v44  ;;  %v982_v1 = vmul.f32 0.2, %v918_v45 }
 0x1d5   : > { %v1043_v31 = vpack.c.bf16 %v1011_v54, %v1011_v54  ;;  %v1012_v2 = vsel %vm948_vm4, %v916_v27, %v980_v57  ;;  %v919_v37 = vadd.f32 %v1813_v14, %v885_v47  ;;  %v886_v5 = vmul.f32 %v1811_v13, %v1634_v63 }
 0x1d6   : > { %1075 = vst.msk [vmem:[%s1501_s5 + $0x60] sm:$0xf] %vm1050_vm8, %v1042_v60  ;;  %v1044_v43 = vpack.c.bf16 %v1012_v2, %v1012_v2  ;;  %v1013_v49 = vsel %vm949_vm5, %v917_v44, %v981_v62  ;;  %v1014_v7 = vsel %vm950_vm6, %v918_v45, %v982_v1  ;;  %v887_v55 = vmul.f32 %v1811_v13, %v1638_v8 }
 0x1d7   : > { %1076 = vst.msk [vmem:[%s1501_s5 + $0x64] sm:$0xf] %vm1050_vm8, %v1043_v31  ;;  %v1045_v10 = vpack.c.bf16 %v1013_v49, %v1013_v49  ;;  %v1046_v11 = vpack.c.bf16 %v1014_v7, %v1014_v7  ;;  %vm951_vm7 = vcmp.gt.f32.partialorder %v919_v37, 0.0  ;;  %v983_v16 = vmul.f32 0.2, %v919_v37 }
 0x1d8   : > { %1077 = vst.msk [vmem:[%s1501_s5 + $0x68] sm:$0xf] %vm1050_vm8, %v1044_v43  ;;  %v920_v63 = vadd.f32 %v1813_v14, %v886_v5  ;;  %v921_v17 = vadd.f32 %v1813_v14, %v887_v55 }
 0x1d9   : > { %1078 = vst.msk [vmem:[%s1501_s5 + $0x6c] sm:$0xf] %vm1050_vm8, %v1045_v10  ;;  %v1015_v12 = vsel %vm951_vm7, %v919_v37, %v983_v16 }
 0x1da   : > { %1079 = vst.msk [vmem:[%s1501_s5 + $0x70] sm:$0xf] %vm1050_vm8, %v1046_v11  ;;  %v1047_v8 = vpack.c.bf16 %v1015_v12, %v1015_v12  ;;  %vm952_vm9 = vcmp.gt.f32.partialorder %v920_v63, 0.0  ;;  %v984_v13 = vmul.f32 0.2, %v920_v63  ;;  %vm953_vm10 = vcmp.gt.f32.partialorder %v921_v17, 0.0 }
 0x1db   : > { %v985_v19 = vmul.f32 0.2, %v921_v17 }
 0x1dc   : > { %1080 = vst.msk [vmem:[%s1501_s5 + $0x74] sm:$0xf] %vm1050_vm8, %v1047_v8  ;;  %v1016_v20 = vsel %vm952_vm9, %v920_v63, %v984_v13 }
 0x1dd   : > { %v1048_v18 = vpack.c.bf16 %v1016_v20, %v1016_v20  ;;  %v1017_v22 = vsel %vm953_vm10, %v921_v17, %v985_v19 }
 0x1de   : > { %v1049_v61 = vpack.c.bf16 %v1017_v22, %v1017_v22 }
 0x1df   : > { %1081 = vst.msk [vmem:[%s1501_s5 + $0x78] sm:$0xf] %vm1050_vm8, %v1048_v18 }
 0x1e0   : > { %1082 = vst.msk [vmem:[%s1501_s5 + $0x7c] sm:$0xf] %vm1050_vm8, %v1049_v61 }
 0x1e1 PF: > { %s14_s19 = sadd.s32 1, %s1423_s19   ;;  %s1995_s15 = smov %s1415_s17 }
 0x1e2   : > { %p11_p0 = scmp.ge.s32.totalorder %s14_s19, 6   ;;  %s1996_s16 = smov %s1419_s18 }
 0x1e3   : > { %s1997_s17 = smov %s2000_s20  ;;  %s1998_s18 = smov %s2004_s21 }
 0x1e4   :  { %13 = sbr.rel (!%p11_p0) target bundleno = 3 (0x3), region = 83 }

// kernel: discriminator_forward.6
= control target key start
LH: loop header
LB: loop body
LE: loop exit
PB: predicated region body
PF: predicated region fallthrough
CT: control target
= control target key end

     0   :  { %s978_s15 = smov 0   ;;  %s980_s16 = smov 0   ;;  %s1192_s0 = inlined_call_operand.vmem [shape: bf16[2,72,128], index: 0, kind: input, shape index: {}]   ;;  %s1193_s1 = inlined_call_operand.vmem [shape: bf16[2,128,32], index: 1, kind: input, shape index: {}]   ;;  %s1194_s2 = inlined_call_operand.vmem [shape: f32[1,32], index: 2, kind: input, shape index: {}]   ;;  %s1195_s3 = inlined_call_operand.vmem [shape: f32[1,32], index: 3, kind: input, shape index: {}]   ;;  %s1196_s4 = inlined_call_operand.vmem [shape: bf16[2,64,32], index: 4, kind: output, shape index: {}]  }
   0x1   :  { %s982_s17 = smov 0   ;;  %s984_s18 = smov 0  }
   0x2   :  { %s986_s19 = smov 0  }
   0x3 LB: > { %s23_s20 = sadd.s32 1, %s942_s17  ;;  %s26_s21 = sadd.s32 1, %s946_s18  ;;  %s950_s19 = sphi %s986_s19, %s14_s19   ;;  %s946_s18 = sphi %s984_s18, %s1200_s18   ;;  %s942_s17 = sphi %s982_s17, %s1199_s17   ;;  %s938_s16 = sphi %s980_s16, %s1198_s16   ;;  %s934_s15 = sphi %s978_s15, %s1197_s15  }
   0x4   : > { %p24_p0 = scmp.ge.s32.totalorder %s23_s20, 2  ;;  %p705_p1 = scmp.ge.s32.totalorder %s950_s19, 1 }
   0x5   : > { %p176_p2 = scmp.lt.s32.totalorder %s950_s19, 5 }
   0x6   : > { %s1202_s20 = smov (%p24_p0, %s23_s20), 0  ;;  %s1204_s21 = smov (!%p24_p0, %s26_s21), %s946_s18 }
   0x7   : > { %p177_p3 = pnand %p705_p1, %p176_p2  ;;  %p28_p4 = scmp.ge.s32.totalorder %s1204_s21, 2 }
   0x8   : > { %p203_p5 = scmp.lt.s32.totalorder (!%p177_p3), %s934_s15, 1  ;;  %s208_s22 = smul.u32 (!%p177_p3), %s934_s15, %s938_s16 }
   0x9   : > { %s1206_s21 = smov (%p28_p4, %s1204_s21), 0  ;;  %180 = sbr.rel (%p177_p3) target bundleno = 315 (0x13b), region = 36 }
   0xa   : > { %p215_p6 = scmp.eq.s32.totalorder (!%p177_p3), %s938_s16, 0  ;;  %p216_p7 = scmp.eq.s32.totalorder (!%p177_p3), %s934_s15, 0 }
   0xb   : > { %p209_p8 = scmp.lt.s32.totalorder (!%p177_p3), %s208_s22, 1 }
   0xc   : > { %p217_p9 = pnand (!%p177_p3), %p216_p7, %p215_p6 }
   0xe   : > { %s204_s23 = scalar_select %p203_p5, %s934_s15, 1 }
   0xf   : > { %s1208_s22 = smov (!%p209_p8, %s208_s22), 1  ;;  %220 = sbr.rel (%p217_p9) target bundleno = 22 (0x16), region = 40 }
  0x10   : > { %s866_s24 = smul.u32 36, %s204_s23  ;;  %s825_s28 = sshll.u32 %s1208_s22, 5 }
  0x11   : > { %s1028_s5 = scalar_lea.vmem %s1196_s4, %s825_s28 }
  0x12   : > { %s1023_s27 = scalar_lea.vmem %s1192_s0, %s866_s24 }
  0x14   : > { %vm221_vm0 = vcmask 261120   ;;  %v952_v0 = vmov 0.0  }
  0x15   : > { %222 = vst.msk [vmem:[#allocation2] sm:$0xff] %vm221_vm0, %v952_v0 }
  0x16 PF: > { %v849_v1 = vld [vmem:[%s1193_s1 + $0x78] sm:$0xff]  ;;  %v848_v3 = vld [vmem:[%s1193_s1 + $0x70] sm:$0xff]  ;;  %v847_v5 = vld [vmem:[%s1193_s1 + $0x68] sm:$0xff]  ;;  %p821_p10 = scmp.ne.s32.totalorder %s938_s16, 0 }
  0x17   : > { %v837_v2 = vld [vmem:[%s1193_s1 + $0x38] sm:$0xff]  ;;  %344 = vmatpush.bf16.msra.mxu0 %v849_v1  ;;  %850 = vmatpush.bf16.msra.mxu2 %v849_v1  ;;  %v836_v4 = vld [vmem:[%s1193_s1 + $0x30] sm:$0xff]  ;;  %v835_v6 = vld [vmem:[%s1193_s1 + $0x28] sm:$0xff] }
  0x18   : > { %445 = vmatpush.bf16.msra.mxu1 %v837_v2  ;;  %858 = vmatpush.bf16.msra.mxu3 %v837_v2  ;;  %v846_v7 = vld [vmem:[%s1193_s1 + $0x60] sm:$0xff]  ;;  %v845_v9 = vld [vmem:[%s1193_s1 + $0x58] sm:$0xff]  ;;  %v844_v11 = vld [vmem:[%s1193_s1 + $0x50] sm:$0xff] }
  0x19   : > { %v834_v8 = vld [vmem:[%s1193_s1 + $0x20] sm:$0xff]  ;;  %v833_v10 = vld [vmem:[%s1193_s1 + $0x18] sm:$0xff]  ;;  %v832_v12 = vld [vmem:[%s1193_s1 + $0x10] sm:$0xff] }
  0x1a   : > { %v843_v13 = vld [vmem:[%s1193_s1 + $0x48] sm:$0xff]  ;;  %v842_v15 = vld [vmem:[%s1193_s1 + $0x40] sm:$0xff]  ;;  %v840_v18 = vld [vmem:[%s1023_s27 + $0x14] sm:$0xff] }
  0x1b   : > { %345 = vmatpush.bf16.msra.mxu0 %v848_v3  ;;  %851 = vmatpush.bf16.msra.mxu2 %v848_v3  ;;  %v831_v14 = vld [vmem:[%s1193_s1 + $0x8] sm:$0xff]  ;;  %v830_v16 = vld [vmem:[%s1193_s1] sm:$0xff]  ;;  %v828_v20 = vld [vmem:[%s1023_s27 + $0x10] sm:$0xff] }
  0x1c   : > { %446 = vmatpush.bf16.msra.mxu1 %v836_v4  ;;  %859 = vmatpush.bf16.msra.mxu3 %v836_v4  ;;  %v838_v17 = vld [vmem:[%s1023_s27 + $0x4] sm:$0xff]  ;;  %v839_v21 = vld [vmem:[%s1023_s27 + $0xc] sm:$0xff]  ;;  %v841_v22 = vld [vmem:[%s1023_s27 + $0x1c] sm:$0xff] }
  0x1d   : > { %v826_v19 = vld [vmem:[%s1023_s27] sm:$0xff]  ;;  %v827_v23 = vld [vmem:[%s1023_s27 + $0x8] sm:$0xff]  ;;  %v829_v24 = vld [vmem:[%s1023_s27 + $0x18] sm:$0xff] }
  0x1f   : > { %346 = vmatpush.bf16.msra.mxu0 %v847_v5  ;;  %852 = vmatpush.bf16.msra.mxu2 %v847_v5 }
  0x20   : > { %447 = vmatpush.bf16.msra.mxu1 %v835_v6  ;;  %860 = vmatpush.bf16.msra.mxu3 %v835_v6 }
  0x23   : > { %347 = vmatpush.bf16.msra.mxu0 %v846_v7  ;;  %853 = vmatpush.bf16.msra.mxu2 %v846_v7 }
  0x24   : > { %448 = vmatpush.bf16.msra.mxu1 %v834_v8  ;;  %861 = vmatpush.bf16.msra.mxu3 %v834_v8 }
  0x27   : > { %348 = vmatpush.bf16.msra.mxu0 %v845_v9  ;;  %854 = vmatpush.bf16.msra.mxu2 %v845_v9 }
  0x28   : > { %449 = vmatpush.bf16.msra.mxu1 %v833_v10  ;;  %862 = vmatpush.bf16.msra.mxu3 %v833_v10 }
  0x2b   : > { %349 = vmatpush.bf16.msra.mxu0 %v844_v11  ;;  %855 = vmatpush.bf16.msra.mxu2 %v844_v11 }
  0x2c   : > { %450 = vmatpush.bf16.msra.mxu1 %v832_v12  ;;  %863 = vmatpush.bf16.msra.mxu3 %v832_v12 }
  0x2f   : > { %350 = vmatpush.bf16.msra.mxu0 %v843_v13  ;;  %856 = vmatpush.bf16.msra.mxu2 %v843_v13 }
  0x30   : > { %451 = vmatpush.bf16.msra.mxu1 %v831_v14  ;;  %864 = vmatpush.bf16.msra.mxu3 %v831_v14 }
  0x33   : > { %351 = vmatpush.bf16.msra.mxu0 %v842_v15  ;;  %857 = vmatpush.bf16.msra.mxu2 %v842_v15 }
  0x34   : > { %452 = vmatpush.bf16.msra.mxu1 %v830_v16  ;;  %865 = vmatpush.bf16.msra.mxu3 %v830_v16 }
  0x36   : > { %352 = vmatmul.bf16.vlgmr.msra.gmra.mxu0 %v838_v17  ;;  %362 = vmatmul.bf16.vlgmr.msra.gmra.mxu2 %v840_v18 }
  0x37   : > { %453 = vmatmul.bf16.vlgmr.msra.gmra.mxu1 %v826_v19  ;;  %463 = vmatmul.bf16.vlgmr.msra.gmra.mxu3 %v828_v20 }
  0x46   : > { %357 = vmatmul.bf16.gmra.mxu0 %v839_v21  ;;  %367 = vmatmul.bf16.gmra.mxu2 %v841_v22 }
  0x47   : > { %458 = vmatmul.bf16.gmra.mxu1 %v827_v23  ;;  %468 = vmatmul.bf16.gmra.mxu3 %v829_v24 }
  0xb3   : > { %v353_v25 = vpop.f32.mrf.mxu0 }
  0xb4   : > { %v454_v26 = vpop.f32.mrf.mxu1 }
  0xb5   : > { %v1086_v27 = vadd.f32 %v454_v26, %v353_v25 }
  0xb9   : > { %v363_v28 = vpop.f32.mrf.mxu2 }
  0xba   : > { %v464_v29 = vpop.f32.mrf.mxu3 }
  0xbb   : > { %v1088_v30 = vadd.f32 %v464_v29, %v363_v28  ;;  %v355_v31 = vpop.f32.mrf.mxu0 }
  0xbc   : > { %v456_v32 = vpop.f32.mrf.mxu1 }
  0xbd   : > { %v1090_v33 = vadd.f32 %v456_v32, %v355_v31 }
  0xc1   : > { %v365_v34 = vpop.f32.mrf.mxu2 }
  0xc2   : > { %v466_v35 = vpop.f32.mrf.mxu3 }
  0xc3   : > { %v1092_v36 = vadd.f32 %v466_v35, %v365_v34  ;;  %v358_v37 = vpop.f32.mrf.mxu0 }
  0xc4   : > { %v459_v38 = vpop.f32.mrf.mxu1 }
  0xc5   : > { %v1094_v39 = vadd.f32 %v459_v38, %v358_v37 }
  0xc9   : > { %v368_v40 = vpop.f32.mrf.mxu2 }
  0xca   : > { %v469_v41 = vpop.f32.mrf.mxu3 }
  0xcb   : > { %v1096_v42 = vadd.f32 %v469_v41, %v368_v40  ;;  %v360_v43 = vpop.f32.mrf.mxu0 }
  0xcc   : > { %v461_v44 = vpop.f32.mrf.mxu1 }
  0xcd   : > { %v1098_v45 = vadd.f32 %v461_v44, %v360_v43 }
  0xcf   : > { %476 = sbr.rel (%p821_p10) target bundleno = 245 (0xf5), region = 44 }
  0xd1   : > { %v370_v46 = vpop.f32.mrf.mxu2 }
  0xd2   : > { %v471_v47 = vpop.f32.mrf.mxu3 }
  0xd3   : > { %v1100_v48 = vadd.f32 %v471_v47, %v370_v46 }
  0xd4   : > { %vm478_vm1 = vcmask 261120   ;;  %v504_v49 = vmul.f32 %v1086_v27, %v1086_v27  ;;  %v505_v53 = vmul.f32 %v1090_v33, %v1090_v33  ;;  %v506_v56 = vmul.f32 %v1094_v39, %v1094_v39  ;;  %v477_v34 = vld [vmem:[#allocation2] sm:$0x1]  ;;  %v503_v41 = vld [vmem:[#allocation2 + $0x1] sm:$0x1] }
  0xd5   : > { %v479_v50 = vsel %vm478_vm1, %v1086_v27, 0.0  ;;  %v480_v51 = vsel %vm478_vm1, %v1090_v33, 0.0  ;;  %v482_v52 = vsel %vm478_vm1, %v1094_v39, 0.0  ;;  %v484_v55 = vsel %vm478_vm1, %v1098_v45, 0.0 }
  0xd6   : > { %v481_v54 = vadd.f32 %v480_v51, %v479_v50  ;;  %v507_v57 = vmul.f32 %v1098_v45, %v1098_v45  ;;  %v486_v59 = vsel %vm478_vm1, %v1088_v30, 0.0  ;;  %v508_v60 = vmul.f32 %v1088_v30, %v1088_v30 }
  0xd7   : > { %v512_v61 = vsel %vm478_vm1, %v504_v49, 0.0  ;;  %v513_v62 = vsel %vm478_vm1, %v505_v53, 0.0  ;;  %v515_v63 = vsel %vm478_vm1, %v506_v56, 0.0  ;;  %v488_v2 = vsel %vm478_vm1, %v1092_v36, 0.0 }
  0xd8   : > { %v483_v58 = vadd.f32 %v482_v52, %v481_v54  ;;  %v514_v1 = vadd.f32 %v513_v62, %v512_v61  ;;  %v509_v3 = vmul.f32 %v1092_v36, %v1092_v36  ;;  %v517_v4 = vsel %vm478_vm1, %v507_v57, 0.0 }
  0xd9   : > { %v490_v7 = vsel %vm478_vm1, %v1096_v42, 0.0  ;;  %v510_v8 = vmul.f32 %v1096_v42, %v1096_v42  ;;  %v519_v9 = vsel %vm478_vm1, %v508_v60, 0.0  ;;  %v492_v12 = vsel %vm478_vm1, %v1100_v48, 0.0 }
  0xda   : > { %v485_v0 = vadd.f32 %v484_v55, %v483_v58  ;;  %v516_v6 = vadd.f32 %v515_v63, %v514_v1  ;;  %v511_v13 = vmul.f32 %v1100_v48, %v1100_v48  ;;  %v521_v14 = vsel %vm478_vm1, %v509_v3, 0.0 }
  0xdb   : > { %v523_v17 = vsel %vm478_vm1, %v510_v8, 0.0  ;;  %vm501_vm2 = vcmask 253952  }
  0xdc   : > { %v487_v5 = vadd.f32 %v486_v59, %v485_v0  ;;  %v518_v11 = vadd.f32 %v517_v4, %v516_v6  ;;  %v525_v20 = vsel %vm478_vm1, %v511_v13, 0.0 }
  0xde   : > { %v489_v10 = vadd.f32 %v488_v2, %v487_v5  ;;  %v520_v16 = vadd.f32 %v519_v9, %v518_v11 }
  0xe0   : > { %v491_v15 = vadd.f32 %v490_v7, %v489_v10  ;;  %v522_v19 = vadd.f32 %v521_v14, %v520_v16 }
  0xe2   : > { %v493_v18 = vadd.f32 %v492_v12, %v491_v15  ;;  %v524_v22 = vadd.f32 %v523_v17, %v522_v19 }
  0xe4   : > { %v494_v21 = vrot.slane %v493_v18, 4  ;;  %v526_v24 = vadd.f32 %v525_v20, %v524_v22 }
  0xe6   : > { %v495_v23 = vadd.f32 %v494_v21, %v493_v18  ;;  %v527_v26 = vrot.slane %v526_v24, 4 }
  0xe8   : > { %v496_v25 = vrot.slane %v495_v23, 2  ;;  %v528_v29 = vadd.f32 %v527_v26, %v526_v24 }
  0xea   : > { %v497_v28 = vadd.f32 %v496_v25, %v495_v23  ;;  %v529_v32 = vrot.slane %v528_v29, 2 }
  0xec   : > { %v498_v31 = vrot.slane %v497_v28, 1  ;;  %v530_v37 = vadd.f32 %v529_v32, %v528_v29 }
  0xee   : > { %v499_v35 = vadd.f32 %v498_v31, %v497_v28  ;;  %v531_v40 = vrot.slane %v530_v37, 1 }
  0xf0   : > { %v500_v38 = vadd.f32 %v499_v35, %v477_v34  ;;  %v532_v43 = vadd.f32 %v531_v40, %v530_v37 }
  0xf2   : > { %502 = vst.msk [vmem:[#allocation2] sm:$0x1] %vm501_vm2, %v500_v38  ;;  %v533_v44 = vadd.f32 %v532_v43, %v503_v41 }
  0xf4   : > { %534 = vst.msk [vmem:[#allocation2 + $0x1] sm:$0x1] %vm501_vm2, %v533_v44 }
  0xf5 PF: > { %p535_p11 = scmp.eq.s32.totalorder %s934_s15, 1 }
  0xf7   : > { %p536_p12 = pnand %p535_p11, %p215_p6 }
  0xf9   : > { %539 = sbr.rel (%p536_p12) target bundleno = 290 (0x122), region = 48 }
  0xfe   : > { %v540_v46 = vld [vmem:[#allocation2] sm:$0x1]  ;;  %v542_v47 = vld [vmem:[#allocation2 + $0x1] sm:$0x1]  ;;  %vm560_vm6 = vcmask 253952  }
  0xff   : > { %v541_v49 = vmul.f32 0.0078125, %v540_v46  ;;  %v543_v50 = vmul.f32 0.0078125, %v542_v47  ;;  %v547_v60 = vld [vmem:[%s1194_s2] sm:$0x1] }
 0x100   : > { %v562_v0 = vld [vmem:[%s1195_s3] sm:$0x1] }
 0x101   : > { %v544_v51 = vmul.f32 %v541_v49, %v541_v49 }
 0x103   : > { %v545_v52 = vsub.f32 %v543_v50, %v544_v51 }
 0x105   : > { %v546_v53 = vmax.f32 %v545_v52, 0.0 }
 0x107   : > { %v548_v54 = vadd.f32 1e-05, %v546_v53 }
 0x109   : > { %908 = vrsqrt.f32 %v548_v54  ;;  %vm555_vm3 = vweird.f32 %v548_v54 }
 0x10f   : > { %v909_v55 = vpop.eup %908 }
 0x110   : > { %v550_v56 = vmul.f32 %v909_v55, %v548_v54  ;;  %vm556_vm4 = vweird.f32 %v909_v55 }
 0x111   : > { %vm557_vm5 = vmor %vm555_vm3, %vm556_vm4 }
 0x112   : > { %v551_v57 = vmul.f32 %v909_v55, %v550_v56 }
 0x114   : > { %v552_v58 = vmul.f32 0.5, %v551_v57 }
 0x116   : > { %v553_v59 = vsub.f32 1.5, %v552_v58 }
 0x118   : > { %v554_v61 = vmul.f32 %v909_v55, %v553_v59 }
 0x11a   : > { %v558_v62 = vsel %vm557_vm5, %v909_v55, %v554_v61 }
 0x11b   : > { %v559_v63 = vmul.f32 %v558_v62, %v547_v60 }
 0x11d   : > { %561 = vst.msk [vmem:[#allocation2 + $0x2] sm:$0x1] %vm560_vm6, %v559_v63  ;;  %v563_v1 = vmul.f32 %v559_v63, %v541_v49 }
 0x11f   : > { %v564_v2 = vsub.f32 %v562_v0, %v563_v1 }
 0x121   : > { %565 = vst.msk [vmem:[#allocation2 + $0x3] sm:$0x1] %vm560_vm6, %v564_v2 }
 0x122 PF: > { %p822_p13 = scmp.ne.s32.totalorder %s938_s16, 1 }
 0x124   : > { %569 = sbr.rel (%p822_p13) target bundleno = 315 (0x13b), region = 52 }
 0x129   : > { %v910_v3 = vld [vmem:[#allocation2 + $0x2] ss:$0 sm:$0xff]  ;;  %v911_v4 = vld [vmem:[#allocation2 + $0x3] ss:$0 sm:$0xff]  ;;  %vm622_vm7 = vcmask 257024  }
 0x12a   : > { %v572_v5 = vmul.f32 %v910_v3, %v1086_v27  ;;  %v573_v6 = vmul.f32 %v910_v3, %v1090_v33  ;;  %v574_v7 = vmul.f32 %v910_v3, %v1094_v39  ;;  %v575_v8 = vmul.f32 %v910_v3, %v1098_v45 }
 0x12b   : > { %v576_v9 = vmul.f32 %v910_v3, %v1088_v30  ;;  %v577_v10 = vmul.f32 %v910_v3, %v1092_v36  ;;  %v578_v11 = vmul.f32 %v910_v3, %v1096_v42  ;;  %v579_v12 = vmul.f32 %v910_v3, %v1100_v48 }
 0x12c   : > { %v582_v13 = vadd.f32 %v911_v4, %v572_v5  ;;  %v583_v14 = vadd.f32 %v911_v4, %v573_v6  ;;  %v584_v15 = vadd.f32 %v911_v4, %v574_v7  ;;  %v585_v16 = vadd.f32 %v911_v4, %v575_v8 }
 0x12d   : > { %v586_v17 = vadd.f32 %v911_v4, %v576_v9  ;;  %v587_v27 = vadd.f32 %v911_v4, %v577_v10  ;;  %v588_v18 = vadd.f32 %v911_v4, %v578_v11  ;;  %v589_v33 = vadd.f32 %v911_v4, %v579_v12 }
 0x12e   : > { %vm590_vm8 = vcmp.gt.f32.partialorder %v582_v13, 0.0  ;;  %v598_v39 = vmul.f32 0.2, %v582_v13  ;;  %vm591_vm9 = vcmp.gt.f32.partialorder %v583_v14, 0.0  ;;  %v599_v45 = vmul.f32 0.2, %v583_v14 }
 0x12f   : > { %vm592_vm10 = vcmp.gt.f32.partialorder %v584_v15, 0.0  ;;  %v600_v30 = vmul.f32 0.2, %v584_v15  ;;  %vm593_vm11 = vcmp.gt.f32.partialorder %v585_v16, 0.0  ;;  %v601_v36 = vmul.f32 0.2, %v585_v16 }
 0x130   : > { %v606_v42 = vsel %vm590_vm8, %v582_v13, %v598_v39  ;;  %v607_v19 = vsel %vm591_vm9, %v583_v14, %v599_v45  ;;  %vm594_vm12 = vcmp.gt.f32.partialorder %v586_v17, 0.0  ;;  %v602_v48 = vmul.f32 0.2, %v586_v17 }
 0x131   : > { %v614_v20 = vpack.c.bf16 %v606_v42, %v606_v42  ;;  %v615_v21 = vpack.c.bf16 %v607_v19, %v607_v19  ;;  %v608_v22 = vsel %vm592_vm10, %v584_v15, %v600_v30  ;;  %v609_v23 = vsel %vm593_vm11, %v585_v16, %v601_v36 }
 0x132   : > { %v616_v24 = vpack.c.bf16 %v608_v22, %v608_v22  ;;  %v617_v25 = vpack.c.bf16 %v609_v23, %v609_v23  ;;  %v610_v26 = vsel %vm594_vm12, %v586_v17, %v602_v48  ;;  %vm595_vm13 = vcmp.gt.f32.partialorder %v587_v27, 0.0 }
 0x133   : > { %623 = vst.msk [vmem:[%s1028_s5] sm:$0xf] %vm622_vm7, %v614_v20  ;;  %v618_v28 = vpack.c.bf16 %v610_v26, %v610_v26  ;;  %v603_v29 = vmul.f32 0.2, %v587_v27  ;;  %vm596_vm14 = vcmp.gt.f32.partialorder %v588_v18, 0.0  ;;  %vm597_vm15 = vcmp.gt.f32.partialorder %v589_v33, 0.0 }
 0x134   : > { %624 = vst.msk [vmem:[%s1028_s5 + $0x4] sm:$0xf] %vm622_vm7, %v615_v21  ;;  %v604_v31 = vmul.f32 0.2, %v588_v18  ;;  %v605_v32 = vmul.f32 0.2, %v589_v33 }
 0x135   : > { %625 = vst.msk [vmem:[%s1028_s5 + $0x8] sm:$0xf] %vm622_vm7, %v616_v24  ;;  %v611_v34 = vsel %vm595_vm13, %v587_v27, %v603_v29 }
 0x136   : > { %626 = vst.msk [vmem:[%s1028_s5 + $0xc] sm:$0xf] %vm622_vm7, %v617_v25  ;;  %v619_v35 = vpack.c.bf16 %v611_v34, %v611_v34  ;;  %v612_v37 = vsel %vm596_vm14, %v588_v18, %v604_v31  ;;  %v613_v38 = vsel %vm597_vm15, %v589_v33, %v605_v32 }
 0x137   : > { %627 = vst.msk [vmem:[%s1028_s5 + $0x10] sm:$0xf] %vm622_vm7, %v618_v28  ;;  %v620_v40 = vpack.c.bf16 %v612_v37, %v612_v37  ;;  %v621_v41 = vpack.c.bf16 %v613_v38, %v613_v38 }
 0x138   : > { %628 = vst.msk [vmem:[%s1028_s5 + $0x14] sm:$0xf] %vm622_vm7, %v619_v35 }
 0x139   : > { %629 = vst.msk [vmem:[%s1028_s5 + $0x18] sm:$0xf] %vm622_vm7, %v620_v40 }
 0x13a   : > { %630 = vst.msk [vmem:[%s1028_s5 + $0x1c] sm:$0xf] %vm622_vm7, %v621_v41 }
 0x13b PF: > { %s14_s19 = sadd.s32 1, %s950_s19   ;;  %s1197_s15 = smov %s942_s17 }
 0x13c   : > { %p11_p0 = scmp.ge.s32.totalorder %s14_s19, 6   ;;  %s1198_s16 = smov %s946_s18 }
 0x13d   : > { %s1199_s17 = smov %s1202_s20  ;;  %s1200_s18 = smov %s1206_s21 }
 0x13e   :  { %13 = sbr.rel (!%p11_p0) target bundleno = 3 (0x3), region = 83 }

// kernel: discriminator_forward.7
= control target key start
LH: loop header
LB: loop body
LE: loop exit
PB: predicated region body
PF: predicated region fallthrough
CT: control target
= control target key end

     0   :  { %s1041_s15 = smov 0   ;;  %s1043_s16 = smov 0   ;;  %s1233_s0 = inlined_call_operand.vmem [shape: bf16[2,20,256], index: 0, kind: input, shape index: {}]   ;;  %s1234_s1 = inlined_call_operand.vmem [shape: bf16[2,256,64], index: 1, kind: input, shape index: {}]   ;;  %s1235_s2 = inlined_call_operand.vmem [shape: f32[1,64], index: 2, kind: input, shape index: {}]   ;;  %s1236_s3 = inlined_call_operand.vmem [shape: f32[1,64], index: 3, kind: input, shape index: {}]   ;;  %s1237_s4 = inlined_call_operand.vmem [shape: bf16[2,16,64], index: 4, kind: output, shape index: {}]  }
   0x1   :  { %s1045_s17 = smov 0   ;;  %s1047_s18 = smov 0  }
   0x2   :  { %s1049_s19 = smov 0  }
   0x3 LB: > { %s23_s20 = sadd.s32 1, %s1005_s17  ;;  %s26_s21 = sadd.s32 1, %s1009_s18  ;;  %s1013_s19 = sphi %s1049_s19, %s14_s19   ;;  %s1009_s18 = sphi %s1047_s18, %s1241_s18   ;;  %s1005_s17 = sphi %s1045_s17, %s1240_s17   ;;  %s1001_s16 = sphi %s1043_s16, %s1239_s16   ;;  %s997_s15 = sphi %s1041_s15, %s1238_s15  }
   0x4   : > { %p24_p0 = scmp.ge.s32.totalorder %s23_s20, 2  ;;  %p728_p1 = scmp.ge.s32.totalorder %s1013_s19, 1 }
   0x5   : > { %p176_p2 = scmp.lt.s32.totalorder %s1013_s19, 5 }
   0x6   : > { %s1243_s20 = smov (%p24_p0, %s23_s20), 0  ;;  %s1245_s21 = smov (!%p24_p0, %s26_s21), %s1009_s18 }
   0x7   : > { %p177_p3 = pnand %p728_p1, %p176_p2  ;;  %p28_p4 = scmp.ge.s32.totalorder %s1245_s21, 2 }
   0x8   : > { %p203_p5 = scmp.lt.s32.totalorder (!%p177_p3), %s997_s15, 1  ;;  %s208_s22 = smul.u32 (!%p177_p3), %s997_s15, %s1001_s16 }
   0x9   : > { %s1247_s21 = smov (%p28_p4, %s1245_s21), 0  ;;  %180 = sbr.rel (%p177_p3) target bundleno = 284 (0x11c), region = 36 }
   0xa   : > { %p215_p6 = scmp.eq.s32.totalorder (!%p177_p3), %s1001_s16, 0  ;;  %p216_p7 = scmp.eq.s32.totalorder (!%p177_p3), %s997_s15, 0 }
   0xb   : > { %p209_p8 = scmp.lt.s32.totalorder (!%p177_p3), %s208_s22, 1 }
   0xc   : > { %p217_p9 = pnand (!%p177_p3), %p216_p7, %p215_p6 }
   0xe   : > { %s204_s23 = scalar_select %p203_p5, %s997_s15, 1 }
   0xf   : > { %s1249_s22 = smov (!%p209_p8, %s208_s22), 1  ;;  %220 = sbr.rel (%p217_p9) target bundleno = 22 (0x16), region = 40 }
  0x10   : > { %s929_s24 = smul.u32 24, %s204_s23  ;;  %s896_s28 = sshll.u32 %s1249_s22, 3 }
  0x11   : > { %s1091_s5 = scalar_lea.vmem %s1237_s4, %s896_s28 }
  0x12   : > { %s1086_s27 = scalar_lea.vmem %s1233_s0, %s929_s24 }
  0x14   : > { %vm221_vm0 = vcmask 523264   ;;  %v1015_v0 = vmov 0.0  }
  0x15   : > { %222 = vst.msk [vmem:[#allocation2] sm:$0xff] %vm221_vm0, %v1015_v0 }
  0x16 PF: > { %v920_v1 = vld [vmem:[%s1234_s1 + $0xb8] sm:$0xff]  ;;  %v919_v5 = vld [vmem:[%s1234_s1 + $0xb0] sm:$0xff]  ;;  %v918_v9 = vld [vmem:[%s1234_s1 + $0xa8] sm:$0xff]  ;;  %vm305_vm1 = vcmask 1045504   ;;  %p892_p10 = scmp.ne.s32.totalorder %s1001_s16, 0 }
  0x17   : > { %v928_v2 = vld [vmem:[%s1234_s1 + $0xf8] sm:$0xff]  ;;  %410 = vmatpush.bf16.msra.mxu0 %v920_v1  ;;  %v927_v6 = vld [vmem:[%s1234_s1 + $0xf0] sm:$0xff]  ;;  %v926_v10 = vld [vmem:[%s1234_s1 + $0xe8] sm:$0xff] }
  0x18   : > { %v904_v3 = vld [vmem:[%s1234_s1 + $0x38] sm:$0xff]  ;;  %424 = vmatpush.bf16.msra.mxu1 %v928_v2  ;;  %v903_v7 = vld [vmem:[%s1234_s1 + $0x30] sm:$0xff]  ;;  %v902_v11 = vld [vmem:[%s1234_s1 + $0x28] sm:$0xff] }
  0x19   : > { %v912_v4 = vld [vmem:[%s1234_s1 + $0x78] sm:$0xff]  ;;  %541 = vmatpush.bf16.msra.mxu2 %v904_v3  ;;  %v911_v8 = vld [vmem:[%s1234_s1 + $0x70] sm:$0xff]  ;;  %v910_v12 = vld [vmem:[%s1234_s1 + $0x68] sm:$0xff] }
  0x1a   : > { %555 = vmatpush.bf16.msra.mxu3 %v912_v4  ;;  %v917_v13 = vld [vmem:[%s1234_s1 + $0xa0] sm:$0xff]  ;;  %v916_v17 = vld [vmem:[%s1234_s1 + $0x98] sm:$0xff]  ;;  %v224_v19 = vld [vmem:[%s1086_s27 + $0x8] sm:$0xff] }
  0x1b   : > { %411 = vmatpush.bf16.msra.mxu0 %v919_v5  ;;  %v925_v14 = vld [vmem:[%s1234_s1 + $0xe0] sm:$0xff]  ;;  %v924_v18 = vld [vmem:[%s1234_s1 + $0xd8] sm:$0xff]  ;;  %v258_v23 = vld [vmem:[%s1086_s27 + $0x10] sm:$0x33]  ;;  %v297_v25 = vunpack.c.l.b16 %v224_v19  ;;  %v298_v30 = vunpack.c.h.b16 %v224_v19 }
  0x1c   : > { %425 = vmatpush.bf16.msra.mxu1 %v927_v6  ;;  %v901_v15 = vld [vmem:[%s1234_s1 + $0x20] sm:$0xff]  ;;  %v900_v21 = vld [vmem:[%s1234_s1 + $0x18] sm:$0xff]  ;;  %v915_v26 = vld [vmem:[%s1234_s1 + $0x90] sm:$0xff]  ;;  %v299_v28 = vunpack.c.l.b16 %v258_v23  ;;  %v300_v31 = vunpack.c.h.b16 %v258_v23 }
  0x1d   : > { %542 = vmatpush.bf16.msra.mxu2 %v903_v7  ;;  %v909_v16 = vld [vmem:[%s1234_s1 + $0x60] sm:$0xff]  ;;  %v908_v22 = vld [vmem:[%s1234_s1 + $0x58] sm:$0xff]  ;;  %v923_v27 = vld [vmem:[%s1234_s1 + $0xd0] sm:$0xff] }
  0x1e   : > { %556 = vmatpush.bf16.msra.mxu3 %v911_v8  ;;  %v257_v20 = vld [vmem:[%s1086_s27] sm:$0xcc]  ;;  %v899_v32 = vld [vmem:[%s1234_s1 + $0x10] sm:$0xff]  ;;  %v914_v35 = vld [vmem:[%s1234_s1 + $0x88] sm:$0xff]  ;;  %v303_v37 = vpack.c.b16 %v299_v28, %v299_v28  ;;  %v304_v39 = vpack.c.b16 %v300_v31, %v300_v31 }
  0x1f   : > { %412 = vmatpush.bf16.msra.mxu0 %v918_v9  ;;  %v295_v24 = vunpack.c.l.b16 %v257_v20  ;;  %v296_v29 = vunpack.c.h.b16 %v257_v20  ;;  %v907_v33 = vld [vmem:[%s1234_s1 + $0x50] sm:$0xff]  ;;  %v922_v36 = vld [vmem:[%s1234_s1 + $0xc8] sm:$0xff]  ;;  %v223_v40 = vld [vmem:[%s1086_s27] sm:$0xff] }
  0x20   : > { %426 = vmatpush.bf16.msra.mxu1 %v926_v10  ;;  %v898_v41 = vld [vmem:[%s1234_s1 + $0x8] sm:$0xff]  ;;  %v439_v43 = vunpack.c.l.b16 %v223_v40  ;;  %v440_v44 = vunpack.c.h.b16 %v223_v40  ;;  %v913_v45 = vld [vmem:[%s1234_s1 + $0x80] sm:$0xff]  ;;  %v307_v48 = vrot.slane %v303_v37, 2  ;;  %v310_v50 = vrot.slane %v304_v39, 2 }
  0x21   : > { %543 = vmatpush.bf16.msra.mxu2 %v902_v11  ;;  %v301_v34 = vpack.c.b16 %v297_v25, %v295_v24  ;;  %v302_v38 = vpack.c.b16 %v298_v30, %v296_v29  ;;  %v906_v42 = vld [vmem:[%s1234_s1 + $0x48] sm:$0xff]  ;;  %v921_v46 = vld [vmem:[%s1234_s1 + $0xc0] sm:$0xff] }
  0x22   : > { %557 = vmatpush.bf16.msra.mxu3 %v910_v12  ;;  %v897_v51 = vld [vmem:[%s1234_s1] sm:$0xff]  ;;  %v441_v53 = vpack.c.b16 %v297_v25, %v439_v43  ;;  %v442_v56 = vpack.c.b16 %v298_v30, %v440_v44 }
  0x23   : > { %413 = vmatpush.bf16.msra.mxu0 %v917_v13  ;;  %v306_v47 = vrot.slane %v301_v34, 2  ;;  %v309_v49 = vrot.slane %v302_v38, 2  ;;  %v905_v52 = vld [vmem:[%s1234_s1 + $0x40] sm:$0xff] }
  0x24   : > { %427 = vmatpush.bf16.msra.mxu1 %v925_v14 }
  0x25   : > { %544 = vmatpush.bf16.msra.mxu2 %v901_v15  ;;  %v308_v54 = vsel %vm305_vm1, %v306_v47, %v307_v48  ;;  %v311_v55 = vsel %vm305_vm1, %v309_v49, %v310_v50 }
  0x26   : > { %558 = vmatpush.bf16.msra.mxu3 %v909_v16 }
  0x27   : > { %414 = vmatpush.bf16.msra.mxu0 %v916_v17 }
  0x28   : > { %428 = vmatpush.bf16.msra.mxu1 %v924_v18 }
  0x29   : > { %545 = vmatpush.bf16.msra.mxu2 %v900_v21 }
  0x2a   : > { %559 = vmatpush.bf16.msra.mxu3 %v908_v22 }
  0x2b   : > { %415 = vmatpush.bf16.msra.mxu0 %v915_v26 }
  0x2c   : > { %429 = vmatpush.bf16.msra.mxu1 %v923_v27 }
  0x2d   : > { %546 = vmatpush.bf16.msra.mxu2 %v899_v32 }
  0x2e   : > { %560 = vmatpush.bf16.msra.mxu3 %v907_v33 }
  0x2f   : > { %416 = vmatpush.bf16.msra.mxu0 %v914_v35 }
  0x30   : > { %430 = vmatpush.bf16.msra.mxu1 %v922_v36 }
  0x31   : > { %547 = vmatpush.bf16.msra.mxu2 %v898_v41 }
  0x32   : > { %561 = vmatpush.bf16.msra.mxu3 %v906_v42 }
  0x33   : > { %417 = vmatpush.bf16.msra.mxu0 %v913_v45 }
  0x34   : > { %431 = vmatpush.bf16.msra.mxu1 %v921_v46 }
  0x35   : > { %548 = vmatpush.bf16.msra.mxu2 %v897_v51 }
  0x36   : > { %562 = vmatpush.bf16.msra.mxu3 %v905_v52  ;;  %418 = vmatmul.bf16.vlgmr.msra.gmra.mxu0 %v308_v54 }
  0x37   : > { %432 = vmatmul.bf16.vlgmr.msra.gmra.mxu1 %v311_v55 }
  0x38   : > { %549 = vmatmul.bf16.vlgmr.msra.gmra.mxu2 %v441_v53 }
  0x39   : > { %563 = vmatmul.bf16.vlgmr.msra.gmra.mxu3 %v442_v56 }
  0xb3   : > { %v419_v57 = vpop.f32.mrf.mxu0 }
  0xb4   : > { %v433_v58 = vpop.f32.mrf.mxu1 }
  0xb5   : > { %v434_v59 = vadd.f32 %v433_v58, %v419_v57 }
  0xbb   : > { %v550_v60 = vpop.f32.mrf.mxu2  ;;  %v421_v0 = vpop.f32.mrf.mxu0 }
  0xbc   : > { %v564_v61 = vpop.f32.mrf.mxu3  ;;  %v551_v62 = vadd.f32 %v550_v60, %v434_v59  ;;  %v435_v1 = vpop.f32.mrf.mxu1 }
  0xbd   : > { %v436_v2 = vadd.f32 %v435_v1, %v421_v0 }
  0xbe   : > { %v1193_v63 = vadd.f32 %v564_v61, %v551_v62 }
  0xc2   : > { %571 = sbr.rel (%p892_p10) target bundleno = 220 (0xdc), region = 44 }
  0xc3   : > { %v552_v3 = vpop.f32.mrf.mxu2 }
  0xc4   : > { %v553_v4 = vadd.f32 %v552_v3, %v436_v2  ;;  %v566_v5 = vpop.f32.mrf.mxu3 }
  0xc6   : > { %v1195_v6 = vadd.f32 %v566_v5, %v553_v4 }
  0xc7   : > { %vm573_vm2 = vcmask 523264   ;;  %v587_v7 = vmul.f32 %v1193_v63, %v1193_v63  ;;  %v572_v24 = vld [vmem:[#allocation2] sm:$0x1]  ;;  %v586_v27 = vld [vmem:[#allocation2 + $0x1] sm:$0x1]  ;;  %vm584_vm3 = vcmask 516096  }
  0xc8   : > { %v588_v8 = vmul.f32 %v1195_v6, %v1195_v6  ;;  %v574_v9 = vsel %vm573_vm2, %v1193_v63, 0.0  ;;  %v575_v10 = vsel %vm573_vm2, %v1195_v6, 0.0 }
  0xc9   : > { %v576_v11 = vadd.f32 %v575_v10, %v574_v9  ;;  %v589_v12 = vsel %vm573_vm2, %v587_v7, 0.0 }
  0xca   : > { %v590_v13 = vsel %vm573_vm2, %v588_v8, 0.0 }
  0xcb   : > { %v591_v14 = vadd.f32 %v590_v13, %v589_v12  ;;  %v577_v15 = vrot.slane %v576_v11, 4 }
  0xcd   : > { %v592_v16 = vrot.slane %v591_v14, 4  ;;  %v578_v17 = vadd.f32 %v577_v15, %v576_v11 }
  0xcf   : > { %v593_v18 = vadd.f32 %v592_v16, %v591_v14  ;;  %v579_v19 = vrot.slane %v578_v17, 2 }
  0xd1   : > { %v594_v20 = vrot.slane %v593_v18, 2  ;;  %v580_v21 = vadd.f32 %v579_v19, %v578_v17 }
  0xd3   : > { %v595_v22 = vadd.f32 %v594_v20, %v593_v18  ;;  %v581_v23 = vrot.slane %v580_v21, 1 }
  0xd5   : > { %v596_v25 = vrot.slane %v595_v22, 1  ;;  %v582_v26 = vadd.f32 %v581_v23, %v580_v21 }
  0xd7   : > { %v597_v28 = vadd.f32 %v596_v25, %v595_v22  ;;  %v583_v29 = vadd.f32 %v582_v26, %v572_v24 }
  0xd9   : > { %v598_v30 = vadd.f32 %v597_v28, %v586_v27  ;;  %585 = vst.msk [vmem:[#allocation2] sm:$0x1] %vm584_vm3, %v583_v29 }
  0xdb   : > { %599 = vst.msk [vmem:[#allocation2 + $0x1] sm:$0x1] %vm584_vm3, %v598_v30 }
  0xdc PF: > { %p600_p11 = scmp.eq.s32.totalorder %s997_s15, 1 }
  0xde   : > { %p601_p12 = pnand %p600_p11, %p215_p6 }
  0xe0   : > { %604 = sbr.rel (%p601_p12) target bundleno = 265 (0x109), region = 48 }
  0xe5   : > { %v605_v31 = vld [vmem:[#allocation2] sm:$0x1]  ;;  %v607_v32 = vld [vmem:[#allocation2 + $0x1] sm:$0x1]  ;;  %vm625_vm7 = vcmask 516096  }
  0xe6   : > { %v606_v33 = vmul.f32 0.03125, %v605_v31  ;;  %v608_v34 = vmul.f32 0.03125, %v607_v32  ;;  %v612_v44 = vld [vmem:[%s1235_s2] sm:$0x1] }
  0xe7   : > { %v627_v48 = vld [vmem:[%s1236_s3] sm:$0x1] }
  0xe8   : > { %v609_v35 = vmul.f32 %v606_v33, %v606_v33 }
  0xea   : > { %v610_v36 = vsub.f32 %v608_v34, %v609_v35 }
  0xec   : > { %v611_v37 = vmax.f32 %v610_v36, 0.0 }
  0xee   : > { %v613_v38 = vadd.f32 1e-05, %v611_v37 }
  0xf0   : > { %971 = vrsqrt.f32 %v613_v38  ;;  %vm620_vm4 = vweird.f32 %v613_v38 }
  0xf6   : > { %v972_v39 = vpop.eup %971 }
  0xf7   : > { %v615_v40 = vmul.f32 %v972_v39, %v613_v38  ;;  %vm621_vm5 = vweird.f32 %v972_v39 }
  0xf8   : > { %vm622_vm6 = vmor %vm620_vm4, %vm621_vm5 }
  0xf9   : > { %v616_v41 = vmul.f32 %v972_v39, %v615_v40 }
  0xfb   : > { %v617_v42 = vmul.f32 0.5, %v616_v41 }
  0xfd   : > { %v618_v43 = vsub.f32 1.5, %v617_v42 }
  0xff   : > { %v619_v45 = vmul.f32 %v972_v39, %v618_v43 }
 0x101   : > { %v623_v46 = vsel %vm622_vm6, %v972_v39, %v619_v45 }
 0x102   : > { %v624_v47 = vmul.f32 %v623_v46, %v612_v44 }
 0x104   : > { %626 = vst.msk [vmem:[#allocation2 + $0x2] sm:$0x1] %vm625_vm7, %v624_v47  ;;  %v628_v49 = vmul.f32 %v624_v47, %v606_v33 }
 0x106   : > { %v629_v50 = vsub.f32 %v627_v48, %v628_v49 }
 0x108   : > { %630 = vst.msk [vmem:[#allocation2 + $0x3] sm:$0x1] %vm625_vm7, %v629_v50 }
 0x109 PF: > { %p893_p13 = scmp.ne.s32.totalorder %s1001_s16, 1 }
 0x10b   : > { %634 = sbr.rel (%p893_p13) target bundleno = 284 (0x11c), region = 52 }
 0x110   : > { %v973_v51 = vld [vmem:[#allocation2 + $0x2] ss:$0 sm:$0xff]  ;;  %v974_v52 = vld [vmem:[#allocation2 + $0x3] ss:$0 sm:$0xff]  ;;  %vm651_vm10 = vcmask 519168  }
 0x111   : > { %v637_v53 = vmul.f32 %v973_v51, %v1193_v63  ;;  %v638_v54 = vmul.f32 %v973_v51, %v1195_v6 }
 0x113   : > { %v641_v55 = vadd.f32 %v974_v52, %v637_v53  ;;  %v642_v56 = vadd.f32 %v974_v52, %v638_v54 }
 0x115   : > { %vm643_vm8 = vcmp.gt.f32.partialorder %v641_v55, 0.0  ;;  %v645_v57 = vmul.f32 0.2, %v641_v55  ;;  %vm644_vm9 = vcmp.gt.f32.partialorder %v642_v56, 0.0  ;;  %v646_v58 = vmul.f32 0.2, %v642_v56 }
 0x117   : > { %v647_v59 = vsel %vm643_vm8, %v641_v55, %v645_v57  ;;  %v648_v60 = vsel %vm644_vm9, %v642_v56, %v646_v58 }
 0x118   : > { %v649_v61 = vpack.c.bf16 %v647_v59, %v647_v59  ;;  %v650_v62 = vpack.c.bf16 %v648_v60, %v648_v60 }
 0x11a   : > { %652 = vst.msk [vmem:[%s1091_s5] sm:$0xf] %vm651_vm10, %v649_v61 }
 0x11b   : > { %653 = vst.msk [vmem:[%s1091_s5 + $0x4] sm:$0xf] %vm651_vm10, %v650_v62 }
 0x11c PF: > { %s14_s19 = sadd.s32 1, %s1013_s19   ;;  %s1238_s15 = smov %s1005_s17 }
 0x11d   : > { %p11_p0 = scmp.ge.s32.totalorder %s14_s19, 6   ;;  %s1239_s16 = smov %s1009_s18 }
 0x11e   : > { %s1240_s17 = smov %s1243_s20  ;;  %s1241_s18 = smov %s1247_s21 }
 0x11f   :  { %13 = sbr.rel (!%p11_p0) target bundleno = 3 (0x3), region = 83 }

</bundles_post_ra>
